<compile_context>
chip_gen: v5e
topology: v5e:2x2
jax: 0.10.0
libtpu: 0.0.40
codegen_flags: <defaults>
</compile_context>

<pallas_src>
import math

import jax
import jax.numpy as jnp
from jax import lax
from jax.experimental import pallas as pl
from jax.experimental.pallas import tpu as pltpu

# ---- model hyper-parameters (nn.Transformer defaults, small d_model) --------
D_MODEL = 32           # constructor arg (must be divisible by nhead=8)
NHEAD = 8              # nn.Transformer default
HEAD_DIM = D_MODEL // NHEAD
NUM_ENC = 6            # nn.Transformer default
NUM_DEC = 6            # nn.Transformer default
DIM_FF = 2048          # nn.Transformer default
EPS = 1e-5             # LayerNorm eps default
PAD_IDX = 2            # padding_idx used by the module
NEG_BIG = -1e9         # finite "-inf": exp() underflows to exactly 0, never NaN
SCALE = 1.0 / math.sqrt(HEAD_DIM)

ENC_PARAMS = ("e_wqkv", "e_bqkv", "e_wo", "e_bo", "e_ln1g", "e_ln1b",
              "e_w1", "e_b1", "e_w2t", "e_b2", "e_ln2g", "e_ln2b")
DEC_PARAMS = ("d_wqkv", "d_bqkv", "d_wo_s", "d_bo_s", "d_ln1g", "d_ln1b",
              "d_wq_c", "d_bq_c", "d_wkv_c", "d_bkv_c", "d_wo_c", "d_bo_c",
              "d_ln2g", "d_ln2b",
              "d_w1", "d_b1", "d_w2t", "d_b2", "d_ln3g", "d_ln3b")


# ===================== in-kernel building blocks (plain arrays) ==============

def _layernorm(v, g, b):
    # v: (M, D) f32; g, b: (1, D) f32
    mean = jnp.mean(v, axis=-1, keepdims=True)
    c = v - mean
    var = jnp.mean(c * c, axis=-1, keepdims=True)
    return c * lax.rsqrt(var + EPS) * g + b


def _split_heads(mat, nb, s):
    # mat: (nb*s, D) -> (NHEAD*nb, s, HEAD_DIM), head-major along axis 0.
    parts = [mat[:, h * HEAD_DIM:(h + 1) * HEAD_DIM].reshape(nb, s, HEAD_DIM)
             for h in range(NHEAD)]
    return jnp.concatenate(parts, axis=0)


def _merge_heads(o, nb, s):
    # o: (NHEAD*nb, s, HEAD_DIM) -> lane-dense (nb*s, D).
    parts = [o[h * nb:(h + 1) * nb].reshape(nb * s, HEAD_DIM)
             for h in range(NHEAD)]
    return jnp.concatenate(parts, axis=-1)


def _attention(q, k, v, bias):
    # q: (HB, sq, hd)  k, v: (HB, sk, hd)  bias: (HB, sq, sk) or None
    # ONE batched QK^T, ONE softmax, ONE batched PV (instead of 8 of each).
    s = jnp.einsum("bqd,bkd->bqk", q, k,
                   preferred_element_type=jnp.float32) * SCALE
    if bias is not None:
        s = s + bias
    m = jnp.max(s, axis=-1, keepdims=True)
    e = jnp.exp(s - m)
    p = e * pl.reciprocal(jnp.sum(e, axis=-1, keepdims=True), approx=True)
    return jnp.einsum("bqk,bkd->bqd", p, v,
                      preferred_element_type=jnp.float32)


def _mha_self(x2, wqkv, bqkv, wo, bo, bias, nb, s):
    # fused QKV projection: one (D, 3D) bf16 matmul, f32 accumulation.
    qkv = jnp.dot(x2.astype(jnp.bfloat16), wqkv,
                  preferred_element_type=jnp.float32) + bqkv
    q = _split_heads(qkv[:, 0:D_MODEL], nb, s)
    k = _split_heads(qkv[:, D_MODEL:2 * D_MODEL], nb, s)
    v = _split_heads(qkv[:, 2 * D_MODEL:3 * D_MODEL], nb, s)
    o = _merge_heads(_attention(q, k, v, bias), nb, s)
    return jnp.dot(o.astype(jnp.bfloat16), wo,
                   preferred_element_type=jnp.float32) + bo


def _mha_cross(x2, mem2, wq, bq, wkv, bkv, wo, bo, nb, sq, sk):
    q2 = jnp.dot(x2.astype(jnp.bfloat16), wq,
                 preferred_element_type=jnp.float32) + bq
    kv = jnp.dot(mem2.astype(jnp.bfloat16), wkv,
                 preferred_element_type=jnp.float32) + bkv
    q = _split_heads(q2, nb, sq)
    k = _split_heads(kv[:, 0:D_MODEL], nb, sk)
    v = _split_heads(kv[:, D_MODEL:2 * D_MODEL], nb, sk)
    # memory_key_padding_mask is None in the reference forward() -> no bias.
    o = _merge_heads(_attention(q, k, v, None), nb, sq)
    return jnp.dot(o.astype(jnp.bfloat16), wo,
                   preferred_element_type=jnp.float32) + bo


def _ffn(x2, w1, b1, w2t, b2):
    # fused FFN: the (M, 2048) relu intermediate never leaves the chip.
    h = jnp.maximum(jnp.dot(x2.astype(jnp.bfloat16), w1,
                            preferred_element_type=jnp.float32) + b1, 0.0)
    # w2 stored transposed (D, FF) bf16 so the big weight stays lane-dense;
    # contract both last dims (h @ w2t.T).
    y = lax.dot_general(h.astype(jnp.bfloat16), w2t,
                        (((1,), (1,)), ((), ())),
                        preferred_element_type=jnp.float32)
    return y + b2


# ============================ per-layer kernels ===============================

def _encoder_kernel(x_ref, bias_ref,
                    wqkv, bqkv, wo, bo, ln1g, ln1b,
                    w1, b1, w2t, b2, ln2g, ln2b,
                    fng, fnb,
                    out_ref, acc_ref):
    l = pl.program_id(0)
    hb, s, _ = bias_ref.shape
    nb = hb // NHEAD

    @pl.when(l == 0)
    def _():
        acc_ref[...] = x_ref[...]        # seed the residual stream

    x2 = acc_ref[...]
    sa = _mha_self(x2, wqkv[...], bqkv[...], wo[...], bo[...],
                   bias_ref[...], nb, s)
    x2 = _layernorm(x2 + sa, ln1g[...], ln1b[...])
    ff = _ffn(x2, w1[...], b1[...], w2t[...], b2[...])
    x2 = _layernorm(x2 + ff, ln2g[...], ln2b[...])
    acc_ref[...] = x2

    @pl.when(l == pl.num_programs(0) - 1)
    def _():
        out_ref[...] = _layernorm(x2, fng[...], fnb[...])   # final encoder norm


def _decoder_kernel(y_ref, mem_ref, bias_ref,
                    wqkv, bqkv, wo_s, bo_s, ln1g, ln1b,
                    wq_c, bq_c, wkv_c, bkv_c, wo_c, bo_c, ln2g, ln2b,
                    w1, b1, w2t, b2, ln3g, ln3b,
                    fng, fnb,
                    out_ref, acc_ref):
    l = pl.program_id(0)
    hb, st, _ = bias_ref.shape
    nb = hb // NHEAD
    ss = mem_ref.shape[0] // nb

    @pl.when(l == 0)
    def _():
        acc_ref[...] = y_ref[...]

    x2 = acc_ref[...]
    mem2 = mem_ref[...]
    sa = _mha_self(x2, wqkv[...], bqkv[...], wo_s[...], bo_s[...],
                   bias_ref[...], nb, st)
    x2 = _layernorm(x2 + sa, ln1g[...], ln1b[...])
    ca = _mha_cross(x2, mem2, wq_c[...], bq_c[...], wkv_c[...], bkv_c[...],
                    wo_c[...], bo_c[...], nb, st, ss)
    x2 = _layernorm(x2 + ca, ln2g[...], ln2b[...])
    ff = _ffn(x2, w1[...], b1[...], w2t[...], b2[...])
    x2 = _layernorm(x2 + ff, ln3g[...], ln3b[...])
    acc_ref[...] = x2

    @pl.when(l == pl.num_programs(0) - 1)
    def _():
        out_ref[...] = _layernorm(x2, fng[...], fnb[...])   # final decoder norm


# ================================ JAX wrapper =================================

def _layer_spec(a):
    # (L, d1, d2) -> per-layer (1, d1, d2) block, leading dim squeezed out.
    n = a.ndim
    return pl.BlockSpec((None,) + a.shape[1:], lambda l: (l,) + (0,) * (n - 1))


def _const_spec(a):
    # whole array, same block every grid step (fetched once, kept resident).
    n = a.ndim
    return pl.BlockSpec(a.shape, lambda l: (0,) * n)


def make_positional_encoding(max_len, d_model):
    position = jnp.arange(max_len, dtype=jnp.float32)[:, None]
    div_term = jnp.exp(jnp.arange(0, d_model, 2, dtype=jnp.float32)
                       * (-math.log(10000.0) / d_model))
    pe = jnp.zeros((max_len, d_model), jnp.float32)
    pe = pe.at[:, 0::2].set(jnp.sin(position * div_term))
    pe = pe.at[:, 1::2].set(jnp.cos(position * div_term))
    return pe


def translation_model_forward(params, src_tokens, tgt_tokens):
    """src_tokens: (B, Ss) int32, tgt_tokens: (B, St) int32 -> (B, St, D_MODEL)."""
    b, ss = src_tokens.shape
    _, st = tgt_tokens.shape
    D = D_MODEL

    # Additive attention biases (finite -1e9), pre-tiled over heads so the
    # kernel's head-stacked (H*B, Sq, Sk) scores can add them directly.
    src_pad = jnp.where(src_tokens == PAD_IDX, NEG_BIG, 0.0).astype(jnp.float32)
    tgt_pad = jnp.where(tgt_tokens == PAD_IDX, NEG_BIG, 0.0).astype(jnp.float32)
    src_bias = jnp.tile(src_pad[:, None, :], (NHEAD, ss, 1))            # (H*B,Ss,Ss)
    causal = jnp.where(jnp.arange(st)[None, :] > jnp.arange(st)[:, None],
                       jnp.float32(NEG_BIG), jnp.float32(0.0))          # (St,St)
    tgt_bias = jnp.tile(tgt_pad[:, None, :] + causal[None], (NHEAD, 1, 1))

    # Embedding gather + positional encoding stay in XLA (glue).
    # TODO(synk): dropout layers are treated as identity (inference semantics).
    src_x = (jnp.take(params["src_emb"], src_tokens, axis=0)
             + params["pe"][None, :ss]).reshape(b * ss, D)
    tgt_x = (jnp.take(params["tgt_emb"], tgt_tokens, axis=0)
             + params["pe"][None, :st]).reshape(b * st, D)

    enc_w = [params[k] for k in ENC_PARAMS]
    dec_w = [params[k] for k in DEC_PARAMS]

    # --- encoder: grid over layers; per-layer weights double-buffered ---------
    mem = pl.pallas_call(
        _encoder_kernel,
        grid=(NUM_ENC,),
        in_specs=([_const_spec(src_x), _const_spec(src_bias)]
                  + [_layer_spec(w) for w in enc_w]
                  + [_const_spec(params["enc_ng"]), _const_spec(params["enc_nb"])]),
        out_specs=_const_spec(src_x),
        out_shape=jax.ShapeDtypeStruct((b * ss, D), jnp.float32),
        scratch_shapes=[pltpu.VMEM((b * ss, D), jnp.float32)],
        compiler_params=pltpu.CompilerParams(
            dimension_semantics=("arbitrary",)),
    )(src_x, src_bias, *enc_w, params["enc_ng"], params["enc_nb"])

    # --- decoder: grid over layers; memory kept resident (constant block) -----
    out = pl.pallas_call(
        _decoder_kernel,
        grid=(NUM_DEC,),
        in_specs=([_const_spec(tgt_x), _const_spec(mem), _const_spec(tgt_bias)]
                  + [_layer_spec(w) for w in dec_w]
                  + [_const_spec(params["dec_ng"]), _const_spec(params["dec_nb"])]),
        out_specs=_const_spec(tgt_x),
        out_shape=jax.ShapeDtypeStruct((b * st, D), jnp.float32),
        scratch_shapes=[pltpu.VMEM((b * st, D), jnp.float32)],
        compiler_params=pltpu.CompilerParams(
            dimension_semantics=("arbitrary",)),
    )(tgt_x, mem, tgt_bias, *dec_w, params["dec_ng"], params["dec_nb"])

    return out.reshape(b, st, D)


# =============================== parameter init ===============================

def init_params(key, src_vocab_size, tgt_vocab_size, max_seq_len):
    keys = iter(jax.random.split(key, 64))

    def rnd(shape, dtype=jnp.float32, scale=0.02):
        return (scale * jax.random.normal(next(keys), shape, jnp.float32)
                ).astype(dtype)

    def ones(shape):
        return jnp.ones(shape, jnp.float32)

    def zeros(shape):
        return jnp.zeros(shape, jnp.float32)

    L, D, F = NUM_ENC, D_MODEL, DIM_FF
    bf = jnp.bfloat16   # matmul weights in bf16 (f32 accumulation in-kernel)

    params = dict(
        # padding_idx=2 row is zero, as in nn.Embedding(padding_idx=2).
        src_emb=rnd((src_vocab_size, D), scale=1.0).at[PAD_IDX].set(0.0),
        tgt_emb=rnd((tgt_vocab_size, D), scale=1.0).at[PAD_IDX].set(0.0),
        pe=make_positional_encoding(max_seq_len, D),

        # ---- encoder stack (stacked over layers; biases/LN as (L,1,X)) ----
        e_wqkv=rnd((L, D, 3 * D), bf), e_bqkv=rnd((L, 1, 3 * D)),
        e_wo=rnd((L, D, D), bf), e_bo=rnd((L, 1, D)),
        e_ln1g=ones((L, 1, D)), e_ln1b=zeros((L, 1, D)),
        e_w1=rnd((L, D, F), bf), e_b1=rnd((L, 1, F)),
        e_w2t=rnd((L, D, F), bf),            # second FFN weight stored transposed
        e_b2=rnd((L, 1, D)),
        e_ln2g=ones((L, 1, D)), e_ln2b=zeros((L, 1, D)),

        # ---- decoder stack ----
        d_wqkv=rnd((L, D, 3 * D), bf), d_bqkv=rnd((L, 1, 3 * D)),
        d_wo_s=rnd((L, D, D), bf), d_bo_s=rnd((L, 1, D)),
        d_ln1g=ones((L, 1, D)), d_ln1b=zeros((L, 1, D)),
        d_wq_c=rnd((L, D, D), bf), d_bq_c=rnd((L, 1, D)),
        d_wkv_c=rnd((L, D, 2 * D), bf), d_bkv_c=rnd((L, 1, 2 * D)),
        d_wo_c=rnd((L, D, D), bf), d_bo_c=rnd((L, 1, D)),
        d_ln2g=ones((L, 1, D)), d_ln2b=zeros((L, 1, D)),
        d_w1=rnd((L, D, F), bf), d_b1=rnd((L, 1, F)),
        d_w2t=rnd((L, D, F), bf),            # stored transposed
        d_b2=rnd((L, 1, D)),
        d_ln3g=ones((L, 1, D)), d_ln3b=zeros((L, 1, D)),

        # final norms of nn.TransformerEncoder / nn.TransformerDecoder
        enc_ng=ones((1, D)), enc_nb=zeros((1, D)),
        dec_ng=ones((1, D)), dec_nb=zeros((1, D)),

        # self.predictor exists in __init__ but is never used in forward().
        predictor_w=rnd((D, tgt_vocab_size)), predictor_b=rnd((1, tgt_vocab_size)),
    )
    return params


# ==================================== main ====================================

if __name__ == "__main__":
    key = jax.random.PRNGKey(0)
    pkey, skey, tkey = jax.random.split(key, 3)

    BATCH, SRC_LEN, TGT_LEN = 2, 8, 8
    SRC_VOCAB_SIZE, TGT_VOCAB_SIZE = 50, 60
    MAX_SEQ_LEN = 16

    params = init_params(pkey, SRC_VOCAB_SIZE, TGT_VOCAB_SIZE, MAX_SEQ_LEN)

    # Token ids in [3, vocab); pad tokens (id 2) at sequence tails so the
    # key-padding masks are exercised (never a fully masked attention row).
    src = jax.random.randint(skey, (BATCH, SRC_LEN), 3, SRC_VOCAB_SIZE, dtype=jnp.int32)
    tgt = jax.random.randint(tkey, (BATCH, TGT_LEN), 3, TGT_VOCAB_SIZE, dtype=jnp.int32)
    src = src.at[0, -2:].set(PAD_IDX)
    tgt = tgt.at[0, -1:].set(PAD_IDX)

    fwd = jax.jit(translation_model_forward)
    out = jax.block_until_ready(fwd(params, src, tgt))

    assert out.shape == (BATCH, TGT_LEN, D_MODEL), out.shape
    assert bool(jnp.all(jnp.isfinite(out)))
    print("KERNEL_OK")
</pallas_src>

<mosaic_0001>
module attributes {stable_mosaic.version = 11 : i64} {
  func.func @_encoder_kernel(%arg0: i32, %arg1: memref<16x32xf32, #tpu.memory_space<vmem>>, %arg2: memref<16x8x8xf32, #tpu.memory_space<vmem>>, %arg3: memref<1x32x96xbf16, #tpu.memory_space<vmem>>, %arg4: memref<1x1x96xf32, #tpu.memory_space<vmem>>, %arg5: memref<1x32x32xbf16, #tpu.memory_space<vmem>>, %arg6: memref<1x1x32xf32, #tpu.memory_space<vmem>>, %arg7: memref<1x1x32xf32, #tpu.memory_space<vmem>>, %arg8: memref<1x1x32xf32, #tpu.memory_space<vmem>>, %arg9: memref<1x32x2048xbf16, #tpu.memory_space<vmem>>, %arg10: memref<1x1x2048xf32, #tpu.memory_space<vmem>>, %arg11: memref<1x32x2048xbf16, #tpu.memory_space<vmem>>, %arg12: memref<1x1x32xf32, #tpu.memory_space<vmem>>, %arg13: memref<1x1x32xf32, #tpu.memory_space<vmem>>, %arg14: memref<1x1x32xf32, #tpu.memory_space<vmem>>, %arg15: memref<1x32xf32, #tpu.memory_space<vmem>>, %arg16: memref<1x32xf32, #tpu.memory_space<vmem>>, %arg17: memref<16x32xf32, #tpu.memory_space<vmem>>, %arg18: memref<16x32xf32, #tpu.memory_space<vmem>>) attributes {dimension_semantics = [#tpu.dimension_semantics<arbitrary>], iteration_bounds = array<i64: 6>, scalar_prefetch = 0 : i64, scratch_operands = 1 : i64, tpu.core_type = #tpu.core_type<tc>, window_params = [{pipeline_mode = #tpu.pipeline_mode<synchronous>, transform_indices = @transform_0, window_bounds = array<i64: 16, 32>}, {pipeline_mode = #tpu.pipeline_mode<synchronous>, transform_indices = @transform_1, window_bounds = array<i64: 16, 8, 8>}, {transform_indices = @transform_2, window_bounds = array<i64: 1, 32, 96>}, {transform_indices = @transform_3, window_bounds = array<i64: 1, 1, 96>}, {transform_indices = @transform_4, window_bounds = array<i64: 1, 32, 32>}, {transform_indices = @transform_5, window_bounds = array<i64: 1, 1, 32>}, {transform_indices = @transform_6, window_bounds = array<i64: 1, 1, 32>}, {transform_indices = @transform_7, window_bounds = array<i64: 1, 1, 32>}, {transform_indices = @transform_8, window_bounds = array<i64: 1, 32, 2048>}, {transform_indices = @transform_9, window_bounds = array<i64: 1, 1, 2048>}, {transform_indices = @transform_10, window_bounds = array<i64: 1, 32, 2048>}, {transform_indices = @transform_11, window_bounds = array<i64: 1, 1, 32>}, {transform_indices = @transform_12, window_bounds = array<i64: 1, 1, 32>}, {transform_indices = @transform_13, window_bounds = array<i64: 1, 1, 32>}, {pipeline_mode = #tpu.pipeline_mode<synchronous>, transform_indices = @transform_14, window_bounds = array<i64: 1, 32>}, {pipeline_mode = #tpu.pipeline_mode<synchronous>, transform_indices = @transform_15, window_bounds = array<i64: 1, 32>}, {pipeline_mode = #tpu.pipeline_mode<synchronous>, transform_indices = @transform_16, window_bounds = array<i64: 16, 32>}]} {
    %c0_i32 = arith.constant 0 : i32
    %0 = arith.cmpi eq, %arg0, %c0_i32 : i32
    %1 = arith.extui %0 : i1 to i32
    %c0_i32_0 = arith.constant 0 : i32
    %2 = arith.cmpi ne, %1, %c0_i32_0 : i32
    scf.if %2 {
      %c0_63 = arith.constant 0 : index
      %c0_64 = arith.constant 0 : index
      %179 = vector.load %arg1[%c0_63, %c0_64] : memref<16x32xf32, #tpu.memory_space<vmem>>, vector<16x32xf32>
      %c0_65 = arith.constant 0 : index
      %c0_66 = arith.constant 0 : index
      %180 = vector.load %arg18[%c0_65, %c0_66] : memref<16x32xf32, #tpu.memory_space<vmem>>, vector<16x32xf32>
      tpu.vector_store %arg18[%c0_65, %c0_66], %179 {strides = array<i32>} : memref<16x32xf32, #tpu.memory_space<vmem>>, vector<16x32xf32>,
    } else {
    }
    %c0 = arith.constant 0 : index
    %c0_1 = arith.constant 0 : index
    %3 = vector.load %arg18[%c0, %c0_1] : memref<16x32xf32, #tpu.memory_space<vmem>>, vector<16x32xf32>
    %c0_2 = arith.constant 0 : index
    %c0_3 = arith.constant 0 : index
    %c0_4 = arith.constant 0 : index
    %4 = vector.load %arg3[%c0_2, %c0_3, %c0_4] : memref<1x32x96xbf16, #tpu.memory_space<vmem>>, vector<1x32x96xbf16>
    %5 = vector.shape_cast %4 : vector<1x32x96xbf16> to vector<32x96xbf16>
    %c0_5 = arith.constant 0 : index
    %c0_6 = arith.constant 0 : index
    %c0_7 = arith.constant 0 : index
    %6 = vector.load %arg4[%c0_5, %c0_6, %c0_7] : memref<1x1x96xf32, #tpu.memory_space<vmem>>, vector<1x1x96xf32>
    %7 = vector.shape_cast %6 : vector<1x1x96xf32> to vector<1x96xf32>
    %c0_8 = arith.constant 0 : index
    %c0_9 = arith.constant 0 : index
    %c0_10 = arith.constant 0 : index
    %8 = vector.load %arg5[%c0_8, %c0_9, %c0_10] : memref<1x32x32xbf16, #tpu.memory_space<vmem>>, vector<1x32x32xbf16>
    %9 = vector.shape_cast %8 : vector<1x32x32xbf16> to vector<32x32xbf16>
    %c0_11 = arith.constant 0 : index
    %c0_12 = arith.constant 0 : index
    %c0_13 = arith.constant 0 : index
    %10 = vector.load %arg6[%c0_11, %c0_12, %c0_13] : memref<1x1x32xf32, #tpu.memory_space<vmem>>, vector<1x1x32xf32>
    %11 = vector.shape_cast %10 : vector<1x1x32xf32> to vector<1x32xf32>
    %c0_14 = arith.constant 0 : index
    %c0_15 = arith.constant 0 : index
    %c0_16 = arith.constant 0 : index
    %12 = vector.load %arg2[%c0_14, %c0_15, %c0_16] : memref<16x8x8xf32, #tpu.memory_space<vmem>>, vector<16x8x8xf32>
    %13 = arith.truncf %3 : vector<16x32xf32> to vector<16x32xbf16>
    %cst = arith.constant dense<0.000000e+00> : vector<16x96xf32>
    %14 = tpu.matmul %13, %5, %cst {dimension_numbers = #tpu.dot_dimension_numbers<[1], [0], [0], [1], [0, 0, 1, 1], [], []>} : vector<16x32xbf16>, vector<32x96xbf16>, vector<16x96xf32> -> vector<16x96xf32>
    %15 = vector.broadcast %7 : vector<1x96xf32> to vector<16x96xf32>
    %16 = arith.addf %14, %15 : vector<16x96xf32>
    %17 = vector.extract_strided_slice %16 {offsets = [0, 0], sizes = [16, 32], strides = [1, 1]} : vector<16x96xf32> to vector<16x32xf32>
    %18 = vector.extract_strided_slice %17 {offsets = [0, 0], sizes = [16, 4], strides = [1, 1]} : vector<16x32xf32> to vector<16x4xf32>
    %19 = vector.shape_cast %18 : vector<16x4xf32> to vector<2x8x4xf32>
    %20 = vector.extract_strided_slice %17 {offsets = [0, 4], sizes = [16, 4], strides = [1, 1]} : vector<16x32xf32> to vector<16x4xf32>
    %21 = vector.shape_cast %20 : vector<16x4xf32> to vector<2x8x4xf32>
    %22 = vector.extract_strided_slice %17 {offsets = [0, 8], sizes = [16, 4], strides = [1, 1]} : vector<16x32xf32> to vector<16x4xf32>
    %23 = vector.shape_cast %22 : vector<16x4xf32> to vector<2x8x4xf32>
    %24 = vector.extract_strided_slice %17 {offsets = [0, 12], sizes = [16, 4], strides = [1, 1]} : vector<16x32xf32> to vector<16x4xf32>
    %25 = vector.shape_cast %24 : vector<16x4xf32> to vector<2x8x4xf32>
    %26 = vector.extract_strided_slice %17 {offsets = [0, 16], sizes = [16, 4], strides = [1, 1]} : vector<16x32xf32> to vector<16x4xf32>
    %27 = vector.shape_cast %26 : vector<16x4xf32> to vector<2x8x4xf32>
    %28 = vector.extract_strided_slice %17 {offsets = [0, 20], sizes = [16, 4], strides = [1, 1]} : vector<16x32xf32> to vector<16x4xf32>
    %29 = vector.shape_cast %28 : vector<16x4xf32> to vector<2x8x4xf32>
    %30 = vector.extract_strided_slice %17 {offsets = [0, 24], sizes = [16, 4], strides = [1, 1]} : vector<16x32xf32> to vector<16x4xf32>
    %31 = vector.shape_cast %30 : vector<16x4xf32> to vector<2x8x4xf32>
    %32 = vector.extract_strided_slice %17 {offsets = [0, 28], sizes = [16, 4], strides = [1, 1]} : vector<16x32xf32> to vector<16x4xf32>
    %33 = vector.shape_cast %32 : vector<16x4xf32> to vector<2x8x4xf32>
    %34 = tpu.concatenate %19, %21, %23, %25, %27, %29, %31, %33 in 0 : vector<2x8x4xf32>, vector<2x8x4xf32>, vector<2x8x4xf32>, vector<2x8x4xf32>, vector<2x8x4xf32>, vector<2x8x4xf32>, vector<2x8x4xf32>, vector<2x8x4xf32> -> vector<16x8x4xf32>
    %35 = vector.extract_strided_slice %16 {offsets = [0, 32], sizes = [16, 32], strides = [1, 1]} : vector<16x96xf32> to vector<16x32xf32>
    %36 = vector.extract_strided_slice %35 {offsets = [0, 0], sizes = [16, 4], strides = [1, 1]} : vector<16x32xf32> to vector<16x4xf32>
    %37 = vector.shape_cast %36 : vector<16x4xf32> to vector<2x8x4xf32>
    %38 = vector.extract_strided_slice %35 {offsets = [0, 4], sizes = [16, 4], strides = [1, 1]} : vector<16x32xf32> to vector<16x4xf32>
    %39 = vector.shape_cast %38 : vector<16x4xf32> to vector<2x8x4xf32>
    %40 = vector.extract_strided_slice %35 {offsets = [0, 8], sizes = [16, 4], strides = [1, 1]} : vector<16x32xf32> to vector<16x4xf32>
    %41 = vector.shape_cast %40 : vector<16x4xf32> to vector<2x8x4xf32>
    %42 = vector.extract_strided_slice %35 {offsets = [0, 12], sizes = [16, 4], strides = [1, 1]} : vector<16x32xf32> to vector<16x4xf32>
    %43 = vector.shape_cast %42 : vector<16x4xf32> to vector<2x8x4xf32>
    %44 = vector.extract_strided_slice %35 {offsets = [0, 16], sizes = [16, 4], strides = [1, 1]} : vector<16x32xf32> to vector<16x4xf32>
    %45 = vector.shape_cast %44 : vector<16x4xf32> to vector<2x8x4xf32>
    %46 = vector.extract_strided_slice %35 {offsets = [0, 20], sizes = [16, 4], strides = [1, 1]} : vector<16x32xf32> to vector<16x4xf32>
    %47 = vector.shape_cast %46 : vector<16x4xf32> to vector<2x8x4xf32>
    %48 = vector.extract_strided_slice %35 {offsets = [0, 24], sizes = [16, 4], strides = [1, 1]} : vector<16x32xf32> to vector<16x4xf32>
    %49 = vector.shape_cast %48 : vector<16x4xf32> to vector<2x8x4xf32>
    %50 = vector.extract_strided_slice %35 {offsets = [0, 28], sizes = [16, 4], strides = [1, 1]} : vector<16x32xf32> to vector<16x4xf32>
    %51 = vector.shape_cast %50 : vector<16x4xf32> to vector<2x8x4xf32>
    %52 = tpu.concatenate %37, %39, %41, %43, %45, %47, %49, %51 in 0 : vector<2x8x4xf32>, vector<2x8x4xf32>, vector<2x8x4xf32>, vector<2x8x4xf32>, vector<2x8x4xf32>, vector<2x8x4xf32>, vector<2x8x4xf32>, vector<2x8x4xf32> -> vector<16x8x4xf32>
    %53 = vector.extract_strided_slice %16 {offsets = [0, 64], sizes = [16, 32], strides = [1, 1]} : vector<16x96xf32> to vector<16x32xf32>
    %54 = vector.extract_strided_slice %53 {offsets = [0, 0], sizes = [16, 4], strides = [1, 1]} : vector<16x32xf32> to vector<16x4xf32>
    %55 = vector.shape_cast %54 : vector<16x4xf32> to vector<2x8x4xf32>
    %56 = vector.extract_strided_slice %53 {offsets = [0, 4], sizes = [16, 4], strides = [1, 1]} : vector<16x32xf32> to vector<16x4xf32>
    %57 = vector.shape_cast %56 : vector<16x4xf32> to vector<2x8x4xf32>
    %58 = vector.extract_strided_slice %53 {offsets = [0, 8], sizes = [16, 4], strides = [1, 1]} : vector<16x32xf32> to vector<16x4xf32>
    %59 = vector.shape_cast %58 : vector<16x4xf32> to vector<2x8x4xf32>
    %60 = vector.extract_strided_slice %53 {offsets = [0, 12], sizes = [16, 4], strides = [1, 1]} : vector<16x32xf32> to vector<16x4xf32>
    %61 = vector.shape_cast %60 : vector<16x4xf32> to vector<2x8x4xf32>
    %62 = vector.extract_strided_slice %53 {offsets = [0, 16], sizes = [16, 4], strides = [1, 1]} : vector<16x32xf32> to vector<16x4xf32>
    %63 = vector.shape_cast %62 : vector<16x4xf32> to vector<2x8x4xf32>
    %64 = vector.extract_strided_slice %53 {offsets = [0, 20], sizes = [16, 4], strides = [1, 1]} : vector<16x32xf32> to vector<16x4xf32>
    %65 = vector.shape_cast %64 : vector<16x4xf32> to vector<2x8x4xf32>
    %66 = vector.extract_strided_slice %53 {offsets = [0, 24], sizes = [16, 4], strides = [1, 1]} : vector<16x32xf32> to vector<16x4xf32>
    %67 = vector.shape_cast %66 : vector<16x4xf32> to vector<2x8x4xf32>
    %68 = vector.extract_strided_slice %53 {offsets = [0, 28], sizes = [16, 4], strides = [1, 1]} : vector<16x32xf32> to vector<16x4xf32>
    %69 = vector.shape_cast %68 : vector<16x4xf32> to vector<2x8x4xf32>
    %70 = tpu.concatenate %55, %57, %59, %61, %63, %65, %67, %69 in 0 : vector<2x8x4xf32>, vector<2x8x4xf32>, vector<2x8x4xf32>, vector<2x8x4xf32>, vector<2x8x4xf32>, vector<2x8x4xf32>, vector<2x8x4xf32>, vector<2x8x4xf32> -> vector<16x8x4xf32>
    "tpu.trace_start"() <{level = 10 : i32, message = "bqd,bkd->bqk"}> : () -> ()
    %cst_17 = arith.constant dense<0.000000e+00> : vector<16x8x8xf32>
    %71 = tpu.matmul %34, %52, %cst_17 {dimension_numbers = #tpu.dot_dimension_numbers<[2], [2], [1], [1], [0, 0, 0, 1, 1, 1], [0], [0]>} : vector<16x8x4xf32>, vector<16x8x4xf32>, vector<16x8x8xf32> -> vector<16x8x8xf32>
    "tpu.trace_stop"() : () -> ()
    %cst_18 = arith.constant 5.000000e-01 : f32
    %72 = vector.broadcast %cst_18 : f32 to vector<16x8x8xf32>
    %73 = arith.mulf %71, %72 : vector<16x8x8xf32>
    %74 = arith.addf %73, %12 : vector<16x8x8xf32>
    %cst_19 = arith.constant dense<0xFF800000> : vector<16x8xf32>
    %75 = vector.multi_reduction <maximumf>, %74, %cst_19 [2] : vector<16x8x8xf32> to vector<16x8xf32>
    %76 = vector.shape_cast %75 : vector<16x8xf32> to vector<16x8x1xf32>
    %77 = vector.broadcast %76 : vector<16x8x1xf32> to vector<16x8x8xf32>
    %78 = arith.subf %74, %77 : vector<16x8x8xf32>
    %79 = math.exp %78 : vector<16x8x8xf32>
    %cst_20 = arith.constant dense<0.000000e+00> : vector<16x8xf32>
    %80 = vector.multi_reduction <add>, %79, %cst_20 [2] : vector<16x8x8xf32> to vector<16x8xf32>
    %81 = vector.shape_cast %80 : vector<16x8xf32> to vector<16x8x1xf32>
    %82 = tpu.reciprocal %81 {approx = true} : vector<16x8x1xf32> -> vector<16x8x1xf32>
    %83 = vector.broadcast %82 : vector<16x8x1xf32> to vector<16x8x8xf32>
    %84 = arith.mulf %79, %83 : vector<16x8x8xf32>
    "tpu.trace_start"() <{level = 10 : i32, message = "bqk,bkd->bqd"}> : () -> ()
    %cst_21 = arith.constant dense<0.000000e+00> : vector<16x8x4xf32>
    %85 = tpu.matmul %84, %70, %cst_21 {dimension_numbers = #tpu.dot_dimension_numbers<[2], [1], [1], [2], [0, 0, 0, 1, 1, 2], [0], [0]>} : vector<16x8x8xf32>, vector<16x8x4xf32>, vector<16x8x4xf32> -> vector<16x8x4xf32>
    "tpu.trace_stop"() : () -> ()
    %86 = vector.extract_strided_slice %85 {offsets = [0, 0, 0], sizes = [2, 8, 4], strides = [1, 1, 1]} : vector<16x8x4xf32> to vector<2x8x4xf32>
    %87 = vector.shape_cast %86 : vector<2x8x4xf32> to vector<16x4xf32>
    %88 = vector.extract_strided_slice %85 {offsets = [2, 0, 0], sizes = [2, 8, 4], strides = [1, 1, 1]} : vector<16x8x4xf32> to vector<2x8x4xf32>
    %89 = vector.shape_cast %88 : vector<2x8x4xf32> to vector<16x4xf32>
    %90 = vector.extract_strided_slice %85 {offsets = [4, 0, 0], sizes = [2, 8, 4], strides = [1, 1, 1]} : vector<16x8x4xf32> to vector<2x8x4xf32>
    %91 = vector.shape_cast %90 : vector<2x8x4xf32> to vector<16x4xf32>
    %92 = vector.extract_strided_slice %85 {offsets = [6, 0, 0], sizes = [2, 8, 4], strides = [1, 1, 1]} : vector<16x8x4xf32> to vector<2x8x4xf32>
    %93 = vector.shape_cast %92 : vector<2x8x4xf32> to vector<16x4xf32>
    %94 = vector.extract_strided_slice %85 {offsets = [8, 0, 0], sizes = [2, 8, 4], strides = [1, 1, 1]} : vector<16x8x4xf32> to vector<2x8x4xf32>
    %95 = vector.shape_cast %94 : vector<2x8x4xf32> to vector<16x4xf32>
    %96 = vector.extract_strided_slice %85 {offsets = [10, 0, 0], sizes = [2, 8, 4], strides = [1, 1, 1]} : vector<16x8x4xf32> to vector<2x8x4xf32>
    %97 = vector.shape_cast %96 : vector<2x8x4xf32> to vector<16x4xf32>
    %98 = vector.extract_strided_slice %85 {offsets = [12, 0, 0], sizes = [2, 8, 4], strides = [1, 1, 1]} : vector<16x8x4xf32> to vector<2x8x4xf32>
    %99 = vector.shape_cast %98 : vector<2x8x4xf32> to vector<16x4xf32>
    %100 = vector.extract_strided_slice %85 {offsets = [14, 0, 0], sizes = [2, 8, 4], strides = [1, 1, 1]} : vector<16x8x4xf32> to vector<2x8x4xf32>
    %101 = vector.shape_cast %100 : vector<2x8x4xf32> to vector<16x4xf32>
    %102 = tpu.concatenate %87, %89, %91, %93, %95, %97, %99, %101 in 1 : vector<16x4xf32>, vector<16x4xf32>, vector<16x4xf32>, vector<16x4xf32>, vector<16x4xf32>, vector<16x4xf32>, vector<16x4xf32>, vector<16x4xf32> -> vector<16x32xf32>
    %103 = arith.truncf %102 : vector<16x32xf32> to vector<16x32xbf16>
    %cst_22 = arith.constant dense<0.000000e+00> : vector<16x32xf32>
    %104 = tpu.matmul %103, %9, %cst_22 {dimension_numbers = #tpu.dot_dimension_numbers<[1], [0], [0], [1], [0, 0, 1, 1], [], []>} : vector<16x32xbf16>, vector<32x32xbf16>, vector<16x32xf32> -> vector<16x32xf32>
    %105 = vector.broadcast %11 : vector<1x32xf32> to vector<16x32xf32>
    %106 = arith.addf %104, %105 : vector<16x32xf32>
    %107 = arith.addf %3, %106 : vector<16x32xf32>
    %c0_23 = arith.constant 0 : index
    %c0_24 = arith.constant 0 : index
    %c0_25 = arith.constant 0 : index
    %108 = vector.load %arg7[%c0_23, %c0_24, %c0_25] : memref<1x1x32xf32, #tpu.memory_space<vmem>>, vector<1x1x32xf32>
    %109 = vector.shape_cast %108 : vector<1x1x32xf32> to vector<1x32xf32>
    %c0_26 = arith.constant 0 : index
    %c0_27 = arith.constant 0 : index
    %c0_28 = arith.constant 0 : index
    %110 = vector.load %arg8[%c0_26, %c0_27, %c0_28] : memref<1x1x32xf32, #tpu.memory_space<vmem>>, vector<1x1x32xf32>
    %111 = vector.shape_cast %110 : vector<1x1x32xf32> to vector<1x32xf32>
    %cst_29 = arith.constant dense<0.000000e+00> : vector<16xf32>
    %112 = vector.multi_reduction <add>, %107, %cst_29 [1] : vector<16x32xf32> to vector<16xf32>
    %113 = vector.shape_cast %112 : vector<16xf32> to vector<16x1xf32>
    %cst_30 = arith.constant 3.200000e+01 : f32
    %114 = vector.broadcast %cst_30 : f32 to vector<16x1xf32>
    %115 = arith.divf %113, %114 : vector<16x1xf32>
    %116 = vector.broadcast %115 : vector<16x1xf32> to vector<16x32xf32>
    %117 = arith.subf %107, %116 : vector<16x32xf32>
    %118 = arith.mulf %117, %117 : vector<16x32xf32>
    %cst_31 = arith.constant dense<0.000000e+00> : vector<16xf32>
    %119 = vector.multi_reduction <add>, %118, %cst_31 [1] : vector<16x32xf32> to vector<16xf32>
    %120 = vector.shape_cast %119 : vector<16xf32> to vector<16x1xf32>
    %cst_32 = arith.constant 3.200000e+01 : f32
    %121 = vector.broadcast %cst_32 : f32 to vector<16x1xf32>
    %122 = arith.divf %120, %121 : vector<16x1xf32>
    %cst_33 = arith.constant 9.99999974E-6 : f32
    %123 = vector.broadcast %cst_33 : f32 to vector<16x1xf32>
    %124 = arith.addf %122, %123 : vector<16x1xf32>
    %125 = math.rsqrt %124 : vector<16x1xf32>
    %126 = vector.broadcast %125 : vector<16x1xf32> to vector<16x32xf32>
    %127 = arith.mulf %117, %126 : vector<16x32xf32>
    %128 = vector.broadcast %109 : vector<1x32xf32> to vector<16x32xf32>
    %129 = arith.mulf %127, %128 : vector<16x32xf32>
    %130 = vector.broadcast %111 : vector<1x32xf32> to vector<16x32xf32>
    %131 = arith.addf %129, %130 : vector<16x32xf32>
    %c0_34 = arith.constant 0 : index
    %c0_35 = arith.constant 0 : index
    %c0_36 = arith.constant 0 : index
    %132 = vector.load %arg9[%c0_34, %c0_35, %c0_36] : memref<1x32x2048xbf16, #tpu.memory_space<vmem>>, vector<1x32x2048xbf16>
    %133 = vector.shape_cast %132 : vector<1x32x2048xbf16> to vector<32x2048xbf16>
    %c0_37 = arith.constant 0 : index
    %c0_38 = arith.constant 0 : index
    %c0_39 = arith.constant 0 : index
    %134 = vector.load %arg10[%c0_37, %c0_38, %c0_39] : memref<1x1x2048xf32, #tpu.memory_space<vmem>>, vector<1x1x2048xf32>
    %135 = vector.shape_cast %134 : vector<1x1x2048xf32> to vector<1x2048xf32>
    %c0_40 = arith.constant 0 : index
    %c0_41 = arith.constant 0 : index
    %c0_42 = arith.constant 0 : index
    %136 = vector.load %arg11[%c0_40, %c0_41, %c0_42] : memref<1x32x2048xbf16, #tpu.memory_space<vmem>>, vector<1x32x2048xbf16>
    %137 = vector.shape_cast %136 : vector<1x32x2048xbf16> to vector<32x2048xbf16>
    %c0_43 = arith.constant 0 : index
    %c0_44 = arith.constant 0 : index
    %c0_45 = arith.constant 0 : index
    %138 = vector.load %arg12[%c0_43, %c0_44, %c0_45] : memref<1x1x32xf32, #tpu.memory_space<vmem>>, vector<1x1x32xf32>
    %139 = vector.shape_cast %138 : vector<1x1x32xf32> to vector<1x32xf32>
    %140 = arith.truncf %131 : vector<16x32xf32> to vector<16x32xbf16>
    %cst_46 = arith.constant dense<0.000000e+00> : vector<16x2048xf32>
    %141 = tpu.matmul %140, %133, %cst_46 {dimension_numbers = #tpu.dot_dimension_numbers<[1], [0], [0], [1], [0, 0, 1, 1], [], []>} : vector<16x32xbf16>, vector<32x2048xbf16>, vector<16x2048xf32> -> vector<16x2048xf32>
    %142 = vector.broadcast %135 : vector<1x2048xf32> to vector<16x2048xf32>
    %143 = arith.addf %141, %142 : vector<16x2048xf32>
    %cst_47 = arith.constant 0.000000e+00 : f32
    %144 = vector.broadcast %cst_47 : f32 to vector<16x2048xf32>
    %145 = arith.maximumf %143, %144 : vector<16x2048xf32>
    %146 = arith.truncf %145 : vector<16x2048xf32> to vector<16x2048xbf16>
    %cst_48 = arith.constant dense<0.000000e+00> : vector<16x32xf32>
    %147 = tpu.matmul %146, %137, %cst_48 {dimension_numbers = #tpu.dot_dimension_numbers<[1], [1], [0], [0], [0, 0, 1, 0], [], []>} : vector<16x2048xbf16>, vector<32x2048xbf16>, vector<16x32xf32> -> vector<16x32xf32>
    %148 = vector.broadcast %139 : vector<1x32xf32> to vector<16x32xf32>
    %149 = arith.addf %147, %148 : vector<16x32xf32>
    %150 = arith.addf %131, %149 : vector<16x32xf32>
    %c0_49 = arith.constant 0 : index
    %c0_50 = arith.constant 0 : index
    %c0_51 = arith.constant 0 : index
    %151 = vector.load %arg13[%c0_49, %c0_50, %c0_51] : memref<1x1x32xf32, #tpu.memory_space<vmem>>, vector<1x1x32xf32>
    %152 = vector.shape_cast %151 : vector<1x1x32xf32> to vector<1x32xf32>
    %c0_52 = arith.constant 0 : index
    %c0_53 = arith.constant 0 : index
    %c0_54 = arith.constant 0 : index
    %153 = vector.load %arg14[%c0_52, %c0_53, %c0_54] : memref<1x1x32xf32, #tpu.memory_space<vmem>>, vector<1x1x32xf32>
    %154 = vector.shape_cast %153 : vector<1x1x32xf32> to vector<1x32xf32>
    %cst_55 = arith.constant dense<0.000000e+00> : vector<16xf32>
    %155 = vector.multi_reduction <add>, %150, %cst_55 [1] : vector<16x32xf32> to vector<16xf32>
    %156 = vector.shape_cast %155 : vector<16xf32> to vector<16x1xf32>
    %cst_56 = arith.constant 3.200000e+01 : f32
    %157 = vector.broadcast %cst_56 : f32 to vector<16x1xf32>
    %158 = arith.divf %156, %157 : vector<16x1xf32>
    %159 = vector.broadcast %158 : vector<16x1xf32> to vector<16x32xf32>
    %160 = arith.subf %150, %159 : vector<16x32xf32>
    %161 = arith.mulf %160, %160 : vector<16x32xf32>
    %cst_57 = arith.constant dense<0.000000e+00> : vector<16xf32>
    %162 = vector.multi_reduction <add>, %161, %cst_57 [1] : vector<16x32xf32> to vector<16xf32>
    %163 = vector.shape_cast %162 : vector<16xf32> to vector<16x1xf32>
    %cst_58 = arith.constant 3.200000e+01 : f32
    %164 = vector.broadcast %cst_58 : f32 to vector<16x1xf32>
    %165 = arith.divf %163, %164 : vector<16x1xf32>
    %cst_59 = arith.constant 9.99999974E-6 : f32
    %166 = vector.broadcast %cst_59 : f32 to vector<16x1xf32>
    %167 = arith.addf %165, %166 : vector<16x1xf32>
    %168 = math.rsqrt %167 : vector<16x1xf32>
    %169 = vector.broadcast %168 : vector<16x1xf32> to vector<16x32xf32>
    %170 = arith.mulf %160, %169 : vector<16x32xf32>
    %171 = vector.broadcast %152 : vector<1x32xf32> to vector<16x32xf32>
    %172 = arith.mulf %170, %171 : vector<16x32xf32>
    %173 = vector.broadcast %154 : vector<1x32xf32> to vector<16x32xf32>
    %174 = arith.addf %172, %173 : vector<16x32xf32>
    %c0_60 = arith.constant 0 : index
    %c0_61 = arith.constant 0 : index
    %175 = vector.load %arg18[%c0_60, %c0_61] : memref<16x32xf32, #tpu.memory_space<vmem>>, vector<16x32xf32>
    tpu.vector_store %arg18[%c0_60, %c0_61], %174 {strides = array<i32>} : memref<16x32xf32, #tpu.memory_space<vmem>>, vector<16x32xf32>,
    %c5_i32 = arith.constant 5 : i32
    %176 = arith.cmpi eq, %arg0, %c5_i32 : i32
    %177 = arith.extui %176 : i1 to i32
    %c0_i32_62 = arith.constant 0 : i32
    %178 = arith.cmpi ne, %177, %c0_i32_62 : i32
    scf.if %178 {
      %c0_63 = arith.constant 0 : index
      %c0_64 = arith.constant 0 : index
      %179 = vector.load %arg15[%c0_63, %c0_64] : memref<1x32xf32, #tpu.memory_space<vmem>>, vector<1x32xf32>
      %c0_65 = arith.constant 0 : index
      %c0_66 = arith.constant 0 : index
      %180 = vector.load %arg16[%c0_65, %c0_66] : memref<1x32xf32, #tpu.memory_space<vmem>>, vector<1x32xf32>
      %cst_67 = arith.constant dense<0.000000e+00> : vector<16xf32>
      %181 = vector.multi_reduction <add>, %174, %cst_67 [1] : vector<16x32xf32> to vector<16xf32>
      %182 = vector.shape_cast %181 : vector<16xf32> to vector<16x1xf32>
      %cst_68 = arith.constant 3.200000e+01 : f32
      %183 = vector.broadcast %cst_68 : f32 to vector<16x1xf32>
      %184 = arith.divf %182, %183 : vector<16x1xf32>
      %185 = vector.broadcast %184 : vector<16x1xf32> to vector<16x32xf32>
      %186 = arith.subf %174, %185 : vector<16x32xf32>
      %187 = arith.mulf %186, %186 : vector<16x32xf32>
      %cst_69 = arith.constant dense<0.000000e+00> : vector<16xf32>
      %188 = vector.multi_reduction <add>, %187, %cst_69 [1] : vector<16x32xf32> to vector<16xf32>
      %189 = vector.shape_cast %188 : vector<16xf32> to vector<16x1xf32>
      %cst_70 = arith.constant 3.200000e+01 : f32
      %190 = vector.broadcast %cst_70 : f32 to vector<16x1xf32>
      %191 = arith.divf %189, %190 : vector<16x1xf32>
      %cst_71 = arith.constant 9.99999974E-6 : f32
      %192 = vector.broadcast %cst_71 : f32 to vector<16x1xf32>
      %193 = arith.addf %191, %192 : vector<16x1xf32>
      %194 = math.rsqrt %193 : vector<16x1xf32>
      %195 = vector.broadcast %194 : vector<16x1xf32> to vector<16x32xf32>
      %196 = arith.mulf %186, %195 : vector<16x32xf32>
      %197 = vector.broadcast %179 : vector<1x32xf32> to vector<16x32xf32>
      %198 = arith.mulf %196, %197 : vector<16x32xf32>
      %199 = vector.broadcast %180 : vector<1x32xf32> to vector<16x32xf32>
      %200 = arith.addf %198, %199 : vector<16x32xf32>
      %c0_72 = arith.constant 0 : index
      %c0_73 = arith.constant 0 : index
      %201 = vector.load %arg17[%c0_72, %c0_73] : memref<16x32xf32, #tpu.memory_space<vmem>>, vector<16x32xf32>
      tpu.vector_store %arg17[%c0_72, %c0_73], %200 {strides = array<i32>} : memref<16x32xf32, #tpu.memory_space<vmem>>, vector<16x32xf32>,
    } else {
    }
    return
  }
  func.func @transform_0(%arg0: i32) -> (i32, i32) {
    %c0_i32 = arith.constant 0 : i32
    %c0_i32_0 = arith.constant 0 : i32
    %c0_i32_1 = arith.constant 0 : i32
    return %c0_i32, %c0_i32_0 : i32, i32
  }
  func.func @transform_1(%arg0: i32) -> (i32, i32, i32) {
    %c0_i32 = arith.constant 0 : i32
    %c0_i32_0 = arith.constant 0 : i32
    %c0_i32_1 = arith.constant 0 : i32
    %c0_i32_2 = arith.constant 0 : i32
    return %c0_i32, %c0_i32_0, %c0_i32_1 : i32, i32, i32
  }
  func.func @transform_2(%arg0: i32) -> (i32, i32, i32) {
    %c0_i32 = arith.constant 0 : i32
    %c0_i32_0 = arith.constant 0 : i32
    %c0_i32_1 = arith.constant 0 : i32
    return %arg0, %c0_i32, %c0_i32_0 : i32, i32, i32
  }
  func.func @transform_3(%arg0: i32) -> (i32, i32, i32) {
    %c0_i32 = arith.constant 0 : i32
    %c0_i32_0 = arith.constant 0 : i32
    %c0_i32_1 = arith.constant 0 : i32
    return %arg0, %c0_i32, %c0_i32_0 : i32, i32, i32
  }
  func.func @transform_4(%arg0: i32) -> (i32, i32, i32) {
    %c0_i32 = arith.constant 0 : i32
    %c0_i32_0 = arith.constant 0 : i32
    %c0_i32_1 = arith.constant 0 : i32
    return %arg0, %c0_i32, %c0_i32_0 : i32, i32, i32
  }
  func.func @transform_5(%arg0: i32) -> (i32, i32, i32) {
    %c0_i32 = arith.constant 0 : i32
    %c0_i32_0 = arith.constant 0 : i32
    %c0_i32_1 = arith.constant 0 : i32
    return %arg0, %c0_i32, %c0_i32_0 : i32, i32, i32
  }
  func.func @transform_6(%arg0: i32) -> (i32, i32, i32) {
    %c0_i32 = arith.constant 0 : i32
    %c0_i32_0 = arith.constant 0 : i32
    %c0_i32_1 = arith.constant 0 : i32
    return %arg0, %c0_i32, %c0_i32_0 : i32, i32, i32
  }
  func.func @transform_7(%arg0: i32) -> (i32, i32, i32) {
    %c0_i32 = arith.constant 0 : i32
    %c0_i32_0 = arith.constant 0 : i32
    %c0_i32_1 = arith.constant 0 : i32
    return %arg0, %c0_i32, %c0_i32_0 : i32, i32, i32
  }
  func.func @transform_8(%arg0: i32) -> (i32, i32, i32) {
    %c0_i32 = arith.constant 0 : i32
    %c0_i32_0 = arith.constant 0 : i32
    %c0_i32_1 = arith.constant 0 : i32
    return %arg0, %c0_i32, %c0_i32_0 : i32, i32, i32
  }
  func.func @transform_9(%arg0: i32) -> (i32, i32, i32) {
    %c0_i32 = arith.constant 0 : i32
    %c0_i32_0 = arith.constant 0 : i32
    %c0_i32_1 = arith.constant 0 : i32
    return %arg0, %c0_i32, %c0_i32_0 : i32, i32, i32
  }
  func.func @transform_10(%arg0: i32) -> (i32, i32, i32) {
    %c0_i32 = arith.constant 0 : i32
    %c0_i32_0 = arith.constant 0 : i32
    %c0_i32_1 = arith.constant 0 : i32
    return %arg0, %c0_i32, %c0_i32_0 : i32, i32, i32
  }
  func.func @transform_11(%arg0: i32) -> (i32, i32, i32) {
    %c0_i32 = arith.constant 0 : i32
    %c0_i32_0 = arith.constant 0 : i32
    %c0_i32_1 = arith.constant 0 : i32
    return %arg0, %c0_i32, %c0_i32_0 : i32, i32, i32
  }
  func.func @transform_12(%arg0: i32) -> (i32, i32, i32) {
    %c0_i32 = arith.constant 0 : i32
    %c0_i32_0 = arith.constant 0 : i32
    %c0_i32_1 = arith.constant 0 : i32
    return %arg0, %c0_i32, %c0_i32_0 : i32, i32, i32
  }
  func.func @transform_13(%arg0: i32) -> (i32, i32, i32) {
    %c0_i32 = arith.constant 0 : i32
    %c0_i32_0 = arith.constant 0 : i32
    %c0_i32_1 = arith.constant 0 : i32
    return %arg0, %c0_i32, %c0_i32_0 : i32, i32, i32
  }
  func.func @transform_14(%arg0: i32) -> (i32, i32) {
    %c0_i32 = arith.constant 0 : i32
    %c0_i32_0 = arith.constant 0 : i32
    %c0_i32_1 = arith.constant 0 : i32
    return %c0_i32, %c0_i32_0 : i32, i32
  }
  func.func @transform_15(%arg0: i32) -> (i32, i32) {
    %c0_i32 = arith.constant 0 : i32
    %c0_i32_0 = arith.constant 0 : i32
    %c0_i32_1 = arith.constant 0 : i32
    return %c0_i32, %c0_i32_0 : i32, i32
  }
  func.func @transform_16(%arg0: i32) -> (i32, i32) {
    %c0_i32 = arith.constant 0 : i32
    %c0_i32_0 = arith.constant 0 : i32
    %c0_i32_1 = arith.constant 0 : i32
    return %c0_i32, %c0_i32_0 : i32, i32
  }
}

module attributes {stable_mosaic.version = 11 : i64} {
  func.func @_decoder_kernel(%arg0: i32, %arg1: memref<16x32xf32, #tpu.memory_space<vmem>>, %arg2: memref<16x32xf32, #tpu.memory_space<vmem>>, %arg3: memref<16x8x8xf32, #tpu.memory_space<vmem>>, %arg4: memref<1x32x96xbf16, #tpu.memory_space<vmem>>, %arg5: memref<1x1x96xf32, #tpu.memory_space<vmem>>, %arg6: memref<1x32x32xbf16, #tpu.memory_space<vmem>>, %arg7: memref<1x1x32xf32, #tpu.memory_space<vmem>>, %arg8: memref<1x1x32xf32, #tpu.memory_space<vmem>>, %arg9: memref<1x1x32xf32, #tpu.memory_space<vmem>>, %arg10: memref<1x32x32xbf16, #tpu.memory_space<vmem>>, %arg11: memref<1x1x32xf32, #tpu.memory_space<vmem>>, %arg12: memref<1x32x64xbf16, #tpu.memory_space<vmem>>, %arg13: memref<1x1x64xf32, #tpu.memory_space<vmem>>, %arg14: memref<1x32x32xbf16, #tpu.memory_space<vmem>>, %arg15: memref<1x1x32xf32, #tpu.memory_space<vmem>>, %arg16: memref<1x1x32xf32, #tpu.memory_space<vmem>>, %arg17: memref<1x1x32xf32, #tpu.memory_space<vmem>>, %arg18: memref<1x32x2048xbf16, #tpu.memory_space<vmem>>, %arg19: memref<1x1x2048xf32, #tpu.memory_space<vmem>>, %arg20: memref<1x32x2048xbf16, #tpu.memory_space<vmem>>, %arg21: memref<1x1x32xf32, #tpu.memory_space<vmem>>, %arg22: memref<1x1x32xf32, #tpu.memory_space<vmem>>, %arg23: memref<1x1x32xf32, #tpu.memory_space<vmem>>, %arg24: memref<1x32xf32, #tpu.memory_space<vmem>>, %arg25: memref<1x32xf32, #tpu.memory_space<vmem>>, %arg26: memref<16x32xf32, #tpu.memory_space<vmem>>, %arg27: memref<16x32xf32, #tpu.memory_space<vmem>>) attributes {dimension_semantics = [#tpu.dimension_semantics<arbitrary>], iteration_bounds = array<i64: 6>, scalar_prefetch = 0 : i64, scratch_operands = 1 : i64, tpu.core_type = #tpu.core_type<tc>, window_params = [{pipeline_mode = #tpu.pipeline_mode<synchronous>, transform_indices = @transform_0, window_bounds = array<i64: 16, 32>}, {pipeline_mode = #tpu.pipeline_mode<synchronous>, transform_indices = @transform_1, window_bounds = array<i64: 16, 32>}, {pipeline_mode = #tpu.pipeline_mode<synchronous>, transform_indices = @transform_2, window_bounds = array<i64: 16, 8, 8>}, {transform_indices = @transform_3, window_bounds = array<i64: 1, 32, 96>}, {transform_indices = @transform_4, window_bounds = array<i64: 1, 1, 96>}, {transform_indices = @transform_5, window_bounds = array<i64: 1, 32, 32>}, {transform_indices = @transform_6, window_bounds = array<i64: 1, 1, 32>}, {transform_indices = @transform_7, window_bounds = array<i64: 1, 1, 32>}, {transform_indices = @transform_8, window_bounds = array<i64: 1, 1, 32>}, {transform_indices = @transform_9, window_bounds = array<i64: 1, 32, 32>}, {transform_indices = @transform_10, window_bounds = array<i64: 1, 1, 32>}, {transform_indices = @transform_11, window_bounds = array<i64: 1, 32, 64>}, {transform_indices = @transform_12, window_bounds = array<i64: 1, 1, 64>}, {transform_indices = @transform_13, window_bounds = array<i64: 1, 32, 32>}, {transform_indices = @transform_14, window_bounds = array<i64: 1, 1, 32>}, {transform_indices = @transform_15, window_bounds = array<i64: 1, 1, 32>}, {transform_indices = @transform_16, window_bounds = array<i64: 1, 1, 32>}, {transform_indices = @transform_17, window_bounds = array<i64: 1, 32, 2048>}, {transform_indices = @transform_18, window_bounds = array<i64: 1, 1, 2048>}, {transform_indices = @transform_19, window_bounds = array<i64: 1, 32, 2048>}, {transform_indices = @transform_20, window_bounds = array<i64: 1, 1, 32>}, {transform_indices = @transform_21, window_bounds = array<i64: 1, 1, 32>}, {transform_indices = @transform_22, window_bounds = array<i64: 1, 1, 32>}, {pipeline_mode = #tpu.pipeline_mode<synchronous>, transform_indices = @transform_23, window_bounds = array<i64: 1, 32>}, {pipeline_mode = #tpu.pipeline_mode<synchronous>, transform_indices = @transform_24, window_bounds = array<i64: 1, 32>}, {pipeline_mode = #tpu.pipeline_mode<synchronous>, transform_indices = @transform_25, window_bounds = array<i64: 16, 32>}]} {
    %c0_i32 = arith.constant 0 : i32
    %0 = arith.cmpi eq, %arg0, %c0_i32 : i32
    %1 = arith.extui %0 : i1 to i32
    %c0_i32_0 = arith.constant 0 : i32
    %2 = arith.cmpi ne, %1, %c0_i32_0 : i32
    scf.if %2 {
      %c0_102 = arith.constant 0 : index
      %c0_103 = arith.constant 0 : index
      %313 = vector.load %arg1[%c0_102, %c0_103] : memref<16x32xf32, #tpu.memory_space<vmem>>, vector<16x32xf32>
      %c0_104 = arith.constant 0 : index
      %c0_105 = arith.constant 0 : index
      %314 = vector.load %arg27[%c0_104, %c0_105] : memref<16x32xf32, #tpu.memory_space<vmem>>, vector<16x32xf32>
      tpu.vector_store %arg27[%c0_104, %c0_105], %313 {strides = array<i32>} : memref<16x32xf32, #tpu.memory_space<vmem>>, vector<16x32xf32>,
    } else {
    }
    %c0 = arith.constant 0 : index
    %c0_1 = arith.constant 0 : index
    %3 = vector.load %arg27[%c0, %c0_1] : memref<16x32xf32, #tpu.memory_space<vmem>>, vector<16x32xf32>
    %c0_2 = arith.constant 0 : index
    %c0_3 = arith.constant 0 : index
    %4 = vector.load %arg2[%c0_2, %c0_3] : memref<16x32xf32, #tpu.memory_space<vmem>>, vector<16x32xf32>
    %c0_4 = arith.constant 0 : index
    %c0_5 = arith.constant 0 : index
    %c0_6 = arith.constant 0 : index
    %5 = vector.load %arg4[%c0_4, %c0_5, %c0_6] : memref<1x32x96xbf16, #tpu.memory_space<vmem>>, vector<1x32x96xbf16>
    %6 = vector.shape_cast %5 : vector<1x32x96xbf16> to vector<32x96xbf16>
    %c0_7 = arith.constant 0 : index
    %c0_8 = arith.constant 0 : index
    %c0_9 = arith.constant 0 : index
    %7 = vector.load %arg5[%c0_7, %c0_8, %c0_9] : memref<1x1x96xf32, #tpu.memory_space<vmem>>, vector<1x1x96xf32>
    %8 = vector.shape_cast %7 : vector<1x1x96xf32> to vector<1x96xf32>
    %c0_10 = arith.constant 0 : index
    %c0_11 = arith.constant 0 : index
    %c0_12 = arith.constant 0 : index
    %9 = vector.load %arg6[%c0_10, %c0_11, %c0_12] : memref<1x32x32xbf16, #tpu.memory_space<vmem>>, vector<1x32x32xbf16>
    %10 = vector.shape_cast %9 : vector<1x32x32xbf16> to vector<32x32xbf16>
    %c0_13 = arith.constant 0 : index
    %c0_14 = arith.constant 0 : index
    %c0_15 = arith.constant 0 : index
    %11 = vector.load %arg7[%c0_13, %c0_14, %c0_15] : memref<1x1x32xf32, #tpu.memory_space<vmem>>, vector<1x1x32xf32>
    %12 = vector.shape_cast %11 : vector<1x1x32xf32> to vector<1x32xf32>
    %c0_16 = arith.constant 0 : index
    %c0_17 = arith.constant 0 : index
    %c0_18 = arith.constant 0 : index
    %13 = vector.load %arg3[%c0_16, %c0_17, %c0_18] : memref<16x8x8xf32, #tpu.memory_space<vmem>>, vector<16x8x8xf32>
    %14 = arith.truncf %3 : vector<16x32xf32> to vector<16x32xbf16>
    %cst = arith.constant dense<0.000000e+00> : vector<16x96xf32>
    %15 = tpu.matmul %14, %6, %cst {dimension_numbers = #tpu.dot_dimension_numbers<[1], [0], [0], [1], [0, 0, 1, 1], [], []>} : vector<16x32xbf16>, vector<32x96xbf16>, vector<16x96xf32> -> vector<16x96xf32>
    %16 = vector.broadcast %8 : vector<1x96xf32> to vector<16x96xf32>
    %17 = arith.addf %15, %16 : vector<16x96xf32>
    %18 = vector.extract_strided_slice %17 {offsets = [0, 0], sizes = [16, 32], strides = [1, 1]} : vector<16x96xf32> to vector<16x32xf32>
    %19 = vector.extract_strided_slice %18 {offsets = [0, 0], sizes = [16, 4], strides = [1, 1]} : vector<16x32xf32> to vector<16x4xf32>
    %20 = vector.shape_cast %19 : vector<16x4xf32> to vector<2x8x4xf32>
    %21 = vector.extract_strided_slice %18 {offsets = [0, 4], sizes = [16, 4], strides = [1, 1]} : vector<16x32xf32> to vector<16x4xf32>
    %22 = vector.shape_cast %21 : vector<16x4xf32> to vector<2x8x4xf32>
    %23 = vector.extract_strided_slice %18 {offsets = [0, 8], sizes = [16, 4], strides = [1, 1]} : vector<16x32xf32> to vector<16x4xf32>
    %24 = vector.shape_cast %23 : vector<16x4xf32> to vector<2x8x4xf32>
    %25 = vector.extract_strided_slice %18 {offsets = [0, 12], sizes = [16, 4], strides = [1, 1]} : vector<16x32xf32> to vector<16x4xf32>
    %26 = vector.shape_cast %25 : vector<16x4xf32> to vector<2x8x4xf32>
    %27 = vector.extract_strided_slice %18 {offsets = [0, 16], sizes = [16, 4], strides = [1, 1]} : vector<16x32xf32> to vector<16x4xf32>
    %28 = vector.shape_cast %27 : vector<16x4xf32> to vector<2x8x4xf32>
    %29 = vector.extract_strided_slice %18 {offsets = [0, 20], sizes = [16, 4], strides = [1, 1]} : vector<16x32xf32> to vector<16x4xf32>
    %30 = vector.shape_cast %29 : vector<16x4xf32> to vector<2x8x4xf32>
    %31 = vector.extract_strided_slice %18 {offsets = [0, 24], sizes = [16, 4], strides = [1, 1]} : vector<16x32xf32> to vector<16x4xf32>
    %32 = vector.shape_cast %31 : vector<16x4xf32> to vector<2x8x4xf32>
    %33 = vector.extract_strided_slice %18 {offsets = [0, 28], sizes = [16, 4], strides = [1, 1]} : vector<16x32xf32> to vector<16x4xf32>
    %34 = vector.shape_cast %33 : vector<16x4xf32> to vector<2x8x4xf32>
    %35 = tpu.concatenate %20, %22, %24, %26, %28, %30, %32, %34 in 0 : vector<2x8x4xf32>, vector<2x8x4xf32>, vector<2x8x4xf32>, vector<2x8x4xf32>, vector<2x8x4xf32>, vector<2x8x4xf32>, vector<2x8x4xf32>, vector<2x8x4xf32> -> vector<16x8x4xf32>
    %36 = vector.extract_strided_slice %17 {offsets = [0, 32], sizes = [16, 32], strides = [1, 1]} : vector<16x96xf32> to vector<16x32xf32>
    %37 = vector.extract_strided_slice %36 {offsets = [0, 0], sizes = [16, 4], strides = [1, 1]} : vector<16x32xf32> to vector<16x4xf32>
    %38 = vector.shape_cast %37 : vector<16x4xf32> to vector<2x8x4xf32>
    %39 = vector.extract_strided_slice %36 {offsets = [0, 4], sizes = [16, 4], strides = [1, 1]} : vector<16x32xf32> to vector<16x4xf32>
    %40 = vector.shape_cast %39 : vector<16x4xf32> to vector<2x8x4xf32>
    %41 = vector.extract_strided_slice %36 {offsets = [0, 8], sizes = [16, 4], strides = [1, 1]} : vector<16x32xf32> to vector<16x4xf32>
    %42 = vector.shape_cast %41 : vector<16x4xf32> to vector<2x8x4xf32>
    %43 = vector.extract_strided_slice %36 {offsets = [0, 12], sizes = [16, 4], strides = [1, 1]} : vector<16x32xf32> to vector<16x4xf32>
    %44 = vector.shape_cast %43 : vector<16x4xf32> to vector<2x8x4xf32>
    %45 = vector.extract_strided_slice %36 {offsets = [0, 16], sizes = [16, 4], strides = [1, 1]} : vector<16x32xf32> to vector<16x4xf32>
    %46 = vector.shape_cast %45 : vector<16x4xf32> to vector<2x8x4xf32>
    %47 = vector.extract_strided_slice %36 {offsets = [0, 20], sizes = [16, 4], strides = [1, 1]} : vector<16x32xf32> to vector<16x4xf32>
    %48 = vector.shape_cast %47 : vector<16x4xf32> to vector<2x8x4xf32>
    %49 = vector.extract_strided_slice %36 {offsets = [0, 24], sizes = [16, 4], strides = [1, 1]} : vector<16x32xf32> to vector<16x4xf32>
    %50 = vector.shape_cast %49 : vector<16x4xf32> to vector<2x8x4xf32>
    %51 = vector.extract_strided_slice %36 {offsets = [0, 28], sizes = [16, 4], strides = [1, 1]} : vector<16x32xf32> to vector<16x4xf32>
    %52 = vector.shape_cast %51 : vector<16x4xf32> to vector<2x8x4xf32>
    %53 = tpu.concatenate %38, %40, %42, %44, %46, %48, %50, %52 in 0 : vector<2x8x4xf32>, vector<2x8x4xf32>, vector<2x8x4xf32>, vector<2x8x4xf32>, vector<2x8x4xf32>, vector<2x8x4xf32>, vector<2x8x4xf32>, vector<2x8x4xf32> -> vector<16x8x4xf32>
    %54 = vector.extract_strided_slice %17 {offsets = [0, 64], sizes = [16, 32], strides = [1, 1]} : vector<16x96xf32> to vector<16x32xf32>
    %55 = vector.extract_strided_slice %54 {offsets = [0, 0], sizes = [16, 4], strides = [1, 1]} : vector<16x32xf32> to vector<16x4xf32>
    %56 = vector.shape_cast %55 : vector<16x4xf32> to vector<2x8x4xf32>
    %57 = vector.extract_strided_slice %54 {offsets = [0, 4], sizes = [16, 4], strides = [1, 1]} : vector<16x32xf32> to vector<16x4xf32>
    %58 = vector.shape_cast %57 : vector<16x4xf32> to vector<2x8x4xf32>
    %59 = vector.extract_strided_slice %54 {offsets = [0, 8], sizes = [16, 4], strides = [1, 1]} : vector<16x32xf32> to vector<16x4xf32>
    %60 = vector.shape_cast %59 : vector<16x4xf32> to vector<2x8x4xf32>
    %61 = vector.extract_strided_slice %54 {offsets = [0, 12], sizes = [16, 4], strides = [1, 1]} : vector<16x32xf32> to vector<16x4xf32>
    %62 = vector.shape_cast %61 : vector<16x4xf32> to vector<2x8x4xf32>
    %63 = vector.extract_strided_slice %54 {offsets = [0, 16], sizes = [16, 4], strides = [1, 1]} : vector<16x32xf32> to vector<16x4xf32>
    %64 = vector.shape_cast %63 : vector<16x4xf32> to vector<2x8x4xf32>
    %65 = vector.extract_strided_slice %54 {offsets = [0, 20], sizes = [16, 4], strides = [1, 1]} : vector<16x32xf32> to vector<16x4xf32>
    %66 = vector.shape_cast %65 : vector<16x4xf32> to vector<2x8x4xf32>
    %67 = vector.extract_strided_slice %54 {offsets = [0, 24], sizes = [16, 4], strides = [1, 1]} : vector<16x32xf32> to vector<16x4xf32>
    %68 = vector.shape_cast %67 : vector<16x4xf32> to vector<2x8x4xf32>
    %69 = vector.extract_strided_slice %54 {offsets = [0, 28], sizes = [16, 4], strides = [1, 1]} : vector<16x32xf32> to vector<16x4xf32>
    %70 = vector.shape_cast %69 : vector<16x4xf32> to vector<2x8x4xf32>
    %71 = tpu.concatenate %56, %58, %60, %62, %64, %66, %68, %70 in 0 : vector<2x8x4xf32>, vector<2x8x4xf32>, vector<2x8x4xf32>, vector<2x8x4xf32>, vector<2x8x4xf32>, vector<2x8x4xf32>, vector<2x8x4xf32>, vector<2x8x4xf32> -> vector<16x8x4xf32>
    "tpu.trace_start"() <{level = 10 : i32, message = "bqd,bkd->bqk"}> : () -> ()
    %cst_19 = arith.constant dense<0.000000e+00> : vector<16x8x8xf32>
    %72 = tpu.matmul %35, %53, %cst_19 {dimension_numbers = #tpu.dot_dimension_numbers<[2], [2], [1], [1], [0, 0, 0, 1, 1, 1], [0], [0]>} : vector<16x8x4xf32>, vector<16x8x4xf32>, vector<16x8x8xf32> -> vector<16x8x8xf32>
    "tpu.trace_stop"() : () -> ()
    %cst_20 = arith.constant 5.000000e-01 : f32
    %73 = vector.broadcast %cst_20 : f32 to vector<16x8x8xf32>
    %74 = arith.mulf %72, %73 : vector<16x8x8xf32>
    %75 = arith.addf %74, %13 : vector<16x8x8xf32>
    %cst_21 = arith.constant dense<0xFF800000> : vector<16x8xf32>
    %76 = vector.multi_reduction <maximumf>, %75, %cst_21 [2] : vector<16x8x8xf32> to vector<16x8xf32>
    %77 = vector.shape_cast %76 : vector<16x8xf32> to vector<16x8x1xf32>
    %78 = vector.broadcast %77 : vector<16x8x1xf32> to vector<16x8x8xf32>
    %79 = arith.subf %75, %78 : vector<16x8x8xf32>
    %80 = math.exp %79 : vector<16x8x8xf32>
    %cst_22 = arith.constant dense<0.000000e+00> : vector<16x8xf32>
    %81 = vector.multi_reduction <add>, %80, %cst_22 [2] : vector<16x8x8xf32> to vector<16x8xf32>
    %82 = vector.shape_cast %81 : vector<16x8xf32> to vector<16x8x1xf32>
    %83 = tpu.reciprocal %82 {approx = true} : vector<16x8x1xf32> -> vector<16x8x1xf32>
    %84 = vector.broadcast %83 : vector<16x8x1xf32> to vector<16x8x8xf32>
    %85 = arith.mulf %80, %84 : vector<16x8x8xf32>
    "tpu.trace_start"() <{level = 10 : i32, message = "bqk,bkd->bqd"}> : () -> ()
    %cst_23 = arith.constant dense<0.000000e+00> : vector<16x8x4xf32>
    %86 = tpu.matmul %85, %71, %cst_23 {dimension_numbers = #tpu.dot_dimension_numbers<[2], [1], [1], [2], [0, 0, 0, 1, 1, 2], [0], [0]>} : vector<16x8x8xf32>, vector<16x8x4xf32>, vector<16x8x4xf32> -> vector<16x8x4xf32>
    "tpu.trace_stop"() : () -> ()
    %87 = vector.extract_strided_slice %86 {offsets = [0, 0, 0], sizes = [2, 8, 4], strides = [1, 1, 1]} : vector<16x8x4xf32> to vector<2x8x4xf32>
    %88 = vector.shape_cast %87 : vector<2x8x4xf32> to vector<16x4xf32>
    %89 = vector.extract_strided_slice %86 {offsets = [2, 0, 0], sizes = [2, 8, 4], strides = [1, 1, 1]} : vector<16x8x4xf32> to vector<2x8x4xf32>
    %90 = vector.shape_cast %89 : vector<2x8x4xf32> to vector<16x4xf32>
    %91 = vector.extract_strided_slice %86 {offsets = [4, 0, 0], sizes = [2, 8, 4], strides = [1, 1, 1]} : vector<16x8x4xf32> to vector<2x8x4xf32>
    %92 = vector.shape_cast %91 : vector<2x8x4xf32> to vector<16x4xf32>
    %93 = vector.extract_strided_slice %86 {offsets = [6, 0, 0], sizes = [2, 8, 4], strides = [1, 1, 1]} : vector<16x8x4xf32> to vector<2x8x4xf32>
    %94 = vector.shape_cast %93 : vector<2x8x4xf32> to vector<16x4xf32>
    %95 = vector.extract_strided_slice %86 {offsets = [8, 0, 0], sizes = [2, 8, 4], strides = [1, 1, 1]} : vector<16x8x4xf32> to vector<2x8x4xf32>
    %96 = vector.shape_cast %95 : vector<2x8x4xf32> to vector<16x4xf32>
    %97 = vector.extract_strided_slice %86 {offsets = [10, 0, 0], sizes = [2, 8, 4], strides = [1, 1, 1]} : vector<16x8x4xf32> to vector<2x8x4xf32>
    %98 = vector.shape_cast %97 : vector<2x8x4xf32> to vector<16x4xf32>
    %99 = vector.extract_strided_slice %86 {offsets = [12, 0, 0], sizes = [2, 8, 4], strides = [1, 1, 1]} : vector<16x8x4xf32> to vector<2x8x4xf32>
    %100 = vector.shape_cast %99 : vector<2x8x4xf32> to vector<16x4xf32>
    %101 = vector.extract_strided_slice %86 {offsets = [14, 0, 0], sizes = [2, 8, 4], strides = [1, 1, 1]} : vector<16x8x4xf32> to vector<2x8x4xf32>
    %102 = vector.shape_cast %101 : vector<2x8x4xf32> to vector<16x4xf32>
    %103 = tpu.concatenate %88, %90, %92, %94, %96, %98, %100, %102 in 1 : vector<16x4xf32>, vector<16x4xf32>, vector<16x4xf32>, vector<16x4xf32>, vector<16x4xf32>, vector<16x4xf32>, vector<16x4xf32>, vector<16x4xf32> -> vector<16x32xf32>
    %104 = arith.truncf %103 : vector<16x32xf32> to vector<16x32xbf16>
    %cst_24 = arith.constant dense<0.000000e+00> : vector<16x32xf32>
    %105 = tpu.matmul %104, %10, %cst_24 {dimension_numbers = #tpu.dot_dimension_numbers<[1], [0], [0], [1], [0, 0, 1, 1], [], []>} : vector<16x32xbf16>, vector<32x32xbf16>, vector<16x32xf32> -> vector<16x32xf32>
    %106 = vector.broadcast %12 : vector<1x32xf32> to vector<16x32xf32>
    %107 = arith.addf %105, %106 : vector<16x32xf32>
    %108 = arith.addf %3, %107 : vector<16x32xf32>
    %c0_25 = arith.constant 0 : index
    %c0_26 = arith.constant 0 : index
    %c0_27 = arith.constant 0 : index
    %109 = vector.load %arg8[%c0_25, %c0_26, %c0_27] : memref<1x1x32xf32, #tpu.memory_space<vmem>>, vector<1x1x32xf32>
    %110 = vector.shape_cast %109 : vector<1x1x32xf32> to vector<1x32xf32>
    %c0_28 = arith.constant 0 : index
    %c0_29 = arith.constant 0 : index
    %c0_30 = arith.constant 0 : index
    %111 = vector.load %arg9[%c0_28, %c0_29, %c0_30] : memref<1x1x32xf32, #tpu.memory_space<vmem>>, vector<1x1x32xf32>
    %112 = vector.shape_cast %111 : vector<1x1x32xf32> to vector<1x32xf32>
    %cst_31 = arith.constant dense<0.000000e+00> : vector<16xf32>
    %113 = vector.multi_reduction <add>, %108, %cst_31 [1] : vector<16x32xf32> to vector<16xf32>
    %114 = vector.shape_cast %113 : vector<16xf32> to vector<16x1xf32>
    %cst_32 = arith.constant 3.200000e+01 : f32
    %115 = vector.broadcast %cst_32 : f32 to vector<16x1xf32>
    %116 = arith.divf %114, %115 : vector<16x1xf32>
    %117 = vector.broadcast %116 : vector<16x1xf32> to vector<16x32xf32>
    %118 = arith.subf %108, %117 : vector<16x32xf32>
    %119 = arith.mulf %118, %118 : vector<16x32xf32>
    %cst_33 = arith.constant dense<0.000000e+00> : vector<16xf32>
    %120 = vector.multi_reduction <add>, %119, %cst_33 [1] : vector<16x32xf32> to vector<16xf32>
    %121 = vector.shape_cast %120 : vector<16xf32> to vector<16x1xf32>
    %cst_34 = arith.constant 3.200000e+01 : f32
    %122 = vector.broadcast %cst_34 : f32 to vector<16x1xf32>
    %123 = arith.divf %121, %122 : vector<16x1xf32>
    %cst_35 = arith.constant 9.99999974E-6 : f32
    %124 = vector.broadcast %cst_35 : f32 to vector<16x1xf32>
    %125 = arith.addf %123, %124 : vector<16x1xf32>
    %126 = math.rsqrt %125 : vector<16x1xf32>
    %127 = vector.broadcast %126 : vector<16x1xf32> to vector<16x32xf32>
    %128 = arith.mulf %118, %127 : vector<16x32xf32>
    %129 = vector.broadcast %110 : vector<1x32xf32> to vector<16x32xf32>
    %130 = arith.mulf %128, %129 : vector<16x32xf32>
    %131 = vector.broadcast %112 : vector<1x32xf32> to vector<16x32xf32>
    %132 = arith.addf %130, %131 : vector<16x32xf32>
    %c0_36 = arith.constant 0 : index
    %c0_37 = arith.constant 0 : index
    %c0_38 = arith.constant 0 : index
    %133 = vector.load %arg10[%c0_36, %c0_37, %c0_38] : memref<1x32x32xbf16, #tpu.memory_space<vmem>>, vector<1x32x32xbf16>
    %134 = vector.shape_cast %133 : vector<1x32x32xbf16> to vector<32x32xbf16>
    %c0_39 = arith.constant 0 : index
    %c0_40 = arith.constant 0 : index
    %c0_41 = arith.constant 0 : index
    %135 = vector.load %arg11[%c0_39, %c0_40, %c0_41] : memref<1x1x32xf32, #tpu.memory_space<vmem>>, vector<1x1x32xf32>
    %136 = vector.shape_cast %135 : vector<1x1x32xf32> to vector<1x32xf32>
    %c0_42 = arith.constant 0 : index
    %c0_43 = arith.constant 0 : index
    %c0_44 = arith.constant 0 : index
    %137 = vector.load %arg12[%c0_42, %c0_43, %c0_44] : memref<1x32x64xbf16, #tpu.memory_space<vmem>>, vector<1x32x64xbf16>
    %138 = vector.shape_cast %137 : vector<1x32x64xbf16> to vector<32x64xbf16>
    %c0_45 = arith.constant 0 : index
    %c0_46 = arith.constant 0 : index
    %c0_47 = arith.constant 0 : index
    %139 = vector.load %arg13[%c0_45, %c0_46, %c0_47] : memref<1x1x64xf32, #tpu.memory_space<vmem>>, vector<1x1x64xf32>
    %140 = vector.shape_cast %139 : vector<1x1x64xf32> to vector<1x64xf32>
    %c0_48 = arith.constant 0 : index
    %c0_49 = arith.constant 0 : index
    %c0_50 = arith.constant 0 : index
    %141 = vector.load %arg14[%c0_48, %c0_49, %c0_50] : memref<1x32x32xbf16, #tpu.memory_space<vmem>>, vector<1x32x32xbf16>
    %142 = vector.shape_cast %141 : vector<1x32x32xbf16> to vector<32x32xbf16>
    %c0_51 = arith.constant 0 : index
    %c0_52 = arith.constant 0 : index
    %c0_53 = arith.constant 0 : index
    %143 = vector.load %arg15[%c0_51, %c0_52, %c0_53] : memref<1x1x32xf32, #tpu.memory_space<vmem>>, vector<1x1x32xf32>
    %144 = vector.shape_cast %143 : vector<1x1x32xf32> to vector<1x32xf32>
    %145 = arith.truncf %132 : vector<16x32xf32> to vector<16x32xbf16>
    %cst_54 = arith.constant dense<0.000000e+00> : vector<16x32xf32>
    %146 = tpu.matmul %145, %134, %cst_54 {dimension_numbers = #tpu.dot_dimension_numbers<[1], [0], [0], [1], [0, 0, 1, 1], [], []>} : vector<16x32xbf16>, vector<32x32xbf16>, vector<16x32xf32> -> vector<16x32xf32>
    %147 = vector.broadcast %136 : vector<1x32xf32> to vector<16x32xf32>
    %148 = arith.addf %146, %147 : vector<16x32xf32>
    %149 = arith.truncf %4 : vector<16x32xf32> to vector<16x32xbf16>
    %cst_55 = arith.constant dense<0.000000e+00> : vector<16x64xf32>
    %150 = tpu.matmul %149, %138, %cst_55 {dimension_numbers = #tpu.dot_dimension_numbers<[1], [0], [0], [1], [0, 0, 1, 1], [], []>} : vector<16x32xbf16>, vector<32x64xbf16>, vector<16x64xf32> -> vector<16x64xf32>
    %151 = vector.broadcast %140 : vector<1x64xf32> to vector<16x64xf32>
    %152 = arith.addf %150, %151 : vector<16x64xf32>
    %153 = vector.extract_strided_slice %148 {offsets = [0, 0], sizes = [16, 4], strides = [1, 1]} : vector<16x32xf32> to vector<16x4xf32>
    %154 = vector.shape_cast %153 : vector<16x4xf32> to vector<2x8x4xf32>
    %155 = vector.extract_strided_slice %148 {offsets = [0, 4], sizes = [16, 4], strides = [1, 1]} : vector<16x32xf32> to vector<16x4xf32>
    %156 = vector.shape_cast %155 : vector<16x4xf32> to vector<2x8x4xf32>
    %157 = vector.extract_strided_slice %148 {offsets = [0, 8], sizes = [16, 4], strides = [1, 1]} : vector<16x32xf32> to vector<16x4xf32>
    %158 = vector.shape_cast %157 : vector<16x4xf32> to vector<2x8x4xf32>
    %159 = vector.extract_strided_slice %148 {offsets = [0, 12], sizes = [16, 4], strides = [1, 1]} : vector<16x32xf32> to vector<16x4xf32>
    %160 = vector.shape_cast %159 : vector<16x4xf32> to vector<2x8x4xf32>
    %161 = vector.extract_strided_slice %148 {offsets = [0, 16], sizes = [16, 4], strides = [1, 1]} : vector<16x32xf32> to vector<16x4xf32>
    %162 = vector.shape_cast %161 : vector<16x4xf32> to vector<2x8x4xf32>
    %163 = vector.extract_strided_slice %148 {offsets = [0, 20], sizes = [16, 4], strides = [1, 1]} : vector<16x32xf32> to vector<16x4xf32>
    %164 = vector.shape_cast %163 : vector<16x4xf32> to vector<2x8x4xf32>
    %165 = vector.extract_strided_slice %148 {offsets = [0, 24], sizes = [16, 4], strides = [1, 1]} : vector<16x32xf32> to vector<16x4xf32>
    %166 = vector.shape_cast %165 : vector<16x4xf32> to vector<2x8x4xf32>
    %167 = vector.extract_strided_slice %148 {offsets = [0, 28], sizes = [16, 4], strides = [1, 1]} : vector<16x32xf32> to vector<16x4xf32>
    %168 = vector.shape_cast %167 : vector<16x4xf32> to vector<2x8x4xf32>
    %169 = tpu.concatenate %154, %156, %158, %160, %162, %164, %166, %168 in 0 : vector<2x8x4xf32>, vector<2x8x4xf32>, vector<2x8x4xf32>, vector<2x8x4xf32>, vector<2x8x4xf32>, vector<2x8x4xf32>, vector<2x8x4xf32>, vector<2x8x4xf32> -> vector<16x8x4xf32>
    %170 = vector.extract_strided_slice %152 {offsets = [0, 0], sizes = [16, 32], strides = [1, 1]} : vector<16x64xf32> to vector<16x32xf32>
    %171 = vector.extract_strided_slice %170 {offsets = [0, 0], sizes = [16, 4], strides = [1, 1]} : vector<16x32xf32> to vector<16x4xf32>
    %172 = vector.shape_cast %171 : vector<16x4xf32> to vector<2x8x4xf32>
    %173 = vector.extract_strided_slice %170 {offsets = [0, 4], sizes = [16, 4], strides = [1, 1]} : vector<16x32xf32> to vector<16x4xf32>
    %174 = vector.shape_cast %173 : vector<16x4xf32> to vector<2x8x4xf32>
    %175 = vector.extract_strided_slice %170 {offsets = [0, 8], sizes = [16, 4], strides = [1, 1]} : vector<16x32xf32> to vector<16x4xf32>
    %176 = vector.shape_cast %175 : vector<16x4xf32> to vector<2x8x4xf32>
    %177 = vector.extract_strided_slice %170 {offsets = [0, 12], sizes = [16, 4], strides = [1, 1]} : vector<16x32xf32> to vector<16x4xf32>
    %178 = vector.shape_cast %177 : vector<16x4xf32> to vector<2x8x4xf32>
    %179 = vector.extract_strided_slice %170 {offsets = [0, 16], sizes = [16, 4], strides = [1, 1]} : vector<16x32xf32> to vector<16x4xf32>
    %180 = vector.shape_cast %179 : vector<16x4xf32> to vector<2x8x4xf32>
    %181 = vector.extract_strided_slice %170 {offsets = [0, 20], sizes = [16, 4], strides = [1, 1]} : vector<16x32xf32> to vector<16x4xf32>
    %182 = vector.shape_cast %181 : vector<16x4xf32> to vector<2x8x4xf32>
    %183 = vector.extract_strided_slice %170 {offsets = [0, 24], sizes = [16, 4], strides = [1, 1]} : vector<16x32xf32> to vector<16x4xf32>
    %184 = vector.shape_cast %183 : vector<16x4xf32> to vector<2x8x4xf32>
    %185 = vector.extract_strided_slice %170 {offsets = [0, 28], sizes = [16, 4], strides = [1, 1]} : vector<16x32xf32> to vector<16x4xf32>
    %186 = vector.shape_cast %185 : vector<16x4xf32> to vector<2x8x4xf32>
    %187 = tpu.concatenate %172, %174, %176, %178, %180, %182, %184, %186 in 0 : vector<2x8x4xf32>, vector<2x8x4xf32>, vector<2x8x4xf32>, vector<2x8x4xf32>, vector<2x8x4xf32>, vector<2x8x4xf32>, vector<2x8x4xf32>, vector<2x8x4xf32> -> vector<16x8x4xf32>
    %188 = vector.extract_strided_slice %152 {offsets = [0, 32], sizes = [16, 32], strides = [1, 1]} : vector<16x64xf32> to vector<16x32xf32>
    %189 = vector.extract_strided_slice %188 {offsets = [0, 0], sizes = [16, 4], strides = [1, 1]} : vector<16x32xf32> to vector<16x4xf32>
    %190 = vector.shape_cast %189 : vector<16x4xf32> to vector<2x8x4xf32>
    %191 = vector.extract_strided_slice %188 {offsets = [0, 4], sizes = [16, 4], strides = [1, 1]} : vector<16x32xf32> to vector<16x4xf32>
    %192 = vector.shape_cast %191 : vector<16x4xf32> to vector<2x8x4xf32>
    %193 = vector.extract_strided_slice %188 {offsets = [0, 8], sizes = [16, 4], strides = [1, 1]} : vector<16x32xf32> to vector<16x4xf32>
    %194 = vector.shape_cast %193 : vector<16x4xf32> to vector<2x8x4xf32>
    %195 = vector.extract_strided_slice %188 {offsets = [0, 12], sizes = [16, 4], strides = [1, 1]} : vector<16x32xf32> to vector<16x4xf32>
    %196 = vector.shape_cast %195 : vector<16x4xf32> to vector<2x8x4xf32>
    %197 = vector.extract_strided_slice %188 {offsets = [0, 16], sizes = [16, 4], strides = [1, 1]} : vector<16x32xf32> to vector<16x4xf32>
    %198 = vector.shape_cast %197 : vector<16x4xf32> to vector<2x8x4xf32>
    %199 = vector.extract_strided_slice %188 {offsets = [0, 20], sizes = [16, 4], strides = [1, 1]} : vector<16x32xf32> to vector<16x4xf32>
    %200 = vector.shape_cast %199 : vector<16x4xf32> to vector<2x8x4xf32>
    %201 = vector.extract_strided_slice %188 {offsets = [0, 24], sizes = [16, 4], strides = [1, 1]} : vector<16x32xf32> to vector<16x4xf32>
    %202 = vector.shape_cast %201 : vector<16x4xf32> to vector<2x8x4xf32>
    %203 = vector.extract_strided_slice %188 {offsets = [0, 28], sizes = [16, 4], strides = [1, 1]} : vector<16x32xf32> to vector<16x4xf32>
    %204 = vector.shape_cast %203 : vector<16x4xf32> to vector<2x8x4xf32>
    %205 = tpu.concatenate %190, %192, %194, %196, %198, %200, %202, %204 in 0 : vector<2x8x4xf32>, vector<2x8x4xf32>, vector<2x8x4xf32>, vector<2x8x4xf32>, vector<2x8x4xf32>, vector<2x8x4xf32>, vector<2x8x4xf32>, vector<2x8x4xf32> -> vector<16x8x4xf32>
    "tpu.trace_start"() <{level = 10 : i32, message = "bqd,bkd->bqk"}> : () -> ()
    %cst_56 = arith.constant dense<0.000000e+00> : vector<16x8x8xf32>
    %206 = tpu.matmul %169, %187, %cst_56 {dimension_numbers = #tpu.dot_dimension_numbers<[2], [2], [1], [1], [0, 0, 0, 1, 1, 1], [0], [0]>} : vector<16x8x4xf32>, vector<16x8x4xf32>, vector<16x8x8xf32> -> vector<16x8x8xf32>
    "tpu.trace_stop"() : () -> ()
    %cst_57 = arith.constant 5.000000e-01 : f32
    %207 = vector.broadcast %cst_57 : f32 to vector<16x8x8xf32>
    %208 = arith.mulf %206, %207 : vector<16x8x8xf32>
    %cst_58 = arith.constant dense<0xFF800000> : vector<16x8xf32>
    %209 = vector.multi_reduction <maximumf>, %208, %cst_58 [2] : vector<16x8x8xf32> to vector<16x8xf32>
    %210 = vector.shape_cast %209 : vector<16x8xf32> to vector<16x8x1xf32>
    %211 = vector.broadcast %210 : vector<16x8x1xf32> to vector<16x8x8xf32>
    %212 = arith.subf %208, %211 : vector<16x8x8xf32>
    %213 = math.exp %212 : vector<16x8x8xf32>
    %cst_59 = arith.constant dense<0.000000e+00> : vector<16x8xf32>
    %214 = vector.multi_reduction <add>, %213, %cst_59 [2] : vector<16x8x8xf32> to vector<16x8xf32>
    %215 = vector.shape_cast %214 : vector<16x8xf32> to vector<16x8x1xf32>
    %216 = tpu.reciprocal %215 {approx = true} : vector<16x8x1xf32> -> vector<16x8x1xf32>
    %217 = vector.broadcast %216 : vector<16x8x1xf32> to vector<16x8x8xf32>
    %218 = arith.mulf %213, %217 : vector<16x8x8xf32>
    "tpu.trace_start"() <{level = 10 : i32, message = "bqk,bkd->bqd"}> : () -> ()
    %cst_60 = arith.constant dense<0.000000e+00> : vector<16x8x4xf32>
    %219 = tpu.matmul %218, %205, %cst_60 {dimension_numbers = #tpu.dot_dimension_numbers<[2], [1], [1], [2], [0, 0, 0, 1, 1, 2], [0], [0]>} : vector<16x8x8xf32>, vector<16x8x4xf32>, vector<16x8x4xf32> -> vector<16x8x4xf32>
    "tpu.trace_stop"() : () -> ()
    %220 = vector.extract_strided_slice %219 {offsets = [0, 0, 0], sizes = [2, 8, 4], strides = [1, 1, 1]} : vector<16x8x4xf32> to vector<2x8x4xf32>
    %221 = vector.shape_cast %220 : vector<2x8x4xf32> to vector<16x4xf32>
    %222 = vector.extract_strided_slice %219 {offsets = [2, 0, 0], sizes = [2, 8, 4], strides = [1, 1, 1]} : vector<16x8x4xf32> to vector<2x8x4xf32>
    %223 = vector.shape_cast %222 : vector<2x8x4xf32> to vector<16x4xf32>
    %224 = vector.extract_strided_slice %219 {offsets = [4, 0, 0], sizes = [2, 8, 4], strides = [1, 1, 1]} : vector<16x8x4xf32> to vector<2x8x4xf32>
    %225 = vector.shape_cast %224 : vector<2x8x4xf32> to vector<16x4xf32>
    %226 = vector.extract_strided_slice %219 {offsets = [6, 0, 0], sizes = [2, 8, 4], strides = [1, 1, 1]} : vector<16x8x4xf32> to vector<2x8x4xf32>
    %227 = vector.shape_cast %226 : vector<2x8x4xf32> to vector<16x4xf32>
    %228 = vector.extract_strided_slice %219 {offsets = [8, 0, 0], sizes = [2, 8, 4], strides = [1, 1, 1]} : vector<16x8x4xf32> to vector<2x8x4xf32>
    %229 = vector.shape_cast %228 : vector<2x8x4xf32> to vector<16x4xf32>
    %230 = vector.extract_strided_slice %219 {offsets = [10, 0, 0], sizes = [2, 8, 4], strides = [1, 1, 1]} : vector<16x8x4xf32> to vector<2x8x4xf32>
    %231 = vector.shape_cast %230 : vector<2x8x4xf32> to vector<16x4xf32>
    %232 = vector.extract_strided_slice %219 {offsets = [12, 0, 0], sizes = [2, 8, 4], strides = [1, 1, 1]} : vector<16x8x4xf32> to vector<2x8x4xf32>
    %233 = vector.shape_cast %232 : vector<2x8x4xf32> to vector<16x4xf32>
    %234 = vector.extract_strided_slice %219 {offsets = [14, 0, 0], sizes = [2, 8, 4], strides = [1, 1, 1]} : vector<16x8x4xf32> to vector<2x8x4xf32>
    %235 = vector.shape_cast %234 : vector<2x8x4xf32> to vector<16x4xf32>
    %236 = tpu.concatenate %221, %223, %225, %227, %229, %231, %233, %235 in 1 : vector<16x4xf32>, vector<16x4xf32>, vector<16x4xf32>, vector<16x4xf32>, vector<16x4xf32>, vector<16x4xf32>, vector<16x4xf32>, vector<16x4xf32> -> vector<16x32xf32>
    %237 = arith.truncf %236 : vector<16x32xf32> to vector<16x32xbf16>
    %cst_61 = arith.constant dense<0.000000e+00> : vector<16x32xf32>
    %238 = tpu.matmul %237, %142, %cst_61 {dimension_numbers = #tpu.dot_dimension_numbers<[1], [0], [0], [1], [0, 0, 1, 1], [], []>} : vector<16x32xbf16>, vector<32x32xbf16>, vector<16x32xf32> -> vector<16x32xf32>
    %239 = vector.broadcast %144 : vector<1x32xf32> to vector<16x32xf32>
    %240 = arith.addf %238, %239 : vector<16x32xf32>
    %241 = arith.addf %132, %240 : vector<16x32xf32>
    %c0_62 = arith.constant 0 : index
    %c0_63 = arith.constant 0 : index
    %c0_64 = arith.constant 0 : index
    %242 = vector.load %arg16[%c0_62, %c0_63, %c0_64] : memref<1x1x32xf32, #tpu.memory_space<vmem>>, vector<1x1x32xf32>
    %243 = vector.shape_cast %242 : vector<1x1x32xf32> to vector<1x32xf32>
    %c0_65 = arith.constant 0 : index
    %c0_66 = arith.constant 0 : index
    %c0_67 = arith.constant 0 : index
    %244 = vector.load %arg17[%c0_65, %c0_66, %c0_67] : memref<1x1x32xf32, #tpu.memory_space<vmem>>, vector<1x1x32xf32>
    %245 = vector.shape_cast %244 : vector<1x1x32xf32> to vector<1x32xf32>
    %cst_68 = arith.constant dense<0.000000e+00> : vector<16xf32>
    %246 = vector.multi_reduction <add>, %241, %cst_68 [1] : vector<16x32xf32> to vector<16xf32>
    %247 = vector.shape_cast %246 : vector<16xf32> to vector<16x1xf32>
    %cst_69 = arith.constant 3.200000e+01 : f32
    %248 = vector.broadcast %cst_69 : f32 to vector<16x1xf32>
    %249 = arith.divf %247, %248 : vector<16x1xf32>
    %250 = vector.broadcast %249 : vector<16x1xf32> to vector<16x32xf32>
    %251 = arith.subf %241, %250 : vector<16x32xf32>
    %252 = arith.mulf %251, %251 : vector<16x32xf32>
    %cst_70 = arith.constant dense<0.000000e+00> : vector<16xf32>
    %253 = vector.multi_reduction <add>, %252, %cst_70 [1] : vector<16x32xf32> to vector<16xf32>
    %254 = vector.shape_cast %253 : vector<16xf32> to vector<16x1xf32>
    %cst_71 = arith.constant 3.200000e+01 : f32
    %255 = vector.broadcast %cst_71 : f32 to vector<16x1xf32>
    %256 = arith.divf %254, %255 : vector<16x1xf32>
    %cst_72 = arith.constant 9.99999974E-6 : f32
    %257 = vector.broadcast %cst_72 : f32 to vector<16x1xf32>
    %258 = arith.addf %256, %257 : vector<16x1xf32>
    %259 = math.rsqrt %258 : vector<16x1xf32>
    %260 = vector.broadcast %259 : vector<16x1xf32> to vector<16x32xf32>
    %261 = arith.mulf %251, %260 : vector<16x32xf32>
    %262 = vector.broadcast %243 : vector<1x32xf32> to vector<16x32xf32>
    %263 = arith.mulf %261, %262 : vector<16x32xf32>
    %264 = vector.broadcast %245 : vector<1x32xf32> to vector<16x32xf32>
    %265 = arith.addf %263, %264 : vector<16x32xf32>
    %c0_73 = arith.constant 0 : index
    %c0_74 = arith.constant 0 : index
    %c0_75 = arith.constant 0 : index
    %266 = vector.load %arg18[%c0_73, %c0_74, %c0_75] : memref<1x32x2048xbf16, #tpu.memory_space<vmem>>, vector<1x32x2048xbf16>
    %267 = vector.shape_cast %266 : vector<1x32x2048xbf16> to vector<32x2048xbf16>
    %c0_76 = arith.constant 0 : index
    %c0_77 = arith.constant 0 : index
    %c0_78 = arith.constant 0 : index
    %268 = vector.load %arg19[%c0_76, %c0_77, %c0_78] : memref<1x1x2048xf32, #tpu.memory_space<vmem>>, vector<1x1x2048xf32>
    %269 = vector.shape_cast %268 : vector<1x1x2048xf32> to vector<1x2048xf32>
    %c0_79 = arith.constant 0 : index
    %c0_80 = arith.constant 0 : index
    %c0_81 = arith.constant 0 : index
    %270 = vector.load %arg20[%c0_79, %c0_80, %c0_81] : memref<1x32x2048xbf16, #tpu.memory_space<vmem>>, vector<1x32x2048xbf16>
    %271 = vector.shape_cast %270 : vector<1x32x2048xbf16> to vector<32x2048xbf16>
    %c0_82 = arith.constant 0 : index
    %c0_83 = arith.constant 0 : index
    %c0_84 = arith.constant 0 : index
    %272 = vector.load %arg21[%c0_82, %c0_83, %c0_84] : memref<1x1x32xf32, #tpu.memory_space<vmem>>, vector<1x1x32xf32>
    %273 = vector.shape_cast %272 : vector<1x1x32xf32> to vector<1x32xf32>
    %274 = arith.truncf %265 : vector<16x32xf32> to vector<16x32xbf16>
    %cst_85 = arith.constant dense<0.000000e+00> : vector<16x2048xf32>
    %275 = tpu.matmul %274, %267, %cst_85 {dimension_numbers = #tpu.dot_dimension_numbers<[1], [0], [0], [1], [0, 0, 1, 1], [], []>} : vector<16x32xbf16>, vector<32x2048xbf16>, vector<16x2048xf32> -> vector<16x2048xf32>
    %276 = vector.broadcast %269 : vector<1x2048xf32> to vector<16x2048xf32>
    %277 = arith.addf %275, %276 : vector<16x2048xf32>
    %cst_86 = arith.constant 0.000000e+00 : f32
    %278 = vector.broadcast %cst_86 : f32 to vector<16x2048xf32>
    %279 = arith.maximumf %277, %278 : vector<16x2048xf32>
    %280 = arith.truncf %279 : vector<16x2048xf32> to vector<16x2048xbf16>
    %cst_87 = arith.constant dense<0.000000e+00> : vector<16x32xf32>
    %281 = tpu.matmul %280, %271, %cst_87 {dimension_numbers = #tpu.dot_dimension_numbers<[1], [1], [0], [0], [0, 0, 1, 0], [], []>} : vector<16x2048xbf16>, vector<32x2048xbf16>, vector<16x32xf32> -> vector<16x32xf32>
    %282 = vector.broadcast %273 : vector<1x32xf32> to vector<16x32xf32>
    %283 = arith.addf %281, %282 : vector<16x32xf32>
    %284 = arith.addf %265, %283 : vector<16x32xf32>
    %c0_88 = arith.constant 0 : index
    %c0_89 = arith.constant 0 : index
    %c0_90 = arith.constant 0 : index
    %285 = vector.load %arg22[%c0_88, %c0_89, %c0_90] : memref<1x1x32xf32, #tpu.memory_space<vmem>>, vector<1x1x32xf32>
    %286 = vector.shape_cast %285 : vector<1x1x32xf32> to vector<1x32xf32>
    %c0_91 = arith.constant 0 : index
    %c0_92 = arith.constant 0 : index
    %c0_93 = arith.constant 0 : index
    %287 = vector.load %arg23[%c0_91, %c0_92, %c0_93] : memref<1x1x32xf32, #tpu.memory_space<vmem>>, vector<1x1x32xf32>
    %288 = vector.shape_cast %287 : vector<1x1x32xf32> to vector<1x32xf32>
    %cst_94 = arith.constant dense<0.000000e+00> : vector<16xf32>
    %289 = vector.multi_reduction <add>, %284, %cst_94 [1] : vector<16x32xf32> to vector<16xf32>
    %290 = vector.shape_cast %289 : vector<16xf32> to vector<16x1xf32>
    %cst_95 = arith.constant 3.200000e+01 : f32
    %291 = vector.broadcast %cst_95 : f32 to vector<16x1xf32>
    %292 = arith.divf %290, %291 : vector<16x1xf32>
    %293 = vector.broadcast %292 : vector<16x1xf32> to vector<16x32xf32>
    %294 = arith.subf %284, %293 : vector<16x32xf32>
    %295 = arith.mulf %294, %294 : vector<16x32xf32>
    %cst_96 = arith.constant dense<0.000000e+00> : vector<16xf32>
    %296 = vector.multi_reduction <add>, %295, %cst_96 [1] : vector<16x32xf32> to vector<16xf32>
    %297 = vector.shape_cast %296 : vector<16xf32> to vector<16x1xf32>
    %cst_97 = arith.constant 3.200000e+01 : f32
    %298 = vector.broadcast %cst_97 : f32 to vector<16x1xf32>
    %299 = arith.divf %297, %298 : vector<16x1xf32>
    %cst_98 = arith.constant 9.99999974E-6 : f32
    %300 = vector.broadcast %cst_98 : f32 to vector<16x1xf32>
    %301 = arith.addf %299, %300 : vector<16x1xf32>
    %302 = math.rsqrt %301 : vector<16x1xf32>
    %303 = vector.broadcast %302 : vector<16x1xf32> to vector<16x32xf32>
    %304 = arith.mulf %294, %303 : vector<16x32xf32>
    %305 = vector.broadcast %286 : vector<1x32xf32> to vector<16x32xf32>
    %306 = arith.mulf %304, %305 : vector<16x32xf32>
    %307 = vector.broadcast %288 : vector<1x32xf32> to vector<16x32xf32>
    %308 = arith.addf %306, %307 : vector<16x32xf32>
    %c0_99 = arith.constant 0 : index
    %c0_100 = arith.constant 0 : index
    %309 = vector.load %arg27[%c0_99, %c0_100] : memref<16x32xf32, #tpu.memory_space<vmem>>, vector<16x32xf32>
    tpu.vector_store %arg27[%c0_99, %c0_100], %308 {strides = array<i32>} : memref<16x32xf32, #tpu.memory_space<vmem>>, vector<16x32xf32>,
    %c5_i32 = arith.constant 5 : i32
    %310 = arith.cmpi eq, %arg0, %c5_i32 : i32
    %311 = arith.extui %310 : i1 to i32
    %c0_i32_101 = arith.constant 0 : i32
    %312 = arith.cmpi ne, %311, %c0_i32_101 : i32
    scf.if %312 {
      %c0_102 = arith.constant 0 : index
      %c0_103 = arith.constant 0 : index
      %313 = vector.load %arg24[%c0_102, %c0_103] : memref<1x32xf32, #tpu.memory_space<vmem>>, vector<1x32xf32>
      %c0_104 = arith.constant 0 : index
      %c0_105 = arith.constant 0 : index
      %314 = vector.load %arg25[%c0_104, %c0_105] : memref<1x32xf32, #tpu.memory_space<vmem>>, vector<1x32xf32>
      %cst_106 = arith.constant dense<0.000000e+00> : vector<16xf32>
      %315 = vector.multi_reduction <add>, %308, %cst_106 [1] : vector<16x32xf32> to vector<16xf32>
      %316 = vector.shape_cast %315 : vector<16xf32> to vector<16x1xf32>
      %cst_107 = arith.constant 3.200000e+01 : f32
      %317 = vector.broadcast %cst_107 : f32 to vector<16x1xf32>
      %318 = arith.divf %316, %317 : vector<16x1xf32>
      %319 = vector.broadcast %318 : vector<16x1xf32> to vector<16x32xf32>
      %320 = arith.subf %308, %319 : vector<16x32xf32>
      %321 = arith.mulf %320, %320 : vector<16x32xf32>
      %cst_108 = arith.constant dense<0.000000e+00> : vector<16xf32>
      %322 = vector.multi_reduction <add>, %321, %cst_108 [1] : vector<16x32xf32> to vector<16xf32>
      %323 = vector.shape_cast %322 : vector<16xf32> to vector<16x1xf32>
      %cst_109 = arith.constant 3.200000e+01 : f32
      %324 = vector.broadcast %cst_109 : f32 to vector<16x1xf32>
      %325 = arith.divf %323, %324 : vector<16x1xf32>
      %cst_110 = arith.constant 9.99999974E-6 : f32
      %326 = vector.broadcast %cst_110 : f32 to vector<16x1xf32>
      %327 = arith.addf %325, %326 : vector<16x1xf32>
      %328 = math.rsqrt %327 : vector<16x1xf32>
      %329 = vector.broadcast %328 : vector<16x1xf32> to vector<16x32xf32>
      %330 = arith.mulf %320, %329 : vector<16x32xf32>
      %331 = vector.broadcast %313 : vector<1x32xf32> to vector<16x32xf32>
      %332 = arith.mulf %330, %331 : vector<16x32xf32>
      %333 = vector.broadcast %314 : vector<1x32xf32> to vector<16x32xf32>
      %334 = arith.addf %332, %333 : vector<16x32xf32>
      %c0_111 = arith.constant 0 : index
      %c0_112 = arith.constant 0 : index
      %335 = vector.load %arg26[%c0_111, %c0_112] : memref<16x32xf32, #tpu.memory_space<vmem>>, vector<16x32xf32>
      tpu.vector_store %arg26[%c0_111, %c0_112], %334 {strides = array<i32>} : memref<16x32xf32, #tpu.memory_space<vmem>>, vector<16x32xf32>,
    } else {
    }
    return
  }
  func.func @transform_0(%arg0: i32) -> (i32, i32) {
    %c0_i32 = arith.constant 0 : i32
    %c0_i32_0 = arith.constant 0 : i32
    %c0_i32_1 = arith.constant 0 : i32
    return %c0_i32, %c0_i32_0 : i32, i32
  }
  func.func @transform_1(%arg0: i32) -> (i32, i32) {
    %c0_i32 = arith.constant 0 : i32
    %c0_i32_0 = arith.constant 0 : i32
    %c0_i32_1 = arith.constant 0 : i32
    return %c0_i32, %c0_i32_0 : i32, i32
  }
  func.func @transform_2(%arg0: i32) -> (i32, i32, i32) {
    %c0_i32 = arith.constant 0 : i32
    %c0_i32_0 = arith.constant 0 : i32
    %c0_i32_1 = arith.constant 0 : i32
    %c0_i32_2 = arith.constant 0 : i32
    return %c0_i32, %c0_i32_0, %c0_i32_1 : i32, i32, i32
  }
  func.func @transform_3(%arg0: i32) -> (i32, i32, i32) {
    %c0_i32 = arith.constant 0 : i32
    %c0_i32_0 = arith.constant 0 : i32
    %c0_i32_1 = arith.constant 0 : i32
    return %arg0, %c0_i32, %c0_i32_0 : i32, i32, i32
  }
  func.func @transform_4(%arg0: i32) -> (i32, i32, i32) {
    %c0_i32 = arith.constant 0 : i32
    %c0_i32_0 = arith.constant 0 : i32
    %c0_i32_1 = arith.constant 0 : i32
    return %arg0, %c0_i32, %c0_i32_0 : i32, i32, i32
  }
  func.func @transform_5(%arg0: i32) -> (i32, i32, i32) {
    %c0_i32 = arith.constant 0 : i32
    %c0_i32_0 = arith.constant 0 : i32
    %c0_i32_1 = arith.constant 0 : i32
    return %arg0, %c0_i32, %c0_i32_0 : i32, i32, i32
  }
  func.func @transform_6(%arg0: i32) -> (i32, i32, i32) {
    %c0_i32 = arith.constant 0 : i32
    %c0_i32_0 = arith.constant 0 : i32
    %c0_i32_1 = arith.constant 0 : i32
    return %arg0, %c0_i32, %c0_i32_0 : i32, i32, i32
  }
  func.func @transform_7(%arg0: i32) -> (i32, i32, i32) {
    %c0_i32 = arith.constant 0 : i32
    %c0_i32_0 = arith.constant 0 : i32
    %c0_i32_1 = arith.constant 0 : i32
    return %arg0, %c0_i32, %c0_i32_0 : i32, i32, i32
  }
  func.func @transform_8(%arg0: i32) -> (i32, i32, i32) {
    %c0_i32 = arith.constant 0 : i32
    %c0_i32_0 = arith.constant 0 : i32
    %c0_i32_1 = arith.constant 0 : i32
    return %arg0, %c0_i32, %c0_i32_0 : i32, i32, i32
  }
  func.func @transform_9(%arg0: i32) -> (i32, i32, i32) {
    %c0_i32 = arith.constant 0 : i32
    %c0_i32_0 = arith.constant 0 : i32
    %c0_i32_1 = arith.constant 0 : i32
    return %arg0, %c0_i32, %c0_i32_0 : i32, i32, i32
  }
  func.func @transform_10(%arg0: i32) -> (i32, i32, i32) {
    %c0_i32 = arith.constant 0 : i32
    %c0_i32_0 = arith.constant 0 : i32
    %c0_i32_1 = arith.constant 0 : i32
    return %arg0, %c0_i32, %c0_i32_0 : i32, i32, i32
  }
  func.func @transform_11(%arg0: i32) -> (i32, i32, i32) {
    %c0_i32 = arith.constant 0 : i32
    %c0_i32_0 = arith.constant 0 : i32
    %c0_i32_1 = arith.constant 0 : i32
    return %arg0, %c0_i32, %c0_i32_0 : i32, i32, i32
  }
  func.func @transform_12(%arg0: i32) -> (i32, i32, i32) {
    %c0_i32 = arith.constant 0 : i32
    %c0_i32_0 = arith.constant 0 : i32
    %c0_i32_1 = arith.constant 0 : i32
    return %arg0, %c0_i32, %c0_i32_0 : i32, i32, i32
  }
  func.func @transform_13(%arg0: i32) -> (i32, i32, i32) {
    %c0_i32 = arith.constant 0 : i32
    %c0_i32_0 = arith.constant 0 : i32
    %c0_i32_1 = arith.constant 0 : i32
    return %arg0, %c0_i32, %c0_i32_0 : i32, i32, i32
  }
  func.func @transform_14(%arg0: i32) -> (i32, i32, i32) {
    %c0_i32 = arith.constant 0 : i32
    %c0_i32_0 = arith.constant 0 : i32
    %c0_i32_1 = arith.constant 0 : i32
    return %arg0, %c0_i32, %c0_i32_0 : i32, i32, i32
  }
  func.func @transform_15(%arg0: i32) -> (i32, i32, i32) {
    %c0_i32 = arith.constant 0 : i32
    %c0_i32_0 = arith.constant 0 : i32
    %c0_i32_1 = arith.constant 0 : i32
    return %arg0, %c0_i32, %c0_i32_0 : i32, i32, i32
  }
  func.func @transform_16(%arg0: i32) -> (i32, i32, i32) {
    %c0_i32 = arith.constant 0 : i32
    %c0_i32_0 = arith.constant 0 : i32
    %c0_i32_1 = arith.constant 0 : i32
    return %arg0, %c0_i32, %c0_i32_0 : i32, i32, i32
  }
  func.func @transform_17(%arg0: i32) -> (i32, i32, i32) {
    %c0_i32 = arith.constant 0 : i32
    %c0_i32_0 = arith.constant 0 : i32
    %c0_i32_1 = arith.constant 0 : i32
    return %arg0, %c0_i32, %c0_i32_0 : i32, i32, i32
  }
  func.func @transform_18(%arg0: i32) -> (i32, i32, i32) {
    %c0_i32 = arith.constant 0 : i32
    %c0_i32_0 = arith.constant 0 : i32
    %c0_i32_1 = arith.constant 0 : i32
    return %arg0, %c0_i32, %c0_i32_0 : i32, i32, i32
  }
  func.func @transform_19(%arg0: i32) -> (i32, i32, i32) {
    %c0_i32 = arith.constant 0 : i32
    %c0_i32_0 = arith.constant 0 : i32
    %c0_i32_1 = arith.constant 0 : i32
    return %arg0, %c0_i32, %c0_i32_0 : i32, i32, i32
  }
  func.func @transform_20(%arg0: i32) -> (i32, i32, i32) {
    %c0_i32 = arith.constant 0 : i32
    %c0_i32_0 = arith.constant 0 : i32
    %c0_i32_1 = arith.constant 0 : i32
    return %arg0, %c0_i32, %c0_i32_0 : i32, i32, i32
  }
  func.func @transform_21(%arg0: i32) -> (i32, i32, i32) {
    %c0_i32 = arith.constant 0 : i32
    %c0_i32_0 = arith.constant 0 : i32
    %c0_i32_1 = arith.constant 0 : i32
    return %arg0, %c0_i32, %c0_i32_0 : i32, i32, i32
  }
  func.func @transform_22(%arg0: i32) -> (i32, i32, i32) {
    %c0_i32 = arith.constant 0 : i32
    %c0_i32_0 = arith.constant 0 : i32
    %c0_i32_1 = arith.constant 0 : i32
    return %arg0, %c0_i32, %c0_i32_0 : i32, i32, i32
  }
  func.func @transform_23(%arg0: i32) -> (i32, i32) {
    %c0_i32 = arith.constant 0 : i32
    %c0_i32_0 = arith.constant 0 : i32
    %c0_i32_1 = arith.constant 0 : i32
    return %c0_i32, %c0_i32_0 : i32, i32
  }
  func.func @transform_24(%arg0: i32) -> (i32, i32) {
    %c0_i32 = arith.constant 0 : i32
    %c0_i32_0 = arith.constant 0 : i32
    %c0_i32_1 = arith.constant 0 : i32
    return %c0_i32, %c0_i32_0 : i32, i32
  }
  func.func @transform_25(%arg0: i32) -> (i32, i32) {
    %c0_i32 = arith.constant 0 : i32
    %c0_i32_0 = arith.constant 0 : i32
    %c0_i32_1 = arith.constant 0 : i32
    return %c0_i32, %c0_i32_0 : i32, i32
  }
}

</mosaic_0001>

<bundles_post_ra>
// kernel: translation_model_forward.2
= control target key start
LH: loop header
LB: loop body
LE: loop exit
PB: predicated region body
PF: predicated region fallthrough
CT: control target
= control target key end

     0   :  { %s4922_s0 = inlined_call_operand.vmem [shape: f32[16,32], index: 0, kind: input, shape index: {}]   ;;  %s4923_s1 = inlined_call_operand.vmem [shape: f32[16,8,8], index: 1, kind: input, shape index: {}]   ;;  %s4924_s2 = inlined_call_operand.vmem [shape: bf16[6,32,96], index: 2, kind: input, shape index: {}]   ;;  %s4925_s3 = inlined_call_operand.vmem [shape: f32[6,1,96], index: 3, kind: input, shape index: {}]   ;;  %s4926_s4 = inlined_call_operand.vmem [shape: bf16[6,32,32], index: 4, kind: input, shape index: {}]   ;;  %s4927_s5 = inlined_call_operand.vmem [shape: f32[6,1,32], index: 5, kind: input, shape index: {}]   ;;  %s4928_s6 = inlined_call_operand.vmem [shape: f32[6,1,32], index: 6, kind: input, shape index: {}]   ;;  %s4929_s7 = inlined_call_operand.vmem [shape: f32[6,1,32], index: 7, kind: input, shape index: {}]   ;;  %s4930_s8 = inlined_call_operand.hbm [shape: bf16[6,32,2048], index: 8, kind: input, shape index: {}]   ;;  %s4931_s9 = inlined_call_operand.vmem [shape: f32[6,1,2048], index: 9, kind: input, shape index: {}]   ;;  %s4932_s10 = inlined_call_operand.hbm [shape: bf16[6,32,2048], index: 10, kind: input, shape index: {}]   ;;  %s4933_s11 = inlined_call_operand.vmem [shape: f32[6,1,32], index: 11, kind: input, shape index: {}]   ;;  %s4934_s12 = inlined_call_operand.vmem [shape: f32[6,1,32], index: 12, kind: input, shape index: {}]   ;;  %s4935_s13 = inlined_call_operand.vmem [shape: f32[6,1,32], index: 13, kind: input, shape index: {}]   ;;  %s4936_s14 = inlined_call_operand.vmem [shape: f32[1,32], index: 14, kind: input, shape index: {}]   ;;  %s4937_s15 = inlined_call_operand.vmem [shape: f32[1,32], index: 15, kind: input, shape index: {}]   ;;  %s4938_s16 = inlined_call_operand.vmem [shape: f32[16,32], index: 16, kind: output, shape index: {}]  }
   0x1   :  { %4947 = sst [smem:[#allocation12_spill]] %s4922_s0 }
   0x2   :  { %4948 = sst [smem:[#allocation13_spill]] %s4923_s1 }
   0x3   :  { %4949 = sst [smem:[#allocation14_spill]] %s4924_s2 }
   0x4   :  { %4950 = sst [smem:[#allocation15_spill]] %s4925_s3 }
   0x5   :  { %4951 = sst [smem:[#allocation16_spill]] %s4926_s4 }
   0x6   :  { %4952 = sst [smem:[#allocation17_spill]] %s4930_s8 }
   0x7   :  { %4953 = sst [smem:[#allocation18_spill]] %s4932_s10 }
   0x8   :  { %4954 = sst [smem:[#allocation19_spill]] %s4934_s12 }
   0x9   :  { %4955 = sst [smem:[#allocation20_spill]] %s4935_s13 }
   0xa   :  { %4956 = sst [smem:[#allocation21_spill]] %s4936_s14 }
   0xb   :  { %4957 = sst [smem:[#allocation22_spill]] %s4937_s15 }
   0xc   :  { %4958 = sst [smem:[#allocation23_spill]] %s4938_s16 }
   0xd   :  { %21 = vsyncpa [#allocation4], 0 }
   0xe   :  { %23 = vsyncpa [#allocation4 + $0x1], 0 }
   0xf   :  { %24 = vsyncpa [#allocation6], 0 }
  0x10   :  { %26 = vsyncpa [#allocation6 + $0x1], 0  ;;  %s4112_s21 = smov 0   ;;  %s4114_s22 = smov 0  }
  0x11   :  { %s4116_s23 = smov 0   ;;  %s4118_s24 = smov 0  }
  0x12 LB: > { %4959 = sst [smem:[#allocation9_spill]] %s4002_s23  ;;  %s4131_s25 = sadd.s32 4294967295, %s4006_s24   ;;  %s4006_s24 = sphi %s4118_s24, %s4985_s24   ;;  %s4002_s23 = sphi %s4116_s23, %s4987_s23   ;;  %s3998_s22 = sphi %s4114_s22, %s4989_s22   ;;  %s3994_s21 = sphi %s4112_s21, %s4988_s21  }
  0x13   : > { %s4134_s26 = sadd.s32 1, %s4006_s24   ;;  %s237_s28 = sadd.s32 1, %s4002_s23 }
  0x14   : > { %4960 = sst [smem:[#allocation10_spill]] %s4134_s26  ;;  %s234_s27 = ssub.s32 %s4006_s24, %s4134_s26 }
  0x15   : > { %p235_p0 = scmp.eq.s32.totalorder %s234_s27, 0  ;;  %p244_p1 = scmp.ne.s32.totalorder %s4002_s23, %s3998_s22 }
  0x16   : > { %p245_p2 = scmp.eq.s32.totalorder %s4006_s24, 0  ;;  %p250_p3 = scmp.ne.s32.totalorder %s3998_s22, %s3994_s21 }
  0x17   : > { %s4144_s29 = scalar_select %p235_p0, %s4002_s23, %s237_s28  }
  0x18   : > { %p4146_p4 = por %p245_p2, %p244_p1  ;;  %p251_p5 = scmp.eq.s32.totalorder %s4131_s25, 0 }
  0x19   : > { %4961 = sst [smem:[#allocation11_spill]] %s4144_s29  ;;  %p3692_p6 = scmp.lt.s32.totalorder %s4006_s24, 6 }
  0x1a   : > { %p4152_p7 = por %p251_p5, %p250_p3  ;;  %s4157_s17 = sand.u32 1, %s4002_s23  }
  0x1b   : > { %s4944_s18 = sshll.u32 %s4157_s17, 8  ;;  %s4945_s19 = sshll.u32 %s4006_s24, 8 }
  0x1c   : > { %s4964_s8 = sld [smem:[#allocation17_spill]]  ;;  %s523_s28 = scalar_lea.vmem [#allocation3], %s4944_s18 }
  0x1d   : > { %s531_s29 = sshll.u32 %s523_s28, 4  ;;  %p4170_p8 = pnand %p3692_p6, %p4146_p4  ;;  %s532_s29 = int_to_ptr.vmem [resolvable:$true] %s531_s29 }
  0x1e   : > { %p3259_p9 = scmp.ge.s32.totalorder %s4006_s24, 1  ;;  %s520_s16 = scalar_lea.sflag [#allocation4], %s4157_s17 }
  0x1f   : > { %p3912_p11 = pneg %p4170_p8 }
  0x22   : > { %s528_s27 = scalar_lea.hbm %s4964_s8, %s4945_s19  ;;  %s3915_s21 = scalar_lea.hbm %s4964_s8, 1536 }
  0x23   : > { %s529_s26 = sshll.u32 %s528_s27, 4  ;;  %s530_s26 = int_to_ptr.hbm [resolvable:$true] %s529_s26 }
  0x24   : > { %s3908_s15 = sshra.s32 %s530_s26, 4  ;;  %s3909_s15 = int_to_ptr.hbm [resolvable:$true] %s3908_s15 }
  0x25   : > { %s3910_s14 = scalar_lea.hbm %s3909_s15, 256  ;;  %p3916_p0 = scmp.lt.s32.totalorder %s3909_s15, %s4964_s8 }
  0x26   : > { %p3911_p10 = scmp.ne.s32.totalorder %s3909_s15, %s3910_s14  ;;  %p3917_p1 = scmp.lt.s32.totalorder %s3915_s21, %s3910_s14 }
  0x28   : > { %p3913_p12 = pnand %p3912_p11, %p3911_p10  ;;  %p3918_p2 = por %p3917_p1, %p3916_p0 }
  0x2a   : > { %p3914_p13 = pneg %p3913_p12 }
  0x2c   : > { %p3919_p3 = pnand %p3918_p2, %p3914_p13 }
  0x2e   : > { %3922 = shalt.err (!%p3919_p3)
}
  0x2f   : > { %s4008_s18 = smov 1024   ;;  %s4009_s19 = smov 64  }
  0x30   : > { %3688 = dma.hbm_to_vmem [thread:$0]  (!%p4170_p8), %s530_s26, 4096, %s532_s29, %s520_s16, %s4008_s18, %s4008_s18, %s4009_s19  }
  0x31   : > { %p586_p4 = scmp.lt.s32.totalorder %s4006_s24, 7  ;;  %s4966_s20 = sshll.u32 %s4006_s24, 8 }
  0x32   : > { %s4967_s10 = sld [smem:[#allocation18_spill]]  ;;  %s4969_s28 = sshll.u32 %s4157_s17, 8 }
  0x33   : > { %p4197_p5 = pnand %p3259_p9, %p586_p4  ;;  %s552_s8 = scalar_lea.vmem [#allocation5], %s4969_s28 }
  0x34   : > { %s560_s1 = sshll.u32 %s552_s8, 4  ;;  %s549_s13 = scalar_lea.sflag [#allocation6], %s4157_s17  ;;  %s561_s1 = int_to_ptr.vmem [resolvable:$true] %s560_s1 }
  0x38   : > { %s557_s14 = scalar_lea.hbm %s4967_s10, %s4966_s20  ;;  %s3945_s29 = scalar_lea.hbm %s4967_s10, 1536 }
  0x39   : > { %s558_s21 = sshll.u32 %s557_s14, 4  ;;  %s559_s21 = int_to_ptr.hbm [resolvable:$true] %s558_s21 }
  0x3a   : > { %s3938_s12 = sshra.s32 %s559_s21, 4  ;;  %s3939_s12 = int_to_ptr.hbm [resolvable:$true] %s3938_s12 }
  0x3b   : > { %s3940_s16 = scalar_lea.hbm %s3939_s12, 256  ;;  %p3946_p9 = scmp.lt.s32.totalorder %s3939_s12, %s4967_s10 }
  0x3c   : > { %p3941_p6 = scmp.ne.s32.totalorder %s3939_s12, %s3940_s16  ;;  %p3947_p13 = scmp.lt.s32.totalorder %s3945_s29, %s3940_s16 }
  0x3e   : > { %p3943_p10 = pnand %p3941_p6, %p3912_p11  ;;  %p3948_p0 = por %p3947_p13, %p3946_p9 }
  0x40   : > { %p3944_p12 = pneg %p3943_p10 }
  0x42   : > { %p3949_p1 = pnand %p3948_p0, %p3944_p12 }
  0x44   : > { %3952 = shalt.err (!%p3949_p1)
}
  0x45   : > { %3691 = dma.hbm_to_vmem [thread:$0]  (!%p4170_p8), %s559_s21, 4096, %s561_s1, %s549_s13, %s4008_s18, %s4008_s18, %s4009_s19  }
  0x46   : > { %590 = sbr.rel (%p4197_p5) target bundleno = 2503 (0x9c7), region = 84  ;;  %s592_s8 = sand.u32 (!%p4197_p5), 1, %s3998_s22  }
  0x47   : > { %s3260_s17 = sshll.u32 (!%p4197_p5), %s592_s8, 8  ;;  %s593_s27 = scalar_lea.sflag (!%p4197_p5), [#allocation4], %s592_s8 }
  0x48   : > { %s4218_s14 = scalar_lea.vmem (!%p4197_p5), [#allocation3], %s3260_s17 }
  0x4b   : > { %3985 = dma.done.wait (%p4152_p7), %s593_s27, 4096  }
  0x4c   : > { %3987 = vsyncadd (%p4152_p7), %s593_s27, 4294963200  ;;  %s603_s12 = scalar_lea.sflag [#allocation6], %s592_s8  ;;  %s4224_s28 = scalar_lea.vmem [#allocation5], %s3260_s17 }
  0x4d   : > { %3989 = dma.done.wait (%p4152_p7), %s603_s12, 4096  }
  0x4e   : > { %3991 = vsyncadd (%p4152_p7), %s603_s12, 4294963200  ;;  %p691_p8 = scmp.lt.s32.totalorder %s4131_s25, 5  ;;  %s4970_s3 = sld [smem:[#allocation15_spill]] }
  0x4f   : > { %s4971_s2 = sld [smem:[#allocation14_spill]]  ;;  %p3267_p7 = scmp.ne.s32.totalorder %s4131_s25, 0 }
  0x50   : > { %s4232_s1 = scalar_select %p691_p8, %s4131_s25, 5 }
  0x51   : > { %s4972_s4 = sld [smem:[#allocation16_spill]] }
  0x52   : > { %s3611_s13 = sshll.u32 %s4232_s1, 4  ;;  %s712_s18 = scalar_lea.vmem %s4929_s7, %s4232_s1 }
  0x53   : > { %s4262_s15 = scalar_lea.vmem %s4931_s9, %s3611_s13  ;;  %s4973_s20 = sld [smem:[#allocation19_spill]] }
  0x54   : > { %s698_s19 = scalar_lea.vmem %s4970_s3, %s4232_s1  ;;  %s4974_s17 = sld [smem:[#allocation20_spill]] }
  0x55   : > { %s695_s21 = scalar_lea.vmem %s4971_s2, %s3611_s13  ;;  %s719_s2 = scalar_lea.vmem %s4933_s11, %s4232_s1 }
  0x56   : > { %730 = sbr.rel (%p3267_p7) target bundleno = 95 (0x5f), region = 96  ;;  %s4975_s3 = sld [smem:[#allocation12_spill]] (!%p3267_p7) }
  0x57   : > { %s4245_s26 = scalar_lea.vmem %s4972_s4, %s3611_s13 }
  0x59   : > { %s722_s30 = scalar_lea.vmem %s4973_s20, %s4232_s1 }
  0x5a   : > { %s725_s27 = scalar_lea.vmem %s4974_s17, %s4232_s1 }
  0x5b   : > { %vm733_vm0 = vcmask 261120  }
  0x5c   : > { %v731_v0 = vld [vmem:[%s4975_s3] sm:$0xff]  ;;  %v732_v1 = vld [vmem:[%s4975_s3 + $0x8] sm:$0xff] }
  0x5d   : > { %734 = vst.msk [vmem:[#allocation2] sm:$0xff] %vm733_vm0, %v731_v0 }
  0x5e   : > { %735 = vst.msk [vmem:[#allocation2 + $0x8] sm:$0xff] %vm733_vm0, %v732_v1 }
  0x5f PF: > { %v3614_v2 = vld [vmem:[%s695_s21 + $0x8] sm:$0xff]  ;;  %v3613_v3 = vld [vmem:[%s695_s21] sm:$0xff]  ;;  %vm780_vm1 = vcmask 261120   ;;  %s4010_s4 = smov 124   ;;  %s4011_s10 = smov 120   ;;  %vm830_vm2 = vcmask 31744  }
  0x60   : > { %790 = vmatpush.bf16.msra.mxu0 %v3614_v2  ;;  %v3819_v7 = vld [vmem:[%s698_s19] ss:$0 sm:$0xff]  ;;  %s4012_s21 = smov 112   ;;  %s4013_s16 = smov 116   ;;  %vm1277_vm3 = vcmask 64512   ;;  %vm1930_vm4 = vcmask 97280  }
  0x61   : > { %s4014_s24 = smov 104   ;;  %s4015_s19 = smov 108   ;;  %vm1933_vm5 = vcmask 130048   ;;  %vm1936_vm6 = vcmask 162816   ;;  %vm1939_vm7 = vcmask 195584   ;;  %vm1942_vm8 = vcmask 228352  }
  0x62   : > { %s4016_s29 = smov 100   ;;  %s4017_s20 = smov 96  }
  0x63   : > { %s4018_s8 = smov 64   ;;  %s4976_s23 = sld [smem:[#allocation13_spill]] }
  0x64   : > { %v736_v4 = vld [vmem:[#allocation2] sm:$0xff]  ;;  %791 = vmatpush.bf16.msra.mxu0 %v3613_v3  ;;  %s4023_s17 = smov 16   ;;  %s4024_s12 = smov 28  }
  0x65   : > { %v737_v5 = vld [vmem:[#allocation2 + $0x8] sm:$0xff]  ;;  %p3606_p11 = scmp.ne.s32.totalorder %s4131_s25, 5 }
  0x66   : > { %v764_v6 = vpack.c.bf16 %v737_v5, %v736_v4  ;;  %s4984_s0 = sld [smem:[#allocation23_spill]] (!%p3606_p11) }
  0x68   : > { %3276 = vmatmul.msk.bf16.vlgmr.msra.gmra.mxu0 %vm780_vm1, %v764_v6 }
  0x69   : > { %s4977_s13 = smov %s4976_s23  ;;  %v749_v55 = vld [vmem:[%s4976_s23 + $0x8] sm:$0xff]  ;;  %s4025_s23 = smov 24  }
  0x6a   : > { %v748_v58 = vld [vmem:[%s4977_s13] sm:$0xff]  ;;  %v751_v1 = vld [vmem:[%s4977_s13 + $0x18] sm:$0xff]  ;;  %v750_v6 = vld [vmem:[%s4977_s13 + $0x10] sm:$0xff] }
  0xe5   : > { %v793_v8 = vpop.f32.mrf.mxu0 }
  0xe6   : > { %v4284_v9 = vadd.f32 %v3819_v7, %v793_v8 }
  0xe8   : > { %800 = vrot.lane.b32.xlu2 %v4284_v9, %s4010_s4  ;;  %804 = vrot.lane.b32.xlu0 %v4284_v9, %s4011_s10 }
  0xed   : > { %v795_v10 = vpop.f32.mrf.mxu0 }
  0xee   : > { %v796_v11 = vadd.f32 %v3819_v7, %v795_v10 }
  0xf0   : > { %806 = vrot.lane.b32.xlu1 %v796_v11, %s4011_s10  ;;  %812 = vrot.lane.b32.xlu2 %v4284_v9, %s4012_s21 }
  0xf1   : > { %802 = vrot.lane.b32.xlu0 %v796_v11, %s4010_s4  ;;  %s4978_s4 = scalar_lea.vmem %s4927_s5, %s4232_s1 }
  0xf8   : > { %810 = vrot.lane.b32.xlu1 %v796_v11, %s4013_s16  ;;  %820 = vrot.lane.b32.xlu2 %v4284_v9, %s4014_s24 }
  0xf9   : > { %818 = vrot.lane.b32.xlu0 %v796_v11, %s4015_s19 }
 0x100   : > { %808 = vrot.lane.b32.xlu1 %v4284_v9, %s4013_s16  ;;  %816 = vrot.lane.b32.xlu2 %v4284_v9, %s4015_s19  ;;  %s4020_s19 = smov 8   ;;  %s4979_s16 = scalar_lea.vmem %s4928_s6, %s4232_s1 }
 0x101   : > { %826 = vrot.lane.b32.xlu0 %v796_v11, %s4016_s29 }
 0x108   : > { %814 = vrot.lane.b32.xlu1 %v796_v11, %s4012_s21  ;;  %824 = vrot.lane.b32.xlu2 %v4284_v9, %s4016_s29  ;;  %s4021_s29 = smov 12  }
 0x109   : > { %855 = vrot.lane.b32.xlu0 %v796_v11, %s4017_s20 }
 0x110   : > { %822 = vrot.lane.b32.xlu1 %v796_v11, %s4014_s24 }
 0x111   : > { %828 = vrot.lane.b32.xlu0 %v4284_v9, %s4017_s20 }
 0x142   : > { %v801_v13 = vpop.permute.xlu2 %800 }
 0x143   : > { %v3744_v29 = vpack.i.bf16 %v801_v13, %v796_v11 }
 0x14a   : > { %v4302_v16 = vpop.permute.xlu2 %812 }
 0x152   : > { %v4310_v19 = vpop.permute.xlu2 %820 }
 0x15a   : > { %v805_v12 = vpop.permute.xlu0 %804  ;;  %v4322_v22 = vpop.permute.xlu2 %816 }
 0x15b   : > { %933 = vrot.lane.b32.xlu1 %v805_v12, %s4017_s20 }
 0x162   : > { %v4297_v14 = vpop.permute.xlu1 %806  ;;  %v4337_v27 = vpop.permute.xlu2 %824 }
 0x163   : > { %v803_v15 = vpop.permute.xlu0 %802  ;;  %959 = vrot.lane.b32.xlu0 %v4297_v14, %s4017_s20 }
 0x164   : > { %907 = vrot.lane.b32.xlu2 %v803_v15, %s4017_s20  ;;  %v3749_v25 = vpack.i.bf16 %v803_v15, %v4284_v9 }
 0x16a   : > { %v811_v17 = vpop.permute.xlu1 %810 }
 0x16b   : > { %v4304_v18 = vpop.permute.xlu0 %818  ;;  %1037 = vrot.lane.b32.xlu0 %v4302_v16, %s4017_s20  ;;  %1011 = vrot.lane.b32.xlu1 %v811_v17, %s4017_s20  ;;  %v3754_v30 = vpack.i.bf16 %v811_v17, %v805_v12 }
 0x16c   : > { %881 = vrot.lane.b32.xlu2 %v801_v13, %s4017_s20 }
 0x172   : > { %v4312_v20 = vpop.permute.xlu1 %808 }
 0x173   : > { %v4314_v21 = vpop.permute.xlu0 %826  ;;  %1141 = vrot.lane.b32.xlu0 %v4310_v19, %s4017_s20  ;;  %1115 = vrot.lane.b32.xlu1 %v4304_v18, %s4017_s20 }
 0x174   : > { %985 = vrot.lane.b32.xlu2 %v4312_v20, %s4017_s20 }
 0x17a   : > { %v4324_v23 = vpop.permute.xlu1 %814 }
 0x17b   : > { %v856_v24 = vpop.permute.xlu0 %855  ;;  %1089 = vrot.lane.b32.xlu0 %v4322_v22, %s4017_s20  ;;  %1219 = vrot.lane.b32.xlu1 %v4314_v21, %s4017_s20 }
 0x17c   : > { %1063 = vrot.lane.b32.xlu2 %v4324_v23, %s4017_s20  ;;  %3279 = vmatpush.xpose.msk.msra.mxu2 %vm830_vm2, %v856_v24 }
 0x17f   : > { %3280 = vmatmul.msk.f32.vlgmr.msra.gmra.mxu2 %vm830_vm2, %v796_v11  ;;  %v752_v11 = vld [vmem:[%s4977_s13 + $0x20] sm:$0xff] }
 0x182   : > { %v4335_v26 = vpop.permute.xlu1 %822 }
 0x183   : > { %v829_v28 = vpop.permute.xlu0 %828  ;;  %3750 = vrot.lane.b32.xlu0 %v3749_v25, %s4018_s8  ;;  %1167 = vrot.lane.b32.xlu1 %v4335_v26, %s4017_s20  ;;  %v757_v25 = vld [vmem:[%s4977_s13 + $0x48] sm:$0xff] }
 0x184   : > { %1193 = vrot.lane.b32.xlu2 %v4337_v27, %s4017_s20  ;;  %3277 = vmatpush.xpose.msk.msra.mxu1 %vm830_vm2, %v829_v28  ;;  %s4022_s20 = smov 20  }
 0x187   : > { %3278 = vmatmul.msk.f32.vlgmr.msra.gmra.mxu1 %vm830_vm2, %v4284_v9 }
 0x18b   : > { %3745 = vrot.lane.b32.xlu1 %v3744_v29, %s4018_s8  ;;  %v753_v29 = vld [vmem:[%s4977_s13 + $0x28] sm:$0xff] }
 0x18c   : > { %3755 = vrot.lane.b32.xlu2 %v3754_v30, %s4018_s8 }
 0x1be   : > { %v908_v31 = vpop.permute.xlu2 %907 }
 0x1bf   : > { %3283 = vmatpush.xpose.msk.msrb.mxu1 %vm830_vm2, %v908_v31 }
 0x1c2   : > { %3284 = vmatmul.msk.f32.vlgmr.msrb.gmra.mxu1 %vm830_vm2, %v803_v15 }
 0x1c6   : > { %v882_v32 = vpop.permute.xlu2 %881 }
 0x1c7   : > { %3281 = vmatpush.xpose.msk.msrb.mxu0 %vm830_vm2, %v882_v32 }
 0x1ca   : > { %3282 = vmatmul.msk.f32.vlgmr.msrb.gmra.mxu0 %vm830_vm2, %v801_v13 }
 0x1cd   : > { %v934_v33 = vpop.permute.xlu1 %933 }
 0x1ce   : > { %v986_v34 = vpop.permute.xlu2 %985  ;;  %3285 = vmatpush.xpose.msk.msrb.mxu2 %vm830_vm2, %v934_v33 }
 0x1cf   : > { %3289 = vmatpush.xpose.msk.msra.mxu1 %vm830_vm2, %v986_v34 }
 0x1d1   : > { %3286 = vmatmul.msk.f32.vlgmr.msrb.gmra.mxu2 %vm830_vm2, %v805_v12 }
 0x1d2   : > { %3290 = vmatmul.msk.f32.vlgmr.msra.gmra.mxu1 %vm830_vm2, %v4312_v20 }
 0x1d5   : > { %v960_v35 = vpop.permute.xlu0 %959 }
 0x1d6   : > { %v1064_v36 = vpop.permute.xlu2 %1063  ;;  %3287 = vmatpush.xpose.msk.msra.mxu3 %vm830_vm2, %v960_v35 }
 0x1d7   : > { %3295 = vmatpush.xpose.msk.msra.mxu0 %vm830_vm2, %v1064_v36  ;;  %v755_v36 = vld [vmem:[%s4977_s13 + $0x38] sm:$0xff] }
 0x1d9   : > { %3288 = vmatmul.msk.f32.vlgmr.msra.gmra.mxu3 %vm830_vm2, %v4297_v14 }
 0x1da   : > { %3296 = vmatmul.msk.f32.vlgmr.msra.gmra.mxu0 %vm830_vm2, %v4324_v23 }
 0x1dd   : > { %v1012_v37 = vpop.permute.xlu1 %1011  ;;  %v1038_v38 = vpop.permute.xlu0 %1037 }
 0x1de   : > { %3291 = vmatpush.xpose.msk.msra.mxu2 %vm830_vm2, %v1012_v37  ;;  %3293 = vmatpush.xpose.msk.msrb.mxu3 %vm830_vm2, %v1038_v38  ;;  %v1194_v41 = vpop.permute.xlu2 %1193 }
 0x1e1   : > { %3292 = vmatmul.msk.f32.vlgmr.msra.gmra.mxu2 %vm830_vm2, %v811_v17  ;;  %3294 = vmatmul.msk.f32.vlgmr.msrb.gmra.mxu3 %vm830_vm2, %v4302_v16 }
 0x1e5   : > { %v1116_v39 = vpop.permute.xlu1 %1115  ;;  %v1142_v40 = vpop.permute.xlu0 %1141 }
 0x1e6   : > { %3299 = vmatpush.xpose.msk.msrb.mxu2 %vm830_vm2, %v1116_v39  ;;  %3301 = vmatpush.xpose.msk.msra.mxu3 %vm830_vm2, %v1142_v40  ;;  %v3756_v44 = vpop.permute.xlu2 %3755 }
 0x1e7   : > { %v3758_v49 = vunpack.i.h.bf16 %v3756_v44  ;;  %v3757_v50 = vunpack.i.l.bf16 %v3756_v44 }
 0x1e9   : > { %3300 = vmatmul.msk.f32.vlgmr.msrb.gmra.mxu2 %vm830_vm2, %v4304_v18  ;;  %3302 = vmatmul.msk.f32.vlgmr.msra.gmra.mxu3 %vm830_vm2, %v4310_v19 }
 0x1ed   : > { %v1220_v42 = vpop.permute.xlu1 %1219  ;;  %v1090_v43 = vpop.permute.xlu0 %1089 }
 0x1ee   : > { %3297 = vmatpush.xpose.msk.msrb.mxu1 %vm830_vm2, %v1090_v43  ;;  %3307 = vmatpush.xpose.msk.msra.mxu2 %vm830_vm2, %v1220_v42 }
 0x1f1   : > { %3298 = vmatmul.msk.f32.vlgmr.msrb.gmra.mxu1 %vm830_vm2, %v4322_v22  ;;  %3308 = vmatmul.msk.f32.vlgmr.msra.gmra.mxu2 %vm830_vm2, %v4314_v21 }
 0x1f2   : > { %3305 = vmatpush.xpose.msk.msra.mxu1 %vm830_vm2, %v1194_v41  ;;  %v759_v41 = vld [vmem:[%s4977_s13 + $0x58] sm:$0xff] }
 0x1f5   : > { %v1168_v45 = vpop.permute.xlu1 %1167  ;;  %v3751_v46 = vpop.permute.xlu0 %3750 }
 0x1f6   : > { %v3753_v47 = vunpack.i.h.bf16 %v3751_v46  ;;  %v3752_v48 = vunpack.i.l.bf16 %v3751_v46  ;;  %3303 = vmatpush.xpose.msk.msrb.mxu0 %vm830_vm2, %v1168_v45  ;;  %v761_v46 = vld [vmem:[%s4977_s13 + $0x68] sm:$0xff] }
 0x1f8   : > { %1475 = vmatpush.msrb.mxu3 %v3752_v48  ;;  %1553 = vmatpush.msrb.mxu2 %v3753_v47 }
 0x1f9   : > { %3304 = vmatmul.msk.f32.vlgmr.msrb.gmra.mxu0 %vm830_vm2, %v4335_v26  ;;  %3306 = vmatmul.msk.f32.vlgmr.msra.gmra.mxu1 %vm830_vm2, %v4337_v27 }
 0x1fa   : > { %1579 = vmatpush.msra.mxu3 %v3757_v50  ;;  %1657 = vmatpush.msra.mxu2 %v3758_v49 }
 0x1fd   : > { %v3746_v51 = vpop.permute.xlu1 %3745 }
 0x1fe   : > { %v3748_v52 = vunpack.i.h.bf16 %v3746_v51  ;;  %v3747_v53 = vunpack.i.l.bf16 %v3746_v51 }
 0x200   : > { %1501 = vmatpush.msra.mxu0 %v3747_v53  ;;  %1527 = vmatpush.msrb.mxu1 %v3748_v52 }
 0x202   : > { %v878_v54 = vpop.f32.mrf.mxu2 }
 0x203   : > { %v1246_v56 = vmul.f32 0.5, %v878_v54 }
 0x204   : > { %v852_v57 = vpop.f32.mrf.mxu1 }
 0x205   : > { %v1245_v59 = vmul.f32 0.5, %v852_v57  ;;  %v1262_v60 = vadd.f32 %v1246_v56, %v749_v55  ;;  %v756_v55 = vld [vmem:[%s4977_s13 + $0x40] sm:$0xff] }
 0x207   : > { %v1281_v61 = vsel %vm1277_vm3, %v1262_v60, -inf  ;;  %v4394_v62 = vadd.f32 %v1245_v59, %v748_v58 }
 0x208   : > { %1282 = vmax.xlane.f32.xlu2 %v1281_v61 }
 0x209   : > { %v1278_v63 = vsel %vm1277_vm3, %v4394_v62, -inf }
 0x20a   : > { %1279 = vmax.xlane.f32.xlu0 %v1278_v63 }
 0x23f   : > { %v930_v0 = vpop.f32.mrf.mxu1 }
 0x240   : > { %v1248_v2 = vmul.f32 0.5, %v930_v0 }
 0x242   : > { %v4401_v3 = vadd.f32 %v1248_v2, %v751_v1  ;;  %v758_v2 = vld [vmem:[%s4977_s13 + $0x50] sm:$0xff] }
 0x244   : > { %v1287_v4 = vsel %vm1277_vm3, %v4401_v3, -inf }
 0x245   : > { %1288 = vmax.xlane.f32.xlu1 %v1287_v4 }
 0x247   : > { %v904_v5 = vpop.f32.mrf.mxu0 }
 0x248   : > { %v1247_v7 = vmul.f32 0.5, %v904_v5 }
 0x24a   : > { %v4408_v8 = vadd.f32 %v1247_v7, %v750_v6 }
 0x24c   : > { %v1284_v9 = vsel %vm1277_vm3, %v4408_v8, -inf }
 0x24d   : > { %1285 = vmax.xlane.f32.xlu2 %v1284_v9  ;;  %v760_v9 = vld [vmem:[%s4977_s13 + $0x60] sm:$0xff] }
 0x24f   : > { %v1008_v48 = vpop.f32.mrf.mxu1 }
 0x254   : > { %v956_v10 = vpop.f32.mrf.mxu2 }
 0x255   : > { %v1249_v12 = vmul.f32 0.5, %v956_v10  ;;  %v1251_v10 = vmul.f32 0.5, %v1008_v48 }
 0x257   : > { %v1086_v13 = vpop.f32.mrf.mxu0  ;;  %v4415_v15 = vadd.f32 %v1249_v12, %v752_v11  ;;  %v754_v12 = vld [vmem:[%s4977_s13 + $0x30] sm:$0xff] }
 0x258   : > { %v1254_v17 = vmul.f32 0.5, %v1086_v13 }
 0x259   : > { %v1290_v24 = vsel %vm1277_vm3, %v4415_v15, -inf }
 0x25a   : > { %1291 = vmax.xlane.f32.xlu0 %v1290_v24  ;;  %v4425_v31 = vadd.f32 %v1254_v17, %v757_v25  ;;  %v4485_v25 = vadd.f32 %v1251_v10, %v754_v12 }
 0x25c   : > { %v982_v28 = vpop.f32.mrf.mxu3  ;;  %v1305_v33 = vsel %vm1277_vm3, %v4425_v31, -inf }
 0x25d   : > { %v1250_v30 = vmul.f32 0.5, %v982_v28 }
 0x25f   : > { %v4427_v32 = vadd.f32 %v1250_v30, %v753_v29 }
 0x261   : > { %v1293_v34 = vsel %vm1277_vm3, %v4427_v32, -inf }
 0x262   : > { %1306 = vmax.xlane.f32.xlu0 %v1305_v33  ;;  %1294 = vmax.xlane.f32.xlu2 %v1293_v34  ;;  %v762_v33 = vld [vmem:[%s4977_s13 + $0x70] sm:$0xff] }
 0x264   : > { %v1034_v35 = vpop.f32.mrf.mxu2  ;;  %v1060_v49 = vpop.f32.mrf.mxu3 }
 0x265   : > { %v1252_v37 = vmul.f32 0.5, %v1034_v35  ;;  %v1253_v51 = vmul.f32 0.5, %v1060_v49  ;;  %v1296_v35 = vsel %vm1277_vm3, %v4485_v25, -inf }
 0x267   : > { %v4436_v38 = vadd.f32 %v1252_v37, %v755_v36  ;;  %v4458_v59 = vadd.f32 %v1253_v51, %v756_v55  ;;  %v763_v36 = vld [vmem:[%s4977_s13 + $0x78] sm:$0xff] }
 0x269   : > { %v1299_v39 = vsel %vm1277_vm3, %v4436_v38, -inf  ;;  %v1302_v1 = vsel %vm1277_vm3, %v4458_v59, -inf }
 0x26a   : > { %1300 = vmax.xlane.f32.xlu1 %v1299_v39 }
 0x26c   : > { %v1138_v40 = vpop.f32.mrf.mxu2 }
 0x26d   : > { %v1256_v42 = vmul.f32 0.5, %v1138_v40 }
 0x26e   : > { %v1112_v61 = vpop.f32.mrf.mxu1 }
 0x26f   : > { %v4443_v43 = vadd.f32 %v1256_v42, %v759_v41  ;;  %v1255_v0 = vmul.f32 0.5, %v1112_v61 }
 0x271   : > { %v1311_v44 = vsel %vm1277_vm3, %v4443_v43, -inf  ;;  %v4469_v6 = vadd.f32 %v1255_v0, %v758_v2 }
 0x272   : > { %1312 = vmax.xlane.f32.xlu2 %v1311_v44 }
 0x273   : > { %v1308_v13 = vsel %vm1277_vm3, %v4469_v6, -inf }
 0x274   : > { %v1242_v28 = vpop.f32.mrf.mxu2 }
 0x275   : > { %v1260_v34 = vmul.f32 0.5, %v1242_v28 }
 0x276   : > { %v1190_v45 = vpop.f32.mrf.mxu0  ;;  %v1216_v24 = vpop.f32.mrf.mxu1 }
 0x277   : > { %v1258_v47 = vmul.f32 0.5, %v1190_v45  ;;  %v1259_v29 = vmul.f32 0.5, %v1216_v24  ;;  %v4499_v39 = vadd.f32 %v1260_v34, %v763_v36 }
 0x279   : > { %v4450_v50 = vadd.f32 %v1258_v47, %v761_v46  ;;  %v4497_v37 = vadd.f32 %v1259_v29, %v762_v33  ;;  %v1323_v41 = vsel %vm1277_vm3, %v4499_v39, -inf }
 0x27b   : > { %v1283_v52 = vpop.xlane.xlu2 %1282  ;;  %v1317_v53 = vsel %vm1277_vm3, %v4450_v50, -inf  ;;  %v1320_v40 = vsel %vm1277_vm3, %v4497_v37, -inf }
 0x27c   : > { %v1327_v54 = vsub.f32 %v1262_v60, %v1283_v52  ;;  %1318 = vmax.xlane.f32.xlu1 %v1317_v53  ;;  %v1164_v60 = vpop.f32.mrf.mxu3 }
 0x27d   : > { %v1280_v56 = vpop.xlane.xlu0 %1279  ;;  %v1257_v5 = vmul.f32 0.5, %v1164_v60 }
 0x27e   : > { %v1344_v57 = vmul.f32 1.442695, %v1327_v54  ;;  %v1326_v58 = vsub.f32 %v4394_v62, %v1280_v56 }
 0x27f   : > { %v4483_v17 = vadd.f32 %v1257_v5, %v760_v9 }
 0x280   : > { %3826 = vpow2.f32 %v1344_v57  ;;  %v1342_v63 = vmul.f32 1.442695, %v1326_v58 }
 0x281   : > { %v1314_v30 = vsel %vm1277_vm3, %v4483_v17, -inf }
 0x282   : > { %3828 = vpow2.f32 %v1342_v63 }
 0x284   : > { %1303 = vmax.xlane.f32.xlu1 %v1302_v1 }
 0x286   : > { %v4465_v4 = vpop.eup %3826 }
 0x287   : > { %v1377_v62 = vsel %vm1277_vm3, %v4465_v4, 0.0 }
 0x288   : > { %v4471_v7 = vpop.eup %3828  ;;  %1378 = vadd.xlane.f32.xlu2 %v1377_v62 }
 0x289   : > { %v1374_v11 = vsel %vm1277_vm3, %v4471_v7, 0.0 }
 0x28a   : > { %1375 = vadd.xlane.f32.xlu0 %v1374_v11 }
 0x28c   : > { %1309 = vmax.xlane.f32.xlu1 %v1308_v13 }
 0x290   : > { %1315 = vmax.xlane.f32.xlu2 %v1314_v30 }
 0x292   : > { %1297 = vmax.xlane.f32.xlu0 %v1296_v35 }
 0x298   : > { %1321 = vmax.xlane.f32.xlu2 %v1320_v40 }
 0x29a   : > { %1324 = vmax.xlane.f32.xlu0 %v1323_v41 }
 0x2b8   : > { %v1289_v48 = vpop.xlane.xlu1 %1288 }
 0x2b9   : > { %v1329_v52 = vsub.f32 %v4401_v3, %v1289_v48 }
 0x2bb   : > { %v1348_v54 = vmul.f32 1.442695, %v1329_v52 }
 0x2c0   : > { %v1286_v42 = vpop.xlane.xlu2 %1285 }
 0x2c1   : > { %v1328_v44 = vsub.f32 %v4408_v8, %v1286_v42 }
 0x2c3   : > { %v1346_v45 = vmul.f32 1.442695, %v1328_v44 }
 0x2c5   : > { %3830 = vpow2.f32 %v1346_v45 }
 0x2cb   : > { %v4506_v46 = vpop.eup %3830 }
 0x2cc   : > { %v1380_v47 = vsel %vm1277_vm3, %v4506_v46, 0.0 }
 0x2cd   : > { %1381 = vadd.xlane.f32.xlu0 %v1380_v47  ;;  %v1292_v49 = vpop.xlane.xlu0 %1291 }
 0x2ce   : > { %v1330_v51 = vsub.f32 %v4415_v15, %v1292_v49  ;;  %v3759_v15 = vpack.i.bf16 %v4312_v20, %v4297_v14 }
 0x2d0   : > { %v1350_v53 = vmul.f32 1.442695, %v1330_v51 }
 0x2d2   : > { %3832 = vpow2.f32 %v1350_v53 }
 0x2d3   : > { %3834 = vpow2.f32 %v1348_v54 }
 0x2d5   : > { %v1307_v55 = vpop.xlane.xlu0 %1306  ;;  %v1295_v61 = vpop.xlane.xlu2 %1294 }
 0x2d6   : > { %v1335_v8 = vsub.f32 %v4425_v31, %v1307_v55  ;;  %v1331_v1 = vsub.f32 %v4427_v32, %v1295_v61 }
 0x2d8   : > { %v4512_v56 = vpop.eup %3832  ;;  %v1360_v58 = vmul.f32 1.442695, %v1335_v8  ;;  %v1352_v2 = vmul.f32 1.442695, %v1331_v1 }
 0x2d9   : > { %v1386_v57 = vsel %vm1277_vm3, %v4512_v56, 0.0  ;;  %v4517_v0 = vpop.eup %3834 }
 0x2da   : > { %1387 = vadd.xlane.f32.xlu1 %v1386_v57  ;;  %3836 = vpow2.f32 %v1360_v58  ;;  %v1383_v31 = vsel %vm1277_vm3, %v4517_v0, 0.0 }
 0x2dd   : > { %v1301_v63 = vpop.xlane.xlu1 %1300 }
 0x2de   : > { %v1333_v3 = vsub.f32 %v4436_v38, %v1301_v63 }
 0x2e0   : > { %v1356_v60 = vmul.f32 1.442695, %v1333_v3  ;;  %v4526_v5 = vpop.eup %3836 }
 0x2e1   : > { %3760 = vrot.lane.b32.xlu0 %v3759_v15, %s4018_s8  ;;  %v1401_v20 = vsel %vm1277_vm3, %v4526_v5, 0.0 }
 0x2e2   : > { %3838 = vpow2.f32 %v1356_v60  ;;  %1384 = vadd.xlane.f32.xlu1 %v1383_v31  ;;  %v3764_v60 = vpack.i.bf16 %v4304_v18, %v4302_v16  ;;  %v3779_v16 = vpack.i.bf16 %v4337_v27, %v4335_v26 }
 0x2e3   : > { %3840 = vpow2.f32 %v1352_v2 }
 0x2e5   : > { %v1313_v9 = vpop.xlane.xlu2 %1312 }
 0x2e6   : > { %v1337_v10 = vsub.f32 %v4443_v43, %v1313_v9 }
 0x2e8   : > { %v4528_v62 = vpop.eup %3838  ;;  %v1364_v13 = vmul.f32 1.442695, %v1337_v10 }
 0x2e9   : > { %v1395_v14 = vsel %vm1277_vm3, %v4528_v62, 0.0  ;;  %v4534_v32 = vpop.eup %3840 }
 0x2ea   : > { %1396 = vadd.xlane.f32.xlu2 %v1395_v14  ;;  %1402 = vadd.xlane.f32.xlu1 %v1401_v20  ;;  %v1389_v38 = vsel %vm1277_vm3, %v4534_v32, 0.0 }
 0x2ef   : > { %v1319_v11 = vpop.xlane.xlu1 %1318 }
 0x2f2   : > { %1390 = vadd.xlane.f32.xlu1 %v1389_v38  ;;  %v3769_v38 = vpack.i.bf16 %v4322_v22, %v4324_v23 }
 0x2f7   : > { %v1304_v29 = vpop.xlane.xlu1 %1303 }
 0x2f8   : > { %v1334_v44 = vsub.f32 %v4458_v59, %v1304_v29 }
 0x2fb   : > { %v1379_v12 = vpop.xlane.xlu2 %1378 }
 0x2fc   : > { %3842 = vrcp.f32 %v1379_v12 }
 0x2fd   : > { %v1376_v24 = vpop.xlane.xlu0 %1375 }
 0x2fe   : > { %3844 = vrcp.f32 %v1376_v24 }
 0x2ff   : > { %3846 = vpow2.f32 %v1364_v13 }
 0x302   : > { %v3843_v28 = vpop.eup %3842 }
 0x303   : > { %v1316_v30 = vpop.xlane.xlu2 %1315  ;;  %v1439_v34 = vmul.f32 %v3843_v28, %v4465_v4 }
 0x304   : > { %v3845_v33 = vpop.eup %3844  ;;  %v1338_v35 = vsub.f32 %v4483_v17, %v1316_v30  ;;  %v1310_v17 = vpop.xlane.xlu1 %1309 }
 0x305   : > { %v1438_v36 = vmul.f32 %v3845_v33, %v4471_v7  ;;  %v1298_v40 = vpop.xlane.xlu0 %1297  ;;  %3310 = vmatmul.msk.f32.vlgmr.msra.gmra.mxu0 %vm1277_vm3, %v1439_v34  ;;  %v4544_v42 = vpop.eup %3846  ;;  %v1358_v7 = vmul.f32 1.442695, %v1334_v44  ;;  %v1336_v59 = vsub.f32 %v4469_v6, %v1310_v17 }
 0x306   : > { %v1366_v41 = vmul.f32 1.442695, %v1338_v35  ;;  %v1332_v43 = vsub.f32 %v4485_v25, %v1298_v40  ;;  %v1407_v4 = vsel %vm1277_vm3, %v4544_v42, 0.0 }
 0x307   : > { %3309 = vmatmul.msk.f32.vlgmr.msrb.gmra.mxu3 %vm1277_vm3, %v1438_v36  ;;  %v1362_v54 = vmul.f32 1.442695, %v1336_v59 }
 0x308   : > { %3848 = vpow2.f32 %v1366_v41  ;;  %v1354_v45 = vmul.f32 1.442695, %v1332_v43 }
 0x30a   : > { %3850 = vpow2.f32 %v1354_v45 }
 0x30b   : > { %1408 = vadd.xlane.f32.xlu0 %v1407_v4  ;;  %3852 = vpow2.f32 %v1358_v7  ;;  %v1322_v61 = vpop.xlane.xlu2 %1321 }
 0x30c   : > { %v1340_v3 = vsub.f32 %v4497_v37, %v1322_v61  ;;  %v3774_v37 = vpack.i.bf16 %v4314_v21, %v4310_v19 }
 0x30d   : > { %v1325_v47 = vpop.xlane.xlu0 %1324 }
 0x30e   : > { %v4550_v48 = vpop.eup %3848  ;;  %v1341_v25 = vsub.f32 %v4499_v39, %v1325_v47  ;;  %v1339_v39 = vsub.f32 %v4450_v50, %v1319_v11  ;;  %v1370_v50 = vmul.f32 1.442695, %v1340_v3 }
 0x30f   : > { %v1410_v49 = vsel %vm1277_vm3, %v4550_v48, 0.0 }
 0x310   : > { %v4555_v51 = vpop.eup %3850  ;;  %v1372_v52 = vmul.f32 1.442695, %v1341_v25  ;;  %1411 = vadd.xlane.f32.xlu1 %v1410_v49  ;;  %v1368_v58 = vmul.f32 1.442695, %v1339_v39 }
 0x311   : > { %v1392_v53 = vsel %vm1277_vm3, %v4555_v51, 0.0  ;;  %v4560_v55 = vpop.eup %3852 }
 0x312   : > { %3854 = vpow2.f32 %v1372_v52  ;;  %1393 = vadd.xlane.f32.xlu2 %v1392_v53  ;;  %v1398_v57 = vsel %vm1277_vm3, %v4560_v55, 0.0 }
 0x313   : > { %3856 = vpow2.f32 %v1362_v54 }
 0x314   : > { %3858 = vpow2.f32 %v1368_v58 }
 0x315   : > { %3860 = vpow2.f32 %v1370_v50 }
 0x318   : > { %v4562_v8 = vpop.eup %3854 }
 0x319   : > { %v1419_v6 = vsel %vm1277_vm3, %v4562_v8, 0.0  ;;  %v4569_v63 = vpop.eup %3856 }
 0x31a   : > { %1399 = vadd.xlane.f32.xlu2 %v1398_v57  ;;  %1420 = vadd.xlane.f32.xlu0 %v1419_v6  ;;  %v1404_v15 = vsel %vm1277_vm3, %v4569_v63, 0.0  ;;  %v4574_v1 = vpop.eup %3858 }
 0x31b   : > { %v1413_v31 = vsel %vm1277_vm3, %v4574_v1, 0.0  ;;  %v4581_v2 = vpop.eup %3860 }
 0x31c   : > { %v1416_v14 = vsel %vm1277_vm3, %v4581_v2, 0.0 }
 0x322   : > { %1405 = vadd.xlane.f32.xlu2 %v1404_v15 }
 0x329   : > { %3765 = vrot.lane.b32.xlu1 %v3764_v60, %s4018_s8 }
 0x32a   : > { %1414 = vadd.xlane.f32.xlu2 %v1413_v31 }
 0x331   : > { %3775 = vrot.lane.b32.xlu1 %v3774_v37, %s4018_s8 }
 0x332   : > { %1417 = vadd.xlane.f32.xlu2 %v1416_v14 }
 0x339   : > { %3780 = vrot.lane.b32.xlu1 %v3779_v16, %s4018_s8 }
 0x340   : > { %v1382_v18 = vpop.xlane.xlu0 %1381 }
 0x341   : > { %3862 = vrcp.f32 %v1382_v18 }
 0x347   : > { %v3863_v20 = vpop.eup %3862 }
 0x348   : > { %v1440_v9 = vmul.f32 %v3863_v20, %v4506_v46 }
 0x34a   : > { %3770 = vrot.lane.b32.xlu2 %v3769_v38, %s4018_s8  ;;  %3311 = vmatmul.msk.f32.vlgmr.msrb.gmra.mxu1 %vm1277_vm3, %v1440_v9  ;;  %s4019_s8 = smov 4  }
 0x34d   : > { %v1388_v19 = vpop.xlane.xlu1 %1387 }
 0x34e   : > { %3864 = vrcp.f32 %v1388_v19 }
 0x353   : > { %v3761_v21 = vpop.permute.xlu0 %3760 }
 0x354   : > { %v3865_v10 = vpop.eup %3864  ;;  %v3763_v11 = vunpack.i.h.bf16 %v3761_v21  ;;  %v3762_v26 = vunpack.i.l.bf16 %v3761_v21 }
 0x355   : > { %v1442_v27 = vmul.f32 %v3865_v10, %v4512_v56  ;;  %v1385_v12 = vpop.xlane.xlu1 %1384 }
 0x356   : > { %3866 = vrcp.f32 %v1385_v12  ;;  %1605 = vmatpush.msrb.mxu0 %v3762_v26  ;;  %1631 = vmatpush.msra.mxu1 %v3763_v11 }
 0x357   : > { %3313 = vmatmul.msk.f32.vlgmr.msra.gmra.mxu3 %vm1277_vm3, %v1442_v27 }
 0x35c   : > { %v3867_v22 = vpop.eup %3866 }
 0x35d   : > { %v1441_v23 = vmul.f32 %v3867_v22, %v4517_v0  ;;  %v1397_v46 = vpop.xlane.xlu2 %1396  ;;  %v1403_v13 = vpop.xlane.xlu1 %1402 }
 0x35e   : > { %3868 = vrcp.f32 %v1397_v46 }
 0x35f   : > { %3312 = vmatmul.msk.f32.vlgmr.msrb.gmra.mxu2 %vm1277_vm3, %v1441_v23 }
 0x364   : > { %v3869_v24 = vpop.eup %3868 }
 0x365   : > { %v1445_v28 = vmul.f32 %v3869_v24, %v4528_v62  ;;  %v1391_v29 = vpop.xlane.xlu1 %1390 }
 0x366   : > { %3870 = vrcp.f32 %v1391_v29  ;;  %v3616_v29 = vld [vmem:[%s4245_s26 + $0x8] sm:$0xff] }
 0x367   : > { %3316 = vmatmul.msk.f32.vlgmr.msra.gmra.mxu2 %vm1277_vm3, %v1445_v28 }
 0x36c   : > { %v3871_v56 = vpop.eup %3870 }
 0x36d   : > { %v1443_v30 = vmul.f32 %v3871_v56, %v4534_v32  ;;  %v3615_v56 = vld [vmem:[%s4245_s26] sm:$0xff] }
 0x36f   : > { %3314 = vmatmul.msk.f32.vlgmr.msrb.gmra.mxu0 %vm1277_vm3, %v1443_v30 }
 0x37e   : > { %v1409_v36 = vpop.xlane.xlu0 %1408 }
 0x382   : > { %v1503_v16 = vpop.f32.mrf.mxu0 }
 0x383   : > { %v1412_v62 = vpop.xlane.xlu1 %1411 }
 0x385   : > { %v1394_v33 = vpop.xlane.xlu2 %1393 }
 0x386   : > { %3872 = vrcp.f32 %v1394_v33 }
 0x387   : > { %3874 = vrcp.f32 %v1409_v36 }
 0x38a   : > { %v1477_v18 = vpop.f32.mrf.mxu3 }
 0x38c   : > { %v3873_v0 = vpop.eup %3872 }
 0x38d   : > { %v1444_v34 = vmul.f32 %v3873_v0, %v4555_v51  ;;  %v1400_v35 = vpop.xlane.xlu2 %1399  ;;  %v3875_v41 = vpop.eup %3874 }
 0x38e   : > { %3876 = vrcp.f32 %v1400_v35  ;;  %v1421_v43 = vpop.xlane.xlu0 %1420  ;;  %v1449_v7 = vmul.f32 %v3875_v41, %v4544_v42 }
 0x38f   : > { %3315 = vmatmul.msk.f32.vlgmr.msra.gmra.mxu1 %vm1277_vm3, %v1444_v34  ;;  %3878 = vrcp.f32 %v1412_v62 }
 0x390   : > { %3880 = vrcp.f32 %v1421_v43 }
 0x391   : > { %3882 = vrcp.f32 %v1403_v13 }
 0x394   : > { %v3877_v44 = vpop.eup %3876 }
 0x395   : > { %v1406_v40 = vpop.xlane.xlu2 %1405  ;;  %v1446_v17 = vmul.f32 %v3877_v44, %v4560_v55  ;;  %v3879_v25 = vpop.eup %3878 }
 0x396   : > { %v3881_v49 = vpop.eup %3880  ;;  %v1450_v53 = vmul.f32 %v3879_v25, %v4550_v48  ;;  %3884 = vrcp.f32 %v1406_v40 }
 0x397   : > { %v1453_v54 = vmul.f32 %v3881_v49, %v4562_v8  ;;  %v3883_v55 = vpop.eup %3882 }
 0x398   : > { %v1447_v48 = vmul.f32 %v3883_v55, %v4526_v5 }
 0x39b   : > { %v3766_v32 = vpop.permute.xlu1 %3765 }
 0x39c   : > { %v3768_v45 = vunpack.i.h.bf16 %v3766_v32  ;;  %v3767_v4 = vunpack.i.l.bf16 %v3766_v32  ;;  %v3885_v39 = vpop.eup %3884 }
 0x39d   : > { %v1415_v47 = vpop.xlane.xlu2 %1414  ;;  %v1448_v8 = vmul.f32 %v3885_v39, %v4569_v63 }
 0x39e   : > { %1683 = vmatpush.msrb.mxu3 %v3767_v4  ;;  %1761 = vmatpush.msrb.mxu2 %v3768_v45  ;;  %3886 = vrcp.f32 %v1415_v47 }
 0x39f   : > { %3317 = vmatmul.msk.f32.vlgmr.msrb.gmra.mxu3 %vm1277_vm3, %v1446_v17  ;;  %3320 = vmatmul.msk.f32.vlgmr.msrb.gmra.mxu2 %vm1277_vm3, %v1449_v7 }
 0x3a3   : > { %v3776_v51 = vpop.permute.xlu1 %3775 }
 0x3a4   : > { %v3778_v59 = vunpack.i.h.bf16 %v3776_v51  ;;  %v3777_v52 = vunpack.i.l.bf16 %v3776_v51  ;;  %v3887_v50 = vpop.eup %3886 }
 0x3a5   : > { %v1418_v42 = vpop.xlane.xlu2 %1417  ;;  %v1451_v31 = vmul.f32 %v3887_v50, %v4574_v1 }
 0x3a6   : > { %1787 = vmatpush.msra.mxu3 %v3777_v52  ;;  %1865 = vmatpush.msra.mxu2 %v3778_v59  ;;  %3888 = vrcp.f32 %v1418_v42 }
 0x3a7   : > { %3321 = vmatmul.msk.f32.vlgmr.msra.gmra.mxu3 %vm1277_vm3, %v1450_v53  ;;  %3324 = vmatmul.msk.f32.vlgmr.msra.gmra.mxu2 %vm1277_vm3, %v1453_v54 }
 0x3a8   : > { %1970 = vmatpush.bf16.msrb.mxu3 %v3616_v29 }
 0x3ab   : > { %v3781_v57 = vpop.permute.xlu1 %3780 }
 0x3ac   : > { %v3783_v3 = vunpack.i.h.bf16 %v3781_v57  ;;  %v3782_v15 = vunpack.i.l.bf16 %v3781_v57  ;;  %v3889_v60 = vpop.eup %3888  ;;  %1971 = vmatpush.bf16.msrb.mxu3 %v3615_v56 }
 0x3ad   : > { %v3771_v6 = vpop.permute.xlu2 %3770  ;;  %v1452_v37 = vmul.f32 %v3889_v60, %v4581_v2  ;;  %v3820_v60 = vld [vmem:[%s4978_s4] ss:$0 sm:$0xff] }
 0x3ae   : > { %v3773_v58 = vunpack.i.h.bf16 %v3771_v6  ;;  %v3772_v61 = vunpack.i.l.bf16 %v3771_v6 }
 0x3b0   : > { %1709 = vmatpush.msra.mxu0 %v3772_v61  ;;  %1735 = vmatpush.msrb.mxu1 %v3773_v58 }
 0x3b1   : > { %3318 = vmatmul.msk.f32.vlgmr.msra.gmra.mxu0 %vm1277_vm3, %v1447_v48  ;;  %3319 = vmatmul.msk.f32.vlgmr.msrb.gmra.mxu1 %vm1277_vm3, %v1448_v8 }
 0x3b2   : > { %1813 = vmatpush.msrb.mxu0 %v3782_v15  ;;  %1839 = vmatpush.msra.mxu1 %v3783_v3 }
 0x3b9   : > { %3322 = vmatmul.msk.f32.vlgmr.msrb.gmra.mxu0 %vm1277_vm3, %v1451_v31  ;;  %3323 = vmatmul.msk.f32.vlgmr.msra.gmra.mxu1 %vm1277_vm3, %v1452_v37 }
 0x3c7   : > { %v1529_v5 = vpop.f32.mrf.mxu1 }
 0x3da   : > { %v1581_v20 = vpop.f32.mrf.mxu3 }
 0x3e2   : > { %v1555_v63 = vpop.f32.mrf.mxu2 }
 0x3e3   : > { %v3784_v14 = vpack.i.bf16 %v1555_v63, %v1529_v5  ;;  %v3900_v5 = vld [vmem:[#allocation2] sm:$0xff] }
 0x3e5   : > { %3785 = vrot.lane.b32.xlu0 %v3784_v14, %s4019_s8 }
 0x3ea   : > { %v1659_v19 = vpop.f32.mrf.mxu2 }
 0x3ec   : > { %v1607_v38 = vpop.f32.mrf.mxu0 }
 0x3ed   : > { %v3789_v9 = vpack.i.bf16 %v1607_v38, %v1581_v20  ;;  %v3901_v20 = vld [vmem:[#allocation2 + $0x8] sm:$0xff] }
 0x3ef   : > { %3790 = vrot.lane.b32.xlu1 %v3789_v9, %s4020_s19 }
 0x40c   : > { %v1633_v1 = vpop.f32.mrf.mxu1 }
 0x40d   : > { %v3794_v21 = vpack.i.bf16 %v1659_v19, %v1633_v1  ;;  %v4026_v19 = vmov 32.0  }
 0x40e   : > { %3890 = vrcp.f32 %v4026_v19 }
 0x40f   : > { %3795 = vrot.lane.b32.xlu2 %v3794_v21, %s4021_s29 }
 0x414   : > { %v3891_v1 = vpop.eup %3890 }
 0x415   : > { %v1989_v21 = vmul.f32 32.0, %v3891_v1  ;;  %vm1993_vm9 = vweird.f32 %v3891_v1 }
 0x422   : > { %v1685_v2 = vpop.f32.mrf.mxu3  ;;  %v1763_v10 = vpop.f32.mrf.mxu2 }
 0x42a   : > { %v1789_v22 = vpop.f32.mrf.mxu3  ;;  %v1867_v23 = vpop.f32.mrf.mxu2 }
 0x42e   : > { %v1711_v11 = vpop.f32.mrf.mxu0  ;;  %v1737_v26 = vpop.f32.mrf.mxu1 }
 0x42f   : > { %v3799_v27 = vpack.i.bf16 %v1711_v11, %v1685_v2  ;;  %v3804_v12 = vpack.i.bf16 %v1763_v10, %v1737_v26  ;;  %v1990_v2 = vsub.f32 1.0, %v1989_v21  ;;  %v3360_v21 = vld [vmem:[%s4218_s14 + $0x18] sm:$0xf] }
 0x431   : > { %3805 = vrot.lane.b32.xlu2 %v3804_v12, %s4022_s20  ;;  %3800 = vrot.lane.b32.xlu1 %v3799_v27, %s4023_s17  ;;  %v1991_v10 = vmul.f32 %v3891_v1, %v1990_v2  ;;  %v3628_v2 = vld [vmem:[%s4218_s14 + $0x54] sm:$0xf0] }
 0x433   : > { %v1992_v11 = vadd.f32 %v3891_v1, %v1991_v10 }
 0x435   : > { %v4636_v26 = vsel %vm1993_vm9, %v3891_v1, %v1992_v11  ;;  %v3354_v1 = vld [vmem:[%s4218_s14 + $0x50] sm:$0xf0]  ;;  %v3361_v11 = vor.u32 %v3628_v2, %v3360_v21  ;;  %v3631_v21 = vld [vmem:[%s4218_s14 + $0x6c] sm:$0xf0] }
 0x436   : > { %v1815_v46 = vpop.f32.mrf.mxu0  ;;  %v1841_v13 = vpop.f32.mrf.mxu1 }
 0x437   : > { %v3809_v24 = vpack.i.bf16 %v1815_v46, %v1789_v22  ;;  %v3814_v28 = vpack.i.bf16 %v1867_v23, %v1841_v13 }
 0x439   : > { %3815 = vrot.lane.b32.xlu0 %v3814_v28, %s4024_s12  ;;  %3810 = vrot.lane.b32.xlu1 %v3809_v24, %s4025_s23  ;;  %s4983_s12 = sld [smem:[#allocation22_spill]] (!%p3606_p11) }
 0x457   : > { %v3786_v33 = vpop.permute.xlu0 %3785 }
 0x458   : > { %v3788_v34 = vunpack.i.h.bf16 %v3786_v33  ;;  %v3787_v35 = vunpack.i.l.bf16 %v3786_v33  ;;  %v3641_v33 = vld [vmem:[%s4218_s14 + $0xbc] sm:$0xf0] }
 0x45a   : > { %v1927_v45 = vsel %vm830_vm2, %v1503_v16, %v3788_v34  ;;  %v1926_v4 = vsel %vm830_vm2, %v1477_v18, %v3787_v35  ;;  %v3402_v35 = vld [vmem:[%s4218_s14 + $0xc0] sm:$0xf0] }
 0x461   : > { %v3791_v30 = vpop.permute.xlu1 %3790 }
 0x462   : > { %v3793_v62 = vunpack.i.h.bf16 %v3791_v30  ;;  %v3792_v40 = vunpack.i.l.bf16 %v3791_v30  ;;  %v3400_v30 = vld [vmem:[%s4218_s14 + $0x80] sm:$0xf] }
 0x463   : > { %v3401_v34 = vor.u32 %v3641_v33, %v3400_v30 }
 0x464   : > { %v1929_v7 = vsel %vm1277_vm3, %v1927_v45, %v3793_v62  ;;  %v1928_v17 = vsel %vm1277_vm3, %v1926_v4, %v3792_v40  ;;  %v3642_v62 = vld [vmem:[%s4218_s14 + $0xc4] sm:$0xf0] }
 0x465   : > { %2314 = vmatpush.bf16.msra.mxu0 %v3401_v34 }
 0x469   : > { %v3796_v0 = vpop.permute.xlu2 %3795 }
 0x46a   : > { %v3798_v41 = vunpack.i.h.bf16 %v3796_v0  ;;  %v3797_v43 = vunpack.i.l.bf16 %v3796_v0  ;;  %v3633_v0 = vld [vmem:[%s4218_s14 + $0x84] sm:$0xf] }
 0x46c   : > { %v1931_v25 = vsel %vm1930_vm4, %v1928_v17, %v3797_v43  ;;  %v1932_v49 = vsel %vm1930_vm4, %v1929_v7, %v3798_v41  ;;  %v3405_v41 = vor.u32 %v3633_v0, %v3402_v35  ;;  %v3336_v7 = vld [vmem:[%s4218_s14] sm:$0xf] }
 0x46d   : > { %v3625_v17 = vld [vmem:[%s4218_s14 + $0x3c] sm:$0xf0] }
 0x46e   : > { %2328 = vmatpush.bf16.msrb.mxu1 %v3405_v41 }
 0x48b   : > { %v3806_v47 = vpop.permute.xlu2 %3805 }
 0x48c   : > { %v3808_v52 = vunpack.i.h.bf16 %v3806_v47  ;;  %v3807_v53 = vunpack.i.l.bf16 %v3806_v47  ;;  %v3617_v47 = vld [vmem:[%s4218_s14 + $0x4] sm:$0xf] }
 0x4a3   : > { %v3801_v36 = vpop.permute.xlu1 %3800 }
 0x4a4   : > { %v3803_v44 = vunpack.i.h.bf16 %v3801_v36  ;;  %v3802_v32 = vunpack.i.l.bf16 %v3801_v36  ;;  %v3408_v36 = vld [vmem:[%s4218_s14 + $0x88] sm:$0xf] }
 0x4a5   : > { %v3409_v43 = vor.u32 %v3642_v62, %v3408_v36  ;;  %v3821_v36 = vld [vmem:[%s4979_s16] ss:$0 sm:$0xff] }
 0x4a6   : > { %v1935_v51 = vsel %vm1933_vm5, %v1932_v49, %v3803_v44  ;;  %v1934_v59 = vsel %vm1933_vm5, %v1931_v25, %v3802_v32  ;;  %v3634_v44 = vld [vmem:[%s4218_s14 + $0x8c] sm:$0xf]  ;;  %v3337_v49 = vor.u32 %v3625_v17, %v3336_v7  ;;  %v3432_v7 = vld [vmem:[%s4218_s14 + $0xa0] sm:$0xf] }
 0x4a7   : > { %v1937_v58 = vsel %vm1936_vm6, %v1934_v59, %v3807_v53  ;;  %v1938_v61 = vsel %vm1936_vm6, %v1935_v51, %v3808_v52  ;;  %v3410_v32 = vld [vmem:[%s4218_s14 + $0xc8] sm:$0xf0]  ;;  %2342 = vmatpush.bf16.msrb.mxu2 %v3409_v43  ;;  %v3338_v51 = vld [vmem:[%s4218_s14 + $0x40] sm:$0xf0]  ;;  %v3344_v59 = vld [vmem:[%s4218_s14 + $0x8] sm:$0xf] }
 0x4a8   : > { %v3413_v4 = vor.u32 %v3634_v44, %v3410_v32  ;;  %v3341_v52 = vor.u32 %v3617_v47, %v3338_v51  ;;  %v3626_v53 = vld [vmem:[%s4218_s14 + $0x44] sm:$0xf0]  ;;  %2315 = vmatpush.bf16.msra.mxu0 %v3337_v49  ;;  %v3822_v43 = vld [vmem:[%s712_s18] ss:$0 sm:$0xff]  ;;  %v3645_v17 = vld [vmem:[%s4218_s14 + $0xdc] sm:$0xf0] }
 0x4a9   : > { %v3637_v47 = vld [vmem:[%s4218_s14 + $0xa4] sm:$0xf] }
 0x4aa   : > { %2356 = vmatpush.bf16.msra.mxu3 %v3413_v4  ;;  %2329 = vmatpush.bf16.msrb.mxu1 %v3341_v52  ;;  %v3440_v4 = vld [vmem:[%s4218_s14 + $0xa8] sm:$0xf]  ;;  %v3434_v51 = vld [vmem:[%s4218_s14 + $0xe0] sm:$0xf0] }
 0x4ab   : > { %v3816_v54 = vpop.permute.xlu0 %3815  ;;  %v3811_v42 = vpop.permute.xlu1 %3810 }
 0x4ac   : > { %v3818_v55 = vunpack.i.h.bf16 %v3816_v54  ;;  %v3817_v39 = vunpack.i.l.bf16 %v3816_v54  ;;  %v3813_v57 = vunpack.i.h.bf16 %v3811_v42  ;;  %v3812_v6 = vunpack.i.l.bf16 %v3811_v42  ;;  %v3618_v54 = vld [vmem:[%s4218_s14 + $0xc] sm:$0xf] }
 0x4ad   : > { %v3346_v42 = vld [vmem:[%s4218_s14 + $0x48] sm:$0xf0] }
 0x4ae   : > { %v1941_v48 = vsel %vm1939_vm7, %v1938_v61, %v3813_v57  ;;  %v1940_v8 = vsel %vm1939_vm7, %v1937_v58, %v3812_v6  ;;  %v3424_v6 = vld [vmem:[%s4218_s14 + $0x98] sm:$0xf]  ;;  %v3416_v61 = vld [vmem:[%s4218_s14 + $0x90] sm:$0xf] }
 0x4af   : > { %v1944_v3 = vsel %vm1942_vm8, %v1941_v48, %v3818_v55  ;;  %v1943_v15 = vsel %vm1942_vm8, %v1940_v8, %v3817_v39  ;;  %v3345_v55 = vor.u32 %v3626_v53, %v3344_v59  ;;  %v3349_v39 = vor.u32 %v3618_v54, %v3346_v42  ;;  %v3644_v58 = vld [vmem:[%s4218_s14 + $0xd4] sm:$0xf0]  ;;  %v3638_v59 = vld [vmem:[%s4218_s14 + $0xac] sm:$0xf]  ;;  %v3368_v42 = vld [vmem:[%s4218_s14 + $0x20] sm:$0xf] }
 0x4b0   : > { %v1945_v50 = vpack.c.bf16 %v1944_v3, %v1943_v15  ;;  %v3425_v8 = vor.u32 %v3644_v58, %v3424_v6  ;;  %v3643_v3 = vld [vmem:[%s4218_s14 + $0xcc] sm:$0xf0]  ;;  %v3635_v15 = vld [vmem:[%s4218_s14 + $0x94] sm:$0xf]  ;;  %v3433_v54 = vor.u32 %v3645_v17, %v3432_v7  ;;  %v3621_v6 = vld [vmem:[%s4218_s14 + $0x24] sm:$0xf] }
 0x4b1   : > { %2343 = vmatpush.bf16.msrb.mxu2 %v3345_v55  ;;  %2357 = vmatpush.bf16.msra.mxu3 %v3349_v39  ;;  %v3629_v55 = vld [vmem:[%s4218_s14 + $0x5c] sm:$0xf0]  ;;  %v3437_v39 = vor.u32 %v3637_v47, %v3434_v51  ;;  %v3376_v58 = vld [vmem:[%s4218_s14 + $0x28] sm:$0xf]  ;;  %v3649_v17 = vld [vmem:[%s4224_s28 + $0x4] sm:$0xf] }
 0x4b2   : > { %3333 = vmatmul.msk.bf16.vlgmr.msrb.gmra.mxu3 %vm780_vm1, %v1945_v50  ;;  %v3418_v50 = vld [vmem:[%s4218_s14 + $0xd0] sm:$0xf0]  ;;  %v3482_v47 = vld [vmem:[%s4224_s28 + $0x40] sm:$0xf0] }
 0x4b3   : > { %v3485_v51 = vor.u32 %v3649_v17, %v3482_v47 }
 0x4b5   : > { %2398 = vmatpush.bf16.msra.mxu2 %v3425_v8  ;;  %v3622_v8 = vld [vmem:[%s4218_s14 + $0x2c] sm:$0xf] }
 0x4b9   : > { %2399 = vmatpush.bf16.msra.mxu2 %v3361_v11  ;;  %v3623_v11 = vld [vmem:[%s4218_s14 + $0x34] sm:$0xf] }
 0x535   : > { %v1973_v31 = vpop.f32.mrf.mxu3 }
 0x536   : > { %v1974_v37 = vadd.f32 %v3820_v60, %v1973_v31  ;;  %v3421_v31 = vor.u32 %v3635_v15, %v3418_v50  ;;  %v3369_v15 = vor.u32 %v3629_v55, %v3368_v42  ;;  %v3560_v55 = vld [vmem:[%s4224_s28 + $0x90] sm:$0xf] }
 0x538   : > { %v1978_v63 = vadd.f32 %v3900_v5, %v1974_v37  ;;  %v3636_v37 = vld [vmem:[%s4218_s14 + $0x9c] sm:$0xf]  ;;  %2384 = vmatpush.bf16.msra.mxu1 %v3421_v31 }
 0x539   : > { %v3426_v5 = vld [vmem:[%s4218_s14 + $0xd8] sm:$0xf0] }
 0x53a   : > { %v1982_v14 = vsel %vm780_vm1, %v1978_v63, 0.0 }
 0x53b   : > { %1983 = vadd.xlane.f32.xlu2 %v1982_v14 }
 0x53d   : > { %v1975_v16 = vpop.f32.mrf.mxu3 }
 0x53e   : > { %v1976_v18 = vadd.f32 %v3820_v60, %v1975_v16  ;;  %v3417_v60 = vor.u32 %v3643_v3, %v3416_v61  ;;  %v3630_v61 = vld [vmem:[%s4218_s14 + $0x64] sm:$0xf0]  ;;  %v3378_v3 = vld [vmem:[%s4218_s14 + $0x68] sm:$0xf0] }
 0x53f   : > { %v3377_v50 = vor.u32 %v3630_v61, %v3376_v58  ;;  %v3381_v31 = vor.u32 %v3622_v8, %v3378_v3  ;;  %v3562_v58 = vld [vmem:[%s4224_s28 + $0xd0] sm:$0xf0]  ;;  %v3676_v8 = vld [vmem:[%s4224_s28 + $0xd4] sm:$0xf0]  ;;  %v3668_v3 = vld [vmem:[%s4224_s28 + $0x9c] sm:$0xf] }
 0x540   : > { %v1979_v38 = vadd.f32 %v3901_v20, %v1976_v18  ;;  %v3429_v18 = vor.u32 %v3636_v37, %v3426_v5  ;;  %v3627_v20 = vld [vmem:[%s4218_s14 + $0x4c] sm:$0xf0]  ;;  %2370 = vmatpush.bf16.msrb.mxu0 %v3417_v60  ;;  %v3456_v37 = vld [vmem:[%s4218_s14 + $0xb8] sm:$0xf] }
 0x541   : > { %v3648_v5 = vld [vmem:[%s4218_s14 + $0xf4] sm:$0xf0] }
 0x542   : > { %v1985_v9 = vsel %vm780_vm1, %v1979_v38, 0.0  ;;  %2412 = vmatpush.bf16.msrb.mxu3 %v3429_v18  ;;  %v3450_v18 = vld [vmem:[%s4218_s14 + $0xf0] sm:$0xf0] }
 0x543   : > { %1986 = vadd.xlane.f32.xlu1 %v1985_v9 }
 0x5ae   : > { %v1984_v27 = vpop.xlane.xlu2 %1983 }
 0x5af   : > { %v1995_v12 = vmul.f32 %v4636_v26, %v1984_v27  ;;  %v3620_v27 = vld [vmem:[%s4218_s14 + $0x1c] sm:$0xf] }
 0x5b1   : > { %v4639_v22 = vsub.f32 %v1978_v63, %v1995_v12  ;;  %v3352_v63 = vld [vmem:[%s4218_s14 + $0x10] sm:$0xf]  ;;  %v3362_v12 = vld [vmem:[%s4218_s14 + $0x58] sm:$0xf0] }
 0x5b2   : > { %v3353_v19 = vor.u32 %v3627_v20, %v3352_v63  ;;  %v3448_v63 = vld [vmem:[%s4218_s14 + $0xb0] sm:$0xf]  ;;  %v3640_v20 = vld [vmem:[%s4218_s14 + $0xbc] sm:$0xf] }
 0x5b3   : > { %v1999_v23 = vmul.f32 %v4639_v22, %v4639_v22 }
 0x5b4   : > { %2371 = vmatpush.bf16.msrb.mxu0 %v3353_v19 }
 0x5b5   : > { %v2001_v46 = vsel %vm780_vm1, %v1999_v23, 0.0 }
 0x5b6   : > { %v1987_v13 = vpop.xlane.xlu1 %1986  ;;  %2002 = vadd.xlane.f32.xlu0 %v2001_v46  ;;  %v3365_v46 = vor.u32 %v3620_v27, %v3362_v12  ;;  %v3392_v27 = vld [vmem:[%s4218_s14 + $0x38] sm:$0xf] }
 0x5b7   : > { %v1996_v24 = vmul.f32 %v4636_v26, %v1987_v13  ;;  %v3632_v12 = vld [vmem:[%s4218_s14 + $0x74] sm:$0xf0] }
 0x5b8   : > { %2413 = vmatpush.bf16.msrb.mxu3 %v3365_v46  ;;  %v3624_v46 = vld [vmem:[%s4218_s14 + $0x3c] sm:$0xf] }
 0x5b9   : > { %v4645_v28 = vsub.f32 %v1979_v38, %v1996_v24  ;;  %v3619_v38 = vld [vmem:[%s4218_s14 + $0x14] sm:$0xf] }
 0x5ba   : > { %v3357_v10 = vor.u32 %v3619_v38, %v3354_v1  ;;  %v3458_v38 = vld [vmem:[%s4218_s14 + $0xf8] sm:$0xf0]  ;;  %v3384_v1 = vld [vmem:[%s4218_s14 + $0x30] sm:$0xf] }
 0x5bb   : > { %v2000_v29 = vmul.f32 %v4645_v28, %v4645_v28 }
 0x5bc   : > { %2385 = vmatpush.bf16.msra.mxu1 %v3357_v10  ;;  %v3461_v10 = vor.u32 %v3640_v20, %v3458_v38  ;;  %v3660_v20 = vld [vmem:[%s4224_s28 + $0x54] sm:$0xf0]  ;;  %v3652_v38 = vld [vmem:[%s4224_s28 + $0x1c] sm:$0xf] }
 0x5bd   : > { %v2004_v56 = vsel %vm780_vm1, %v2000_v29, 0.0 }
 0x5be   : > { %2005 = vadd.xlane.f32.xlu2 %v2004_v56 }
 0x629   : > { %v2003_v40 = vpop.xlane.xlu0 %2002 }
 0x62a   : > { %v2007_v45 = vmul.f32 %v2003_v40, %v4636_v26 }
 0x62c   : > { %v4662_v25 = vadd.f32 1e-05, %v2007_v45 }
 0x62e   : > { %3892 = vrsqrt.f32 %v4662_v25  ;;  %vm2017_vm11 = vweird.f32 %v4662_v25 }
 0x631   : > { %v2006_v57 = vpop.xlane.xlu2 %2005 }
 0x632   : > { %v2008_v48 = vmul.f32 %v2006_v57, %v4636_v26 }
 0x634   : > { %v3893_v14 = vpop.eup %3892  ;;  %v2010_v16 = vadd.f32 1e-05, %v2008_v48  ;;  %v3370_v48 = vld [vmem:[%s4218_s14 + $0x60] sm:$0xf0] }
 0x635   : > { %v2012_v9 = vmul.f32 %v3893_v14, %v4662_v25  ;;  %vm2018_vm10 = vweird.f32 %v3893_v14  ;;  %v3373_v60 = vor.u32 %v3621_v6, %v3370_v48  ;;  %v3568_v48 = vld [vmem:[%s4224_s28 + $0x98] sm:$0xf] }
 0x636   : > { %3894 = vrsqrt.f32 %v2010_v16  ;;  %vm2019_vm12 = vmor %vm2017_vm11, %vm2018_vm10  ;;  %vm2027_vm14 = vweird.f32 %v2010_v16 }
 0x637   : > { %v2013_v23 = vmul.f32 %v3893_v14, %v2012_v9  ;;  %v3457_v9 = vor.u32 %v3648_v5, %v3456_v37  ;;  %v3659_v37 = vld [vmem:[%s4224_s28 + $0x4c] sm:$0xf0] }
 0x639   : > { %v2014_v13 = vmul.f32 0.5, %v2013_v23  ;;  %v3386_v23 = vld [vmem:[%s4218_s14 + $0x70] sm:$0xf0] }
 0x63b   : > { %v2015_v24 = vsub.f32 1.5, %v2014_v13  ;;  %v3394_v13 = vld [vmem:[%s4218_s14 + $0x78] sm:$0xf0] }
 0x63c   : > { %v3895_v29 = vpop.eup %3894 }
 0x63d   : > { %v2016_v56 = vmul.f32 %v3893_v14, %v2015_v24  ;;  %v2022_v30 = vmul.f32 %v3895_v29, %v2010_v16  ;;  %vm2028_vm13 = vweird.f32 %v3895_v29  ;;  %v3639_v16 = vld [vmem:[%s4218_s14 + $0xb4] sm:$0xf]  ;;  %v3385_v24 = vor.u32 %v3631_v21, %v3384_v1 }
 0x63e   : > { %vm2029_vm15 = vmor %vm2027_vm14, %vm2028_vm13  ;;  %v3453_v2 = vor.u32 %v3639_v16, %v3450_v18  ;;  %v3504_v18 = vld [vmem:[%s4224_s28 + $0x18] sm:$0xf]  ;;  %v4806_v21 = vld [vmem:[%s4262_s15] sm:$0xff] }
 0x63f   : > { %v2023_v33 = vmul.f32 %v3895_v29, %v2022_v30  ;;  %v2020_v0 = vsel %vm2019_vm12, %v3893_v14, %v2016_v56  ;;  %v3647_v14 = vld [vmem:[%s4218_s14 + $0xec] sm:$0xf0]  ;;  %v3389_v56 = vor.u32 %v3623_v11, %v3386_v23  ;;  %v3397_v30 = vor.u32 %v3624_v46, %v3394_v13 }
 0x640   : > { %v2031_v62 = vmul.f32 %v2020_v0, %v4639_v22  ;;  %v3646_v22 = vld [vmem:[%s4218_s14 + $0xe4] sm:$0xf0]  ;;  %v3449_v19 = vor.u32 %v3647_v14, %v3448_v63  ;;  %v3673_v0 = vld [vmem:[%s4224_s28 + $0xbc] sm:$0xf0]  ;;  %v3651_v63 = vld [vmem:[%s4224_s28 + $0x14] sm:$0xf] }
 0x641   : > { %v2024_v34 = vmul.f32 0.5, %v2023_v33  ;;  %v3441_v53 = vor.u32 %v3646_v22, %v3440_v4  ;;  %v3544_v33 = vld [vmem:[%s4224_s28 + $0x80] sm:$0xf]  ;;  %v3498_v14 = vld [vmem:[%s4224_s28 + $0x50] sm:$0xf0]  ;;  %v2113_v11 = vperm.slane %v4806_v21, 0 }
 0x642   : > { %v2036_v44 = vmul.f32 %v3821_v36, %v2031_v62  ;;  %v3480_v4 = vld [vmem:[%s4224_s28] sm:$0xf]  ;;  %v3501_v16 = vor.u32 %v3651_v63, %v3498_v14 }
 0x643   : > { %v2025_v35 = vsub.f32 1.5, %v2024_v34  ;;  %v3665_v34 = vld [vmem:[%s4224_s28 + $0x84] sm:$0xf]  ;;  %v3657_v22 = vld [vmem:[%s4224_s28 + $0x3c] sm:$0xf0] }
 0x644   : > { %v4706_v25 = vadd.f32 %v3822_v43, %v2036_v44  ;;  %v3481_v7 = vor.u32 %v3657_v22, %v3480_v4 }
 0x645   : > { %v2026_v40 = vmul.f32 %v3895_v29, %v2025_v35  ;;  %v3545_v35 = vor.u32 %v3673_v0, %v3544_v33  ;;  %v3677_v0 = vld [vmem:[%s4224_s28 + $0xdc] sm:$0xf0] }
 0x647   : > { %v2030_v41 = vsel %vm2029_vm15, %v3895_v29, %v2026_v40  ;;  %v3393_v29 = vor.u32 %v3632_v12, %v3392_v27  ;;  %v3552_v40 = vld [vmem:[%s4224_s28 + $0x88] sm:$0xf]  ;;  %v2114_v27 = vperm.slane %v4806_v21, 1 }
 0x648   : > { %v2032_v32 = vmul.f32 %v2030_v41, %v4645_v28  ;;  %v3442_v28 = vld [vmem:[%s4218_s14 + $0xe8] sm:$0xf0]  ;;  %v3674_v41 = vld [vmem:[%s4224_s28 + $0xc4] sm:$0xf0] }
 0x649   : > { %v3445_v57 = vor.u32 %v3638_v59, %v3442_v28  ;;  %v3553_v44 = vor.u32 %v3674_v41, %v3552_v40  ;;  %v3488_v59 = vld [vmem:[%s4224_s28 + $0x8] sm:$0xf] }
 0x64a   : > { %v2037_v45 = vmul.f32 %v3821_v36, %v2032_v32  ;;  %v3546_v36 = vld [vmem:[%s4224_s28 + $0xc0] sm:$0xf0]  ;;  %v3554_v32 = vld [vmem:[%s4224_s28 + $0xc8] sm:$0xf0]  ;;  %v3658_v28 = vld [vmem:[%s4224_s28 + $0x44] sm:$0xf0] }
 0x64b   : > { %v3549_v62 = vor.u32 %v3665_v34, %v3546_v36  ;;  %v3669_v34 = vld [vmem:[%s4224_s28 + $0xa4] sm:$0xf]  ;;  %v2115_v36 = vperm.slane %v4806_v21, 2 }
 0x64c   : > { %v4708_v49 = vadd.f32 %v3822_v43, %v2037_v45  ;;  %v3666_v43 = vld [vmem:[%s4224_s28 + $0x8c] sm:$0xf] }
 0x64d   : > { %v3557_v45 = vor.u32 %v3666_v43, %v3554_v32 }
 0x64e   : > { %v4715_v52 = vpack.c.bf16 %v4708_v49, %v4706_v25 }
 0x650   : > { %3462 = vmatmul.msk.bf16.vlgmr.msra.gmra.mxu0 %vm780_vm1, %v4715_v52  ;;  %3463 = vmatmul.msk.bf16.vlgmr.msrb.gmra.mxu1 %vm780_vm1, %v4715_v52 }
 0x651   : > { %3464 = vmatmul.msk.bf16.vlgmr.msrb.gmra.mxu2 %vm780_vm1, %v4715_v52  ;;  %3465 = vmatmul.msk.bf16.vlgmr.msra.gmra.mxu3 %vm780_vm1, %v4715_v52 }
 0x652   : > { %2454 = vmatpush.bf16.msrb.mxu2 %v3441_v53  ;;  %2426 = vmatpush.bf16.msra.mxu0 %v3433_v54  ;;  %v3489_v53 = vor.u32 %v3658_v28, %v3488_v59  ;;  %v3490_v54 = vld [vmem:[%s4224_s28 + $0x48] sm:$0xf0]  ;;  %v3584_v59 = vld [vmem:[%s4224_s28 + $0xa8] sm:$0xf] }
 0x653   : > { %2440 = vmatpush.bf16.msrb.mxu1 %v3437_v39  ;;  %2468 = vmatpush.bf16.msra.mxu3 %v3445_v57  ;;  %v3675_v39 = vld [vmem:[%s4224_s28 + $0xcc] sm:$0xf0]  ;;  %v3667_v57 = vld [vmem:[%s4224_s28 + $0x94] sm:$0xf]  ;;  %v3678_v28 = vld [vmem:[%s4224_s28 + $0xe4] sm:$0xf0] }
 0x654   : > { %v3561_v6 = vor.u32 %v3675_v39, %v3560_v55  ;;  %v3565_v61 = vor.u32 %v3667_v57, %v3562_v58  ;;  %v3670_v55 = vld [vmem:[%s4224_s28 + $0xac] sm:$0xf]  ;;  %v3512_v57 = vld [vmem:[%s4224_s28 + $0x20] sm:$0xf]  ;;  %v3653_v58 = vld [vmem:[%s4224_s28 + $0x24] sm:$0xf] }
 0x655   : > { %v3586_v39 = vld [vmem:[%s4224_s28 + $0xe8] sm:$0xf0] }
 0x656   : > { %2427 = vmatpush.bf16.msra.mxu0 %v3369_v15  ;;  %2455 = vmatpush.bf16.msrb.mxu2 %v3377_v50  ;;  %v3569_v15 = vor.u32 %v3676_v8, %v3568_v48  ;;  %v3570_v50 = vld [vmem:[%s4224_s28 + $0xd8] sm:$0xf0] }
 0x657   : > { %2441 = vmatpush.bf16.msrb.mxu1 %v3373_v60  ;;  %2469 = vmatpush.bf16.msra.mxu3 %v3381_v31  ;;  %v3573_v60 = vor.u32 %v3668_v3, %v3570_v50  ;;  %v3496_v31 = vld [vmem:[%s4224_s28 + $0x10] sm:$0xf]  ;;  %v2117_v50 = vperm.slane %v4806_v21, 4 }
 0x658   : > { %v3497_v5 = vor.u32 %v3659_v37, %v3496_v31  ;;  %v3585_v31 = vor.u32 %v3678_v28, %v3584_v59  ;;  %v3589_v37 = vor.u32 %v3670_v55, %v3586_v39  ;;  %v3680_v28 = vld [vmem:[%s4224_s28 + $0xf4] sm:$0xf0]  ;;  %v3655_v55 = vld [vmem:[%s4224_s28 + $0x34] sm:$0xf] }
 0x660   : > { %3466 = vmatmul.msk.bf16.vlgmr.msrb.gmra.mxu0 %vm780_vm1, %v4715_v52  ;;  %3467 = vmatmul.msk.bf16.vlgmr.msra.gmra.mxu1 %vm780_vm1, %v4715_v52 }
 0x661   : > { %3468 = vmatmul.msk.bf16.vlgmr.msra.gmra.mxu2 %vm780_vm1, %v4715_v52  ;;  %3469 = vmatmul.msk.bf16.vlgmr.msrb.gmra.mxu3 %vm780_vm1, %v4715_v52 }
 0x662   : > { %2510 = vmatpush.bf16.msra.mxu2 %v3457_v9  ;;  %2482 = vmatpush.bf16.msrb.mxu0 %v3449_v19  ;;  %v3505_v9 = vor.u32 %v3660_v20, %v3504_v18  ;;  %v3506_v19 = vld [vmem:[%s4224_s28 + $0x58] sm:$0xf0] }
 0x663   : > { %2496 = vmatpush.bf16.msra.mxu1 %v3453_v2  ;;  %2524 = vmatpush.bf16.msrb.mxu3 %v3461_v10  ;;  %v3509_v1 = vor.u32 %v3652_v38, %v3506_v19  ;;  %v2119_v19 = vperm.slane %v4806_v21, 6 }
 0x666   : > { %2483 = vmatpush.bf16.msrb.mxu0 %v3385_v24  ;;  %2511 = vmatpush.bf16.msra.mxu2 %v3393_v29 }
 0x667   : > { %2497 = vmatpush.bf16.msra.mxu1 %v3389_v56  ;;  %2525 = vmatpush.bf16.msrb.mxu3 %v3397_v30  ;;  %v3576_v56 = vld [vmem:[%s4224_s28 + $0xa0] sm:$0xf] }
 0x668   : > { %v3577_v32 = vor.u32 %v3677_v0, %v3576_v56  ;;  %v3671_v56 = vld [vmem:[%s4224_s28 + $0xb4] sm:$0xf] }
 0x670   : > { %3470 = vmatmul.msk.bf16.vlgmr.msra.gmra.mxu0 %vm780_vm1, %v4715_v52  ;;  %3471 = vmatmul.msk.bf16.vlgmr.msrb.gmra.mxu1 %vm780_vm1, %v4715_v52 }
 0x671   : > { %3472 = vmatmul.msk.bf16.vlgmr.msrb.gmra.mxu2 %vm780_vm1, %v4715_v52  ;;  %3473 = vmatmul.msk.bf16.vlgmr.msra.gmra.mxu3 %vm780_vm1, %v4715_v52 }
 0x672   : > { %2749 = vmatpush.bf16.xpose.msra.mxu0 %v3545_v35  ;;  %2763 = vmatpush.bf16.xpose.msrb.mxu1 %v3549_v62  ;;  %v3578_v35 = vld [vmem:[%s4224_s28 + $0xe0] sm:$0xf0]  ;;  %v2116_v62 = vperm.slane %v4806_v21, 3 }
 0x673   : > { %2777 = vmatpush.bf16.xpose.msrb.mxu2 %v3553_v44  ;;  %2791 = vmatpush.bf16.xpose.msra.mxu3 %v3557_v45  ;;  %v3581_v45 = vor.u32 %v3669_v34, %v3578_v35 }
 0x67a   : > { %2750 = vmatpush.bf16.xpose.msra.mxu0 %v3481_v7  ;;  %2764 = vmatpush.bf16.xpose.msrb.mxu1 %v3485_v51 }
 0x67b   : > { %2778 = vmatpush.bf16.xpose.msrb.mxu2 %v3489_v53 }
 0x680   : > { %3474 = vmatmul.msk.bf16.vlgmr.msrb.gmra.mxu0 %vm780_vm1, %v4715_v52  ;;  %3475 = vmatmul.msk.bf16.vlgmr.msra.gmra.mxu1 %vm780_vm1, %v4715_v52 }
 0x681   : > { %3476 = vmatmul.msk.bf16.vlgmr.msra.gmra.mxu2 %vm780_vm1, %v4715_v52  ;;  %3477 = vmatmul.msk.bf16.vlgmr.msrb.gmra.mxu3 %vm780_vm1, %v4715_v52  ;;  %v3650_v52 = vld [vmem:[%s4224_s28 + $0xc] sm:$0xf] }
 0x682   : > { %v3493_v42 = vor.u32 %v3650_v52, %v3490_v54  ;;  %2805 = vmatpush.bf16.xpose.msrb.mxu0 %v3561_v6  ;;  %2819 = vmatpush.bf16.xpose.msra.mxu1 %v3565_v61  ;;  %v3661_v6 = vld [vmem:[%s4224_s28 + $0x5c] sm:$0xf0]  ;;  %v3514_v61 = vld [vmem:[%s4224_s28 + $0x60] sm:$0xf0] }
 0x683   : > { %2833 = vmatpush.bf16.xpose.msra.mxu2 %v3569_v15  ;;  %v3513_v14 = vor.u32 %v3661_v6, %v3512_v57 }
 0x684   : > { %2792 = vmatpush.bf16.xpose.msra.mxu3 %v3493_v42 }
 0x68a   : > { %2806 = vmatpush.bf16.xpose.msrb.mxu0 %v3497_v5  ;;  %2820 = vmatpush.bf16.xpose.msra.mxu1 %v3501_v16  ;;  %v3517_v16 = vor.u32 %v3653_v58, %v3514_v61  ;;  %v3530_v61 = vld [vmem:[%s4224_s28 + $0x70] sm:$0xf0] }
 0x68b   : > { %2834 = vmatpush.bf16.xpose.msra.mxu2 %v3505_v9 }
 0x68c   : > { %2847 = vmatpush.bf16.xpose.msrb.mxu3 %v3573_v60  ;;  %v2118_v60 = vperm.slane %v4806_v21, 5 }
 0x694   : > { %2848 = vmatpush.bf16.xpose.msrb.mxu3 %v3509_v1  ;;  %v2120_v1 = vperm.slane %v4806_v21, 7 }
 0x6cd   : > { %v2317_v2 = vpop.f32.mrf.mxu0  ;;  %v2331_v10 = vpop.f32.mrf.mxu1 }
 0x6ce   : > { %v2318_v12 = vadd.f32 %v2317_v2, %v2113_v11  ;;  %v2332_v23 = vadd.f32 %v2331_v10, %v2114_v27 }
 0x6d0   : > { %v2532_v40 = vmax.f32 %v2318_v12, 0.0  ;;  %v2533_v41 = vmax.f32 %v2332_v23, 0.0 }
 0x6d4   : > { %v2345_v46 = vpop.f32.mrf.mxu2  ;;  %v2359_v13 = vpop.f32.mrf.mxu3 }
 0x6d5   : > { %v2319_v24 = vpop.f32.mrf.mxu0  ;;  %v2333_v29 = vpop.f32.mrf.mxu1  ;;  %v2346_v7 = vadd.f32 %v2345_v46, %v2115_v36  ;;  %v2360_v17 = vadd.f32 %v2359_v13, %v2116_v62  ;;  %v3654_v46 = vld [vmem:[%s4224_s28 + $0x2c] sm:$0xf] }
 0x6d6   : > { %v2320_v30 = vadd.f32 %v2319_v24, %v2113_v11  ;;  %v2334_v33 = vadd.f32 %v2333_v29, %v2114_v27  ;;  %v3520_v11 = vld [vmem:[%s4224_s28 + $0x28] sm:$0xf]  ;;  %v3522_v13 = vld [vmem:[%s4224_s28 + $0x68] sm:$0xf0]  ;;  %v3592_v24 = vld [vmem:[%s4224_s28 + $0xb0] sm:$0xf] }
 0x6d7   : > { %v2534_v48 = vmax.f32 %v2346_v7, 0.0  ;;  %v2535_v8 = vmax.f32 %v2360_v17, 0.0  ;;  %v3662_v27 = vld [vmem:[%s4224_s28 + $0x64] sm:$0xf0]  ;;  %v3679_v29 = vld [vmem:[%s4224_s28 + $0xec] sm:$0xf0] }
 0x6d8   : > { %v2548_v43 = vmax.f32 %v2320_v30, 0.0  ;;  %v2549_v44 = vmax.f32 %v2334_v33, 0.0  ;;  %v3594_v30 = vld [vmem:[%s4224_s28 + $0xf0] sm:$0xf0]  ;;  %v3521_v35 = vor.u32 %v3662_v27, %v3520_v11  ;;  %v3600_v7 = vld [vmem:[%s4224_s28 + $0xb8] sm:$0xf] }
 0x6da   : > { %v2564_v4 = vpack.c.bf16 %v2548_v43, %v2532_v40  ;;  %v2565_v22 = vpack.c.bf16 %v2549_v44, %v2533_v41  ;;  %v3593_v41 = vor.u32 %v3679_v29, %v3592_v24  ;;  %v3597_v43 = vor.u32 %v3671_v56, %v3594_v30 }
 0x6dc   : > { %v2347_v47 = vpop.f32.mrf.mxu2  ;;  %v2361_v51 = vpop.f32.mrf.mxu3  ;;  %2751 = vmatmul.bf16.vlgmr.msra.gmra.mxu0 %v2564_v4  ;;  %2765 = vmatmul.bf16.vlgmr.msrb.gmra.mxu1 %v2565_v22  ;;  %v4837_v22 = vld [vmem:[%s4262_s15 + $0x8] sm:$0xff] }
 0x6dd   : > { %v2348_v52 = vadd.f32 %v2347_v47, %v2115_v36  ;;  %v2362_v53 = vadd.f32 %v2361_v51, %v2116_v62  ;;  %v2373_v54 = vpop.f32.mrf.mxu0  ;;  %v2387_v42 = vpop.f32.mrf.mxu1  ;;  %2861 = vmatpush.bf16.xpose.msra.mxu0 %v3577_v32  ;;  %2875 = vmatpush.bf16.xpose.msrb.mxu1 %v3581_v45  ;;  %v3525_v36 = vor.u32 %v3654_v46, %v3522_v13  ;;  %v2123_v11 = vperm.slane %v4837_v22, 2 }
 0x6de   : > { %v2374_v18 = vadd.f32 %v2373_v54, %v2117_v50  ;;  %v2388_v20 = vadd.f32 %v2387_v42, %v2118_v60  ;;  %v3528_v54 = vld [vmem:[%s4224_s28 + $0x30] sm:$0xf]  ;;  %v2124_v27 = vperm.slane %v4837_v22, 3 }
 0x6df   : > { %v2550_v3 = vmax.f32 %v2348_v52, 0.0  ;;  %v2551_v15 = vmax.f32 %v2362_v53, 0.0  ;;  %v3672_v52 = vld [vmem:[%s4224_s28 + $0xbc] sm:$0xf]  ;;  %v3663_v42 = vld [vmem:[%s4224_s28 + $0x6c] sm:$0xf0] }
 0x6e0   : > { %v2536_v33 = vmax.f32 %v2374_v18, 0.0  ;;  %v2537_v0 = vmax.f32 %v2388_v20, 0.0  ;;  %v3602_v53 = vld [vmem:[%s4224_s28 + $0xf8] sm:$0xf0] }
 0x6e1   : > { %v2566_v5 = vpack.c.bf16 %v2550_v3, %v2534_v48  ;;  %v2567_v63 = vpack.c.bf16 %v2551_v15, %v2535_v8  ;;  %v2121_v48 = vperm.slane %v4837_v22, 0  ;;  %v2122_v8 = vperm.slane %v4837_v22, 1 }
 0x6e2   : > { %v3601_v3 = vor.u32 %v3680_v28, %v3600_v7  ;;  %v3605_v15 = vor.u32 %v3672_v52, %v3602_v53 }
 0x6e3   : > { %2779 = vmatmul.bf16.vlgmr.msrb.gmra.mxu2 %v2566_v5  ;;  %2793 = vmatmul.bf16.vlgmr.msra.gmra.mxu3 %v2567_v63 }
 0x6e4   : > { %v2401_v38 = vpop.f32.mrf.mxu2  ;;  %v2415_v9 = vpop.f32.mrf.mxu3  ;;  %2889 = vmatpush.bf16.xpose.msrb.mxu2 %v3585_v31  ;;  %2903 = vmatpush.bf16.xpose.msra.mxu3 %v3589_v37  ;;  %v3529_v31 = vor.u32 %v3663_v42, %v3528_v54  ;;  %v3533_v37 = vor.u32 %v3655_v55, %v3530_v61  ;;  %v2127_v55 = vperm.slane %v4837_v22, 6 }
 0x6e5   : > { %v2375_v2 = vpop.f32.mrf.mxu0  ;;  %v2389_v10 = vpop.f32.mrf.mxu1  ;;  %2862 = vmatpush.bf16.xpose.msra.mxu0 %v3513_v14  ;;  %2876 = vmatpush.bf16.xpose.msrb.mxu1 %v3517_v16  ;;  %v2402_v44 = vadd.f32 %v2401_v38, %v2119_v19  ;;  %v2416_v32 = vadd.f32 %v2415_v9, %v2120_v1  ;;  %v3536_v38 = vld [vmem:[%s4224_s28 + $0x38] sm:$0xf] }
 0x6e6   : > { %v2376_v12 = vadd.f32 %v2375_v2, %v2117_v50  ;;  %v2390_v23 = vadd.f32 %v2389_v10, %v2118_v60  ;;  %v3656_v2 = vld [vmem:[%s4224_s28 + $0x3c] sm:$0xf] }
 0x6e7   : > { %v2538_v39 = vmax.f32 %v2402_v44, 0.0  ;;  %v2539_v57 = vmax.f32 %v2416_v32, 0.0  ;;  %v3538_v10 = vld [vmem:[%s4224_s28 + $0x78] sm:$0xf0] }
 0x6e8   : > { %v2552_v34 = vmax.f32 %v2376_v12, 0.0  ;;  %v2553_v21 = vmax.f32 %v2390_v23, 0.0  ;;  %v3541_v29 = vor.u32 %v3656_v2, %v3538_v10 }
 0x6ea   : > { %v2568_v62 = vpack.c.bf16 %v2552_v34, %v2536_v33  ;;  %v2569_v40 = vpack.c.bf16 %v2553_v21, %v2537_v0 }
 0x6ec   : > { %v2403_v45 = vpop.f32.mrf.mxu2  ;;  %v2417_v4 = vpop.f32.mrf.mxu3  ;;  %2807 = vmatmul.bf16.vlgmr.msrb.gmra.mxu0 %v2568_v62  ;;  %2821 = vmatmul.bf16.vlgmr.msra.gmra.mxu1 %v2569_v40 }
 0x6ed   : > { %v2404_v17 = vadd.f32 %v2403_v45, %v2119_v19  ;;  %v2418_v47 = vadd.f32 %v2417_v4, %v2120_v1  ;;  %v2429_v51 = vpop.f32.mrf.mxu0  ;;  %v2443_v59 = vpop.f32.mrf.mxu1  ;;  %2890 = vmatpush.bf16.xpose.msrb.mxu2 %v3521_v35  ;;  %2904 = vmatpush.bf16.xpose.msra.mxu3 %v3525_v36  ;;  %v3664_v1 = vld [vmem:[%s4224_s28 + $0x74] sm:$0xf0]  ;;  %v2125_v45 = vperm.slane %v4837_v22, 4  ;;  %v2126_v4 = vperm.slane %v4837_v22, 5 }
 0x6ee   : > { %2917 = vmatpush.bf16.xpose.msrb.mxu0 %v3593_v41  ;;  %2931 = vmatpush.bf16.xpose.msra.mxu1 %v3597_v43  ;;  %v2430_v5 = vadd.f32 %v2429_v51, %v2121_v48  ;;  %v2444_v63 = vadd.f32 %v2443_v59, %v2122_v8  ;;  %v3537_v24 = vor.u32 %v3664_v1, %v3536_v38  ;;  %v3823_v1 = vld [vmem:[%s719_s2] ss:$0 sm:$0xff] }
 0x6ef   : > { %v2554_v6 = vmax.f32 %v2404_v17, 0.0  ;;  %v2555_v58 = vmax.f32 %v2418_v47, 0.0 }
 0x6f0   : > { %v2540_v12 = vmax.f32 %v2430_v5, 0.0  ;;  %v2541_v23 = vmax.f32 %v2444_v63, 0.0 }
 0x6f1   : > { %v2570_v50 = vpack.c.bf16 %v2554_v6, %v2538_v39  ;;  %v2571_v60 = vpack.c.bf16 %v2555_v58, %v2539_v57  ;;  %v2128_v39 = vperm.slane %v4837_v22, 7 }
 0x6f3   : > { %2835 = vmatmul.bf16.vlgmr.msra.gmra.mxu2 %v2570_v50  ;;  %2849 = vmatmul.bf16.vlgmr.msrb.gmra.mxu3 %v2571_v60 }
 0x6f4   : > { %v2457_v14 = vpop.f32.mrf.mxu2  ;;  %v2471_v16 = vpop.f32.mrf.mxu3 }
 0x6f5   : > { %2945 = vmatpush.bf16.xpose.msra.mxu2 %v3601_v3  ;;  %2959 = vmatpush.bf16.xpose.msrb.mxu3 %v3605_v15  ;;  %v2431_v18 = vpop.f32.mrf.mxu0  ;;  %v2445_v20 = vpop.f32.mrf.mxu1  ;;  %v2458_v33 = vadd.f32 %v2457_v14, %v2123_v11  ;;  %v2472_v0 = vadd.f32 %v2471_v16, %v2124_v27 }
 0x6f6   : > { %v2432_v9 = vadd.f32 %v2431_v18, %v2121_v48  ;;  %v2446_v19 = vadd.f32 %v2445_v20, %v2122_v8  ;;  %2918 = vmatpush.bf16.xpose.msrb.mxu0 %v3529_v31  ;;  %2932 = vmatpush.bf16.xpose.msra.mxu1 %v3533_v37 }
 0x6f7   : > { %v2542_v41 = vmax.f32 %v2458_v33, 0.0  ;;  %v2543_v43 = vmax.f32 %v2472_v0, 0.0 }
 0x6f8   : > { %v2556_v46 = vmax.f32 %v2432_v9, 0.0  ;;  %v2557_v13 = vmax.f32 %v2446_v19, 0.0 }
 0x6fa   : > { %v2572_v56 = vpack.c.bf16 %v2556_v46, %v2540_v12  ;;  %v2573_v30 = vpack.c.bf16 %v2557_v13, %v2541_v23 }
 0x6fc   : > { %v2459_v34 = vpop.f32.mrf.mxu2  ;;  %v2473_v21 = vpop.f32.mrf.mxu3  ;;  %2863 = vmatmul.bf16.vlgmr.msra.gmra.mxu0 %v2572_v56  ;;  %2877 = vmatmul.bf16.vlgmr.msrb.gmra.mxu1 %v2573_v30 }
 0x6fd   : > { %v2460_v35 = vadd.f32 %v2459_v34, %v2123_v11  ;;  %v2474_v36 = vadd.f32 %v2473_v21, %v2124_v27  ;;  %v2485_v62 = vpop.f32.mrf.mxu0  ;;  %v2499_v40 = vpop.f32.mrf.mxu1  ;;  %2946 = vmatpush.bf16.xpose.msra.mxu2 %v3537_v24  ;;  %2960 = vmatpush.bf16.xpose.msrb.mxu3 %v3541_v29 }
 0x6fe   : > { %v2486_v47 = vadd.f32 %v2485_v62, %v2125_v45  ;;  %v2500_v51 = vadd.f32 %v2499_v40, %v2126_v4 }
 0x6ff   : > { %v2558_v44 = vmax.f32 %v2460_v35, 0.0  ;;  %v2559_v32 = vmax.f32 %v2474_v36, 0.0 }
 0x700   : > { %v2544_v57 = vmax.f32 %v2486_v47, 0.0  ;;  %v2545_v6 = vmax.f32 %v2500_v51, 0.0 }
 0x701   : > { %v2574_v7 = vpack.c.bf16 %v2558_v44, %v2542_v41  ;;  %v2575_v17 = vpack.c.bf16 %v2559_v32, %v2543_v43 }
 0x703   : > { %2891 = vmatmul.bf16.vlgmr.msrb.gmra.mxu2 %v2574_v7  ;;  %2905 = vmatmul.bf16.vlgmr.msra.gmra.mxu3 %v2575_v17 }
 0x704   : > { %v2513_v59 = vpop.f32.mrf.mxu2  ;;  %v2527_v28 = vpop.f32.mrf.mxu3 }
 0x705   : > { %v2487_v52 = vpop.f32.mrf.mxu0  ;;  %v2501_v53 = vpop.f32.mrf.mxu1  ;;  %v2514_v3 = vadd.f32 %v2513_v59, %v2127_v55  ;;  %v2528_v15 = vadd.f32 %v2527_v28, %v2128_v39 }
 0x706   : > { %v2488_v54 = vadd.f32 %v2487_v52, %v2125_v45  ;;  %v2502_v42 = vadd.f32 %v2501_v53, %v2126_v4 }
 0x707   : > { %v2546_v5 = vmax.f32 %v2514_v3, 0.0  ;;  %v2547_v63 = vmax.f32 %v2528_v15, 0.0 }
 0x708   : > { %v2560_v58 = vmax.f32 %v2488_v54, 0.0  ;;  %v2561_v61 = vmax.f32 %v2502_v42, 0.0 }
 0x70a   : > { %v2576_v48 = vpack.c.bf16 %v2560_v58, %v2544_v57  ;;  %v2577_v8 = vpack.c.bf16 %v2561_v61, %v2545_v6 }
 0x70c   : > { %v2515_v50 = vpop.f32.mrf.mxu2  ;;  %v2529_v60 = vpop.f32.mrf.mxu3  ;;  %2919 = vmatmul.bf16.vlgmr.msrb.gmra.mxu0 %v2576_v48  ;;  %2933 = vmatmul.bf16.vlgmr.msra.gmra.mxu1 %v2577_v8 }
 0x70d   : > { %v2516_v31 = vadd.f32 %v2515_v50, %v2127_v55  ;;  %v2530_v37 = vadd.f32 %v2529_v60, %v2128_v39 }
 0x70f   : > { %v2562_v14 = vmax.f32 %v2516_v31, 0.0  ;;  %v2563_v16 = vmax.f32 %v2530_v37, 0.0 }
 0x711   : > { %v2578_v22 = vpack.c.bf16 %v2562_v14, %v2546_v5  ;;  %v2579_v18 = vpack.c.bf16 %v2563_v16, %v2547_v63 }
 0x713   : > { %2947 = vmatmul.bf16.vlgmr.msra.gmra.mxu2 %v2578_v22  ;;  %2961 = vmatmul.bf16.vlgmr.msrb.gmra.mxu3 %v2579_v18 }
 0x759   : > { %v2752_v20 = vpop.f32.mrf.mxu0  ;;  %v2766_v38 = vpop.f32.mrf.mxu1 }
 0x75a   : > { %v2753_v11 = vadd.f32 %v3823_v1, %v2752_v20 }
 0x75c   : > { %v2767_v23 = vadd.f32 %v2766_v38, %v2753_v11 }
 0x761   : > { %v2754_v9 = vpop.f32.mrf.mxu0  ;;  %v2768_v19 = vpop.f32.mrf.mxu1 }
 0x762   : > { %v2755_v29 = vadd.f32 %v3823_v1, %v2754_v9 }
 0x764   : > { %v2769_v33 = vadd.f32 %v2768_v19, %v2755_v29 }
 0x766   : > { %v2780_v2 = vpop.f32.mrf.mxu2  ;;  %v2794_v10 = vpop.f32.mrf.mxu3 }
 0x767   : > { %v2781_v46 = vadd.f32 %v2780_v2, %v2767_v23 }
 0x769   : > { %v2808_v27 = vpop.f32.mrf.mxu0  ;;  %v2822_v12 = vpop.f32.mrf.mxu1  ;;  %v2795_v56 = vadd.f32 %v2794_v10, %v2781_v46 }
 0x76b   : > { %v2809_v34 = vadd.f32 %v2808_v27, %v2795_v56 }
 0x76d   : > { %v2823_v62 = vadd.f32 %v2822_v12, %v2809_v34 }
 0x76e   : > { %v2782_v13 = vpop.f32.mrf.mxu2  ;;  %v2796_v24 = vpop.f32.mrf.mxu3 }
 0x76f   : > { %v2783_v21 = vadd.f32 %v2782_v13, %v2769_v33 }
 0x771   : > { %v2810_v30 = vpop.f32.mrf.mxu0  ;;  %v2824_v0 = vpop.f32.mrf.mxu1  ;;  %v2797_v40 = vadd.f32 %v2796_v24, %v2783_v21 }
 0x773   : > { %v2811_v44 = vadd.f32 %v2810_v30, %v2797_v40 }
 0x775   : > { %v2825_v17 = vadd.f32 %v2824_v0, %v2811_v44 }
 0x776   : > { %v2836_v35 = vpop.f32.mrf.mxu2  ;;  %v2850_v36 = vpop.f32.mrf.mxu3 }
 0x777   : > { %v2837_v43 = vadd.f32 %v2836_v35, %v2823_v62 }
 0x779   : > { %v2864_v41 = vpop.f32.mrf.mxu0  ;;  %v2878_v32 = vpop.f32.mrf.mxu1  ;;  %v2851_v7 = vadd.f32 %v2850_v36, %v2837_v43 }
 0x77b   : > { %v2865_v51 = vadd.f32 %v2864_v41, %v2851_v7 }
 0x77d   : > { %v2879_v53 = vadd.f32 %v2878_v32, %v2865_v51 }
 0x77e   : > { %v2838_v45 = vpop.f32.mrf.mxu2  ;;  %v2852_v4 = vpop.f32.mrf.mxu3 }
 0x77f   : > { %v2839_v59 = vadd.f32 %v2838_v45, %v2825_v17 }
 0x781   : > { %v2866_v47 = vpop.f32.mrf.mxu0  ;;  %v2853_v54 = vadd.f32 %v2852_v4, %v2839_v59  ;;  %v2880_v42 = vpop.f32.mrf.mxu1  ;;  %v3824_v4 = vld [vmem:[%s722_s30] ss:$0 sm:$0xff]  ;;  %s4982_s30 = sld [smem:[#allocation21_spill]] (!%p3606_p11) }
 0x783   : > { %v2867_v39 = vadd.f32 %v2866_v47, %v2853_v54  ;;  %v3825_v47 = vld [vmem:[%s725_s27] ss:$0 sm:$0xff] }
 0x785   : > { %v2881_v48 = vadd.f32 %v2880_v42, %v2867_v39 }
 0x786   : > { %v2892_v28 = vpop.f32.mrf.mxu2  ;;  %v2906_v52 = vpop.f32.mrf.mxu3 }
 0x787   : > { %v2893_v55 = vadd.f32 %v2892_v28, %v2879_v53 }
 0x789   : > { %v2920_v57 = vpop.f32.mrf.mxu0  ;;  %v2907_v6 = vadd.f32 %v2906_v52, %v2893_v55  ;;  %v2934_v15 = vpop.f32.mrf.mxu1 }
 0x78b   : > { %v2921_v8 = vadd.f32 %v2920_v57, %v2907_v6 }
 0x78d   : > { %v2935_v50 = vadd.f32 %v2934_v15, %v2921_v8 }
 0x78e   : > { %v2894_v58 = vpop.f32.mrf.mxu2  ;;  %v2908_v61 = vpop.f32.mrf.mxu3 }
 0x78f   : > { %v2895_v3 = vadd.f32 %v2894_v58, %v2881_v48 }
 0x791   : > { %v2909_v60 = vadd.f32 %v2908_v61, %v2895_v3  ;;  %v2922_v31 = vpop.f32.mrf.mxu0  ;;  %v2936_v18 = vpop.f32.mrf.mxu1 }
 0x793   : > { %v2923_v14 = vadd.f32 %v2922_v31, %v2909_v60 }
 0x795   : > { %v2937_v20 = vadd.f32 %v2936_v18, %v2923_v14 }
 0x796   : > { %v2948_v37 = vpop.f32.mrf.mxu2  ;;  %v2962_v5 = vpop.f32.mrf.mxu3 }
 0x797   : > { %v2949_v63 = vadd.f32 %v2948_v37, %v2935_v50 }
 0x799   : > { %v2963_v16 = vadd.f32 %v2962_v5, %v2949_v63 }
 0x79b   : > { %v2967_v22 = vadd.f32 %v2963_v16, %v4706_v25 }
 0x79d   : > { %v2971_v38 = vsel %vm780_vm1, %v2967_v22, 0.0 }
 0x79e   : > { %v2950_v9 = vpop.f32.mrf.mxu2  ;;  %2972 = vadd.xlane.f32.xlu1 %v2971_v38  ;;  %v2964_v1 = vpop.f32.mrf.mxu3 }
 0x79f   : > { %v2951_v19 = vadd.f32 %v2950_v9, %v2937_v20 }
 0x7a1   : > { %v2965_v2 = vadd.f32 %v2964_v1, %v2951_v19 }
 0x7a3   : > { %v2968_v10 = vadd.f32 %v2965_v2, %v4708_v49 }
 0x7a5   : > { %v2974_v11 = vsel %vm780_vm1, %v2968_v10, 0.0 }
 0x7a6   : > { %2975 = vadd.xlane.f32.xlu2 %v2974_v11 }
 0x811   : > { %v2973_v27 = vpop.xlane.xlu1 %2972 }
 0x812   : > { %v2977_v12 = vmul.f32 %v2973_v27, %v4636_v26 }
 0x814   : > { %v2979_v23 = vsub.f32 %v2967_v22, %v2977_v12 }
 0x816   : > { %v2981_v46 = vmul.f32 %v2979_v23, %v2979_v23 }
 0x818   : > { %v2983_v25 = vsel %vm780_vm1, %v2981_v46, 0.0 }
 0x819   : > { %v2976_v13 = vpop.xlane.xlu2 %2975  ;;  %2984 = vadd.xlane.f32.xlu0 %v2983_v25 }
 0x81a   : > { %v2978_v24 = vmul.f32 %v2976_v13, %v4636_v26 }
 0x81c   : > { %v2980_v29 = vsub.f32 %v2968_v10, %v2978_v24 }
 0x81e   : > { %v2982_v56 = vmul.f32 %v2980_v29, %v2980_v29 }
 0x820   : > { %v2986_v30 = vsel %vm780_vm1, %v2982_v56, 0.0 }
 0x821   : > { %2987 = vadd.xlane.f32.xlu1 %v2986_v30 }
 0x88c   : > { %v2985_v49 = vpop.xlane.xlu0 %2984 }
 0x88d   : > { %v2989_v33 = vmul.f32 %v2985_v49, %v4636_v26 }
 0x88f   : > { %v2991_v0 = vadd.f32 1e-05, %v2989_v33 }
 0x891   : > { %3896 = vrsqrt.f32 %v2991_v0  ;;  %vm2999_vm2 = vweird.f32 %v2991_v0 }
 0x894   : > { %v2988_v34 = vpop.xlane.xlu1 %2987 }
 0x895   : > { %v2990_v21 = vmul.f32 %v2988_v34, %v4636_v26 }
 0x897   : > { %v3897_v35 = vpop.eup %3896  ;;  %v2992_v36 = vadd.f32 1e-05, %v2990_v21 }
 0x898   : > { %v2994_v62 = vmul.f32 %v3897_v35, %v2991_v0  ;;  %vm3000_vm0 = vweird.f32 %v3897_v35 }
 0x899   : > { %3898 = vrsqrt.f32 %v2992_v36  ;;  %vm3001_vm3 = vmor %vm2999_vm2, %vm3000_vm0  ;;  %vm3009_vm5 = vweird.f32 %v2992_v36 }
 0x89a   : > { %v2995_v40 = vmul.f32 %v3897_v35, %v2994_v62 }
 0x89c   : > { %v2996_v41 = vmul.f32 0.5, %v2995_v40 }
 0x89e   : > { %v2997_v43 = vsub.f32 1.5, %v2996_v41 }
 0x89f   : > { %v3899_v44 = vpop.eup %3898 }
 0x8a0   : > { %v2998_v32 = vmul.f32 %v3897_v35, %v2997_v43  ;;  %v3004_v45 = vmul.f32 %v3899_v44, %v2992_v36  ;;  %vm3010_vm4 = vweird.f32 %v3899_v44 }
 0x8a1   : > { %vm3011_vm6 = vmor %vm3009_vm5, %vm3010_vm4 }
 0x8a2   : > { %v3002_v7 = vsel %vm3001_vm3, %v3897_v35, %v2998_v32  ;;  %v3005_v17 = vmul.f32 %v3899_v44, %v3004_v45 }
 0x8a3   : > { %v3013_v51 = vmul.f32 %v3002_v7, %v2979_v23 }
 0x8a4   : > { %v3006_v59 = vmul.f32 0.5, %v3005_v17 }
 0x8a5   : > { %v3018_v28 = vmul.f32 %v3824_v4, %v3013_v51 }
 0x8a6   : > { %v3007_v52 = vsub.f32 1.5, %v3006_v59 }
 0x8a7   : > { %v3023_v53 = vadd.f32 %v3825_v47, %v3018_v28 }
 0x8a8   : > { %v3008_v54 = vmul.f32 %v3899_v44, %v3007_v52 }
 0x8a9   : > { %3025 = vst.msk [vmem:[#allocation2] sm:$0xff] %vm780_vm1, %v3023_v53 }
 0x8aa   : > { %v3012_v42 = vsel %vm3011_vm6, %v3899_v44, %v3008_v54 }
 0x8ab   : > { %v3014_v55 = vmul.f32 %v3012_v42, %v2980_v29 }
 0x8ad   : > { %v3019_v39 = vmul.f32 %v3824_v4, %v3014_v55  ;;  %3030 = sbr.rel (%p3606_p11) target bundleno = 2503 (0x9c7), region = 100 }
 0x8af   : > { %v3024_v57 = vadd.f32 %v3825_v47, %v3019_v39 }
 0x8b1   : > { %3026 = vst.msk [vmem:[#allocation2 + $0x8] sm:$0xff] %vm780_vm1, %v3024_v57 }
 0x8b2   : > { %v3033_v6 = vsel %vm780_vm1, %v3023_v53, 0.0  ;;  %v3036_v58 = vsel %vm780_vm1, %v3024_v57, 0.0  ;;  %v3902_v12 = vld [vmem:[%s4982_s30] ss:$0 sm:$0xff] }
 0x8b3   : > { %3034 = vadd.xlane.f32.xlu0 %v3033_v6  ;;  %v3903_v25 = vld [vmem:[%s4983_s12] ss:$0 sm:$0xff] }
 0x8bb   : > { %3037 = vadd.xlane.f32.xlu0 %v3036_v58 }
 0x926   : > { %v3035_v61 = vpop.xlane.xlu0 %3034 }
 0x927   : > { %v3039_v48 = vmul.f32 %v3035_v61, %v4636_v26 }
 0x929   : > { %v3041_v8 = vsub.f32 %v3023_v53, %v3039_v48 }
 0x92b   : > { %v3043_v3 = vmul.f32 %v3041_v8, %v3041_v8 }
 0x92d   : > { %v3045_v15 = vsel %vm780_vm1, %v3043_v3, 0.0 }
 0x92e   : > { %3046 = vadd.xlane.f32.xlu1 %v3045_v15  ;;  %v3038_v50 = vpop.xlane.xlu0 %3037 }
 0x92f   : > { %v3040_v60 = vmul.f32 %v3038_v50, %v4636_v26 }
 0x931   : > { %v3042_v31 = vsub.f32 %v3024_v57, %v3040_v60 }
 0x933   : > { %v3044_v37 = vmul.f32 %v3042_v31, %v3042_v31 }
 0x935   : > { %v3048_v5 = vsel %vm780_vm1, %v3044_v37, 0.0 }
 0x936   : > { %3049 = vadd.xlane.f32.xlu1 %v3048_v5 }
 0x9a1   : > { %v3047_v63 = vpop.xlane.xlu1 %3046 }
 0x9a2   : > { %v3051_v14 = vmul.f32 %v3047_v63, %v4636_v26 }
 0x9a4   : > { %v3053_v16 = vadd.f32 1e-05, %v3051_v14 }
 0x9a6   : > { %3904 = vrsqrt.f32 %v3053_v16  ;;  %vm3061_vm8 = vweird.f32 %v3053_v16 }
 0x9a9   : > { %v3050_v22 = vpop.xlane.xlu1 %3049 }
 0x9aa   : > { %v3052_v18 = vmul.f32 %v3050_v22, %v4636_v26 }
 0x9ac   : > { %v3905_v20 = vpop.eup %3904  ;;  %v3054_v38 = vadd.f32 1e-05, %v3052_v18 }
 0x9ad   : > { %v3056_v9 = vmul.f32 %v3905_v20, %v3053_v16  ;;  %vm3062_vm7 = vweird.f32 %v3905_v20 }
 0x9ae   : > { %3906 = vrsqrt.f32 %v3054_v38  ;;  %vm3063_vm9 = vmor %vm3061_vm8, %vm3062_vm7  ;;  %vm3071_vm11 = vweird.f32 %v3054_v38 }
 0x9af   : > { %v3057_v19 = vmul.f32 %v3905_v20, %v3056_v9 }
 0x9b1   : > { %v3058_v1 = vmul.f32 0.5, %v3057_v19 }
 0x9b3   : > { %v3059_v2 = vsub.f32 1.5, %v3058_v1 }
 0x9b4   : > { %v3907_v10 = vpop.eup %3906 }
 0x9b5   : > { %v3060_v11 = vmul.f32 %v3905_v20, %v3059_v2  ;;  %v3066_v27 = vmul.f32 %v3907_v10, %v3054_v38  ;;  %vm3072_vm10 = vweird.f32 %v3907_v10 }
 0x9b6   : > { %vm3073_vm12 = vmor %vm3071_vm11, %vm3072_vm10 }
 0x9b7   : > { %v3064_v23 = vsel %vm3063_vm9, %v3905_v20, %v3060_v11  ;;  %v3067_v46 = vmul.f32 %v3907_v10, %v3066_v27 }
 0x9b8   : > { %v3075_v26 = vmul.f32 %v3064_v23, %v3041_v8 }
 0x9b9   : > { %v3068_v13 = vmul.f32 0.5, %v3067_v46 }
 0x9ba   : > { %v3080_v24 = vmul.f32 %v3902_v12, %v3075_v26 }
 0x9bb   : > { %v3069_v29 = vsub.f32 1.5, %v3068_v13 }
 0x9bc   : > { %v3085_v56 = vadd.f32 %v3903_v25, %v3080_v24 }
 0x9bd   : > { %v3070_v30 = vmul.f32 %v3907_v10, %v3069_v29 }
 0x9be   : > { %3087 = vst.msk [vmem:[%s4984_s0] sm:$0xff] %vm780_vm1, %v3085_v56 }
 0x9bf   : > { %v3074_v49 = vsel %vm3073_vm12, %v3907_v10, %v3070_v30 }
 0x9c0   : > { %v3076_v33 = vmul.f32 %v3074_v49, %v3042_v31 }
 0x9c2   : > { %v3081_v0 = vmul.f32 %v3902_v12, %v3076_v33 }
 0x9c4   : > { %v3086_v34 = vadd.f32 %v3903_v25, %v3081_v0 }
 0x9c6   : > { %3088 = vst.msk [vmem:[%s4984_s0 + $0x8] sm:$0xff] %vm780_vm1, %v3086_v34 }
 0x9c7 PF: > { %s4985_s24 = sld [smem:[#allocation10_spill]]  ;;  %s4988_s21 = smov %s3998_s22 }
 0x9c8   : > { %s4986_s16 = sld [smem:[#allocation9_spill]] }
 0x9c9   : > { %s4987_s23 = sld [smem:[#allocation11_spill]] }
 0x9cd   : > { %p29_p2 = scmp.ge.s32.totalorder %s4985_s24, 8  }
 0x9ce   : > { %s4989_s22 = smov %s4986_s16 }
 0x9cf   :  { %31 = sbr.rel (!%p29_p2) target bundleno = 18 (0x12), region = 171 }
 0x9d4   :  { %3100 = vsyncpa [#allocation4], 1 }
 0x9d5   :  { %3102 = vsyncpa [#allocation4 + $0x1], 1 }
 0x9d6   :  { %3103 = vsyncpa [#allocation6], 1 }
 0x9d7   :  { %3105 = vsyncpa [#allocation6 + $0x1], 1 }

// kernel: translation_model_forward.3
= control target key start
LH: loop header
LB: loop body
LE: loop exit
PB: predicated region body
PF: predicated region fallthrough
CT: control target
= control target key end

     0   :  { %s8248_s0 = inlined_call_operand.vmem [shape: f32[16,32], index: 0, kind: input, shape index: {}]   ;;  %s8249_s1 = inlined_call_operand.vmem [shape: f32[16,32], index: 1, kind: input, shape index: {}]   ;;  %s8250_s2 = inlined_call_operand.vmem [shape: f32[16,8,8], index: 2, kind: input, shape index: {}]   ;;  %s8251_s3 = inlined_call_operand.vmem [shape: bf16[6,32,96], index: 3, kind: input, shape index: {}]   ;;  %s8252_s4 = inlined_call_operand.vmem [shape: f32[6,1,96], index: 4, kind: input, shape index: {}]   ;;  %s8253_s5 = inlined_call_operand.vmem [shape: bf16[6,32,32], index: 5, kind: input, shape index: {}]   ;;  %s8254_s6 = inlined_call_operand.vmem [shape: f32[6,1,32], index: 6, kind: input, shape index: {}]   ;;  %s8255_s7 = inlined_call_operand.hbm [shape: f32[6,1,32], index: 7, kind: input, shape index: {}]   ;;  %s8256_s8 = inlined_call_operand.hbm [shape: f32[6,1,32], index: 8, kind: input, shape index: {}]   ;;  %s8257_s9 = inlined_call_operand.vmem [shape: bf16[6,32,32], index: 9, kind: input, shape index: {}]   ;;  %s8258_s10 = inlined_call_operand.hbm [shape: f32[6,1,32], index: 10, kind: input, shape index: {}]   ;;  %s8259_s11 = inlined_call_operand.vmem [shape: bf16[6,32,64], index: 11, kind: input, shape index: {}]   ;;  %s8260_s12 = inlined_call_operand.hbm [shape: f32[6,1,64], index: 12, kind: input, shape index: {}]   ;;  %s8261_s13 = inlined_call_operand.vmem [shape: bf16[6,32,32], index: 13, kind: input, shape index: {}]   ;;  %s8262_s14 = inlined_call_operand.hbm [shape: f32[6,1,32], index: 14, kind: input, shape index: {}]   ;;  %s8263_s15 = inlined_call_operand.hbm [shape: f32[6,1,32], index: 15, kind: input, shape index: {}]   ;;  %s8264_s16 = inlined_call_operand.hbm [shape: f32[6,1,32], index: 16, kind: input, shape index: {}]   ;;  %s8265_s17 = inlined_call_operand.hbm [shape: bf16[6,32,2048], index: 17, kind: input, shape index: {}]   ;;  %s8266_s18 = inlined_call_operand.vmem [shape: f32[6,1,2048], index: 18, kind: input, shape index: {}]   ;;  %s8267_s19 = inlined_call_operand.hbm [shape: bf16[6,32,2048], index: 19, kind: input, shape index: {}]   ;;  %s8268_s20 = inlined_call_operand.hbm [shape: f32[6,1,32], index: 20, kind: input, shape index: {}]   ;;  %s8269_s21 = inlined_call_operand.hbm [shape: f32[6,1,32], index: 21, kind: input, shape index: {}]   ;;  %s8270_s22 = inlined_call_operand.hbm [shape: f32[6,1,32], index: 22, kind: input, shape index: {}]   ;;  %s8271_s23 = inlined_call_operand.vmem [shape: f32[1,32], index: 23, kind: input, shape index: {}]   ;;  %s8272_s24 = inlined_call_operand.vmem [shape: f32[1,32], index: 24, kind: input, shape index: {}]   ;;  %s8273_s25 = inlined_call_operand.hbm [shape: f32[16,32], index: 25, kind: output, shape index: {}]  }
   0x1   :  { %8301 = sst [smem:[#allocation39_spill]] %s8248_s0 }
   0x2   :  { %8302 = sst [smem:[#allocation40_spill]] %s8249_s1 }
   0x3   :  { %8303 = sst [smem:[#allocation41_spill]] %s8250_s2 }
   0x4   :  { %8304 = sst [smem:[#allocation42_spill]] %s8251_s3 }
   0x5   :  { %8305 = sst [smem:[#allocation43_spill]] %s8252_s4 }
   0x6   :  { %8306 = sst [smem:[#allocation44_spill]] %s8253_s5 }
   0x7   :  { %8307 = sst [smem:[#allocation45_spill]] %s8254_s6 }
   0x8   :  { %8308 = sst [smem:[#allocation46_spill]] %s8255_s7 }
   0x9   :  { %8309 = sst [smem:[#allocation47_spill]] %s8256_s8 }
   0xa   :  { %8310 = sst [smem:[#allocation48_spill]] %s8257_s9 }
   0xb   :  { %8311 = sst [smem:[#allocation49_spill]] %s8258_s10 }
   0xc   :  { %8312 = sst [smem:[#allocation50_spill]] %s8259_s11 }
   0xd   :  { %8313 = sst [smem:[#allocation51_spill]] %s8260_s12 }
   0xe   :  { %8314 = sst [smem:[#allocation52_spill]] %s8261_s13 }
   0xf   :  { %8315 = sst [smem:[#allocation53_spill]] %s8262_s14 }
  0x10   :  { %8316 = sst [smem:[#allocation54_spill]] %s8263_s15 }
  0x11   :  { %8317 = sst [smem:[#allocation55_spill]] %s8264_s16 }
  0x12   :  { %8318 = sst [smem:[#allocation56_spill]] %s8265_s17 }
  0x13   :  { %8319 = sst [smem:[#allocation57_spill]] %s8266_s18 }
  0x14   :  { %8320 = sst [smem:[#allocation58_spill]] %s8267_s19 }
  0x15   :  { %8321 = sst [smem:[#allocation59_spill]] %s8271_s23 }
  0x16   :  { %8322 = sst [smem:[#allocation60_spill]] %s8272_s24 }
  0x17   :  { %8323 = sst [smem:[#allocation61_spill]] %s8273_s25 }
  0x18   :  { %30 = vsyncpa [#allocation4], 0 }
  0x19   :  { %32 = vsyncpa [#allocation4 + $0x1], 0 }
  0x1a   :  { %33 = vsyncpa [#allocation7], 0 }
  0x1b   :  { %35 = vsyncpa [#allocation7 + $0x1], 0 }
  0x1c   :  { %36 = vsyncpa [#allocation10], 0 }
  0x1d   :  { %38 = vsyncpa [#allocation10 + $0x1], 0 }
  0x1e   :  { %39 = vsyncpa [#allocation13], 0 }
  0x1f   :  { %41 = vsyncpa [#allocation13 + $0x1], 0 }
  0x20   :  { %42 = vsyncpa [#allocation16], 0 }
  0x21   :  { %44 = vsyncpa [#allocation16 + $0x1], 0 }
  0x22   :  { %45 = vsyncpa [#allocation19], 0 }
  0x23   :  { %47 = vsyncpa [#allocation19 + $0x1], 0 }
  0x24   :  { %48 = vsyncpa [#allocation22], 0 }
  0x25   :  { %50 = vsyncpa [#allocation22 + $0x1], 0 }
  0x26   :  { %51 = vsyncpa [#allocation5], 0  ;;  %s6862_s29 = smov 0   ;;  %s6864_s2 = smov 0  }
  0x27   :  { %s6866_s6 = smov 0   ;;  %s6868_s30 = smov 0  }
  0x28 LB: > { %8324 = sst [smem:[#allocation32_spill]] %s6701_s2  ;;  %s6881_s7 = sadd.s32 4294967295, %s6709_s30   ;;  %s6709_s30 = sphi %s6868_s30, %s8388_s30   ;;  %s6705_s6 = sphi %s6866_s6, %s8391_s6   ;;  %s6701_s2 = sphi %s6864_s2, %s8390_s2   ;;  %s6697_s29 = sphi %s6862_s29, %s8389_s29  }
  0x29   : > { %8325 = sst [smem:[#allocation33_spill]] %s6705_s6  ;;  %s6884_s3 = sadd.s32 1, %s6709_s30  }
  0x2a   : > { %8326 = sst [smem:[#allocation34_spill]] %s6881_s7  ;;  %s228_s26 = ssub.s32 %s6709_s30, %s6884_s3 }
  0x2b   : > { %8327 = sst [smem:[#allocation35_spill]] %s6884_s3  ;;  %s231_s1 = sadd.s32 1, %s6705_s6 }
  0x2c   : > { %p229_p0 = scmp.eq.s32.totalorder %s228_s26, 0  ;;  %p238_p1 = scmp.ne.s32.totalorder %s6705_s6, %s6701_s2 }
  0x2d   : > { %p239_p2 = scmp.eq.s32.totalorder %s6709_s30, 0  ;;  %p244_p3 = scmp.ne.s32.totalorder %s6701_s2, %s6697_s29 }
  0x2e   : > { %s6894_s8 = scalar_select %p229_p0, %s6705_s6, %s231_s1  }
  0x2f   : > { %p240_p4 = por %p239_p2, %p238_p1  ;;  %p245_p5 = scmp.eq.s32.totalorder %s6881_s7, 0 }
  0x30   : > { %8328 = sst [smem:[#allocation36_spill]] %s6894_s8  ;;  %p5891_p6 = scmp.lt.s32.totalorder %s6709_s30, 6 }
  0x31   : > { %p6898_p7 = por %p245_p5, %p244_p3  ;;  %s6903_s4 = sand.u32 1, %s6705_s6  }
  0x32   : > { %p6905_p8 = pnand %p5891_p6, %p240_p4  ;;  %s6910_s9 = sand.u32 1, %s6709_s30  }
  0x33   : > { %s8329_s27 = scalar_select %p6898_p7, 1, 0 }
  0x34   : > { %s8332_s29 = sld [smem:[#allocation47_spill]]  ;;  %s784_s3 = scalar_lea.vmem [#allocation6], %s6903_s4 }
  0x35   : > { %8330 = sst [smem:[#allocation37_spill]] %s8329_s27  ;;  %s791_s25 = sshll.u32 %s784_s3, 4  ;;  %s792_s25 = int_to_ptr.vmem [resolvable:$true] %s791_s25 }
  0x36   : > { %s8283_s6 = scalar_lea.sflag [#allocation7], %s6910_s9  ;;  %p6920_p10 = pneg %p6905_p8 }
  0x3a   : > { %s8333_s26 = smov %s8332_s29  ;;  %s787_s1 = scalar_lea.hbm %s8332_s29, %s6709_s30 }
  0x3b   : > { %s789_s8 = sshll.u32 %s787_s1, 4  ;;  %s6266_s3 = scalar_lea.hbm %s8333_s26, 6  ;;  %s790_s8 = int_to_ptr.hbm [resolvable:$true] %s789_s8 }
  0x3c   : > { %s6259_s24 = sshra.s32 %s790_s8, 4  ;;  %s6260_s24 = int_to_ptr.hbm [resolvable:$true] %s6259_s24 }
  0x3d   : > { %s6261_s23 = scalar_lea.hbm %s6260_s24, 1  ;;  %p6267_p13 = scmp.lt.s32.totalorder %s6260_s24, %s8333_s26 }
  0x3e   : > { %p6262_p9 = scmp.ne.s32.totalorder %s6260_s24, %s6261_s23  ;;  %p6268_p0 = scmp.lt.s32.totalorder %s6266_s3, %s6261_s23 }
  0x40   : > { %p6264_p11 = pnand %p6920_p10, %p6262_p9  ;;  %p6269_p1 = por %p6268_p0, %p6267_p13 }
  0x42   : > { %p6265_p12 = pneg %p6264_p11 }
  0x44   : > { %p6270_p2 = pnand %p6269_p1, %p6265_p12 }
  0x46   : > { %6273 = shalt.err (!%p6270_p2)
}
  0x47   : > { %5860 = dma.hbm_to_vmem [thread:$0]  (!%p6905_p8), %s790_s8, 16, %s792_s25, %s8283_s6  }
  0x48   : > { %p5312_p3 = scmp.ge.s32.totalorder %s6709_s30, 1  ;;  %p1007_p4 = scmp.lt.s32.totalorder %s6709_s30, 7 }
  0x49   : > { %s8337_s12 = sld [smem:[#allocation51_spill]]  ;;  %s834_s29 = scalar_lea.vmem [#allocation9], %s6903_s4 }
  0x4a   : > { %p6938_p5 = pnand %p5312_p3, %p1007_p4  ;;  %s841_s1 = sshll.u32 %s834_s29, 4  ;;  %s842_s1 = int_to_ptr.vmem [resolvable:$true] %s841_s1 }
  0x4b   : > { %s8286_s26 = scalar_lea.sflag [#allocation10], %s6910_s9 }
  0x4c   : > { %s8335_s5 = scalar_select %p6938_p5, 1, 0 }
  0x4e   : > { %8336 = sst [smem:[#allocation38_spill]] %s8335_s5 }
  0x4f   : > { %s837_s0 = scalar_lea.hbm %s8337_s12, %s6709_s30  ;;  %s6296_s6 = scalar_lea.hbm %s8337_s12, 6 }
  0x50   : > { %s839_s3 = sshll.u32 %s837_s0, 4  ;;  %s840_s3 = int_to_ptr.hbm [resolvable:$true] %s839_s3 }
  0x51   : > { %s6289_s13 = sshra.s32 %s840_s3, 4  ;;  %s6290_s13 = int_to_ptr.hbm [resolvable:$true] %s6289_s13 }
  0x52   : > { %s6291_s11 = scalar_lea.hbm %s6290_s13, 1  ;;  %p6297_p12 = scmp.lt.s32.totalorder %s6290_s13, %s8337_s12 }
  0x53   : > { %p6292_p6 = scmp.ne.s32.totalorder %s6290_s13, %s6291_s11  ;;  %p6298_p13 = scmp.lt.s32.totalorder %s6296_s6, %s6291_s11 }
  0x55   : > { %p6294_p9 = pnand %p6292_p6, %p6920_p10  ;;  %p6299_p0 = por %p6298_p13, %p6297_p12 }
  0x57   : > { %p6295_p11 = pneg %p6294_p9 }
  0x59   : > { %p6300_p1 = pnand %p6299_p0, %p6295_p11 }
  0x5b   : > { %6303 = shalt.err (!%p6300_p1)
}
  0x5c   : > { %5866 = dma.hbm_to_vmem [thread:$0]  (!%p6905_p8), %s840_s3, 16, %s842_s1, %s8286_s26  }
  0x5d   : > { %s8338_s15 = sld [smem:[#allocation54_spill]]  ;;  %s876_s25 = scalar_lea.vmem [#allocation12], %s6903_s4 }
  0x5e   : > { %s883_s7 = sshll.u32 %s876_s25, 4  ;;  %s8287_s11 = scalar_lea.sflag [#allocation13], %s6910_s9  ;;  %s884_s7 = int_to_ptr.vmem [resolvable:$true] %s883_s7 }
  0x63   : > { %s879_s29 = scalar_lea.hbm %s8338_s15, %s6709_s30  ;;  %s6326_s3 = scalar_lea.hbm %s8338_s15, 6 }
  0x64   : > { %s881_s13 = sshll.u32 %s879_s29, 4  ;;  %s882_s13 = int_to_ptr.hbm [resolvable:$true] %s881_s13 }
  0x65   : > { %s6319_s6 = sshra.s32 %s882_s13, 4  ;;  %s6320_s6 = int_to_ptr.hbm [resolvable:$true] %s6319_s6 }
  0x66   : > { %s6321_s8 = scalar_lea.hbm %s6320_s6, 1  ;;  %p6327_p6 = scmp.lt.s32.totalorder %s6320_s6, %s8338_s15 }
  0x67   : > { %p6322_p2 = scmp.ne.s32.totalorder %s6320_s6, %s6321_s8  ;;  %p6328_p9 = scmp.lt.s32.totalorder %s6326_s3, %s6321_s8 }
  0x69   : > { %p6324_p3 = pnand %p6322_p2, %p6920_p10  ;;  %p6329_p11 = por %p6328_p9, %p6327_p6 }
  0x6b   : > { %p6325_p4 = pneg %p6324_p3 }
  0x6d   : > { %p6330_p12 = pnand %p6329_p11, %p6325_p4 }
  0x6f   : > { %6333 = shalt.err (!%p6330_p12)
}
  0x70   : > { %5872 = dma.hbm_to_vmem [thread:$0]  (!%p6905_p8), %s882_s13, 16, %s884_s7, %s8287_s11  }
  0x71   : > { %s5306_s0 = sshll.u32 %s6903_s4, 8  ;;  %s5745_s12 = sshll.u32 %s6709_s30, 8 }
  0x72   : > { %s8339_s17 = sld [smem:[#allocation56_spill]]  ;;  %s911_s8 = scalar_lea.vmem [#allocation15], %s5306_s0 }
  0x73   : > { %s919_s3 = sshll.u32 %s911_s8, 4  ;;  %s8292_s1 = scalar_lea.sflag [#allocation16], %s6910_s9  ;;  %s920_s3 = int_to_ptr.vmem [resolvable:$true] %s919_s3 }
  0x78   : > { %s916_s23 = scalar_lea.hbm %s8339_s17, %s5745_s12  ;;  %s6356_s11 = scalar_lea.hbm %s8339_s17, 1536 }
  0x79   : > { %s917_s6 = sshll.u32 %s916_s23, 4  ;;  %s918_s6 = int_to_ptr.hbm [resolvable:$true] %s917_s6 }
  0x7a   : > { %s6349_s24 = sshra.s32 %s918_s6, 4  ;;  %s6350_s24 = int_to_ptr.hbm [resolvable:$true] %s6349_s24 }
  0x7b   : > { %s6351_s26 = scalar_lea.hbm %s6350_s24, 256  ;;  %p6357_p2 = scmp.lt.s32.totalorder %s6350_s24, %s8339_s17 }
  0x7c   : > { %p6352_p13 = scmp.ne.s32.totalorder %s6350_s24, %s6351_s26  ;;  %p6358_p3 = scmp.lt.s32.totalorder %s6356_s11, %s6351_s26 }
  0x7e   : > { %p6354_p0 = pnand %p6352_p13, %p6920_p10  ;;  %p6359_p4 = por %p6358_p3, %p6357_p2 }
  0x80   : > { %p6355_p1 = pneg %p6354_p0 }
  0x82   : > { %p6360_p6 = pnand %p6359_p4, %p6355_p1 }
  0x84   : > { %6363 = shalt.err (!%p6360_p6)
}
  0x85   : > { %s6711_s25 = smov 1024   ;;  %s6712_s23 = smov 64  }
  0x86   : > { %5878 = dma.hbm_to_vmem [thread:$0]  (!%p6905_p8), %s918_s6, 4096, %s920_s3, %s8292_s1, %s6711_s25, %s6711_s25, %s6712_s23  }
  0x87   : > { %s8340_s19 = sld [smem:[#allocation58_spill]]  ;;  %s940_s24 = scalar_lea.vmem [#allocation17], %s5306_s0 }
  0x88   : > { %s948_s7 = sshll.u32 %s940_s24, 4  ;;  %s964_s17 = scalar_lea.hbm %s8268_s20, %s6709_s30  ;;  %s7004_s7 = int_to_ptr.vmem [resolvable:$true] %s948_s7 }
  0x89   : > { %s961_s27 = scalar_lea.vmem [#allocation18], %s6903_s4  ;;  %s966_s5 = sshll.u32 %s964_s17, 4  ;;  %s967_s5 = int_to_ptr.hbm [resolvable:$true] %s966_s5 }
  0x8a   : > { %s968_s2 = sshll.u32 %s961_s27, 4  ;;  %s8293_s6 = scalar_lea.sflag [#allocation19], %s6910_s9  ;;  %s969_s2 = int_to_ptr.vmem [resolvable:$true] %s968_s2 }
  0x8b   : > { %s6379_s3 = sshra.s32 %s967_s5, 4  ;;  %s6386_s15 = scalar_lea.hbm %s8268_s20, 6  ;;  %s6380_s3 = int_to_ptr.hbm [resolvable:$true] %s6379_s3 }
  0x8c   : > { %p6387_p13 = scmp.lt.s32.totalorder %s6380_s3, %s8268_s20 }
  0x8d   : > { %s945_s26 = scalar_lea.hbm %s8340_s19, %s5745_s12  ;;  %s6381_s12 = scalar_lea.hbm %s6380_s3, 1 }
  0x8e   : > { %s946_s11 = sshll.u32 %s945_s26, 4  ;;  %p6382_p9 = scmp.ne.s32.totalorder %s6380_s3, %s6381_s12  ;;  %s7002_s11 = int_to_ptr.hbm [resolvable:$true] %s946_s11 }
  0x8f   : > { %p6388_p0 = scmp.lt.s32.totalorder %s6386_s15, %s6381_s12 }
  0x90   : > { %p6384_p11 = pnand %p6382_p9, %p6920_p10 }
  0x91   : > { %p6389_p1 = por %p6388_p0, %p6387_p13 }
  0x92   : > { %p6385_p12 = pneg %p6384_p11 }
  0x94   : > { %p6390_p2 = pnand %p6389_p1, %p6385_p12 }
  0x96   : > { %6393 = shalt.err (!%p6390_p2)
}
  0x97   : > { %5884 = dma.hbm_to_vmem [thread:$0]  (!%p6905_p8), %s967_s5, 16, %s969_s2, %s8293_s6  }
  0x98   : > { %s8341_s13 = sld [smem:[#allocation46_spill]]  ;;  %s767_s8 = scalar_lea.vmem [#allocation3], %s6903_s4 }
  0x99   : > { %s774_s3 = sshll.u32 %s767_s8, 4  ;;  %s765_s12 = scalar_lea.sflag [#allocation4], %s6903_s4  ;;  %s775_s3 = int_to_ptr.vmem [resolvable:$true] %s774_s3 }
  0x9e   : > { %s770_s29 = scalar_lea.hbm %s8341_s13, %s6709_s30  ;;  %s6416_s2 = scalar_lea.hbm %s8341_s13, 6 }
  0x9f   : > { %s772_s0 = sshll.u32 %s770_s29, 4  ;;  %s773_s0 = int_to_ptr.hbm [resolvable:$true] %s772_s0 }
  0xa0   : > { %s6409_s15 = sshra.s32 %s773_s0, 4  ;;  %s6410_s15 = int_to_ptr.hbm [resolvable:$true] %s6409_s15 }
  0xa1   : > { %s6411_s26 = scalar_lea.hbm %s6410_s15, 1  ;;  %p6417_p9 = scmp.lt.s32.totalorder %s6410_s15, %s8341_s13 }
  0xa2   : > { %p6412_p3 = scmp.ne.s32.totalorder %s6410_s15, %s6411_s26  ;;  %p6418_p11 = scmp.lt.s32.totalorder %s6416_s2, %s6411_s26 }
  0xa4   : > { %p6414_p4 = pnand %p6412_p3, %p6920_p10  ;;  %p6419_p12 = por %p6418_p11, %p6417_p9 }
  0xa6   : > { %p6415_p6 = pneg %p6414_p4 }
  0xa8   : > { %p6420_p13 = pnand %p6419_p12, %p6415_p6 }
  0xaa   : > { %6423 = shalt.err (!%p6420_p13)
}
  0xab   : > { %5857 = dma.hbm_to_vmem [thread:$0]  (!%p6905_p8), %s773_s0, 16, %s775_s3, %s765_s12  }
  0xac   : > { %s8342_s10 = sld [smem:[#allocation49_spill]]  ;;  %s809_s24 = scalar_lea.vmem [#allocation8], %s6903_s4 }
  0xad   : > { %s816_s6 = sshll.u32 %s809_s24, 4  ;;  %s817_s6 = int_to_ptr.vmem [resolvable:$true] %s816_s6 }
  0xb2   : > { %s812_s8 = scalar_lea.hbm %s8342_s10, %s6709_s30  ;;  %s6446_s0 = scalar_lea.hbm %s8342_s10, 6 }
  0xb3   : > { %s814_s1 = sshll.u32 %s812_s8, 4  ;;  %s815_s1 = int_to_ptr.hbm [resolvable:$true] %s814_s1 }
  0xb4   : > { %s6439_s15 = sshra.s32 %s815_s1, 4  ;;  %s6440_s15 = int_to_ptr.hbm [resolvable:$true] %s6439_s15 }
  0xb5   : > { %s6441_s26 = scalar_lea.hbm %s6440_s15, 1  ;;  %p6447_p3 = scmp.lt.s32.totalorder %s6440_s15, %s8342_s10 }
  0xb6   : > { %p6442_p0 = scmp.ne.s32.totalorder %s6440_s15, %s6441_s26  ;;  %p6448_p4 = scmp.lt.s32.totalorder %s6446_s0, %s6441_s26 }
  0xb8   : > { %p6444_p1 = pnand %p6442_p0, %p6920_p10  ;;  %p6449_p6 = por %p6448_p4, %p6447_p3 }
  0xba   : > { %p6445_p2 = pneg %p6444_p1 }
  0xbc   : > { %p6450_p9 = pnand %p6449_p6, %p6445_p2 }
  0xbe   : > { %6453 = shalt.err (!%p6450_p9)
}
  0xbf   : > { %s8343_s17 = scalar_lea.sflag [#allocation7], %s6910_s9  ;;  %s8344_s14 = sld [smem:[#allocation53_spill]] }
  0xc0   : > { %5863 = dma.hbm_to_vmem [thread:$0]  (!%p6905_p8), %s815_s1, 16, %s817_s6, %s8343_s17  }
  0xc1   : > { %s859_s2 = scalar_lea.vmem [#allocation11], %s6903_s4 }
  0xc2   : > { %s866_s5 = sshll.u32 %s859_s2, 4  ;;  %s867_s5 = int_to_ptr.vmem [resolvable:$true] %s866_s5 }
  0xc5   : > { %s862_s8 = scalar_lea.hbm %s8344_s14, %s6709_s30  ;;  %s6476_s6 = scalar_lea.hbm %s8344_s14, 6 }
  0xc6   : > { %s864_s24 = sshll.u32 %s862_s8, 4  ;;  %s865_s24 = int_to_ptr.hbm [resolvable:$true] %s864_s24 }
  0xc7   : > { %s6469_s15 = sshra.s32 %s865_s24, 4  ;;  %s6470_s15 = int_to_ptr.hbm [resolvable:$true] %s6469_s15 }
  0xc8   : > { %s6471_s26 = scalar_lea.hbm %s6470_s15, 1  ;;  %p6477_p0 = scmp.lt.s32.totalorder %s6470_s15, %s8344_s14 }
  0xc9   : > { %p6472_p11 = scmp.ne.s32.totalorder %s6470_s15, %s6471_s26  ;;  %p6478_p1 = scmp.lt.s32.totalorder %s6476_s6, %s6471_s26 }
  0xcb   : > { %p6474_p12 = pnand %p6472_p11, %p6920_p10  ;;  %p6479_p2 = por %p6478_p1, %p6477_p0 }
  0xcd   : > { %p6475_p13 = pneg %p6474_p12 }
  0xcf   : > { %p6480_p3 = pnand %p6479_p2, %p6475_p13 }
  0xd1   : > { %6483 = shalt.err (!%p6480_p3)
}
  0xd2   : > { %s8345_s17 = scalar_lea.sflag [#allocation10], %s6910_s9  ;;  %s8346_s16 = sld [smem:[#allocation55_spill]] }
  0xd3   : > { %5869 = dma.hbm_to_vmem [thread:$0]  (!%p6905_p8), %s865_s24, 16, %s867_s5, %s8345_s17  }
  0xd4   : > { %s893_s0 = scalar_lea.vmem [#allocation14], %s6903_s4 }
  0xd5   : > { %s900_s3 = sshll.u32 %s893_s0, 4  ;;  %s901_s3 = int_to_ptr.vmem [resolvable:$true] %s900_s3 }
  0xd8   : > { %s896_s8 = scalar_lea.hbm %s8346_s16, %s6709_s30  ;;  %s6506_s24 = scalar_lea.hbm %s8346_s16, 6 }
  0xd9   : > { %s898_s2 = sshll.u32 %s896_s8, 4  ;;  %s899_s2 = int_to_ptr.hbm [resolvable:$true] %s898_s2 }
  0xda   : > { %s6499_s15 = sshra.s32 %s899_s2, 4  ;;  %s6500_s15 = int_to_ptr.hbm [resolvable:$true] %s6499_s15 }
  0xdb   : > { %s6501_s26 = scalar_lea.hbm %s6500_s15, 1  ;;  %p6507_p11 = scmp.lt.s32.totalorder %s6500_s15, %s8346_s16 }
  0xdc   : > { %p6502_p4 = scmp.ne.s32.totalorder %s6500_s15, %s6501_s26  ;;  %p6508_p12 = scmp.lt.s32.totalorder %s6506_s24, %s6501_s26 }
  0xde   : > { %p6504_p6 = pnand %p6502_p4, %p6920_p10  ;;  %p6509_p13 = por %p6508_p12, %p6507_p11 }
  0xe0   : > { %p6505_p9 = pneg %p6504_p6 }
  0xe2   : > { %p6510_p0 = pnand %p6509_p13, %p6505_p9 }
  0xe4   : > { %6513 = shalt.err (!%p6510_p0)
}
  0xe5   : > { %s8347_s17 = scalar_lea.sflag [#allocation13], %s6910_s9  ;;  %s6529_s27 = sshra.s32 %s7002_s11, 4  ;;  %s6530_s27 = int_to_ptr.hbm [resolvable:$true] %s6529_s27 }
  0xe6   : > { %5875 = dma.hbm_to_vmem [thread:$0]  (!%p6905_p8), %s899_s2, 16, %s901_s3, %s8347_s17  }
  0xe7   : > { %s6531_s29 = scalar_lea.hbm %s6530_s27, 256  ;;  %s6536_s15 = scalar_lea.hbm %s8340_s19, 1536 }
  0xe8   : > { %p6532_p1 = scmp.ne.s32.totalorder %s6530_s27, %s6531_s29  ;;  %p6537_p4 = scmp.lt.s32.totalorder %s6530_s27, %s8340_s19 }
  0xe9   : > { %p6538_p6 = scmp.lt.s32.totalorder %s6536_s15, %s6531_s29 }
  0xea   : > { %p6534_p2 = pnand %p6532_p1, %p6920_p10 }
  0xeb   : > { %p6539_p9 = por %p6538_p6, %p6537_p4 }
  0xec   : > { %p6535_p3 = pneg %p6534_p2 }
  0xee   : > { %p6540_p11 = pnand %p6539_p9, %p6535_p3 }
  0xf0   : > { %6543 = shalt.err (!%p6540_p11)
}
  0xf1   : > { %s8348_s2 = scalar_lea.sflag [#allocation16], %s6910_s9  ;;  %s981_s24 = scalar_lea.hbm %s8269_s21, %s6709_s30 }
  0xf2   : > { %5881 = dma.hbm_to_vmem [thread:$0]  (!%p6905_p8), %s7002_s11, 4096, %s7004_s7, %s8348_s2, %s6711_s25, %s6711_s25, %s6712_s23  }
  0xf3   : > { %s983_s5 = sshll.u32 %s981_s24, 4  ;;  %s978_s12 = scalar_lea.vmem [#allocation20], %s6903_s4  ;;  %s984_s5 = int_to_ptr.hbm [resolvable:$true] %s983_s5 }
  0xf4   : > { %s985_s17 = sshll.u32 %s978_s12, 4  ;;  %s6559_s27 = sshra.s32 %s984_s5, 4  ;;  %s986_s17 = int_to_ptr.vmem [resolvable:$true] %s985_s17  ;;  %s6560_s27 = int_to_ptr.hbm [resolvable:$true] %s6559_s27 }
  0xf5   : > { %s6561_s29 = scalar_lea.hbm %s6560_s27, 1  ;;  %s6566_s25 = scalar_lea.hbm %s8269_s21, 6 }
  0xf6   : > { %p6562_p12 = scmp.ne.s32.totalorder %s6560_s27, %s6561_s29  ;;  %p6567_p1 = scmp.lt.s32.totalorder %s6560_s27, %s8269_s21 }
  0xf7   : > { %p6568_p2 = scmp.lt.s32.totalorder %s6566_s25, %s6561_s29 }
  0xf8   : > { %p6564_p13 = pnand %p6562_p12, %p6920_p10 }
  0xf9   : > { %p6569_p3 = por %p6568_p2, %p6567_p1 }
  0xfa   : > { %p6565_p0 = pneg %p6564_p13 }
  0xfc   : > { %p6570_p4 = pnand %p6569_p3, %p6565_p0 }
  0xfe   : > { %6573 = shalt.err (!%p6570_p4)
}
  0xff   : > { %s8349_s7 = scalar_lea.sflag [#allocation19], %s6910_s9  ;;  %s998_s6 = scalar_lea.hbm %s8270_s22, %s6709_s30 }
 0x100   : > { %5887 = dma.hbm_to_vmem [thread:$0]  (!%p6905_p8), %s984_s5, 16, %s986_s17, %s8349_s7  }
 0x101   : > { %s995_s2 = scalar_lea.vmem [#allocation21], %s6903_s4  ;;  %s1000_s1 = sshll.u32 %s998_s6, 4  ;;  %s1001_s1 = int_to_ptr.hbm [resolvable:$true] %s1000_s1 }
 0x102   : > { %s1002_s3 = sshll.u32 %s995_s2, 4  ;;  %s993_s24 = scalar_lea.sflag [#allocation22], %s6903_s4  ;;  %s1003_s3 = int_to_ptr.vmem [resolvable:$true] %s1002_s3 }
 0x103   : > { %s6589_s12 = sshra.s32 %s1001_s1, 4  ;;  %s6596_s5 = scalar_lea.hbm %s8270_s22, 6  ;;  %s6590_s12 = int_to_ptr.hbm [resolvable:$true] %s6589_s12 }
 0x104   : > { %s6591_s27 = scalar_lea.hbm %s6590_s12, 1  ;;  %p6597_p12 = scmp.lt.s32.totalorder %s6590_s12, %s8270_s22 }
 0x105   : > { %p6592_p6 = scmp.ne.s32.totalorder %s6590_s12, %s6591_s27  ;;  %p6598_p13 = scmp.lt.s32.totalorder %s6596_s5, %s6591_s27 }
 0x107   : > { %p6594_p9 = pnand %p6592_p6, %p6920_p10  ;;  %p6599_p0 = por %p6598_p13, %p6597_p12 }
 0x109   : > { %p6595_p11 = pneg %p6594_p9 }
 0x10b   : > { %p6600_p1 = pnand %p6599_p0, %p6595_p11 }
 0x10d   : > { %6603 = shalt.err (!%p6600_p1)
}
 0x10e   : > { %5890 = dma.hbm_to_vmem [thread:$0]  (!%p6905_p8), %s1001_s1, 16, %s1003_s3, %s993_s24  }
 0x10f   : > { %1011 = sbr.rel (%p6938_p5) target bundleno = 4113 (0x1011), region = 120  ;;  %s8351_s18 = sld [smem:[#allocation32_spill]] (!%p6938_p5) }
 0x115   : > { %s7145_s0 = sand.u32 1, %s8351_s18  }
 0x116   : > { %s1014_s25 = scalar_lea.sflag [#allocation4], %s7145_s0 }
 0x117   : > { %6664 = dma.done.wait (%p6898_p7), %s1014_s25, 16  }
 0x118   : > { %6666 = vsyncadd (%p6898_p7), %s1014_s25, 4294967280  ;;  %s8353_s11 = sld [smem:[#allocation34_spill]] }
 0x11e   : > { %s1022_s28 = sand.u32 1, %s8353_s11  }
 0x11f   : > { %s1023_s7 = scalar_lea.sflag [#allocation7], %s1022_s28 }
 0x120   : > { %6668 = dma.done.wait (%p6898_p7), %s1023_s7, 32  }
 0x121   : > { %6670 = vsyncadd (%p6898_p7), %s1023_s7, 4294967264  ;;  %s1041_s6 = scalar_lea.sflag [#allocation10], %s1022_s28 }
 0x122   : > { %6672 = dma.done.wait (%p6898_p7), %s1041_s6, 32  }
 0x123   : > { %6674 = vsyncadd (%p6898_p7), %s1041_s6, 4294967264  ;;  %s1059_s1 = scalar_lea.sflag [#allocation13], %s1022_s28 }
 0x124   : > { %6676 = dma.done.wait (%p6898_p7), %s1059_s1, 32  }
 0x125   : > { %6678 = vsyncadd (%p6898_p7), %s1059_s1, 4294967264  ;;  %s5313_s12 = sshll.u32 %s7145_s0, 8  ;;  %s1077_s9 = scalar_lea.sflag [#allocation16], %s1022_s28 }
 0x126   : > { %s7173_s29 = scalar_lea.vmem [#allocation15], %s5313_s12 }
 0x127   : > { %6680 = dma.done.wait (%p6898_p7), %s1077_s9, 8192  }
 0x128   : > { %6682 = vsyncadd (%p6898_p7), %s1077_s9, 4294959104  ;;  %s7179_s5 = scalar_lea.vmem [#allocation17], %s5313_s12  ;;  %s1097_s17 = scalar_lea.sflag [#allocation19], %s1022_s28 }
 0x129   : > { %6684 = dma.done.wait (%p6898_p7), %s1097_s17, 32  }
 0x12a   : > { %6686 = vsyncadd (%p6898_p7), %s1097_s17, 4294967264  ;;  %s1115_s18 = scalar_lea.sflag [#allocation22], %s7145_s0 }
 0x12b   : > { %6688 = dma.done.wait (%p6898_p7), %s1115_s18, 16  }
 0x12c   : > { %6690 = vsyncadd (%p6898_p7), %s1115_s18, 4294967280  ;;  %p1260_p8 = scmp.lt.s32.totalorder %s8353_s11, 5  ;;  %s8354_s12 = sld [smem:[#allocation43_spill]] }
 0x12d   : > { %s8355_s30 = sld [smem:[#allocation42_spill]]  ;;  %p5326_p7 = scmp.ne.s32.totalorder %s8353_s11, 0 }
 0x12e   : > { %s7195_s28 = scalar_select %p1260_p8, %s8353_s11, 5 }
 0x12f   : > { %s8356_s18 = sld [smem:[#allocation44_spill]] }
 0x130   : > { %s5747_s7 = sshll.u32 %s7195_s28, 4  ;;  %s8357_s15 = sld [smem:[#allocation45_spill]] }
 0x131   : > { %s8358_s13 = sld [smem:[#allocation48_spill]] }
 0x132   : > { %s1267_s9 = scalar_lea.vmem %s8354_s12, %s7195_s28  ;;  %s8359_s12 = sld [smem:[#allocation50_spill]] }
 0x133   : > { %s1264_s8 = scalar_lea.vmem %s8355_s30, %s5747_s7  ;;  %s8360_s17 = sld [smem:[#allocation52_spill]] }
 0x134   : > { %s8361_s19 = sld [smem:[#allocation57_spill]] }
 0x135   : > { %s7208_s24 = scalar_lea.vmem %s8356_s18, %s5747_s7 }
 0x136   : > { %s1275_s23 = scalar_lea.vmem %s8357_s15, %s7195_s28  ;;  %1299 = sbr.rel (%p5326_p7) target bundleno = 320 (0x140), region = 172 }
 0x137   : > { %s7217_s14 = scalar_lea.vmem %s8358_s13, %s5747_s7  ;;  %s8362_s15 = sld [smem:[#allocation39_spill]] (!%p5326_p7) }
 0x138   : > { %s7222_s16 = scalar_lea.vmem %s8359_s12, %s5747_s7 }
 0x139   : > { %s7227_s27 = scalar_lea.vmem %s8360_s17, %s5747_s7 }
 0x13a   : > { %s7232_s26 = scalar_lea.vmem %s8361_s19, %s5747_s7 }
 0x13b   : > { %vm1302_vm0 = vcmask 261120  }
 0x13d   : > { %v1300_v0 = vld [vmem:[%s8362_s15] sm:$0xff]  ;;  %v1301_v1 = vld [vmem:[%s8362_s15 + $0x8] sm:$0xff] }
 0x13e   : > { %1303 = vst.msk [vmem:[#allocation2] sm:$0xff] %vm1302_vm0, %v1300_v0 }
 0x13f   : > { %1304 = vst.msk [vmem:[#allocation2 + $0x8] sm:$0xff] %vm1302_vm0, %v1301_v1 }
 0x140 PF: > { %v5753_v2 = vld [vmem:[%s1264_s8 + $0x8] sm:$0xff]  ;;  %v5752_v3 = vld [vmem:[%s1264_s8] sm:$0xff]  ;;  %vm1351_vm1 = vcmask 261120   ;;  %s6713_s19 = smov 112   ;;  %s6714_s11 = smov 124   ;;  %vm1401_vm2 = vcmask 31744  }
 0x141   : > { %1361 = vmatpush.bf16.msra.mxu0 %v5753_v2  ;;  %v6097_v7 = vld [vmem:[%s1267_s9] ss:$0 sm:$0xff]  ;;  %s6715_s8 = smov 116   ;;  %s6716_s7 = smov 120   ;;  %vm1848_vm3 = vcmask 64512   ;;  %vm2501_vm4 = vcmask 97280  }
 0x142   : > { %s6717_s9 = smov 104   ;;  %s6718_s6 = smov 108   ;;  %vm2504_vm5 = vcmask 130048   ;;  %vm2507_vm6 = vcmask 162816   ;;  %vm2510_vm7 = vcmask 195584   ;;  %vm2513_vm8 = vcmask 228352  }
 0x143   : > { %s6719_s1 = smov 96   ;;  %s6720_s12 = smov 100  }
 0x144   : > { %s6721_s30 = smov 64   ;;  %s8363_s4 = sld [smem:[#allocation41_spill]] }
 0x145   : > { %v1305_v4 = vld [vmem:[#allocation2] sm:$0xff]  ;;  %1362 = vmatpush.bf16.msra.mxu0 %v5752_v3  ;;  %s8300_s13 = smov 8   ;;  %s8299_s2 = smov 12  }
 0x146   : > { %v1306_v5 = vld [vmem:[#allocation2 + $0x8] sm:$0xff]  ;;  %s8297_s3 = smov 20   ;;  %s8298_s25 = smov 16  }
 0x147   : > { %v1335_v6 = vpack.c.bf16 %v1306_v5, %v1305_v4  ;;  %s8296_s17 = smov 28   ;;  %s8295_s18 = smov 24  }
 0x148   : > { %s8369_s28 = scalar_lea.vmem [#allocation8], %s7145_s0 }
 0x149   : > { %5335 = vmatmul.msk.bf16.vlgmr.msra.gmra.mxu0 %vm1351_vm1, %v1335_v6 }
 0x14a   : > { %v1319_v52 = vld [vmem:[%s8363_s4] sm:$0xff]  ;;  %v1320_v60 = vld [vmem:[%s8363_s4 + $0x8] sm:$0xff]  ;;  %v1321_v6 = vld [vmem:[%s8363_s4 + $0x10] sm:$0xff] }
 0x14b   : > { %v1323_v1 = vld [vmem:[%s8363_s4 + $0x20] sm:$0xff] }
 0x1c6   : > { %v1364_v8 = vpop.f32.mrf.mxu0 }
 0x1c7   : > { %v1365_v9 = vadd.f32 %v6097_v7, %v1364_v8 }
 0x1c9   : > { %1383 = vrot.lane.b32.xlu2 %v1365_v9, %s6713_s19  ;;  %1371 = vrot.lane.b32.xlu0 %v1365_v9, %s6714_s11 }
 0x1ce   : > { %v1366_v10 = vpop.f32.mrf.mxu0 }
 0x1cf   : > { %v1367_v11 = vadd.f32 %v6097_v7, %v1366_v10 }
 0x1d1   : > { %1373 = vrot.lane.b32.xlu1 %v1367_v11, %s6714_s11  ;;  %1381 = vrot.lane.b32.xlu2 %v1367_v11, %s6715_s8 }
 0x1d2   : > { %1375 = vrot.lane.b32.xlu0 %v1365_v9, %s6716_s7 }
 0x1d9   : > { %1377 = vrot.lane.b32.xlu1 %v1367_v11, %s6716_s7  ;;  %1391 = vrot.lane.b32.xlu2 %v1365_v9, %s6717_s9 }
 0x1da   : > { %1389 = vrot.lane.b32.xlu0 %v1367_v11, %s6718_s6 }
 0x1e1   : > { %1379 = vrot.lane.b32.xlu1 %v1365_v9, %s6715_s8  ;;  %1385 = vrot.lane.b32.xlu2 %v1367_v11, %s6713_s19 }
 0x1e2   : > { %1399 = vrot.lane.b32.xlu0 %v1365_v9, %s6719_s1 }
 0x1e9   : > { %1397 = vrot.lane.b32.xlu1 %v1367_v11, %s6720_s12  ;;  %1393 = vrot.lane.b32.xlu2 %v1367_v11, %s6717_s9 }
 0x1ea   : > { %1387 = vrot.lane.b32.xlu0 %v1365_v9, %s6718_s6 }
 0x1f1   : > { %1426 = vrot.lane.b32.xlu1 %v1367_v11, %s6719_s1 }
 0x1f2   : > { %1395 = vrot.lane.b32.xlu0 %v1365_v9, %s6720_s12 }
 0x223   : > { %v7258_v12 = vpop.permute.xlu2 %1383 }
 0x22b   : > { %v1382_v16 = vpop.permute.xlu2 %1381 }
 0x233   : > { %v7272_v19 = vpop.permute.xlu2 %1391 }
 0x23b   : > { %v1372_v13 = vpop.permute.xlu0 %1371  ;;  %v7284_v22 = vpop.permute.xlu2 %1385 }
 0x23c   : > { %1452 = vrot.lane.b32.xlu1 %v1372_v13, %s6719_s1  ;;  %v5947_v29 = vpack.i.bf16 %v1372_v13, %v1367_v11 }
 0x243   : > { %v1374_v14 = vpop.permute.xlu1 %1373  ;;  %v7296_v25 = vpop.permute.xlu2 %1393 }
 0x244   : > { %v1376_v15 = vpop.permute.xlu0 %1375  ;;  %1478 = vrot.lane.b32.xlu0 %v1374_v14, %s6719_s1  ;;  %v5952_v27 = vpack.i.bf16 %v1374_v14, %v1365_v9 }
 0x245   : > { %1504 = vrot.lane.b32.xlu2 %v1376_v15, %s6719_s1  ;;  %v5957_v30 = vpack.i.bf16 %v1382_v16, %v1376_v15 }
 0x24b   : > { %v7263_v17 = vpop.permute.xlu1 %1377 }
 0x24c   : > { %v7265_v18 = vpop.permute.xlu0 %1389  ;;  %1608 = vrot.lane.b32.xlu0 %v7258_v12, %s6719_s1  ;;  %1530 = vrot.lane.b32.xlu1 %v7263_v17, %s6719_s1 }
 0x24d   : > { %1582 = vrot.lane.b32.xlu2 %v1382_v16, %s6719_s1 }
 0x253   : > { %v7274_v20 = vpop.permute.xlu1 %1379 }
 0x254   : > { %v1400_v21 = vpop.permute.xlu0 %1399  ;;  %1712 = vrot.lane.b32.xlu0 %v7272_v19, %s6719_s1  ;;  %1686 = vrot.lane.b32.xlu1 %v7265_v18, %s6719_s1 }
 0x255   : > { %1556 = vrot.lane.b32.xlu2 %v7274_v20, %s6719_s1  ;;  %5336 = vmatpush.xpose.msk.msra.mxu2 %vm1401_vm2, %v1400_v21 }
 0x258   : > { %5337 = vmatmul.msk.f32.vlgmr.msra.gmra.mxu2 %vm1401_vm2, %v1365_v9  ;;  %v1322_v9 = vld [vmem:[%s8363_s4 + $0x18] sm:$0xff] }
 0x25b   : > { %v7286_v23 = vpop.permute.xlu1 %1397 }
 0x25c   : > { %v7288_v24 = vpop.permute.xlu0 %1387  ;;  %1790 = vrot.lane.b32.xlu1 %v7286_v23, %s6719_s1 }
 0x25d   : > { %1634 = vrot.lane.b32.xlu2 %v7284_v22, %s6719_s1  ;;  %1660 = vrot.lane.b32.xlu0 %v7288_v24, %s6719_s1 }
 0x263   : > { %v1427_v26 = vpop.permute.xlu1 %1426 }
 0x264   : > { %v7298_v28 = vpop.permute.xlu0 %1395  ;;  %1738 = vrot.lane.b32.xlu1 %v7296_v25, %s6719_s1  ;;  %5338 = vmatpush.xpose.msk.msrb.mxu2 %vm1401_vm2, %v1427_v26 }
 0x265   : > { %5953 = vrot.lane.b32.xlu0 %v5952_v27, %s6721_s30  ;;  %1764 = vrot.lane.b32.xlu2 %v7298_v28, %s6719_s1 }
 0x267   : > { %5339 = vmatmul.msk.f32.vlgmr.msrb.gmra.mxu2 %vm1401_vm2, %v1367_v11 }
 0x26c   : > { %5948 = vrot.lane.b32.xlu1 %v5947_v29, %s6721_s30 }
 0x26d   : > { %5958 = vrot.lane.b32.xlu2 %v5957_v30, %s6721_s30 }
 0x29f   : > { %v1505_v31 = vpop.permute.xlu2 %1504 }
 0x2a0   : > { %5344 = vmatpush.xpose.msk.msra.mxu2 %vm1401_vm2, %v1505_v31 }
 0x2a3   : > { %5345 = vmatmul.msk.f32.vlgmr.msra.gmra.mxu2 %vm1401_vm2, %v1376_v15 }
 0x2a7   : > { %v1583_v32 = vpop.permute.xlu2 %1582 }
 0x2a8   : > { %5350 = vmatpush.xpose.msk.msrb.mxu2 %vm1401_vm2, %v1583_v32  ;;  %v1326_v32 = vld [vmem:[%s8363_s4 + $0x38] sm:$0xff] }
 0x2ab   : > { %5351 = vmatmul.msk.f32.vlgmr.msrb.gmra.mxu2 %vm1401_vm2, %v1382_v16 }
 0x2ae   : > { %v1453_v33 = vpop.permute.xlu1 %1452 }
 0x2af   : > { %v1557_v34 = vpop.permute.xlu2 %1556  ;;  %5340 = vmatpush.xpose.msk.msra.mxu3 %vm1401_vm2, %v1453_v33 }
 0x2b2   : > { %5341 = vmatmul.msk.f32.vlgmr.msra.gmra.mxu3 %vm1401_vm2, %v1372_v13 }
 0x2b6   : > { %v1479_v35 = vpop.permute.xlu0 %1478 }
 0x2b7   : > { %v1635_v36 = vpop.permute.xlu2 %1634  ;;  %5342 = vmatpush.xpose.msk.msra.mxu1 %vm1401_vm2, %v1479_v35 }
 0x2b8   : > { %5354 = vmatpush.xpose.msk.msrb.mxu0 %vm1401_vm2, %v1635_v36 }
 0x2ba   : > { %5343 = vmatmul.msk.f32.vlgmr.msra.gmra.mxu1 %vm1401_vm2, %v1374_v14  ;;  %v1328_v14 = vld [vmem:[%s8363_s4 + $0x48] sm:$0xff] }
 0x2bb   : > { %5348 = vmatpush.xpose.msk.msrb.mxu1 %vm1401_vm2, %v1557_v34  ;;  %5355 = vmatmul.msk.f32.vlgmr.msrb.gmra.mxu0 %vm1401_vm2, %v7284_v22  ;;  %v1325_v34 = vld [vmem:[%s8363_s4 + $0x30] sm:$0xff] }
 0x2be   : > { %v1531_v37 = vpop.permute.xlu1 %1530  ;;  %v1609_v38 = vpop.permute.xlu0 %1608 }
 0x2bf   : > { %5346 = vmatpush.xpose.msk.msrb.mxu3 %vm1401_vm2, %v1531_v37  ;;  %v1765_v41 = vpop.permute.xlu2 %1764 }
 0x2c2   : > { %5347 = vmatmul.msk.f32.vlgmr.msrb.gmra.mxu3 %vm1401_vm2, %v7263_v17  ;;  %5349 = vmatmul.msk.f32.vlgmr.msrb.gmra.mxu1 %vm1401_vm2, %v7274_v20 }
 0x2c3   : > { %5352 = vmatpush.xpose.msk.msra.mxu3 %vm1401_vm2, %v1609_v38 }
 0x2c6   : > { %v1687_v39 = vpop.permute.xlu1 %1686  ;;  %v1713_v40 = vpop.permute.xlu0 %1712 }
 0x2c7   : > { %5358 = vmatpush.xpose.msk.msra.mxu2 %vm1401_vm2, %v1687_v39  ;;  %5360 = vmatpush.xpose.msk.msrb.mxu3 %vm1401_vm2, %v1713_v40  ;;  %v5959_v45 = vpop.permute.xlu2 %5958 }
 0x2c8   : > { %v5961_v49 = vunpack.i.h.bf16 %v5959_v45  ;;  %v5960_v50 = vunpack.i.l.bf16 %v5959_v45 }
 0x2ca   : > { %5353 = vmatmul.msk.f32.vlgmr.msra.gmra.mxu3 %vm1401_vm2, %v7258_v12  ;;  %5359 = vmatmul.msk.f32.vlgmr.msra.gmra.mxu2 %vm1401_vm2, %v7265_v18 }
 0x2ce   : > { %v1791_v42 = vpop.permute.xlu1 %1790 }
 0x2cf   : > { %v1661_v43 = vpop.permute.xlu0 %1660  ;;  %5366 = vmatpush.xpose.msk.msrb.mxu2 %vm1401_vm2, %v1791_v42 }
 0x2d0   : > { %5356 = vmatpush.xpose.msk.msra.mxu1 %vm1401_vm2, %v1661_v43 }
 0x2d2   : > { %5361 = vmatmul.msk.f32.vlgmr.msrb.gmra.mxu3 %vm1401_vm2, %v7272_v19  ;;  %5367 = vmatmul.msk.f32.vlgmr.msrb.gmra.mxu2 %vm1401_vm2, %v7286_v23 }
 0x2d3   : > { %5357 = vmatmul.msk.f32.vlgmr.msra.gmra.mxu1 %vm1401_vm2, %v7288_v24 }
 0x2d4   : > { %5364 = vmatpush.xpose.msk.msrb.mxu1 %vm1401_vm2, %v1765_v41  ;;  %v1324_v41 = vld [vmem:[%s8363_s4 + $0x28] sm:$0xff] }
 0x2d6   : > { %v1739_v44 = vpop.permute.xlu1 %1738 }
 0x2d7   : > { %v5954_v46 = vpop.permute.xlu0 %5953  ;;  %5362 = vmatpush.xpose.msk.msra.mxu0 %vm1401_vm2, %v1739_v44 }
 0x2d8   : > { %v5956_v47 = vunpack.i.h.bf16 %v5954_v46  ;;  %v5955_v48 = vunpack.i.l.bf16 %v5954_v46  ;;  %v1330_v46 = vld [vmem:[%s8363_s4 + $0x58] sm:$0xff] }
 0x2da   : > { %2046 = vmatpush.msra.mxu3 %v5955_v48  ;;  %2124 = vmatpush.msra.mxu2 %v5956_v47 }
 0x2db   : > { %v1423_v51 = vpop.f32.mrf.mxu2  ;;  %5363 = vmatmul.msk.f32.vlgmr.msra.gmra.mxu0 %vm1401_vm2, %v7296_v25  ;;  %5365 = vmatmul.msk.f32.vlgmr.msrb.gmra.mxu1 %vm1401_vm2, %v7298_v28 }
 0x2dc   : > { %v1816_v53 = vmul.f32 0.5, %v1423_v51  ;;  %2150 = vmatpush.msrb.mxu3 %v5960_v50  ;;  %2228 = vmatpush.msrb.mxu2 %v5961_v49 }
 0x2de   : > { %v5949_v54 = vpop.permute.xlu1 %5948  ;;  %v7350_v55 = vadd.f32 %v1816_v53, %v1319_v52 }
 0x2df   : > { %v5951_v56 = vunpack.i.h.bf16 %v5949_v54  ;;  %v5950_v57 = vunpack.i.l.bf16 %v5949_v54  ;;  %v1332_v54 = vld [vmem:[%s8363_s4 + $0x68] sm:$0xff] }
 0x2e0   : > { %v1849_v58 = vsel %vm1848_vm3, %v7350_v55, -inf }
 0x2e1   : > { %1850 = vmax.xlane.f32.xlu0 %v1849_v58  ;;  %2072 = vmatpush.msrb.mxu0 %v5950_v57 }
 0x2e2   : > { %2098 = vmatpush.msra.mxu1 %v5951_v56 }
 0x2ea   : > { %v1449_v59 = vpop.f32.mrf.mxu2 }
 0x2eb   : > { %v1817_v61 = vmul.f32 0.5, %v1449_v59 }
 0x2ed   : > { %v7357_v62 = vadd.f32 %v1817_v61, %v1320_v60 }
 0x2ef   : > { %v1852_v63 = vsel %vm1848_vm3, %v7357_v62, -inf }
 0x2f0   : > { %1853 = vmax.xlane.f32.xlu2 %v1852_v63 }
 0x326   : > { %v1527_v0 = vpop.f32.mrf.mxu2 }
 0x327   : > { %v1820_v2 = vmul.f32 0.5, %v1527_v0 }
 0x329   : > { %v7364_v3 = vadd.f32 %v1820_v2, %v1323_v1 }
 0x32b   : > { %v1861_v4 = vsel %vm1848_vm3, %v7364_v3, -inf }
 0x32c   : > { %1862 = vmax.xlane.f32.xlu0 %v1861_v4  ;;  %v1334_v4 = vld [vmem:[%s8363_s4 + $0x78] sm:$0xff] }
 0x32e   : > { %v1605_v15 = vpop.f32.mrf.mxu2 }
 0x32f   : > { %v1823_v29 = vmul.f32 0.5, %v1605_v15 }
 0x331   : > { %v7395_v36 = vadd.f32 %v1823_v29, %v1326_v32  ;;  %v1331_v32 = vld [vmem:[%s8363_s4 + $0x60] sm:$0xff] }
 0x333   : > { %v1870_v38 = vsel %vm1848_vm3, %v7395_v36, -inf }
 0x335   : > { %v1475_v5 = vpop.f32.mrf.mxu3 }
 0x336   : > { %v1818_v7 = vmul.f32 0.5, %v1475_v5 }
 0x337   : > { %v1501_v8 = vpop.f32.mrf.mxu1 }
 0x338   : > { %v1819_v10 = vmul.f32 0.5, %v1501_v8  ;;  %v1657_v11 = vpop.f32.mrf.mxu0  ;;  %v7374_v13 = vadd.f32 %v1818_v7, %v1321_v6 }
 0x339   : > { %v1825_v16 = vmul.f32 0.5, %v1657_v11 }
 0x33a   : > { %v1855_v21 = vsel %vm1848_vm3, %v7374_v13, -inf  ;;  %v7381_v26 = vadd.f32 %v1819_v10, %v1322_v9 }
 0x33b   : > { %1856 = vmax.xlane.f32.xlu2 %v1855_v21  ;;  %v7383_v27 = vadd.f32 %v1825_v16, %v1328_v14  ;;  %v1329_v14 = vld [vmem:[%s8363_s4 + $0x50] sm:$0xff] }
 0x33c   : > { %v1858_v30 = vsel %vm1848_vm3, %v7381_v26, -inf }
 0x33d   : > { %v1876_v31 = vsel %vm1848_vm3, %v7383_v27, -inf  ;;  %1859 = vmax.xlane.f32.xlu1 %v1858_v30 }
 0x33e   : > { %1877 = vmax.xlane.f32.xlu0 %v1876_v31 }
 0x33f   : > { %v1579_v33 = vpop.f32.mrf.mxu1 }
 0x340   : > { %v1822_v35 = vmul.f32 0.5, %v1579_v33 }
 0x342   : > { %v7397_v37 = vadd.f32 %v1822_v35, %v1325_v34 }
 0x344   : > { %v1867_v39 = vsel %vm1848_vm3, %v7397_v37, -inf }
 0x345   : > { %v1553_v40 = vpop.f32.mrf.mxu3  ;;  %1871 = vmax.xlane.f32.xlu1 %v1870_v38 }
 0x346   : > { %v1821_v42 = vmul.f32 0.5, %v1553_v40  ;;  %1868 = vmax.xlane.f32.xlu0 %v1867_v39  ;;  %v1333_v39 = vld [vmem:[%s8363_s4 + $0x70] sm:$0xff] }
 0x348   : > { %v7406_v43 = vadd.f32 %v1821_v42, %v1324_v41 }
 0x34a   : > { %v1864_v44 = vsel %vm1848_vm3, %v7406_v43, -inf }
 0x34b   : > { %1865 = vmax.xlane.f32.xlu2 %v1864_v44 }
 0x34d   : > { %v1709_v45 = vpop.f32.mrf.mxu2  ;;  %v1631_v57 = vpop.f32.mrf.mxu3 }
 0x34e   : > { %v1827_v47 = vmul.f32 0.5, %v1709_v45  ;;  %v1824_v59 = vmul.f32 0.5, %v1631_v57 }
 0x350   : > { %v7413_v48 = vadd.f32 %v1827_v47, %v1330_v46  ;;  %v1683_v5 = vpop.f32.mrf.mxu1 }
 0x351   : > { %v1826_v9 = vmul.f32 0.5, %v1683_v5 }
 0x352   : > { %v1882_v49 = vsel %vm1848_vm3, %v7413_v48, -inf }
 0x353   : > { %1883 = vmax.xlane.f32.xlu2 %v1882_v49  ;;  %v7447_v16 = vadd.f32 %v1826_v9, %v1329_v14 }
 0x354   : > { %v1851_v50 = vpop.xlane.xlu0 %1850 }
 0x355   : > { %v1897_v51 = vsub.f32 %v7350_v55, %v1851_v50  ;;  %v1813_v60 = vpop.f32.mrf.mxu2  ;;  %v1327_v55 = vld [vmem:[%s8363_s4 + $0x40] sm:$0xff]  ;;  %v1879_v21 = vsel %vm1848_vm3, %v7447_v16, -inf }
 0x356   : > { %v1831_v0 = vmul.f32 0.5, %v1813_v60  ;;  %v7432_v2 = vadd.f32 %v1824_v59, %v1327_v55 }
 0x357   : > { %v1913_v52 = vmul.f32 1.442695, %v1897_v51 }
 0x358   : > { %v1761_v53 = vpop.f32.mrf.mxu0  ;;  %v7438_v8 = vadd.f32 %v1831_v0, %v1334_v4  ;;  %v1873_v10 = vsel %vm1848_vm3, %v7432_v2, -inf  ;;  %v1787_v34 = vpop.f32.mrf.mxu1 }
 0x359   : > { %6109 = vpow2.f32 %v1913_v52  ;;  %v1829_v56 = vmul.f32 0.5, %v1761_v53  ;;  %v1830_v35 = vmul.f32 0.5, %v1787_v34 }
 0x35a   : > { %v1894_v15 = vsel %vm1848_vm3, %v7438_v8, -inf }
 0x35b   : > { %v7421_v58 = vadd.f32 %v1829_v56, %v1332_v54  ;;  %v7465_v40 = vadd.f32 %v1830_v35, %v1333_v39 }
 0x35d   : > { %v1888_v61 = vsel %vm1848_vm3, %v7421_v58, -inf  ;;  %v1891_v41 = vsel %vm1848_vm3, %v7465_v40, -inf }
 0x35e   : > { %1889 = vmax.xlane.f32.xlu1 %v1888_v61 }
 0x35f   : > { %v7428_v63 = vpop.eup %6109 }
 0x360   : > { %v1945_v1 = vsel %vm1848_vm3, %v7428_v63, 0.0 }
 0x361   : > { %1946 = vadd.xlane.f32.xlu0 %v1945_v1 }
 0x363   : > { %v1854_v6 = vpop.xlane.xlu2 %1853 }
 0x364   : > { %v1898_v7 = vsub.f32 %v7357_v62, %v1854_v6  ;;  %v1735_v62 = vpop.f32.mrf.mxu3 }
 0x365   : > { %v1828_v30 = vmul.f32 0.5, %v1735_v62  ;;  %v5962_v62 = vpack.i.bf16 %v7274_v20, %v7263_v17 }
 0x366   : > { %v1915_v11 = vmul.f32 1.442695, %v1898_v7  ;;  %1874 = vmax.xlane.f32.xlu1 %v1873_v10 }
 0x367   : > { %v7458_v33 = vadd.f32 %v1828_v30, %v1331_v32 }
 0x368   : > { %6111 = vpow2.f32 %v1915_v11 }
 0x369   : > { %1895 = vmax.xlane.f32.xlu0 %v1894_v15  ;;  %v1885_v38 = vsel %vm1848_vm3, %v7458_v33, -inf }
 0x36e   : > { %v7451_v29 = vpop.eup %6111  ;;  %1880 = vmax.xlane.f32.xlu1 %v1879_v21 }
 0x36f   : > { %v1948_v31 = vsel %vm1848_vm3, %v7451_v29, 0.0 }
 0x370   : > { %1949 = vadd.xlane.f32.xlu2 %v1948_v31 }
 0x378   : > { %1886 = vmax.xlane.f32.xlu2 %v1885_v38 }
 0x380   : > { %1892 = vmax.xlane.f32.xlu2 %v1891_v41 }
 0x39f   : > { %v1863_v42 = vpop.xlane.xlu0 %1862 }
 0x3a0   : > { %v1901_v44 = vsub.f32 %v7364_v3, %v1863_v42 }
 0x3a2   : > { %v1921_v45 = vmul.f32 1.442695, %v1901_v44 }
 0x3a4   : > { %6113 = vpow2.f32 %v1921_v45 }
 0x3aa   : > { %v7470_v46 = vpop.eup %6113 }
 0x3ab   : > { %v1957_v47 = vsel %vm1848_vm3, %v7470_v46, 0.0 }
 0x3ac   : > { %1958 = vadd.xlane.f32.xlu1 %v1957_v47 }
 0x3ae   : > { %v1857_v49 = vpop.xlane.xlu2 %1856 }
 0x3af   : > { %v1899_v50 = vsub.f32 %v7374_v13, %v1857_v49 }
 0x3b0   : > { %v1860_v51 = vpop.xlane.xlu1 %1859 }
 0x3b1   : > { %v1917_v52 = vmul.f32 1.442695, %v1899_v50  ;;  %v1900_v53 = vsub.f32 %v7381_v26, %v1860_v51  ;;  %v1878_v54 = vpop.xlane.xlu0 %1877 }
 0x3b2   : > { %v1906_v3 = vsub.f32 %v7383_v27, %v1878_v54 }
 0x3b3   : > { %6115 = vpow2.f32 %v1917_v52  ;;  %v1919_v56 = vmul.f32 1.442695, %v1900_v53 }
 0x3b4   : > { %v1931_v57 = vmul.f32 1.442695, %v1906_v3 }
 0x3b5   : > { %6117 = vpow2.f32 %v1919_v56 }
 0x3b6   : > { %6119 = vpow2.f32 %v1931_v57 }
 0x3b8   : > { %v1872_v59 = vpop.xlane.xlu1 %1871 }
 0x3b9   : > { %v7477_v60 = vpop.eup %6115  ;;  %v1904_v61 = vsub.f32 %v7395_v36, %v1872_v59  ;;  %v1869_v55 = vpop.xlane.xlu0 %1868 }
 0x3ba   : > { %v1903_v0 = vsub.f32 %v7397_v37, %v1869_v55  ;;  %v1951_v13 = vsel %vm1848_vm3, %v7477_v60, 0.0 }
 0x3bb   : > { %v7483_v1 = vpop.eup %6117  ;;  %v1927_v26 = vmul.f32 1.442695, %v1904_v61  ;;  %1952 = vadd.xlane.f32.xlu0 %v1951_v13 }
 0x3bc   : > { %v1954_v27 = vsel %vm1848_vm3, %v7483_v1, 0.0  ;;  %v1925_v4 = vmul.f32 1.442695, %v1903_v0  ;;  %v7488_v6 = vpop.eup %6119 }
 0x3bd   : > { %6121 = vpow2.f32 %v1927_v26  ;;  %1955 = vadd.xlane.f32.xlu1 %v1954_v27  ;;  %v1972_v10 = vsel %vm1848_vm3, %v7488_v6, 0.0 }
 0x3be   : > { %v1866_v5 = vpop.xlane.xlu2 %1865  ;;  %6123 = vpow2.f32 %v1925_v4 }
 0x3bf   : > { %v1902_v36 = vsub.f32 %v7406_v43, %v1866_v5  ;;  %v5967_v5 = vpack.i.bf16 %v7265_v18, %v7258_v12 }
 0x3c1   : > { %v1923_v37 = vmul.f32 1.442695, %v1902_v36  ;;  %v5972_v36 = vpack.i.bf16 %v7288_v24, %v7284_v22 }
 0x3c3   : > { %v7490_v7 = vpop.eup %6121  ;;  %6125 = vpow2.f32 %v1923_v37  ;;  %v5977_v37 = vpack.i.bf16 %v7286_v23, %v7272_v19 }
 0x3c4   : > { %v1966_v9 = vsel %vm1848_vm3, %v7490_v7, 0.0  ;;  %v7496_v11 = vpop.eup %6123 }
 0x3c5   : > { %1967 = vadd.xlane.f32.xlu2 %v1966_v9  ;;  %1973 = vadd.xlane.f32.xlu1 %v1972_v10  ;;  %v1963_v15 = vsel %vm1848_vm3, %v7496_v11, 0.0  ;;  %v5982_v9 = vpack.i.bf16 %v7298_v28, %v7296_v25 }
 0x3c6   : > { %v1884_v35 = vpop.xlane.xlu2 %1883 }
 0x3c9   : > { %v7498_v14 = vpop.eup %6125 }
 0x3ca   : > { %v1960_v43 = vsel %vm1848_vm3, %v7498_v14, 0.0 }
 0x3cd   : > { %1961 = vadd.xlane.f32.xlu1 %v1960_v43  ;;  %1964 = vadd.xlane.f32.xlu2 %v1963_v15 }
 0x3cf   : > { %5963 = vrot.lane.b32.xlu0 %v5962_v62, %s6721_s30 }
 0x3d1   : > { %v1890_v21 = vpop.xlane.xlu1 %1889 }
 0x3d2   : > { %v1910_v44 = vsub.f32 %v7421_v58, %v1890_v21 }
 0x3d4   : > { %v1947_v30 = vpop.xlane.xlu0 %1946  ;;  %v1939_v47 = vmul.f32 1.442695, %v1910_v44 }
 0x3d5   : > { %6127 = vrcp.f32 %v1947_v30 }
 0x3d9   : > { %v1875_v31 = vpop.xlane.xlu1 %1874 }
 0x3da   : > { %v1905_v32 = vsub.f32 %v7432_v2, %v1875_v31 }
 0x3db   : > { %v6128_v34 = vpop.eup %6127 }
 0x3dc   : > { %v2009_v38 = vmul.f32 %v6128_v34, %v7428_v63  ;;  %v1929_v39 = vmul.f32 1.442695, %v1905_v32  ;;  %v1908_v63 = vsub.f32 %v7413_v48, %v1884_v35  ;;  %v1896_v53 = vpop.xlane.xlu0 %1895 }
 0x3dd   : > { %v1912_v48 = vsub.f32 %v7438_v8, %v1896_v53 }
 0x3de   : > { %6129 = vpow2.f32 %v1929_v39  ;;  %5368 = vmatmul.msk.f32.vlgmr.msra.gmra.mxu3 %vm1848_vm3, %v2009_v38  ;;  %v1935_v50 = vmul.f32 1.442695, %v1908_v63 }
 0x3e1   : > { %v1881_v41 = vpop.xlane.xlu1 %1880 }
 0x3e2   : > { %v1907_v42 = vsub.f32 %v7447_v16, %v1881_v41 }
 0x3e3   : > { %v1950_v17 = vpop.xlane.xlu2 %1949 }
 0x3e4   : > { %v7511_v20 = vpop.eup %6129  ;;  %v1933_v45 = vmul.f32 1.442695, %v1907_v42  ;;  %6131 = vrcp.f32 %v1950_v17 }
 0x3e5   : > { %v1969_v2 = vsel %vm1848_vm3, %v7511_v20, 0.0 }
 0x3e6   : > { %6133 = vpow2.f32 %v1933_v45  ;;  %1970 = vadd.xlane.f32.xlu2 %v1969_v2 }
 0x3e7   : > { %6135 = vpow2.f32 %v1939_v47 }
 0x3e8   : > { %6137 = vpow2.f32 %v1935_v50 }
 0x3ea   : > { %v6132_v49 = vpop.eup %6131 }
 0x3eb   : > { %v2010_v51 = vmul.f32 %v6132_v49, %v7451_v29  ;;  %v1887_v16 = vpop.xlane.xlu2 %1886  ;;  %v1943_v29 = vmul.f32 1.442695, %v1912_v48 }
 0x3ec   : > { %v7518_v52 = vpop.eup %6133  ;;  %v1909_v58 = vsub.f32 %v7458_v33, %v1887_v16 }
 0x3ed   : > { %5369 = vmatmul.msk.f32.vlgmr.msrb.gmra.mxu0 %vm1848_vm3, %v2010_v51  ;;  %v1975_v54 = vsel %vm1848_vm3, %v7518_v52, 0.0  ;;  %v7525_v3 = vpop.eup %6135 }
 0x3ee   : > { %v1937_v56 = vmul.f32 1.442695, %v1909_v58  ;;  %1976 = vadd.xlane.f32.xlu2 %v1975_v54  ;;  %v7528_v61 = vpop.eup %6137  ;;  %v1984_v33 = vsel %vm1848_vm3, %v7525_v3, 0.0 }
 0x3ef   : > { %v1978_v13 = vsel %vm1848_vm3, %v7528_v61, 0.0 }
 0x3f0   : > { %6139 = vpow2.f32 %v1937_v56 }
 0x3f1   : > { %6141 = vpow2.f32 %v1943_v29 }
 0x3f3   : > { %v1893_v57 = vpop.xlane.xlu2 %1892 }
 0x3f4   : > { %v1911_v59 = vsub.f32 %v7465_v40, %v1893_v57 }
 0x3f6   : > { %v7532_v55 = vpop.eup %6139  ;;  %v1941_v0 = vmul.f32 1.442695, %v1911_v59  ;;  %1985 = vadd.xlane.f32.xlu2 %v1984_v33 }
 0x3f7   : > { %v1981_v8 = vsel %vm1848_vm3, %v7532_v55, 0.0  ;;  %v7538_v40 = vpop.eup %6141 }
 0x3f8   : > { %6143 = vpow2.f32 %v1941_v0  ;;  %1982 = vadd.xlane.f32.xlu1 %v1981_v8  ;;  %v1990_v4 = vsel %vm1848_vm3, %v7538_v40, 0.0 }
 0x3f9   : > { %1979 = vadd.xlane.f32.xlu0 %v1978_v13 }
 0x3fe   : > { %v7540_v26 = vpop.eup %6143 }
 0x3ff   : > { %v1987_v27 = vsel %vm1848_vm3, %v7540_v26, 0.0 }
 0x400   : > { %1988 = vadd.xlane.f32.xlu2 %v1987_v27 }
 0x401   : > { %1991 = vadd.xlane.f32.xlu0 %v1990_v4 }
 0x411   : > { %5968 = vrot.lane.b32.xlu1 %v5967_v5, %s6721_s30 }
 0x418   : > { %5973 = vrot.lane.b32.xlu2 %v5972_v36, %s6721_s30 }
 0x419   : > { %5978 = vrot.lane.b32.xlu1 %v5977_v37, %s6721_s30 }
 0x41f   : > { %v1959_v10 = vpop.xlane.xlu1 %1958 }
 0x420   : > { %6145 = vrcp.f32 %v1959_v10 }
 0x421   : > { %5983 = vrot.lane.b32.xlu1 %v5982_v9, %s6721_s30  ;;  %s6722_s30 = smov 4  }
 0x426   : > { %v6146_v12 = vpop.eup %6145 }
 0x427   : > { %v2013_v18 = vmul.f32 %v6146_v12, %v7470_v46 }
 0x429   : > { %5372 = vmatmul.msk.f32.vlgmr.msrb.gmra.mxu3 %vm1848_vm3, %v2013_v18 }
 0x42e   : > { %v1953_v22 = vpop.xlane.xlu0 %1952 }
 0x42f   : > { %6147 = vrcp.f32 %v1953_v22 }
 0x430   : > { %v1956_v24 = vpop.xlane.xlu1 %1955 }
 0x431   : > { %6149 = vrcp.f32 %v1956_v24 }
 0x435   : > { %v6148_v19 = vpop.eup %6147 }
 0x436   : > { %v2011_v23 = vmul.f32 %v6148_v19, %v7477_v60 }
 0x437   : > { %v6150_v43 = vpop.eup %6149 }
 0x438   : > { %v2012_v15 = vmul.f32 %v6150_v43, %v7483_v1  ;;  %v1968_v25 = vpop.xlane.xlu2 %1967  ;;  %v1974_v28 = vpop.xlane.xlu1 %1973  ;;  %5370 = vmatmul.msk.f32.vlgmr.msra.gmra.mxu1 %vm1848_vm3, %v2011_v23 }
 0x439   : > { %6151 = vrcp.f32 %v1968_v25 }
 0x43a   : > { %5371 = vmatmul.msk.f32.vlgmr.msra.gmra.mxu2 %vm1848_vm3, %v2012_v15 }
 0x43f   : > { %v6152_v46 = vpop.eup %6151 }
 0x440   : > { %v2016_v62 = vmul.f32 %v6152_v46, %v7490_v7  ;;  %v1962_v21 = vpop.xlane.xlu1 %1961  ;;  %v1965_v30 = vpop.xlane.xlu2 %1964 }
 0x441   : > { %6153 = vrcp.f32 %v1962_v21  ;;  %v5964_v31 = vpop.permute.xlu0 %5963 }
 0x442   : > { %6155 = vrcp.f32 %v1965_v30  ;;  %v5966_v32 = vunpack.i.h.bf16 %v5964_v31  ;;  %v5965_v60 = vunpack.i.l.bf16 %v5964_v31  ;;  %5375 = vmatmul.msk.f32.vlgmr.msrb.gmra.mxu2 %vm1848_vm3, %v2016_v62 }
 0x443   : > { %6157 = vrcp.f32 %v1974_v28 }
 0x444   : > { %2176 = vmatpush.msra.mxu0 %v5965_v60  ;;  %2202 = vmatpush.msrb.mxu1 %v5966_v32  ;;  %v5755_v32 = vld [vmem:[%s7208_s24 + $0x8] sm:$0xff]  ;;  %v5754_v60 = vld [vmem:[%s7208_s24] sm:$0xff] }
 0x447   : > { %v6154_v1 = vpop.eup %6153 }
 0x448   : > { %v6156_v34 = vpop.eup %6155  ;;  %v2014_v35 = vmul.f32 %v6154_v1, %v7498_v14 }
 0x449   : > { %v2015_v38 = vmul.f32 %v6156_v34, %v7496_v11  ;;  %v6158_v44 = vpop.eup %6157 }
 0x44a   : > { %5373 = vmatmul.msk.f32.vlgmr.msra.gmra.mxu0 %vm1848_vm3, %v2014_v35  ;;  %v2018_v11 = vmul.f32 %v6158_v44, %v7488_v6 }
 0x44b   : > { %5374 = vmatmul.msk.f32.vlgmr.msrb.gmra.mxu1 %vm1848_vm3, %v2015_v38 }
 0x459   : > { %v1971_v7 = vpop.xlane.xlu2 %1970 }
 0x461   : > { %v1977_v39 = vpop.xlane.xlu2 %1976  ;;  %v2048_v37 = vpop.f32.mrf.mxu3 }
 0x462   : > { %6159 = vrcp.f32 %v1977_v39 }
 0x463   : > { %6161 = vrcp.f32 %v1971_v7 }
 0x468   : > { %v6160_v45 = vpop.eup %6159 }
 0x469   : > { %v1986_v41 = vpop.xlane.xlu2 %1985  ;;  %v2019_v49 = vmul.f32 %v6160_v45, %v7518_v52  ;;  %v6162_v50 = vpop.eup %6161 }
 0x46a   : > { %v2017_v56 = vmul.f32 %v6162_v50, %v7511_v20  ;;  %v2074_v9 = vpop.f32.mrf.mxu0 }
 0x46b   : > { %v1983_v2 = vpop.xlane.xlu1 %1982 }
 0x46c   : > { %v1980_v17 = vpop.xlane.xlu0 %1979 }
 0x46d   : > { %6163 = vrcp.f32 %v1980_v17 }
 0x46e   : > { %6165 = vrcp.f32 %v1983_v2 }
 0x473   : > { %v1989_v42 = vpop.xlane.xlu2 %1988  ;;  %v6164_v16 = vpop.eup %6163 }
 0x474   : > { %v1992_v51 = vpop.xlane.xlu0 %1991  ;;  %v2020_v6 = vmul.f32 %v6164_v16, %v7528_v61  ;;  %v6166_v52 = vpop.eup %6165 }
 0x475   : > { %6167 = vrcp.f32 %v1992_v51  ;;  %v2021_v33 = vmul.f32 %v6166_v52, %v7532_v55 }
 0x476   : > { %6169 = vrcp.f32 %v1986_v41 }
 0x477   : > { %6171 = vrcp.f32 %v1989_v42 }
 0x47b   : > { %v5974_v63 = vpop.permute.xlu2 %5973  ;;  %v6168_v48 = vpop.eup %6167 }
 0x47c   : > { %v5976_v14 = vunpack.i.h.bf16 %v5974_v63  ;;  %v5975_v47 = vunpack.i.l.bf16 %v5974_v63  ;;  %v2024_v0 = vmul.f32 %v6168_v48, %v7538_v40  ;;  %v6170_v20 = vpop.eup %6169 }
 0x47d   : > { %v6172_v61 = vpop.eup %6171  ;;  %v2022_v4 = vmul.f32 %v6170_v20, %v7525_v3 }
 0x47e   : > { %2280 = vmatpush.msrb.mxu0 %v5975_v47  ;;  %2306 = vmatpush.msra.mxu1 %v5976_v14  ;;  %v2023_v5 = vmul.f32 %v6172_v61, %v7540_v26 }
 0x47f   : > { %5377 = vmatmul.msk.f32.vlgmr.msrb.gmra.mxu0 %vm1848_vm3, %v2018_v11  ;;  %5378 = vmatmul.msk.f32.vlgmr.msra.gmra.mxu1 %vm1848_vm3, %v2019_v49 }
 0x483   : > { %v5969_v53 = vpop.permute.xlu1 %5968 }
 0x484   : > { %v5971_v58 = vunpack.i.h.bf16 %v5969_v53  ;;  %v5970_v54 = vunpack.i.l.bf16 %v5969_v53 }
 0x486   : > { %2254 = vmatpush.msra.mxu3 %v5970_v54  ;;  %2332 = vmatpush.msra.mxu2 %v5971_v58 }
 0x487   : > { %5376 = vmatmul.msk.f32.vlgmr.msra.gmra.mxu3 %vm1848_vm3, %v2017_v56  ;;  %5379 = vmatmul.msk.f32.vlgmr.msra.gmra.mxu2 %vm1848_vm3, %v2020_v6 }
 0x48b   : > { %v5979_v29 = vpop.permute.xlu1 %5978 }
 0x48c   : > { %v5981_v57 = vunpack.i.h.bf16 %v5979_v29  ;;  %v5980_v59 = vunpack.i.l.bf16 %v5979_v29 }
 0x48e   : > { %2358 = vmatpush.msrb.mxu3 %v5980_v59  ;;  %2436 = vmatpush.msrb.mxu2 %v5981_v57 }
 0x48f   : > { %5380 = vmatmul.msk.f32.vlgmr.msrb.gmra.mxu3 %vm1848_vm3, %v2021_v33  ;;  %5383 = vmatmul.msk.f32.vlgmr.msrb.gmra.mxu2 %vm1848_vm3, %v2024_v0 }
 0x490   : > { %2541 = vmatpush.bf16.msra.mxu3 %v5755_v32 }
 0x493   : > { %v5984_v8 = vpop.permute.xlu1 %5983 }
 0x494   : > { %v5986_v13 = vunpack.i.h.bf16 %v5984_v8  ;;  %v5985_v27 = vunpack.i.l.bf16 %v5984_v8  ;;  %2542 = vmatpush.bf16.msra.mxu3 %v5754_v60 }
 0x496   : > { %2384 = vmatpush.msra.mxu0 %v5985_v27  ;;  %2410 = vmatpush.msrb.mxu1 %v5986_v13  ;;  %v5759_v27 = vld [vmem:[%s7222_s16 + $0x8] sm:$0xff] }
 0x497   : > { %5381 = vmatmul.msk.f32.vlgmr.msra.gmra.mxu0 %vm1848_vm3, %v2022_v4  ;;  %5382 = vmatmul.msk.f32.vlgmr.msrb.gmra.mxu1 %vm1848_vm3, %v2023_v5  ;;  %v5758_v4 = vld [vmem:[%s7222_s16] sm:$0xff]  ;;  %s8366_s16 = scalar_lea.vmem [#allocation9], %s7145_s0 }
 0x498   : > { %2687 = vmatpush.bf16.msra.mxu1 %v5759_v27 }
 0x49c   : > { %2688 = vmatpush.bf16.msra.mxu1 %v5758_v4 }
 0x4ac   : > { %v2152_v10 = vpop.f32.mrf.mxu3 }
 0x4b5   : > { %v2100_v55 = vpop.f32.mrf.mxu1 }
 0x4bd   : > { %v2126_v40 = vpop.f32.mrf.mxu2 }
 0x4be   : > { %v5987_v36 = vpack.i.bf16 %v2126_v40, %v2100_v55 }
 0x4c0   : > { %5988 = vrot.lane.b32.xlu0 %v5987_v36, %s6722_s30  ;;  %v6098_v36 = vld [vmem:[%s1275_s23] ss:$0 sm:$0xff]  ;;  %s8368_s23 = scalar_lea.vmem [#allocation6], %s7145_s0 }
 0x4c5   : > { %v2230_v18 = vpop.f32.mrf.mxu2 }
 0x4c7   : > { %v2178_v12 = vpop.f32.mrf.mxu0 }
 0x4c8   : > { %v5992_v3 = vpack.i.bf16 %v2178_v12, %v2152_v10  ;;  %v2204_v22 = vpop.f32.mrf.mxu1  ;;  %v6251_v10 = vld [vmem:[#allocation2] sm:$0xff] }
 0x4c9   : > { %v5997_v26 = vpack.i.bf16 %v2230_v18, %v2204_v22 }
 0x4ca   : > { %5993 = vrot.lane.b32.xlu1 %v5992_v3, %s8300_s13 }
 0x4cb   : > { %5998 = vrot.lane.b32.xlu2 %v5997_v26, %s8299_s2  ;;  %v6252_v26 = vld [vmem:[#allocation2 + $0x8] sm:$0xff] }
 0x4fc   : > { %v2282_v24 = vpop.f32.mrf.mxu0  ;;  %v2308_v19 = vpop.f32.mrf.mxu1 }
 0x50a   : > { %v2256_v23 = vpop.f32.mrf.mxu3  ;;  %v2334_v43 = vpop.f32.mrf.mxu2 }
 0x50b   : > { %v6002_v15 = vpack.i.bf16 %v2282_v24, %v2256_v23  ;;  %v6007_v25 = vpack.i.bf16 %v2334_v43, %v2308_v19  ;;  %v6729_v23 = vmov 32.0  }
 0x50c   : > { %6173 = vrcp.f32 %v6729_v23 }
 0x50d   : > { %6008 = vrot.lane.b32.xlu2 %v6007_v25, %s8297_s3  ;;  %6003 = vrot.lane.b32.xlu1 %v6002_v15, %s8298_s25 }
 0x512   : > { %v2360_v28 = vpop.f32.mrf.mxu3  ;;  %v2438_v46 = vpop.f32.mrf.mxu2 }
 0x513   : > { %v6174_v43 = vpop.eup %6173 }
 0x514   : > { %v2386_v62 = vpop.f32.mrf.mxu0  ;;  %v2412_v21 = vpop.f32.mrf.mxu1  ;;  %v2560_v15 = vmul.f32 32.0, %v6174_v43  ;;  %vm2564_vm9 = vweird.f32 %v6174_v43 }
 0x515   : > { %v6012_v30 = vpack.i.bf16 %v2386_v62, %v2360_v28  ;;  %v6017_v31 = vpack.i.bf16 %v2438_v46, %v2412_v21 }
 0x516   : > { %v2561_v25 = vsub.f32 1.0, %v2560_v15 }
 0x517   : > { %6018 = vrot.lane.b32.xlu0 %v6017_v31, %s8296_s17  ;;  %6013 = vrot.lane.b32.xlu1 %v6012_v30, %s8295_s18  ;;  %s8364_s18 = sld [smem:[#allocation40_spill]] }
 0x518   : > { %v2562_v28 = vmul.f32 %v6174_v43, %v2561_v25 }
 0x51a   : > { %v2563_v46 = vadd.f32 %v6174_v43, %v2562_v28 }
 0x51c   : > { %v7626_v62 = vsel %vm2564_vm9, %v6174_v43, %v2563_v46 }
 0x51d   : > { %v1307_v5 = vld [vmem:[%s8364_s18] sm:$0xff]  ;;  %v1308_v55 = vld [vmem:[%s8364_s18 + $0x8] sm:$0xff] }
 0x51e   : > { %v2662_v40 = vpack.c.bf16 %v1308_v55, %v1307_v5 }
 0x520   : > { %5410 = vmatmul.msk.bf16.vlgmr.msra.gmra.mxu1 %vm1351_vm1, %v2662_v40 }
 0x525   : > { %v5999_v35 = vpop.permute.xlu2 %5998 }
 0x526   : > { %v6001_v47 = vunpack.i.h.bf16 %v5999_v35  ;;  %v6000_v11 = vunpack.i.l.bf16 %v5999_v35 }
 0x532   : > { %v5989_v34 = vpop.permute.xlu0 %5988 }
 0x533   : > { %v5991_v38 = vunpack.i.h.bf16 %v5989_v34  ;;  %v5990_v7 = vunpack.i.l.bf16 %v5989_v34 }
 0x535   : > { %v2498_v17 = vsel %vm1401_vm2, %v2074_v9, %v5991_v38  ;;  %v2497_v44 = vsel %vm1401_vm2, %v2048_v37, %v5990_v7 }
 0x53c   : > { %v5994_v1 = vpop.permute.xlu1 %5993 }
 0x53d   : > { %v5996_v39 = vunpack.i.h.bf16 %v5994_v1  ;;  %v5995_v41 = vunpack.i.l.bf16 %v5994_v1 }
 0x53f   : > { %v2500_v45 = vsel %vm1848_vm3, %v2498_v17, %v5996_v39  ;;  %v2499_v2 = vsel %vm1848_vm3, %v2497_v44, %v5995_v41  ;;  %v6101_v41 = vld [vmem:[%s8366_s16] ss:$0 sm:$0xff] }
 0x540   : > { %v2502_v50 = vsel %vm2501_vm4, %v2499_v2, %v6000_v11  ;;  %v2503_v51 = vsel %vm2501_vm4, %v2500_v45, %v6001_v47  ;;  %v5757_v2 = vld [vmem:[%s7217_s14 + $0x8] sm:$0xff]  ;;  %v5756_v47 = vld [vmem:[%s7217_s14] sm:$0xff]  ;;  %s8367_s14 = scalar_lea.vmem [#allocation3], %s7145_s0 }
 0x541   : > { %2654 = vmatpush.bf16.msrb.mxu0 %v5757_v2 }
 0x545   : > { %2655 = vmatpush.bf16.msrb.mxu0 %v5756_v47 }
 0x567   : > { %v6009_v49 = vpop.permute.xlu2 %6008 }
 0x568   : > { %v6011_v58 = vunpack.i.h.bf16 %v6009_v49  ;;  %v6010_v54 = vunpack.i.l.bf16 %v6009_v49 }
 0x57f   : > { %v6004_v42 = vpop.permute.xlu1 %6003 }
 0x580   : > { %v6006_v63 = vunpack.i.h.bf16 %v6004_v42  ;;  %v6005_v14 = vunpack.i.l.bf16 %v6004_v42 }
 0x582   : > { %v2506_v16 = vsel %vm2504_vm5, %v2503_v51, %v6006_v63  ;;  %v2505_v53 = vsel %vm2504_vm5, %v2502_v50, %v6005_v14 }
 0x583   : > { %v2508_v59 = vsel %vm2507_vm6, %v2505_v53, %v6010_v54  ;;  %v2509_v33 = vsel %vm2507_vm6, %v2506_v16, %v6011_v58 }
 0x589   : > { %v6019_v56 = vpop.permute.xlu0 %6018  ;;  %v6014_v6 = vpop.permute.xlu1 %6013 }
 0x58a   : > { %v6021_v52 = vunpack.i.h.bf16 %v6019_v56  ;;  %v6020_v48 = vunpack.i.l.bf16 %v6019_v56  ;;  %v6016_v29 = vunpack.i.h.bf16 %v6014_v6  ;;  %v6015_v57 = vunpack.i.l.bf16 %v6014_v6 }
 0x58c   : > { %v2512_v0 = vsel %vm2510_vm7, %v2509_v33, %v6016_v29  ;;  %v2511_v20 = vsel %vm2510_vm7, %v2508_v59, %v6015_v57  ;;  %v6099_v33 = vld [vmem:[%s8367_s14] ss:$0 sm:$0xff] }
 0x58d   : > { %v2515_v61 = vsel %vm2513_vm8, %v2512_v0, %v6021_v52  ;;  %v2514_v8 = vsel %vm2513_vm8, %v2511_v20, %v6020_v48 }
 0x58e   : > { %v2516_v13 = vpack.c.bf16 %v2515_v61, %v2514_v8  ;;  %v6100_v8 = vld [vmem:[%s8368_s23] ss:$0 sm:$0xff] }
 0x590   : > { %5392 = vmatmul.msk.bf16.vlgmr.msra.gmra.mxu3 %vm1351_vm1, %v2516_v13 }
 0x59d   : > { %v2690_v39 = vpop.f32.mrf.mxu1 }
 0x59e   : > { %v7640_v44 = vadd.f32 %v6101_v41, %v2690_v39 }
 0x5a0   : > { %5411 = vmatpush.xpose.msk.msra.mxu2 %vm1401_vm2, %v7640_v44 }
 0x5a5   : > { %v2692_v42 = vpop.f32.mrf.mxu1 }
 0x5a6   : > { %v7634_v17 = vadd.f32 %v6101_v41, %v2692_v42 }
 0x5a8   : > { %5413 = vmatpush.xpose.msk.msrb.mxu2 %vm1401_vm2, %v7634_v17 }
 0x613   : > { %v2544_v37 = vpop.f32.mrf.mxu3 }
 0x614   : > { %v2545_v9 = vadd.f32 %v6098_v36, %v2544_v37 }
 0x616   : > { %v2549_v12 = vadd.f32 %v6251_v10, %v2545_v9 }
 0x618   : > { %v2553_v18 = vsel %vm1351_vm1, %v2549_v12, 0.0 }
 0x619   : > { %2554 = vadd.xlane.f32.xlu2 %v2553_v18  ;;  %v6102_v18 = vld [vmem:[%s8369_s28] ss:$0 sm:$0xff] }
 0x61b   : > { %v2546_v3 = vpop.f32.mrf.mxu3 }
 0x61c   : > { %v2547_v22 = vadd.f32 %v6098_v36, %v2546_v3 }
 0x61e   : > { %v2550_v24 = vadd.f32 %v6252_v26, %v2547_v22 }
 0x620   : > { %v2556_v19 = vsel %vm1351_vm1, %v2550_v24, 0.0 }
 0x621   : > { %2557 = vadd.xlane.f32.xlu1 %v2556_v19 }
 0x63a   : > { %2727 = vrot.lane.b32.xlu1 %v7640_v44, %s6714_s11 }
 0x642   : > { %2737 = vrot.lane.b32.xlu1 %v7634_v17, %s6715_s8 }
 0x64a   : > { %2749 = vrot.lane.b32.xlu1 %v7634_v17, %s6717_s9 }
 0x68c   : > { %v2555_v21 = vpop.xlane.xlu2 %2554 }
 0x68d   : > { %v2566_v30 = vmul.f32 %v7626_v62, %v2555_v21 }
 0x68f   : > { %v2568_v31 = vsub.f32 %v2549_v12, %v2566_v30 }
 0x691   : > { %v2570_v32 = vmul.f32 %v2568_v31, %v2568_v31 }
 0x693   : > { %v2572_v60 = vsel %vm1351_vm1, %v2570_v32, 0.0 }
 0x694   : > { %v2558_v1 = vpop.xlane.xlu1 %2557  ;;  %2573 = vadd.xlane.f32.xlu0 %v2572_v60 }
 0x695   : > { %v2567_v34 = vmul.f32 %v7626_v62, %v2558_v1 }
 0x697   : > { %v2569_v35 = vsub.f32 %v2550_v24, %v2567_v34 }
 0x699   : > { %v2571_v38 = vmul.f32 %v2569_v35, %v2569_v35 }
 0x69b   : > { %v2575_v7 = vsel %vm1351_vm1, %v2571_v38, 0.0 }
 0x69c   : > { %2576 = vadd.xlane.f32.xlu2 %v2575_v7 }
 0x6a8   : > { %2733 = vrot.lane.b32.xlu0 %v7634_v17, %s6716_s7 }
 0x6ac   : > { %v2728_v9 = vpop.permute.xlu1 %2727 }
 0x6ad   : > { %5415 = vmatpush.xpose.msk.msrb.mxu3 %vm1401_vm2, %v2728_v9  ;;  %v6022_v21 = vpack.i.bf16 %v2728_v9, %v7634_v17 }
 0x6b0   : > { %2735 = vrot.lane.b32.xlu0 %v7640_v44, %s6715_s8 }
 0x6b4   : > { %2741 = vrot.lane.b32.xlu2 %v7634_v17, %s6713_s19  ;;  %v2738_v19 = vpop.permute.xlu1 %2737 }
 0x6b8   : > { %2729 = vrot.lane.b32.xlu0 %v7634_v17, %s6714_s11 }
 0x6bc   : > { %2751 = vrot.lane.b32.xlu2 %v7640_v44, %s6720_s12  ;;  %v7725_v1 = vpop.permute.xlu1 %2749 }
 0x6c0   : > { %2743 = vrot.lane.b32.xlu0 %v7640_v44, %s6718_s6 }
 0x6c8   : > { %2731 = vrot.lane.b32.xlu0 %v7640_v44, %s6716_s7 }
 0x6d0   : > { %2745 = vrot.lane.b32.xlu0 %v7634_v17, %s6718_s6 }
 0x707   : > { %v2574_v45 = vpop.xlane.xlu0 %2573 }
 0x708   : > { %v2578_v63 = vmul.f32 %v2574_v45, %v7626_v62 }
 0x70a   : > { %v2580_v14 = vadd.f32 1e-05, %v2578_v63 }
 0x70c   : > { %6175 = vrsqrt.f32 %v2580_v14  ;;  %vm2588_vm11 = vweird.f32 %v2580_v14 }
 0x70f   : > { %v2577_v11 = vpop.xlane.xlu2 %2576 }
 0x710   : > { %v2579_v49 = vmul.f32 %v2577_v11, %v7626_v62 }
 0x712   : > { %v6176_v50 = vpop.eup %6175  ;;  %v2581_v51 = vadd.f32 1e-05, %v2579_v49 }
 0x713   : > { %v2583_v16 = vmul.f32 %v6176_v50, %v2580_v14  ;;  %vm2589_vm10 = vweird.f32 %v6176_v50 }
 0x714   : > { %6177 = vrsqrt.f32 %v2581_v51  ;;  %vm2590_vm12 = vmor %vm2588_vm11, %vm2589_vm10  ;;  %vm2598_vm14 = vweird.f32 %v2581_v51 }
 0x715   : > { %v2584_v53 = vmul.f32 %v6176_v50, %v2583_v16 }
 0x717   : > { %v2585_v58 = vmul.f32 0.5, %v2584_v53  ;;  %v2742_v23 = vpop.permute.xlu2 %2741 }
 0x719   : > { %v2586_v54 = vsub.f32 1.5, %v2585_v58 }
 0x71a   : > { %v6178_v56 = vpop.eup %6177  ;;  %v2734_v36 = vpop.permute.xlu0 %2733 }
 0x71b   : > { %v2587_v6 = vmul.f32 %v6176_v50, %v2586_v54  ;;  %v2593_v52 = vmul.f32 %v6178_v56, %v2581_v51  ;;  %vm2599_vm13 = vweird.f32 %v6178_v56 }
 0x71c   : > { %vm2600_vm15 = vmor %vm2598_vm14, %vm2599_vm13 }
 0x71d   : > { %v2594_v48 = vmul.f32 %v6178_v56, %v2593_v52  ;;  %v2591_v29 = vsel %vm2590_vm12, %v6176_v50, %v2587_v6 }
 0x71e   : > { %v2602_v0 = vmul.f32 %v2591_v29, %v2568_v31 }
 0x71f   : > { %v2595_v57 = vmul.f32 0.5, %v2594_v48  ;;  %v7717_v30 = vpop.permute.xlu2 %2751 }
 0x720   : > { %v2607_v13 = vmul.f32 %v6099_v33, %v2602_v0 }
 0x721   : > { %v2596_v59 = vsub.f32 1.5, %v2595_v57 }
 0x722   : > { %v7672_v5 = vadd.f32 %v6100_v8, %v2607_v13  ;;  %v2736_v37 = vpop.permute.xlu0 %2735 }
 0x723   : > { %v2597_v20 = vmul.f32 %v6178_v56, %v2596_v59  ;;  %v6032_v10 = vpack.i.bf16 %v2736_v37, %v2734_v36  ;;  %5423 = vmatpush.xpose.msk.msra.mxu3 %vm1401_vm2, %v2736_v37 }
 0x725   : > { %v2601_v61 = vsel %vm2600_vm15, %v6178_v56, %v2597_v20 }
 0x726   : > { %v2603_v27 = vmul.f32 %v2601_v61, %v2569_v35 }
 0x728   : > { %v2608_v4 = vmul.f32 %v6099_v33, %v2603_v27 }
 0x72a   : > { %v7674_v55 = vadd.f32 %v6100_v8, %v2608_v4  ;;  %v2730_v12 = vpop.permute.xlu0 %2729 }
 0x72b   : > { %5417 = vmatpush.xpose.msk.msra.mxu0 %vm1401_vm2, %v2730_v12  ;;  %v6027_v25 = vpack.i.bf16 %v2730_v12, %v7640_v44 }
 0x72c   : > { %v2629_v40 = vpack.c.bf16 %v7674_v55, %v7672_v5 }
 0x72e   : > { %5401 = vmatmul.msk.bf16.vlgmr.msrb.gmra.mxu0 %vm1351_vm1, %v2629_v40 }
 0x72f   : > { %5425 = vmatpush.xpose.msk.msrb.mxu0 %vm1401_vm2, %v2738_v19 }
 0x732   : > { %v2744_v43 = vpop.permute.xlu0 %2743 }
 0x733   : > { %v6042_v46 = vpack.i.bf16 %v2744_v43, %v2742_v23 }
 0x73a   : > { %v2732_v15 = vpop.permute.xlu0 %2731 }
 0x73b   : > { %5419 = vmatpush.xpose.msk.msrb.mxu1 %vm1401_vm2, %v2732_v15  ;;  %v6037_v28 = vpack.i.bf16 %v2738_v19, %v2732_v15 }
 0x742   : > { %v7727_v34 = vpop.permute.xlu0 %2745 }
 0x7ab   : > { %v2657_v3 = vpop.f32.mrf.mxu0 }
 0x7ac   : > { %v2658_v22 = vadd.f32 %v6102_v18, %v2657_v3 }
 0x7ae   : > { %2697 = vrot.lane.b32.xlu2 %v2658_v22, %s6714_s11  ;;  %5412 = vmatmul.msk.f32.vlgmr.msra.gmra.mxu2 %vm1401_vm2, %v2658_v22 }
 0x7af   : > { %5421 = vmatpush.xpose.msk.msra.mxu2 %vm1401_vm2, %v2734_v36 }
 0x7b3   : > { %v2659_v26 = vpop.f32.mrf.mxu0 }
 0x7b4   : > { %v2660_v24 = vadd.f32 %v6102_v18, %v2659_v26 }
 0x7b6   : > { %2707 = vrot.lane.b32.xlu0 %v2660_v24, %s6715_s8  ;;  %2703 = vrot.lane.b32.xlu1 %v2660_v24, %s6716_s7 }
 0x7b7   : > { %2705 = vrot.lane.b32.xlu2 %v2658_v22, %s6715_s8  ;;  %5414 = vmatmul.msk.f32.vlgmr.msrb.gmra.mxu2 %vm1401_vm2, %v2660_v24  ;;  %s8372_s8 = smov 16  }
 0x7b8   : > { %5429 = vmatpush.xpose.msk.msrb.mxu2 %vm1401_vm2, %v2742_v23 }
 0x7be   : > { %2719 = vrot.lane.b32.xlu0 %v2660_v24, %s6717_s9  ;;  %2699 = vrot.lane.b32.xlu1 %v2660_v24, %s6714_s11  ;;  %s8371_s11 = smov 12  }
 0x7bf   : > { %2713 = vrot.lane.b32.xlu2 %v2658_v22, %s6718_s6 }
 0x7c6   : > { %2747 = vrot.lane.b32.xlu0 %v7640_v44, %s6717_s9  ;;  %2711 = vrot.lane.b32.xlu1 %v2660_v24, %s6713_s19 }
 0x7c7   : > { %2701 = vrot.lane.b32.xlu2 %v2658_v22, %s6716_s7  ;;  %s8373_s7 = smov 20  }
 0x7ce   : > { %2723 = vrot.lane.b32.xlu0 %v2660_v24, %s6720_s12  ;;  %2721 = vrot.lane.b32.xlu1 %v2658_v22, %s6720_s12 }
 0x7cf   : > { %2739 = vrot.lane.b32.xlu2 %v7640_v44, %s6713_s19 }
 0x7d6   : > { %6028 = vrot.lane.b32.xlu0 %v6027_v25, %s6719_s1  ;;  %2709 = vrot.lane.b32.xlu1 %v2658_v22, %s6713_s19  ;;  %s8370_s19 = smov 8  }
 0x7d7   : > { %2715 = vrot.lane.b32.xlu2 %v2660_v24, %s6718_s6  ;;  %s8375_s6 = smov 24  }
 0x7de   : > { %2753 = vrot.lane.b32.xlu1 %v7634_v17, %s6720_s12  ;;  %6038 = vrot.lane.b32.xlu0 %v6037_v28, %s6719_s1  ;;  %s8378_s12 = scalar_lea.vmem [#allocation14], %s7145_s0 }
 0x7df   : > { %2717 = vrot.lane.b32.xlu2 %v2658_v22, %s6717_s9  ;;  %s8374_s9 = smov 28  }
 0x7e6   : > { %6043 = vrot.lane.b32.xlu1 %v6042_v46, %s6719_s1 }
 0x7e7   : > { %6023 = vrot.lane.b32.xlu2 %v6022_v21, %s6719_s1 }
 0x7ef   : > { %6033 = vrot.lane.b32.xlu2 %v6032_v10, %s6719_s1 }
 0x808   : > { %v2698_v31 = vpop.permute.xlu2 %2697 }
 0x809   : > { %5416 = vmatmul.msk.f32.vlgmr.msrb.gmra.mxu3 %vm1401_vm2, %v2698_v31 }
 0x80a   : > { %5431 = vmatpush.xpose.msk.msrb.mxu3 %vm1401_vm2, %v2744_v43 }
 0x811   : > { %v2706_v32 = vpop.permute.xlu2 %2705 }
 0x812   : > { %5424 = vmatmul.msk.f32.vlgmr.msra.gmra.mxu3 %vm1401_vm2, %v2706_v32 }
 0x813   : > { %5439 = vmatpush.xpose.msk.msra.mxu3 %vm1401_vm2, %v7717_v30 }
 0x819   : > { %v2714_v60 = vpop.permute.xlu2 %2713 }
 0x81a   : > { %5432 = vmatmul.msk.f32.vlgmr.msrb.gmra.mxu3 %vm1401_vm2, %v2714_v60 }
 0x821   : > { %v2702_v35 = vpop.permute.xlu2 %2701 }
 0x822   : > { %5420 = vmatmul.msk.f32.vlgmr.msrb.gmra.mxu1 %vm1401_vm2, %v2702_v35 }
 0x828   : > { %v2708_v38 = vpop.permute.xlu0 %2707  ;;  %v2704_v7 = vpop.permute.xlu1 %2703 }
 0x829   : > { %v7730_v39 = vpop.permute.xlu2 %2739  ;;  %5422 = vmatmul.msk.f32.vlgmr.msra.gmra.mxu2 %vm1401_vm2, %v2704_v7 }
 0x82a   : > { %v6047_v41 = vpack.i.bf16 %v7727_v34, %v7730_v39  ;;  %5427 = vmatpush.xpose.msk.msra.mxu1 %vm1401_vm2, %v7730_v39  ;;  %5437 = vmatpush.xpose.msk.msra.mxu2 %vm1401_vm2, %v7725_v1 }
 0x830   : > { %v2720_v42 = vpop.permute.xlu0 %2719  ;;  %v2700_v17 = vpop.permute.xlu1 %2699 }
 0x831   : > { %v2716_v44 = vpop.permute.xlu2 %2715  ;;  %v2776_v45 = vpop.f32.mrf.mxu2  ;;  %5418 = vmatmul.msk.f32.vlgmr.msra.gmra.mxu0 %vm1401_vm2, %v2700_v17 }
 0x832   : > { %v3139_v2 = vmul.f32 0.5, %v2776_v45  ;;  %5433 = vmatpush.xpose.msk.msra.mxu0 %vm1401_vm2, %v7727_v34 }
 0x834   : > { %v3155_v63 = vsel %vm1848_vm3, %v3139_v2, -inf }
 0x835   : > { %3156 = vmax.xlane.f32.xlu0 %v3155_v63 }
 0x838   : > { %v7743_v14 = vpop.permute.xlu0 %2747  ;;  %v2712_v47 = vpop.permute.xlu1 %2711 }
 0x839   : > { %v2718_v11 = vpop.permute.xlu2 %2717  ;;  %5426 = vmatmul.msk.f32.vlgmr.msrb.gmra.mxu0 %vm1401_vm2, %v2708_v38  ;;  %5430 = vmatmul.msk.f32.vlgmr.msrb.gmra.mxu2 %vm1401_vm2, %v2712_v47 }
 0x83a   : > { %v2800_v49 = vpop.f32.mrf.mxu2  ;;  %5435 = vmatpush.xpose.msk.msrb.mxu1 %vm1401_vm2, %v7743_v14 }
 0x83b   : > { %v7749_v50 = vmul.f32 0.5, %v2800_v49 }
 0x83d   : > { %v3158_v51 = vsel %vm1848_vm3, %v7749_v50, -inf }
 0x83e   : > { %3159 = vmax.xlane.f32.xlu1 %v3158_v51 }
 0x840   : > { %v2724_v16 = vpop.permute.xlu0 %2723  ;;  %v2722_v53 = vpop.permute.xlu1 %2721 }
 0x841   : > { %v6024_v58 = vpop.permute.xlu2 %6023  ;;  %5434 = vmatmul.msk.f32.vlgmr.msra.gmra.mxu0 %vm1401_vm2, %v2716_v44  ;;  %5438 = vmatmul.msk.f32.vlgmr.msra.gmra.mxu2 %vm1401_vm2, %v2720_v42 }
 0x842   : > { %v6026_v54 = vunpack.i.h.bf16 %v6024_v58  ;;  %v6025_v56 = vunpack.i.l.bf16 %v6024_v58  ;;  %5440 = vmatmul.msk.f32.vlgmr.msra.gmra.mxu3 %vm1401_vm2, %v2722_v53 }
 0x844   : > { %3378 = vmatpush.msrb.mxu2 %v6025_v56  ;;  %3404 = vmatpush.msrb.mxu3 %v6026_v54 }
 0x848   : > { %v6029_v6 = vpop.permute.xlu0 %6028  ;;  %v2710_v52 = vpop.permute.xlu1 %2709 }
 0x849   : > { %v6030_v48 = vunpack.i.l.bf16 %v6029_v6  ;;  %5428 = vmatmul.msk.f32.vlgmr.msra.gmra.mxu1 %vm1401_vm2, %v2710_v52  ;;  %v6034_v29 = vpop.permute.xlu2 %6033  ;;  %v6031_v33 = vunpack.i.h.bf16 %v6029_v6 }
 0x84a   : > { %v6036_v57 = vunpack.i.h.bf16 %v6034_v29  ;;  %v6035_v59 = vunpack.i.l.bf16 %v6034_v29 }
 0x84b   : > { %3352 = vmatpush.msra.mxu1 %v6030_v48 }
 0x84c   : > { %3482 = vmatpush.msra.mxu2 %v6035_v59  ;;  %3508 = vmatpush.msra.mxu3 %v6036_v57 }
 0x850   : > { %v7757_v0 = vpop.permute.xlu1 %2753  ;;  %v6039_v20 = vpop.permute.xlu0 %6038 }
 0x851   : > { %v6057_v61 = vpack.i.bf16 %v7757_v0, %v7743_v14  ;;  %5436 = vmatmul.msk.f32.vlgmr.msrb.gmra.mxu1 %vm1401_vm2, %v2718_v11  ;;  %5441 = vmatpush.xpose.msk.msrb.mxu0 %vm1401_vm2, %v7757_v0  ;;  %v6041_v8 = vunpack.i.h.bf16 %v6039_v20  ;;  %v6040_v13 = vunpack.i.l.bf16 %v6039_v20 }
 0x853   : > { %3456 = vmatpush.msrb.mxu1 %v6040_v13 }
 0x854   : > { %5442 = vmatmul.msk.f32.vlgmr.msrb.gmra.mxu0 %vm1401_vm2, %v2724_v16 }
 0x855   : > { %3430 = vmatpush.msra.mxu0 %v6031_v33 }
 0x857   : > { %3534 = vmatpush.msrb.mxu0 %v6041_v8 }
 0x858   : > { %v7789_v35 = vpop.permute.xlu1 %6043 }
 0x859   : > { %v6046_v34 = vunpack.i.h.bf16 %v7789_v35 }
 0x88c   : > { %v2824_v27 = vpop.f32.mrf.mxu3 }
 0x88d   : > { %v7765_v4 = vmul.f32 0.5, %v2824_v27 }
 0x88f   : > { %v3161_v40 = vsel %vm1848_vm3, %v7765_v4, -inf }
 0x890   : > { %3162 = vmax.xlane.f32.xlu2 %v3161_v40 }
 0x895   : > { %v2920_v36 = vpop.f32.mrf.mxu3 }
 0x896   : > { %v7769_v37 = vmul.f32 0.5, %v2920_v36 }
 0x898   : > { %v3173_v9 = vsel %vm1848_vm3, %v7769_v37, -inf }
 0x899   : > { %3174 = vmax.xlane.f32.xlu0 %v3173_v9 }
 0x89d   : > { %v3016_v28 = vpop.f32.mrf.mxu3 }
 0x89e   : > { %v7785_v21 = vmul.f32 0.5, %v3016_v28 }
 0x89f   : > { %v2872_v10 = vpop.f32.mrf.mxu1 }
 0x8a0   : > { %v7773_v12 = vmul.f32 0.5, %v2872_v10  ;;  %v3185_v32 = vsel %vm1848_vm3, %v7785_v21, -inf }
 0x8a2   : > { %v3167_v18 = vsel %vm1848_vm3, %v7773_v12, -inf }
 0x8a3   : > { %3168 = vmax.xlane.f32.xlu1 %v3167_v18 }
 0x8a8   : > { %v3157_v3 = vpop.xlane.xlu0 %3156 }
 0x8a9   : > { %v3203_v22 = vsub.f32 %v3139_v2, %v3157_v3 }
 0x8ab   : > { %v3219_v26 = vmul.f32 1.442695, %v3203_v22 }
 0x8ac   : > { %v2896_v43 = vpop.f32.mrf.mxu2 }
 0x8ad   : > { %6179 = vpow2.f32 %v3219_v26  ;;  %v7799_v2 = vmul.f32 0.5, %v2896_v43 }
 0x8ae   : > { %v2848_v24 = vpop.f32.mrf.mxu0 }
 0x8af   : > { %v7777_v19 = vmul.f32 0.5, %v2848_v24  ;;  %v3170_v16 = vsel %vm1848_vm3, %v7799_v2, -inf }
 0x8b1   : > { %v3164_v23 = vsel %vm1848_vm3, %v7777_v19, -inf  ;;  %v3160_v63 = vpop.xlane.xlu1 %3159 }
 0x8b2   : > { %3165 = vmax.xlane.f32.xlu1 %v3164_v23  ;;  %v3204_v49 = vsub.f32 %v7749_v50, %v3160_v63 }
 0x8b3   : > { %v7781_v15 = vpop.eup %6179 }
 0x8b4   : > { %v3251_v25 = vsel %vm1848_vm3, %v7781_v15, 0.0  ;;  %v3221_v54 = vmul.f32 1.442695, %v3204_v49 }
 0x8b6   : > { %v2944_v31 = vpop.f32.mrf.mxu0  ;;  %6181 = vpow2.f32 %v3221_v54 }
 0x8b7   : > { %v7812_v6 = vmul.f32 0.5, %v2944_v31 }
 0x8b9   : > { %v3176_v50 = vsel %vm1848_vm3, %v7812_v6, -inf }
 0x8ba   : > { %3252 = vadd.xlane.f32.xlu1 %v3251_v25 }
 0x8bc   : > { %v2992_v46 = vpop.f32.mrf.mxu2  ;;  %v7822_v57 = vpop.eup %6181 }
 0x8bd   : > { %v7814_v52 = vmul.f32 0.5, %v2992_v46  ;;  %v3254_v59 = vsel %vm1848_vm3, %v7822_v57, 0.0 }
 0x8be   : > { %v3040_v17 = vpop.f32.mrf.mxu0 }
 0x8bf   : > { %v3182_v48 = vsel %vm1848_vm3, %v7814_v52, -inf  ;;  %v7820_v29 = vmul.f32 0.5, %v3040_v17 }
 0x8c1   : > { %v3188_v33 = vsel %vm1848_vm3, %v7820_v29, -inf }
 0x8c2   : > { %3186 = vmax.xlane.f32.xlu1 %v3185_v32 }
 0x8c4   : > { %v3088_v60 = vpop.f32.mrf.mxu2 }
 0x8c5   : > { %v7791_v38 = vmul.f32 0.5, %v3088_v60  ;;  %v3112_v20 = vpop.f32.mrf.mxu3 }
 0x8c6   : > { %v2968_v7 = vpop.f32.mrf.mxu1  ;;  %v7828_v8 = vmul.f32 0.5, %v3112_v20 }
 0x8c7   : > { %v7793_v42 = vmul.f32 0.5, %v2968_v7  ;;  %v3194_v44 = vsel %vm1848_vm3, %v7791_v38, -inf }
 0x8c8   : > { %v3197_v13 = vsel %vm1848_vm3, %v7828_v8, -inf }
 0x8c9   : > { %v3179_v45 = vsel %vm1848_vm3, %v7793_v42, -inf }
 0x8ca   : > { %3195 = vmax.xlane.f32.xlu1 %v3194_v44  ;;  %3180 = vmax.xlane.f32.xlu2 %v3179_v45 }
 0x8ce   : > { %v3064_v47 = vpop.f32.mrf.mxu1 }
 0x8cf   : > { %v7801_v11 = vmul.f32 0.5, %v3064_v47 }
 0x8d1   : > { %v3136_v51 = vpop.f32.mrf.mxu0  ;;  %v3191_v53 = vsel %vm1848_vm3, %v7801_v11, -inf }
 0x8d2   : > { %v7808_v58 = vmul.f32 0.5, %v3136_v51  ;;  %3171 = vmax.xlane.f32.xlu2 %v3170_v16  ;;  %3192 = vmax.xlane.f32.xlu0 %v3191_v53 }
 0x8d4   : > { %v3200_v56 = vsel %vm1848_vm3, %v7808_v58, -inf }
 0x8d5   : > { %3201 = vmax.xlane.f32.xlu1 %v3200_v56 }
 0x8da   : > { %3177 = vmax.xlane.f32.xlu2 %v3176_v50  ;;  %3183 = vmax.xlane.f32.xlu0 %v3182_v48 }
 0x8e2   : > { %3255 = vadd.xlane.f32.xlu2 %v3254_v59  ;;  %3189 = vmax.xlane.f32.xlu0 %v3188_v33 }
 0x8ea   : > { %3198 = vmax.xlane.f32.xlu2 %v3197_v13 }
 0x903   : > { %v3163_v27 = vpop.xlane.xlu2 %3162 }
 0x904   : > { %v3205_v9 = vsub.f32 %v7765_v4, %v3163_v27 }
 0x906   : > { %v3223_v18 = vmul.f32 1.442695, %v3205_v9 }
 0x916   : > { %v3169_v40 = vpop.xlane.xlu1 %3168 }
 0x917   : > { %v3207_v36 = vsub.f32 %v7773_v12, %v3169_v40 }
 0x919   : > { %v3227_v10 = vmul.f32 1.442695, %v3207_v36 }
 0x91b   : > { %6183 = vpow2.f32 %v3227_v10 }
 0x91c   : > { %6185 = vpow2.f32 %v3223_v18 }
 0x921   : > { %v7834_v3 = vpop.eup %6183 }
 0x922   : > { %v3263_v22 = vsel %vm1848_vm3, %v7834_v3, 0.0  ;;  %v7839_v23 = vpop.eup %6185 }
 0x923   : > { %3264 = vadd.xlane.f32.xlu0 %v3263_v22  ;;  %v3257_v4 = vsel %vm1848_vm3, %v7839_v23, 0.0 }
 0x925   : > { %v3166_v26 = vpop.xlane.xlu1 %3165 }
 0x926   : > { %v3206_v24 = vsub.f32 %v7777_v19, %v3166_v26  ;;  %v3175_v19 = vpop.xlane.xlu0 %3174 }
 0x927   : > { %v3209_v17 = vsub.f32 %v7769_v37, %v3175_v19 }
 0x928   : > { %v3225_v43 = vmul.f32 1.442695, %v3206_v24 }
 0x929   : > { %v3231_v45 = vmul.f32 1.442695, %v3209_v17 }
 0x92a   : > { %6187 = vpow2.f32 %v3225_v43 }
 0x92b   : > { %3258 = vadd.xlane.f32.xlu0 %v3257_v4  ;;  %v6045_v4 = vunpack.i.l.bf16 %v7789_v35 }
 0x92d   : > { %v3253_v12 = vpop.xlane.xlu1 %3252 }
 0x92e   : > { %6189 = vrcp.f32 %v3253_v12 }
 0x930   : > { %v7843_v25 = vpop.eup %6187 }
 0x931   : > { %v3260_v28 = vsel %vm1848_vm3, %v7843_v25, 0.0 }
 0x932   : > { %3261 = vadd.xlane.f32.xlu2 %v3260_v28 }
 0x934   : > { %v6190_v46 = vpop.eup %6189 }
 0x935   : > { %v3315_v31 = vmul.f32 %v6190_v46, %v7781_v15  ;;  %v3187_v44 = vpop.xlane.xlu1 %3186 }
 0x936   : > { %v3213_v10 = vsub.f32 %v7785_v21, %v3187_v44 }
 0x937   : > { %5443 = vmatmul.msk.f32.vlgmr.msra.gmra.mxu1 %vm1848_vm3, %v3315_v31 }
 0x938   : > { %v3239_v24 = vmul.f32 1.442695, %v3213_v10 }
 0x93d   : > { %v3181_v32 = vpop.xlane.xlu2 %3180 }
 0x93e   : > { %v3211_v60 = vsub.f32 %v7793_v42, %v3181_v32  ;;  %v3196_v42 = vpop.xlane.xlu1 %3195 }
 0x93f   : > { %v3216_v46 = vsub.f32 %v7791_v38, %v3196_v42 }
 0x940   : > { %v3235_v7 = vmul.f32 1.442695, %v3211_v60 }
 0x941   : > { %v3245_v31 = vmul.f32 1.442695, %v3216_v46 }
 0x942   : > { %6191 = vpow2.f32 %v3235_v7 }
 0x943   : > { %6193 = vpow2.f32 %v3231_v45 }
 0x945   : > { %v7851_v63 = vpop.xlane.xlu0 %3192  ;;  %v3172_v47 = vpop.xlane.xlu2 %3171 }
 0x946   : > { %v3208_v49 = vsub.f32 %v7799_v2, %v3172_v47  ;;  %v3215_v38 = vsub.f32 %v7801_v11, %v7851_v63 }
 0x948   : > { %v3229_v51 = vmul.f32 1.442695, %v3208_v49  ;;  %v7854_v16 = vpop.eup %6191  ;;  %v3202_v20 = vpop.xlane.xlu1 %3201  ;;  %v3243_v45 = vmul.f32 1.442695, %v3215_v38 }
 0x949   : > { %v3275_v15 = vsel %vm1848_vm3, %v7854_v16, 0.0  ;;  %v7859_v56 = vpop.eup %6193  ;;  %v3218_v36 = vsub.f32 %v7808_v58, %v3202_v20 }
 0x94a   : > { %6195 = vpow2.f32 %v3229_v51  ;;  %3276 = vadd.xlane.f32.xlu1 %v3275_v15  ;;  %v3269_v59 = vsel %vm1848_vm3, %v7859_v56, 0.0  ;;  %v6052_v51 = vpack.i.bf16 %v7717_v30, %v7725_v1 }
 0x94b   : > { %v3249_v26 = vmul.f32 1.442695, %v3218_v36 }
 0x94d   : > { %v3184_v53 = vpop.xlane.xlu0 %3183  ;;  %v3178_v37 = vpop.xlane.xlu2 %3177 }
 0x94e   : > { %v3210_v54 = vsub.f32 %v7812_v6, %v3178_v37  ;;  %v3212_v2 = vsub.f32 %v7814_v52, %v3184_v53 }
 0x950   : > { %v3233_v50 = vmul.f32 1.442695, %v3210_v54  ;;  %v7861_v48 = vpop.eup %6195  ;;  %v3237_v13 = vmul.f32 1.442695, %v3212_v2 }
 0x951   : > { %v3266_v33 = vsel %vm1848_vm3, %v7861_v48, 0.0 }
 0x952   : > { %6197 = vpow2.f32 %v3233_v50  ;;  %3270 = vadd.xlane.f32.xlu1 %v3269_v59  ;;  %3267 = vadd.xlane.f32.xlu0 %v3266_v33 }
 0x955   : > { %v3190_v27 = vpop.xlane.xlu0 %3189  ;;  %v3256_v6 = vpop.xlane.xlu2 %3255 }
 0x956   : > { %v3214_v40 = vsub.f32 %v7820_v29, %v3190_v27  ;;  %6199 = vrcp.f32 %v3256_v6 }
 0x957   : > { %6201 = vpow2.f32 %v3237_v13 }
 0x958   : > { %v3241_v9 = vmul.f32 1.442695, %v3214_v40  ;;  %v7870_v52 = vpop.eup %6197 }
 0x959   : > { %v3272_v18 = vsel %vm1848_vm3, %v7870_v52, 0.0 }
 0x95a   : > { %6203 = vpow2.f32 %v3241_v9  ;;  %3273 = vadd.xlane.f32.xlu1 %v3272_v18 }
 0x95b   : > { %6205 = vpow2.f32 %v3249_v26 }
 0x95c   : > { %v6200_v22 = vpop.eup %6199  ;;  %6207 = vpow2.f32 %v3239_v24 }
 0x95d   : > { %v3316_v43 = vmul.f32 %v6200_v22, %v7822_v57  ;;  %v3199_v29 = vpop.xlane.xlu2 %3198  ;;  %v7878_v12 = vpop.eup %6201 }
 0x95e   : > { %v3217_v58 = vsub.f32 %v7828_v8, %v3199_v29  ;;  %v3278_v8 = vsel %vm1848_vm3, %v7878_v12, 0.0 }
 0x95f   : > { %5444 = vmatmul.msk.f32.vlgmr.msrb.gmra.mxu2 %vm1848_vm3, %v3316_v43 }
 0x960   : > { %v7881_v21 = vpop.eup %6203  ;;  %v3247_v28 = vmul.f32 1.442695, %v3217_v58  ;;  %3586 = vmatpush.msrb.mxu2 %v6045_v4 }
 0x961   : > { %v3284_v57 = vsel %vm1848_vm3, %v7881_v21, 0.0  ;;  %v7888_v19 = vpop.eup %6205 }
 0x962   : > { %6209 = vpow2.f32 %v3247_v28  ;;  %3285 = vadd.xlane.f32.xlu2 %v3284_v57  ;;  %3279 = vadd.xlane.f32.xlu1 %v3278_v8  ;;  %v7890_v32 = vpop.eup %6207  ;;  %v3296_v7 = vsel %vm1848_vm3, %v7888_v19, 0.0 }
 0x963   : > { %6211 = vpow2.f32 %v3245_v31  ;;  %v3281_v44 = vsel %vm1848_vm3, %v7890_v32, 0.0 }
 0x964   : > { %6213 = vpow2.f32 %v3243_v45 }
 0x968   : > { %v7892_v60 = vpop.eup %6209 }
 0x969   : > { %v3293_v17 = vsel %vm1848_vm3, %v7892_v60, 0.0  ;;  %v7902_v47 = vpop.eup %6211 }
 0x96a   : > { %3297 = vadd.xlane.f32.xlu2 %v3296_v7  ;;  %3294 = vadd.xlane.f32.xlu0 %v3293_v17  ;;  %v3290_v49 = vsel %vm1848_vm3, %v7902_v47, 0.0  ;;  %v7906_v11 = vpop.eup %6213 }
 0x96b   : > { %3282 = vadd.xlane.f32.xlu1 %v3281_v44  ;;  %v3287_v63 = vsel %vm1848_vm3, %v7906_v11, 0.0 }
 0x973   : > { %3291 = vadd.xlane.f32.xlu1 %v3290_v49 }
 0x97b   : > { %3288 = vadd.xlane.f32.xlu1 %v3287_v63 }
 0x97e   : > { %6053 = vrot.lane.b32.xlu0 %v6052_v51, %s6719_s1 }
 0x982   : > { %6048 = vrot.lane.b32.xlu2 %v6047_v41, %s6719_s1 }
 0x986   : > { %6058 = vrot.lane.b32.xlu0 %v6057_v61, %s6719_s1  ;;  %s8377_s1 = scalar_lea.vmem [#allocation12], %s7145_s0 }
 0x996   : > { %v3265_v15 = vpop.xlane.xlu0 %3264 }
 0x997   : > { %6215 = vrcp.f32 %v3265_v15 }
 0x99d   : > { %v6216_v42 = vpop.eup %6215 }
 0x99e   : > { %v3319_v53 = vmul.f32 %v6216_v42, %v7834_v3  ;;  %v3259_v37 = vpop.xlane.xlu0 %3258 }
 0x99f   : > { %6217 = vrcp.f32 %v3259_v37 }
 0x9a0   : > { %5447 = vmatmul.msk.f32.vlgmr.msrb.gmra.mxu1 %vm1848_vm3, %v3319_v53 }
 0x9a5   : > { %v6218_v30 = vpop.eup %6217  ;;  %v3262_v1 = vpop.xlane.xlu2 %3261 }
 0x9a6   : > { %v3317_v54 = vmul.f32 %v6218_v30, %v7839_v23  ;;  %6219 = vrcp.f32 %v3262_v1 }
 0x9a8   : > { %5445 = vmatmul.msk.f32.vlgmr.msrb.gmra.mxu3 %vm1848_vm3, %v3317_v54 }
 0x9a9   : > { %3612 = vmatpush.msrb.mxu3 %v6046_v34 }
 0x9ac   : > { %v6220_v39 = vpop.eup %6219 }
 0x9ad   : > { %v3318_v41 = vmul.f32 %v6220_v39, %v7843_v25 }
 0x9af   : > { %5446 = vmatmul.msk.f32.vlgmr.msra.gmra.mxu0 %vm1848_vm3, %v3318_v41 }
 0x9bd   : > { %v3277_v14 = vpop.xlane.xlu1 %3276 }
 0x9c5   : > { %v3271_v0 = vpop.xlane.xlu1 %3270  ;;  %v3268_v61 = vpop.xlane.xlu0 %3267 }
 0x9c6   : > { %6221 = vrcp.f32 %v3271_v0 }
 0x9c7   : > { %6223 = vrcp.f32 %v3268_v61 }
 0x9cc   : > { %v6222_v3 = vpop.eup %6221 }
 0x9cd   : > { %v6224_v50 = vpop.eup %6223  ;;  %v3321_v23 = vmul.f32 %v6222_v3, %v7859_v56  ;;  %v3274_v2 = vpop.xlane.xlu1 %3273 }
 0x9ce   : > { %v3320_v35 = vmul.f32 %v6224_v50, %v7861_v48  ;;  %6225 = vrcp.f32 %v3274_v2  ;;  %v5761_v50 = vld [vmem:[%s7227_s27 + $0x8] sm:$0xff] }
 0x9cf   : > { %5449 = vmatmul.msk.f32.vlgmr.msra.gmra.mxu3 %vm1848_vm3, %v3321_v23  ;;  %v5760_v23 = vld [vmem:[%s7227_s27] sm:$0xff]  ;;  %s8376_s27 = scalar_lea.vmem [#allocation11], %s7145_s0 }
 0x9d0   : > { %5448 = vmatmul.msk.f32.vlgmr.msra.gmra.mxu2 %vm1848_vm3, %v3320_v35 }
 0x9d4   : > { %v6226_v25 = vpop.eup %6225 }
 0x9d5   : > { %v3286_v59 = vpop.xlane.xlu2 %3285  ;;  %v3322_v33 = vmul.f32 %v6226_v25, %v7870_v52  ;;  %v3280_v20 = vpop.xlane.xlu1 %3279 }
 0x9d6   : > { %6227 = vrcp.f32 %v3280_v20 }
 0x9d7   : > { %5450 = vmatmul.msk.f32.vlgmr.msrb.gmra.mxu0 %vm1848_vm3, %v3322_v33  ;;  %6229 = vrcp.f32 %v3277_v14 }
 0x9d8   : > { %6231 = vrcp.f32 %v3286_v59 }
 0x9dc   : > { %v6228_v13 = vpop.eup %6227 }
 0x9dd   : > { %v3298_v27 = vpop.xlane.xlu2 %3297  ;;  %v3324_v56 = vmul.f32 %v6228_v13, %v7878_v12  ;;  %v6230_v6 = vpop.eup %6229 }
 0x9de   : > { %v3283_v48 = vpop.xlane.xlu1 %3282  ;;  %v6232_v40 = vpop.eup %6231  ;;  %v3323_v24 = vmul.f32 %v6230_v6, %v7854_v16 }
 0x9df   : > { %6233 = vrcp.f32 %v3283_v48  ;;  %5452 = vmatmul.msk.f32.vlgmr.msrb.gmra.mxu2 %vm1848_vm3, %v3324_v56  ;;  %v3295_v9 = vpop.xlane.xlu0 %3294  ;;  %v3326_v43 = vmul.f32 %v6232_v40, %v7881_v21 }
 0x9e0   : > { %6235 = vrcp.f32 %v3295_v9 }
 0x9e2   : > { %v3380_v49 = vpop.f32.mrf.mxu2 }
 0x9e5   : > { %v6234_v36 = vpop.eup %6233  ;;  %v6049_v10 = vpop.permute.xlu2 %6048 }
 0x9e6   : > { %v3325_v52 = vmul.f32 %v6234_v36, %v7890_v32  ;;  %v3292_v18 = vpop.xlane.xlu1 %3291  ;;  %v6051_v22 = vunpack.i.h.bf16 %v6049_v10  ;;  %v6050_v26 = vunpack.i.l.bf16 %v6049_v10  ;;  %v6236_v29 = vpop.eup %6235 }
 0x9e7   : > { %6237 = vrcp.f32 %v3292_v18  ;;  %v3329_v21 = vmul.f32 %v6236_v29, %v7892_v60 }
 0x9e8   : > { %5453 = vmatmul.msk.f32.vlgmr.msrb.gmra.mxu3 %vm1848_vm3, %v3325_v52  ;;  %3560 = vmatpush.msra.mxu1 %v6050_v26  ;;  %6239 = vrcp.f32 %v3298_v27 }
 0x9e9   : > { %3638 = vmatpush.msra.mxu0 %v6051_v22  ;;  %5451 = vmatmul.msk.f32.vlgmr.msra.gmra.mxu1 %vm1848_vm3, %v3323_v24 }
 0x9ea   : > { %5454 = vmatmul.msk.f32.vlgmr.msra.gmra.mxu0 %vm1848_vm3, %v3326_v43 }
 0x9ed   : > { %v6238_v58 = vpop.eup %6237 }
 0x9ee   : > { %v3289_v4 = vpop.xlane.xlu1 %3288  ;;  %v3328_v46 = vmul.f32 %v6238_v58, %v7902_v47  ;;  %v6240_v57 = vpop.eup %6239 }
 0x9ef   : > { %6241 = vrcp.f32 %v3289_v4  ;;  %v3330_v7 = vmul.f32 %v6240_v57, %v7888_v19  ;;  %v3354_v47 = vpop.f32.mrf.mxu1 }
 0x9f0   : > { %v6054_v12 = vpop.permute.xlu0 %6053 }
 0x9f1   : > { %v6056_v28 = vunpack.i.h.bf16 %v6054_v12  ;;  %v6055_v16 = vunpack.i.l.bf16 %v6054_v12 }
 0x9f3   : > { %3690 = vmatpush.msra.mxu2 %v6055_v16  ;;  %3716 = vmatpush.msra.mxu3 %v6056_v28 }
 0x9f4   : > { %5456 = vmatmul.msk.f32.vlgmr.msra.gmra.mxu2 %vm1848_vm3, %v3328_v46  ;;  %5457 = vmatmul.msk.f32.vlgmr.msra.gmra.mxu3 %vm1848_vm3, %v3329_v21 }
 0x9f5   : > { %v6242_v8 = vpop.eup %6241 }
 0x9f6   : > { %v3327_v17 = vmul.f32 %v6242_v8, %v7906_v11 }
 0x9f8   : > { %v6059_v31 = vpop.permute.xlu0 %6058 }
 0x9f9   : > { %v6061_v32 = vunpack.i.h.bf16 %v6059_v31  ;;  %v6060_v38 = vunpack.i.l.bf16 %v6059_v31 }
 0x9fb   : > { %3664 = vmatpush.msrb.mxu1 %v6060_v38  ;;  %3742 = vmatpush.msrb.mxu0 %v6061_v32 }
 0x9fc   : > { %5455 = vmatmul.msk.f32.vlgmr.msrb.gmra.mxu1 %vm1848_vm3, %v3327_v17  ;;  %5458 = vmatmul.msk.f32.vlgmr.msrb.gmra.mxu0 %vm1848_vm3, %v3330_v7 }
 0x9fd   : > { %3842 = vmatpush.bf16.msra.mxu1 %v5761_v50  ;;  %v5542_v50 = vld [vmem:[%s7173_s29 + $0x88] sm:$0xf] }
 0xa01   : > { %3843 = vmatpush.bf16.msra.mxu1 %v5760_v23  ;;  %v5787_v23 = vld [vmem:[%s7173_s29 + $0xc4] sm:$0xf0] }
 0xa1d   : > { %v3458_v63 = vpop.f32.mrf.mxu1 }
 0xa2b   : > { %v3406_v60 = vpop.f32.mrf.mxu3 }
 0xa2c   : > { %v3432_v44 = vpop.f32.mrf.mxu0 }
 0xa2d   : > { %v6062_v45 = vpack.i.bf16 %v3432_v44, %v3406_v60  ;;  %v6103_v60 = vld [vmem:[%s8376_s27] ss:$0 sm:$0xff] }
 0xa2f   : > { %6063 = vrot.lane.b32.xlu2 %v6062_v45, %s6722_s30  ;;  %s8382_s30 = sld [smem:[#allocation34_spill]] }
 0xa35   : > { %p5740_p10 = scmp.ne.s32.totalorder %s8382_s30, 5 }
 0xa36   : > { %s8383_s2 = sld [smem:[#allocation59_spill]] (!%p5740_p10) }
 0xa37   : > { %s8384_s17 = sld [smem:[#allocation60_spill]] (!%p5740_p10) }
 0xa52   : > { %v3510_v42 = vpop.f32.mrf.mxu3 }
 0xa53   : > { %v3484_v51 = vpop.f32.mrf.mxu2 }
 0xa54   : > { %v6067_v15 = vpack.i.bf16 %v3484_v51, %v3458_v63  ;;  %v3536_v19 = vpop.f32.mrf.mxu0 }
 0xa55   : > { %v6072_v53 = vpack.i.bf16 %v3536_v19, %v3510_v42 }
 0xa56   : > { %6068 = vrot.lane.b32.xlu0 %v6067_v15, %s8370_s19 }
 0xa57   : > { %6073 = vrot.lane.b32.xlu2 %v6072_v53, %s8371_s11 }
 0xa62   : > { %v3588_v11 = vpop.f32.mrf.mxu2 }
 0xa66   : > { %v3562_v37 = vpop.f32.mrf.mxu1 }
 0xa67   : > { %v6077_v30 = vpack.i.bf16 %v3588_v11, %v3562_v37  ;;  %v3640_v1 = vpop.f32.mrf.mxu0 }
 0xa69   : > { %6078 = vrot.lane.b32.xlu1 %v6077_v30, %s8372_s8 }
 0xa6b   : > { %v3614_v54 = vpop.f32.mrf.mxu3 }
 0xa6c   : > { %v6082_v34 = vpack.i.bf16 %v3640_v1, %v3614_v54 }
 0xa6e   : > { %6083 = vrot.lane.b32.xlu0 %v6082_v34, %s8373_s7 }
 0xa77   : > { %v3692_v39 = vpop.f32.mrf.mxu2  ;;  %v3718_v41 = vpop.f32.mrf.mxu3 }
 0xa79   : > { %v3666_v14 = vpop.f32.mrf.mxu1  ;;  %v3744_v0 = vpop.f32.mrf.mxu0 }
 0xa7a   : > { %v6087_v61 = vpack.i.bf16 %v3692_v39, %v3666_v14  ;;  %v6092_v3 = vpack.i.bf16 %v3744_v0, %v3718_v41  ;;  %v5534_v39 = vld [vmem:[%s7173_s29 + $0x80] sm:$0xf]  ;;  %v5778_v14 = vld [vmem:[%s7173_s29 + $0x84] sm:$0xf] }
 0xa7b   : > { %v5786_v41 = vld [vmem:[%s7173_s29 + $0xbc] sm:$0xf0] }
 0xa7c   : > { %6093 = vrot.lane.b32.xlu0 %v6092_v3, %s8374_s9  ;;  %6088 = vrot.lane.b32.xlu2 %v6087_v61, %s8375_s6  ;;  %v5535_v61 = vor.u32 %v5786_v41, %v5534_v39  ;;  %v5536_v3 = vld [vmem:[%s7173_s29 + $0xc0] sm:$0xf0] }
 0xa7e   : > { %4179 = vmatpush.bf16.msrb.mxu2 %v5535_v61 }
 0xa89   : > { %v6064_v2 = vpop.permute.xlu2 %6063 }
 0xa8a   : > { %v6066_v25 = vunpack.i.h.bf16 %v6064_v2  ;;  %v6065_v59 = vunpack.i.l.bf16 %v6064_v2 }
 0xa8c   : > { %v3803_v48 = vsel %vm1401_vm2, %v3354_v47, %v6065_v59  ;;  %v3804_v6 = vsel %vm1401_vm2, %v3380_v49, %v6066_v25  ;;  %v5543_v25 = vor.u32 %v5787_v23, %v5542_v50  ;;  %v5779_v59 = vld [vmem:[%s7173_s29 + $0x8c] sm:$0xf] }
 0xa8e   : > { %4207 = vmatpush.bf16.msra.mxu0 %v5543_v25 }
 0xab1   : > { %v6074_v33 = vpop.permute.xlu2 %6073 }
 0xab2   : > { %v6076_v52 = vunpack.i.h.bf16 %v6074_v33  ;;  %v6075_v18 = vunpack.i.l.bf16 %v6074_v33  ;;  %v5544_v33 = vld [vmem:[%s7173_s29 + $0xc8] sm:$0xf0] }
 0xac8   : > { %v6069_v35 = vpop.permute.xlu0 %6068 }
 0xac9   : > { %v6071_v20 = vunpack.i.h.bf16 %v6069_v35  ;;  %v6070_v13 = vunpack.i.l.bf16 %v6069_v35  ;;  %v5539_v35 = vor.u32 %v5778_v14, %v5536_v3  ;;  %v6104_v3 = vld [vmem:[%s8377_s1] ss:$0 sm:$0xff] }
 0xacb   : > { %v3806_v40 = vsel %vm1848_vm3, %v3804_v6, %v6071_v20  ;;  %v3805_v36 = vsel %vm1848_vm3, %v3803_v48, %v6070_v13  ;;  %v5547_v20 = vor.u32 %v5779_v59, %v5544_v33  ;;  %4193 = vmatpush.bf16.msrb.mxu3 %v5539_v35  ;;  %v5762_v6 = vld [vmem:[%s7173_s29 + $0x4] sm:$0xf]  ;;  %v6105_v35 = vld [vmem:[%s8378_s12] ss:$0 sm:$0xff] }
 0xacc   : > { %v3807_v43 = vsel %vm2501_vm4, %v3805_v36, %v6075_v18  ;;  %v3808_v29 = vsel %vm2501_vm4, %v3806_v40, %v6076_v52  ;;  %v5472_v40 = vld [vmem:[%s7173_s29 + $0x40] sm:$0xf0]  ;;  %v5478_v36 = vld [vmem:[%s7173_s29 + $0x8] sm:$0xf]  ;;  %v5763_v52 = vld [vmem:[%s7173_s29 + $0xc] sm:$0xf] }
 0xacd   : > { %4221 = vmatpush.bf16.msrb.mxu1 %v5547_v20  ;;  %v5480_v18 = vld [vmem:[%s7173_s29 + $0x48] sm:$0xf0]  ;;  %v5566_v20 = vld [vmem:[%s7173_s29 + $0xa0] sm:$0xf] }
 0xad6   : > { %v6089_v24 = vpop.permute.xlu2 %6088 }
 0xad7   : > { %v6091_v16 = vunpack.i.h.bf16 %v6089_v24  ;;  %v6090_v21 = vunpack.i.l.bf16 %v6089_v24 }
 0xadb   : > { %v6079_v27 = vpop.permute.xlu1 %6078 }
 0xadc   : > { %v6081_v9 = vunpack.i.h.bf16 %v6079_v27  ;;  %v6080_v10 = vunpack.i.l.bf16 %v6079_v27  ;;  %v5470_v27 = vld [vmem:[%s7173_s29] sm:$0xf] }
 0xade   : > { %v3810_v4 = vsel %vm2504_vm5, %v3808_v29, %v6081_v9  ;;  %v3809_v58 = vsel %vm2504_vm5, %v3807_v43, %v6080_v10  ;;  %v5475_v9 = vor.u32 %v5762_v6, %v5472_v40  ;;  %v5771_v10 = vld [vmem:[%s7173_s29 + $0x44] sm:$0xf0]  ;;  %v5550_v43 = vld [vmem:[%s7173_s29 + $0x90] sm:$0xf] }
 0xadf   : > { %v5788_v29 = vld [vmem:[%s7173_s29 + $0xcc] sm:$0xf0]  ;;  %v5791_v40 = vld [vmem:[%s7173_s29 + $0xe4] sm:$0xf0] }
 0xae0   : > { %v6084_v56 = vpop.permute.xlu0 %6083  ;;  %4194 = vmatpush.bf16.msrb.mxu3 %v5475_v9 }
 0xae1   : > { %v6086_v22 = vunpack.i.h.bf16 %v6084_v56  ;;  %v6085_v26 = vunpack.i.l.bf16 %v6084_v56  ;;  %v5770_v56 = vld [vmem:[%s7173_s29 + $0x3c] sm:$0xf0] }
 0xae2   : > { %v5471_v48 = vor.u32 %v5770_v56, %v5470_v27  ;;  %v5782_v27 = vld [vmem:[%s7173_s29 + $0xa4] sm:$0xf]  ;;  %v5574_v56 = vld [vmem:[%s7173_s29 + $0xa8] sm:$0xf] }
 0xae3   : > { %v3811_v12 = vsel %vm2507_vm6, %v3809_v58, %v6085_v26  ;;  %v3812_v28 = vsel %vm2507_vm6, %v3810_v4, %v6086_v22  ;;  %v5479_v22 = vor.u32 %v5771_v10, %v5478_v36  ;;  %v5483_v26 = vor.u32 %v5763_v52, %v5480_v18  ;;  %v5780_v4 = vld [vmem:[%s7173_s29 + $0x94] sm:$0xf]  ;;  %v5783_v36 = vld [vmem:[%s7173_s29 + $0xac] sm:$0xf]  ;;  %v5502_v18 = vld [vmem:[%s7173_s29 + $0x20] sm:$0xf] }
 0xae4   : > { %v3813_v31 = vsel %vm2510_vm7, %v3811_v12, %v6090_v21  ;;  %v3814_v32 = vsel %vm2510_vm7, %v3812_v28, %v6091_v16  ;;  %4180 = vmatpush.bf16.msrb.mxu2 %v5471_v48  ;;  %v5551_v12 = vor.u32 %v5788_v29, %v5550_v43  ;;  %v5552_v28 = vld [vmem:[%s7173_s29 + $0xd0] sm:$0xf0]  ;;  %v5558_v16 = vld [vmem:[%s7173_s29 + $0x98] sm:$0xf]  ;;  %v5766_v43 = vld [vmem:[%s7173_s29 + $0x24] sm:$0xf] }
 0xae5   : > { %4208 = vmatpush.bf16.msra.mxu0 %v5479_v22  ;;  %4222 = vmatpush.bf16.msrb.mxu1 %v5483_v26  ;;  %v5789_v21 = vld [vmem:[%s7173_s29 + $0xd4] sm:$0xf0]  ;;  %v5774_v22 = vld [vmem:[%s7173_s29 + $0x5c] sm:$0xf0]  ;;  %v5575_v26 = vor.u32 %v5791_v40, %v5574_v56  ;;  %v5504_v29 = vld [vmem:[%s7173_s29 + $0x60] sm:$0xf0] }
 0xae6   : > { %v5624_v56 = vld [vmem:[%s7179_s5 + $0x48] sm:$0xf0] }
 0xae8   : > { %4235 = vmatpush.bf16.msra.mxu2 %v5551_v12  ;;  %v5767_v12 = vld [vmem:[%s7173_s29 + $0x2c] sm:$0xf] }
 0xaee   : > { %v6094_v46 = vpop.permute.xlu0 %6093 }
 0xaef   : > { %v6096_v57 = vunpack.i.h.bf16 %v6094_v46  ;;  %v6095_v8 = vunpack.i.l.bf16 %v6094_v46  ;;  %v5555_v46 = vor.u32 %v5780_v4, %v5552_v28  ;;  %v5510_v4 = vld [vmem:[%s7173_s29 + $0x28] sm:$0xf]  ;;  %v5512_v28 = vld [vmem:[%s7173_s29 + $0x68] sm:$0xf0] }
 0xaf1   : > { %v3815_v38 = vsel %vm2513_vm8, %v3813_v31, %v6095_v8  ;;  %v3816_v7 = vsel %vm2513_vm8, %v3814_v32, %v6096_v57  ;;  %v5559_v57 = vor.u32 %v5789_v21, %v5558_v16  ;;  %v5781_v8 = vld [vmem:[%s7173_s29 + $0x9c] sm:$0xf]  ;;  %v5486_v32 = vld [vmem:[%s7173_s29 + $0x10] sm:$0xf]  ;;  %4249 = vmatpush.bf16.msra.mxu3 %v5555_v46  ;;  %v5503_v16 = vor.u32 %v5774_v22, %v5502_v18  ;;  %v5702_v22 = vld [vmem:[%s7179_s5 + $0x98] sm:$0xf] }
 0xaf2   : > { %v3817_v17 = vpack.c.bf16 %v3816_v7, %v3815_v38  ;;  %v5560_v31 = vld [vmem:[%s7173_s29 + $0xd8] sm:$0xf0]  ;;  %v5507_v21 = vor.u32 %v5766_v43, %v5504_v29 }
 0xaf3   : > { %4263 = vmatpush.bf16.msrb.mxu0 %v5559_v57  ;;  %v5515_v57 = vor.u32 %v5767_v12, %v5512_v28  ;;  %v5704_v29 = vld [vmem:[%s7179_s5 + $0xd8] sm:$0xf0]  ;;  %v5820_v12 = vld [vmem:[%s7179_s5 + $0xcc] sm:$0xf0] }
 0xaf4   : > { %5467 = vmatmul.msk.bf16.vlgmr.msra.gmra.mxu1 %vm1351_vm1, %v3817_v17  ;;  %v5563_v17 = vor.u32 %v5781_v8, %v5560_v31  ;;  %v5582_v8 = vld [vmem:[%s7173_s29 + $0xb0] sm:$0xf] }
 0xaf5   : > { %v5792_v31 = vld [vmem:[%s7173_s29 + $0xec] sm:$0xf0] }
 0xaf6   : > { %4277 = vmatpush.bf16.msra.mxu1 %v5563_v17  ;;  %v5793_v17 = vld [vmem:[%s7173_s29 + $0xf4] sm:$0xf0] }
 0xb71   : > { %v3845_v44 = vpop.f32.mrf.mxu1 }
 0xb72   : > { %v3846_v45 = vadd.f32 %v6103_v60, %v3845_v44  ;;  %v5764_v44 = vld [vmem:[%s7173_s29 + $0x14] sm:$0xf] }
 0xb74   : > { %v3850_v47 = vadd.f32 %v3846_v45, %v7672_v5 }
 0xb76   : > { %v3854_v49 = vsel %vm1351_vm1, %v3850_v47, 0.0 }
 0xb77   : > { %3855 = vadd.xlane.f32.xlu2 %v3854_v49  ;;  %v5488_v49 = vld [vmem:[%s7173_s29 + $0x50] sm:$0xf0] }
 0xb79   : > { %v3847_v63 = vpop.f32.mrf.mxu1 }
 0xb7a   : > { %v3848_v51 = vadd.f32 %v6103_v60, %v3847_v63  ;;  %v5772_v60 = vld [vmem:[%s7173_s29 + $0x4c] sm:$0xf0]  ;;  %v5494_v63 = vld [vmem:[%s7173_s29 + $0x18] sm:$0xf] }
 0xb7c   : > { %v3851_v15 = vadd.f32 %v3848_v51, %v7674_v55  ;;  %v5773_v51 = vld [vmem:[%s7173_s29 + $0x54] sm:$0xf0] }
 0xb7e   : > { %v3857_v42 = vsel %vm1351_vm1, %v3851_v15, 0.0 }
 0xb7f   : > { %3858 = vadd.xlane.f32.xlu0 %v3857_v42  ;;  %v5495_v42 = vor.u32 %v5773_v51, %v5494_v63  ;;  %v5776_v63 = vld [vmem:[%s7173_s29 + $0x6c] sm:$0xf0] }
 0xb81   : > { %4264 = vmatpush.bf16.msrb.mxu0 %v5495_v42  ;;  %v5768_v42 = vld [vmem:[%s7173_s29 + $0x34] sm:$0xf] }
 0xbea   : > { %v3856_v19 = vpop.xlane.xlu2 %3855 }
 0xbeb   : > { %v3860_v53 = vmul.f32 %v3856_v19, %v7626_v62  ;;  %v5765_v19 = vld [vmem:[%s7173_s29 + $0x1c] sm:$0xf] }
 0xbed   : > { %v7981_v11 = vsub.f32 %v3850_v47, %v3860_v53  ;;  %v5487_v47 = vor.u32 %v5772_v60, %v5486_v32  ;;  %v5496_v53 = vld [vmem:[%s7173_s29 + $0x58] sm:$0xf0]  ;;  %v5784_v32 = vld [vmem:[%s7173_s29 + $0xb4] sm:$0xf] }
 0xbee   : > { %v5785_v60 = vld [vmem:[%s7173_s29 + $0xbc] sm:$0xf] }
 0xbef   : > { %v3864_v5 = vmul.f32 %v7981_v11, %v7981_v11  ;;  %4236 = vmatpush.bf16.msra.mxu2 %v5487_v47 }
 0xbf1   : > { %v3866_v37 = vsel %vm1351_vm1, %v3864_v5, 0.0 }
 0xbf2   : > { %v3859_v30 = vpop.xlane.xlu0 %3858  ;;  %3867 = vadd.xlane.f32.xlu1 %v3866_v37  ;;  %v5499_v37 = vor.u32 %v5765_v19, %v5496_v53  ;;  %v5520_v19 = vld [vmem:[%s7173_s29 + $0x70] sm:$0xf0]  ;;  %v5526_v53 = vld [vmem:[%s7173_s29 + $0x38] sm:$0xf] }
 0xbf3   : > { %v3861_v55 = vmul.f32 %v3859_v30, %v7626_v62 }
 0xbf4   : > { %4278 = vmatpush.bf16.msra.mxu1 %v5499_v37  ;;  %v5769_v37 = vld [vmem:[%s7173_s29 + $0x3c] sm:$0xf] }
 0xbf5   : > { %v7987_v1 = vsub.f32 %v3851_v15, %v3861_v55  ;;  %v5491_v15 = vor.u32 %v5764_v44, %v5488_v49  ;;  %v5592_v44 = vld [vmem:[%s7173_s29 + $0xf8] sm:$0xf0]  ;;  %v5518_v49 = vld [vmem:[%s7173_s29 + $0x30] sm:$0xf] }
 0xbf7   : > { %v3865_v54 = vmul.f32 %v7987_v1, %v7987_v1  ;;  %4250 = vmatpush.bf16.msra.mxu3 %v5491_v15  ;;  %v5595_v15 = vor.u32 %v5785_v60, %v5592_v44  ;;  %v5804_v60 = vld [vmem:[%s7179_s5 + $0x4c] sm:$0xf0]  ;;  %v5796_v44 = vld [vmem:[%s7179_s5 + $0x14] sm:$0xf] }
 0xbf9   : > { %v3869_v34 = vsel %vm1351_vm1, %v3865_v54, 0.0 }
 0xbfa   : > { %3870 = vadd.xlane.f32.xlu2 %v3869_v34 }
 0xc65   : > { %v3868_v0 = vpop.xlane.xlu1 %3867 }
 0xc66   : > { %v3872_v2 = vmul.f32 %v3868_v0, %v7626_v62 }
 0xc68   : > { %v8001_v13 = vadd.f32 1e-05, %v3872_v2 }
 0xc6a   : > { %6243 = vrsqrt.f32 %v8001_v13  ;;  %vm3882_vm2 = vweird.f32 %v8001_v13 }
 0xc6d   : > { %v3871_v24 = vpop.xlane.xlu2 %3870 }
 0xc6e   : > { %v3873_v58 = vmul.f32 %v3871_v24, %v7626_v62 }
 0xc70   : > { %v6244_v38 = vpop.eup %6243  ;;  %v3875_v7 = vadd.f32 1e-05, %v3873_v58  ;;  %v5775_v58 = vld [vmem:[%s7173_s29 + $0x64] sm:$0xf0] }
 0xc71   : > { %v3877_v45 = vmul.f32 %v6244_v38, %v8001_v13  ;;  %vm3883_vm0 = vweird.f32 %v6244_v38  ;;  %v5790_v13 = vld [vmem:[%s7173_s29 + $0xdc] sm:$0xf0]  ;;  %v5511_v46 = vor.u32 %v5775_v58, %v5510_v4  ;;  %v5694_v58 = vld [vmem:[%s7179_s5 + $0x90] sm:$0xf] }
 0xc72   : > { %6245 = vrsqrt.f32 %v3875_v7  ;;  %vm3884_vm3 = vmor %vm3882_vm2, %vm3883_vm0  ;;  %vm3892_vm5 = vweird.f32 %v3875_v7  ;;  %v5567_v10 = vor.u32 %v5790_v13, %v5566_v20  ;;  %v5622_v20 = vld [vmem:[%s7179_s5 + $0x8] sm:$0xf]  ;;  %v5695_v28 = vor.u32 %v5820_v12, %v5694_v58 }
 0xc73   : > { %v3878_v5 = vmul.f32 %v6244_v38, %v3877_v45  ;;  %v5583_v45 = vor.u32 %v5792_v31, %v5582_v8  ;;  %v5803_v13 = vld [vmem:[%s7179_s5 + $0x44] sm:$0xf0]  ;;  %v5805_v8 = vld [vmem:[%s7179_s5 + $0x54] sm:$0xf0] }
 0xc74   : > { %v5654_v58 = vld [vmem:[%s7179_s5 + $0x28] sm:$0xf] }
 0xc75   : > { %v3879_v30 = vmul.f32 0.5, %v3878_v5  ;;  %v5777_v5 = vld [vmem:[%s7173_s29 + $0x74] sm:$0xf0] }
 0xc77   : > { %v3880_v55 = vsub.f32 1.5, %v3879_v30  ;;  %v5528_v30 = vld [vmem:[%s7173_s29 + $0x78] sm:$0xf0] }
 0xc78   : > { %v6246_v54 = vpop.eup %6245 }
 0xc79   : > { %v3881_v34 = vmul.f32 %v6244_v38, %v3880_v55  ;;  %v3887_v39 = vmul.f32 %v6246_v54, %v3875_v7  ;;  %vm3893_vm4 = vweird.f32 %v6246_v54  ;;  %v5590_v7 = vld [vmem:[%s7173_s29 + $0xb8] sm:$0xf]  ;;  %v5519_v55 = vor.u32 %v5776_v63, %v5518_v49  ;;  %v8142_v63 = vld [vmem:[%s7232_s26] sm:$0xff] }
 0xc7a   : > { %vm3894_vm6 = vmor %vm3892_vm5, %vm3893_vm4  ;;  %v5591_v51 = vor.u32 %v5793_v17, %v5590_v7  ;;  %v5630_v17 = vld [vmem:[%s7179_s5 + $0x10] sm:$0xf] }
 0xc7b   : > { %v3888_v41 = vmul.f32 %v6246_v54, %v3887_v39  ;;  %v3885_v14 = vsel %vm3884_vm3, %v6244_v38, %v3881_v34  ;;  %v5584_v38 = vld [vmem:[%s7173_s29 + $0xf0] sm:$0xf0]  ;;  %v5527_v34 = vor.u32 %v5777_v5, %v5526_v53  ;;  %v5531_v39 = vor.u32 %v5769_v37, %v5528_v30 }
 0xc7c   : > { %v3896_v50 = vmul.f32 %v3885_v14, %v7981_v11  ;;  %v5568_v11 = vld [vmem:[%s7173_s29 + $0xe0] sm:$0xf0]  ;;  %v5587_v47 = vor.u32 %v5784_v32, %v5584_v38  ;;  %v5819_v14 = vld [vmem:[%s7179_s5 + $0xc4] sm:$0xf0]  ;;  %v5797_v32 = vld [vmem:[%s7179_s5 + $0x1c] sm:$0xf] }
 0xc7d   : > { %v3889_v0 = vmul.f32 0.5, %v3888_v41  ;;  %v5571_v52 = vor.u32 %v5782_v27, %v5568_v11  ;;  %v5686_v41 = vld [vmem:[%s7179_s5 + $0x88] sm:$0xf]  ;;  %v5623_v27 = vor.u32 %v5803_v13, %v5622_v20  ;;  %v5795_v11 = vld [vmem:[%s7179_s5 + $0xc] sm:$0xf] }
 0xc7e   : > { %v3901_v25 = vmul.f32 %v6104_v3, %v3896_v50  ;;  %v5627_v40 = vor.u32 %v5795_v11, %v5624_v56  ;;  %v5640_v38 = vld [vmem:[%s7179_s5 + $0x58] sm:$0xf0] }
 0xc7f   : > { %v3890_v61 = vsub.f32 1.5, %v3889_v0  ;;  %v5811_v0 = vld [vmem:[%s7179_s5 + $0x8c] sm:$0xf]  ;;  %v5643_v7 = vor.u32 %v5797_v32, %v5640_v38  ;;  %v3985_v32 = vperm.slane %v8142_v63, 7 }
 0xc80   : > { %v8042_v48 = vadd.f32 %v6105_v35, %v3901_v25 }
 0xc81   : > { %v3891_v23 = vmul.f32 %v6246_v54, %v3890_v61  ;;  %v5687_v61 = vor.u32 %v5819_v14, %v5686_v41  ;;  %v5718_v41 = vld [vmem:[%s7179_s5 + $0xa8] sm:$0xf] }
 0xc83   : > { %v3895_v2 = vsel %vm3894_vm6, %v6246_v54, %v3891_v23  ;;  %v5523_v54 = vor.u32 %v5768_v42, %v5520_v19  ;;  %v5678_v23 = vld [vmem:[%s7179_s5 + $0x80] sm:$0xf]  ;;  %v3980_v42 = vperm.slane %v8142_v63, 2  ;;  %v3981_v19 = vperm.slane %v8142_v63, 3 }
 0xc84   : > { %v3897_v59 = vmul.f32 %v3895_v2, %v7987_v1  ;;  %v5576_v1 = vld [vmem:[%s7173_s29 + $0xe8] sm:$0xf0]  ;;  %v5818_v2 = vld [vmem:[%s7179_s5 + $0xbc] sm:$0xf0]  ;;  %s8379_s29 = scalar_lea.vmem [#allocation18], %s7145_s0 }
 0xc85   : > { %v5579_v24 = vor.u32 %v5783_v36, %v5576_v1  ;;  %v5679_v25 = vor.u32 %v5818_v2, %v5678_v23  ;;  %v5614_v36 = vld [vmem:[%s7179_s5] sm:$0xf] }
 0xc86   : > { %v3902_v33 = vmul.f32 %v6104_v3, %v3897_v59  ;;  %v5688_v3 = vld [vmem:[%s7179_s5 + $0xc8] sm:$0xf0]  ;;  %v5680_v59 = vld [vmem:[%s7179_s5 + $0xc0] sm:$0xf0]  ;;  %v5802_v1 = vld [vmem:[%s7179_s5 + $0x3c] sm:$0xf0] }
 0xc87   : > { %v5691_v50 = vor.u32 %v5811_v0, %v5688_v3  ;;  %v5815_v3 = vld [vmem:[%s7179_s5 + $0xac] sm:$0xf] }
 0xc88   : > { %v8044_v6 = vadd.f32 %v6105_v35, %v3902_v33  ;;  %v5810_v35 = vld [vmem:[%s7179_s5 + $0x84] sm:$0xf] }
 0xc89   : > { %v5683_v33 = vor.u32 %v5810_v35, %v5680_v59 }
 0xc8a   : > { %v8051_v9 = vpack.c.bf16 %v8044_v6, %v8042_v48 }
 0xc8c   : > { %5596 = vmatmul.msk.bf16.vlgmr.msrb.gmra.mxu2 %vm1351_vm1, %v8051_v9  ;;  %5597 = vmatmul.msk.bf16.vlgmr.msrb.gmra.mxu3 %vm1351_vm1, %v8051_v9 }
 0xc8d   : > { %5598 = vmatmul.msk.bf16.vlgmr.msra.gmra.mxu0 %vm1351_vm1, %v8051_v9  ;;  %5599 = vmatmul.msk.bf16.vlgmr.msrb.gmra.mxu1 %vm1351_vm1, %v8051_v9 }
 0xc8e   : > { %4291 = vmatpush.bf16.msrb.mxu2 %v5567_v10  ;;  %4305 = vmatpush.bf16.msrb.mxu3 %v5571_v52  ;;  %v5615_v10 = vor.u32 %v5802_v1, %v5614_v36  ;;  %v5616_v52 = vld [vmem:[%s7179_s5 + $0x40] sm:$0xf0]  ;;  %v5710_v36 = vld [vmem:[%s7179_s5 + $0xa0] sm:$0xf] }
 0xc8f   : > { %4319 = vmatpush.bf16.msra.mxu0 %v5575_v26  ;;  %4333 = vmatpush.bf16.msrb.mxu1 %v5579_v24  ;;  %v5821_v26 = vld [vmem:[%s7179_s5 + $0xd4] sm:$0xf0]  ;;  %v5813_v24 = vld [vmem:[%s7179_s5 + $0x9c] sm:$0xf] }
 0xc90   : > { %v5703_v43 = vor.u32 %v5821_v26, %v5702_v22  ;;  %v5707_v4 = vor.u32 %v5813_v24, %v5704_v29 }
 0xc92   : > { %4292 = vmatpush.bf16.msrb.mxu2 %v5503_v16  ;;  %4306 = vmatpush.bf16.msrb.mxu3 %v5507_v21  ;;  %v5812_v16 = vld [vmem:[%s7179_s5 + $0x94] sm:$0xf] }
 0xc93   : > { %4320 = vmatpush.bf16.msra.mxu0 %v5511_v46  ;;  %4334 = vmatpush.bf16.msrb.mxu1 %v5515_v57  ;;  %v5696_v21 = vld [vmem:[%s7179_s5 + $0xd0] sm:$0xf0]  ;;  %v5638_v57 = vld [vmem:[%s7179_s5 + $0x18] sm:$0xf] }
 0xc94   : > { %v5699_v46 = vor.u32 %v5812_v16, %v5696_v21  ;;  %v5639_v31 = vor.u32 %v5805_v8, %v5638_v57  ;;  %v5807_v16 = vld [vmem:[%s7179_s5 + $0x64] sm:$0xf0]  ;;  %v5799_v21 = vld [vmem:[%s7179_s5 + $0x2c] sm:$0xf] }
 0xc95   : > { %v5655_v38 = vor.u32 %v5807_v16, %v5654_v58  ;;  %v5801_v58 = vld [vmem:[%s7179_s5 + $0x3c] sm:$0xf] }
 0xc9c   : > { %5600 = vmatmul.msk.bf16.vlgmr.msra.gmra.mxu2 %vm1351_vm1, %v8051_v9  ;;  %5601 = vmatmul.msk.bf16.vlgmr.msra.gmra.mxu3 %vm1351_vm1, %v8051_v9 }
 0xc9d   : > { %5602 = vmatmul.msk.bf16.vlgmr.msrb.gmra.mxu0 %vm1351_vm1, %v8051_v9  ;;  %5603 = vmatmul.msk.bf16.vlgmr.msra.gmra.mxu1 %vm1351_vm1, %v8051_v9 }
 0xc9e   : > { %4347 = vmatpush.bf16.msra.mxu2 %v5583_v45  ;;  %4361 = vmatpush.bf16.msra.mxu3 %v5587_v47  ;;  %v5631_v45 = vor.u32 %v5804_v60, %v5630_v17  ;;  %v5632_v47 = vld [vmem:[%s7179_s5 + $0x50] sm:$0xf0] }
 0xc9f   : > { %4375 = vmatpush.bf16.msrb.mxu0 %v5591_v51  ;;  %4389 = vmatpush.bf16.msra.mxu1 %v5595_v15  ;;  %v5635_v49 = vor.u32 %v5796_v44, %v5632_v47  ;;  %v5646_v44 = vld [vmem:[%s7179_s5 + $0x20] sm:$0xf]  ;;  %v5798_v47 = vld [vmem:[%s7179_s5 + $0x24] sm:$0xf] }
 0xca2   : > { %4348 = vmatpush.bf16.msra.mxu2 %v5519_v55  ;;  %4362 = vmatpush.bf16.msra.mxu3 %v5523_v54  ;;  %v3978_v55 = vperm.slane %v8142_v63, 0  ;;  %v3979_v54 = vperm.slane %v8142_v63, 1 }
 0xca3   : > { %4376 = vmatpush.bf16.msrb.mxu0 %v5527_v34  ;;  %4390 = vmatpush.bf16.msra.mxu1 %v5531_v39 }
 0xcac   : > { %5604 = vmatmul.msk.bf16.vlgmr.msrb.gmra.mxu2 %vm1351_vm1, %v8051_v9  ;;  %5605 = vmatmul.msk.bf16.vlgmr.msrb.gmra.mxu3 %vm1351_vm1, %v8051_v9 }
 0xcad   : > { %5606 = vmatmul.msk.bf16.vlgmr.msra.gmra.mxu0 %vm1351_vm1, %v8051_v9  ;;  %5607 = vmatmul.msk.bf16.vlgmr.msrb.gmra.mxu1 %vm1351_vm1, %v8051_v9 }
 0xcae   : > { %4642 = vmatpush.bf16.xpose.msra.mxu0 %v5687_v61  ;;  %4656 = vmatpush.bf16.xpose.msrb.mxu1 %v5691_v50  ;;  %v5823_v61 = vld [vmem:[%s7179_s5 + $0xe4] sm:$0xf0]  ;;  %v5720_v50 = vld [vmem:[%s7179_s5 + $0xe8] sm:$0xf0] }
 0xcaf   : > { %4614 = vmatpush.bf16.xpose.msrb.mxu2 %v5679_v25  ;;  %4628 = vmatpush.bf16.xpose.msrb.mxu3 %v5683_v33  ;;  %v5719_v20 = vor.u32 %v5823_v61, %v5718_v41  ;;  %v5723_v13 = vor.u32 %v5815_v3, %v5720_v50  ;;  %v5817_v41 = vld [vmem:[%s7179_s5 + $0xbc] sm:$0xf] }
 0xcb6   : > { %4643 = vmatpush.bf16.xpose.msra.mxu0 %v5623_v27  ;;  %4657 = vmatpush.bf16.xpose.msrb.mxu1 %v5627_v40 }
 0xcb7   : > { %4615 = vmatpush.bf16.xpose.msrb.mxu2 %v5615_v10  ;;  %v5822_v10 = vld [vmem:[%s7179_s5 + $0xdc] sm:$0xf0] }
 0xcb8   : > { %v5711_v12 = vor.u32 %v5822_v10, %v5710_v36  ;;  %v5728_v36 = vld [vmem:[%s7179_s5 + $0xf0] sm:$0xf0] }
 0xcbc   : > { %5608 = vmatmul.msk.bf16.vlgmr.msra.gmra.mxu2 %vm1351_vm1, %v8051_v9  ;;  %5609 = vmatmul.msk.bf16.vlgmr.msra.gmra.mxu3 %vm1351_vm1, %v8051_v9 }
 0xcbd   : > { %5610 = vmatmul.msk.bf16.vlgmr.msrb.gmra.mxu0 %vm1351_vm1, %v8051_v9  ;;  %5611 = vmatmul.msk.bf16.vlgmr.msra.gmra.mxu1 %vm1351_vm1, %v8051_v9  ;;  %v5794_v9 = vld [vmem:[%s7179_s5 + $0x4] sm:$0xf] }
 0xcbe   : > { %v5619_v18 = vor.u32 %v5794_v9, %v5616_v52  ;;  %4698 = vmatpush.bf16.xpose.msrb.mxu0 %v5703_v43  ;;  %4712 = vmatpush.bf16.xpose.msra.mxu1 %v5707_v4  ;;  %v5814_v52 = vld [vmem:[%s7179_s5 + $0xa4] sm:$0xf] }
 0xcbf   : > { %4670 = vmatpush.bf16.xpose.msra.mxu2 %v5695_v28 }
 0xcc0   : > { %4629 = vmatpush.bf16.xpose.msrb.mxu3 %v5619_v18  ;;  %v5712_v18 = vld [vmem:[%s7179_s5 + $0xe0] sm:$0xf0] }
 0xcc1   : > { %v5715_v28 = vor.u32 %v5814_v52, %v5712_v18 }
 0xcc6   : > { %4699 = vmatpush.bf16.xpose.msrb.mxu0 %v5639_v31  ;;  %4713 = vmatpush.bf16.xpose.msra.mxu1 %v5643_v7  ;;  %v3984_v31 = vperm.slane %v8142_v63, 6 }
 0xcc7   : > { %4671 = vmatpush.bf16.xpose.msra.mxu2 %v5631_v45  ;;  %v5806_v45 = vld [vmem:[%s7179_s5 + $0x5c] sm:$0xf0] }
 0xcc8   : > { %4684 = vmatpush.bf16.xpose.msra.mxu3 %v5699_v46  ;;  %v5656_v46 = vld [vmem:[%s7179_s5 + $0x68] sm:$0xf0] }
 0xcc9   : > { %v5659_v7 = vor.u32 %v5799_v21, %v5656_v46 }
 0xcd0   : > { %4685 = vmatpush.bf16.xpose.msra.mxu3 %v5635_v49  ;;  %v5648_v49 = vld [vmem:[%s7179_s5 + $0x60] sm:$0xf0] }
 0xd0a   : > { %v4210_v51 = vpop.f32.mrf.mxu0  ;;  %v4224_v15 = vpop.f32.mrf.mxu1 }
 0xd0b   : > { %v4211_v37 = vadd.f32 %v4210_v51, %v3980_v42  ;;  %v4225_v30 = vadd.f32 %v4224_v15, %v3981_v19 }
 0xd0d   : > { %v4399_v23 = vmax.f32 %v4211_v37, 0.0  ;;  %v4400_v2 = vmax.f32 %v4225_v30, 0.0  ;;  %v5734_v37 = vld [vmem:[%s7179_s5 + $0xb8] sm:$0xf] }
 0xd0f   : > { %v4182_v53 = vpop.f32.mrf.mxu2  ;;  %v4196_v5 = vpop.f32.mrf.mxu3 }
 0xd10   : > { %v4183_v59 = vadd.f32 %v4182_v53, %v3978_v55  ;;  %v4197_v33 = vadd.f32 %v4196_v5, %v3979_v54 }
 0xd12   : > { %v4212_v34 = vpop.f32.mrf.mxu0  ;;  %v4226_v39 = vpop.f32.mrf.mxu1  ;;  %v4397_v22 = vmax.f32 %v4183_v59, 0.0  ;;  %v4398_v26 = vmax.f32 %v4197_v33, 0.0 }
 0xd13   : > { %v4213_v14 = vadd.f32 %v4212_v34, %v3980_v42  ;;  %v4227_v0 = vadd.f32 %v4226_v39, %v3981_v19  ;;  %v3982_v42 = vperm.slane %v8142_v63, 4  ;;  %v3983_v19 = vperm.slane %v8142_v63, 5  ;;  %v5825_v39 = vld [vmem:[%s7179_s5 + $0xf4] sm:$0xf0] }
 0xd14   : > { %v5651_v34 = vor.u32 %v5798_v47, %v5648_v49 }
 0xd15   : > { %v4415_v35 = vmax.f32 %v4213_v14, 0.0  ;;  %v4416_v25 = vmax.f32 %v4227_v0, 0.0  ;;  %v5736_v14 = vld [vmem:[%s7179_s5 + $0xf8] sm:$0xf0] }
 0xd17   : > { %v4431_v27 = vpack.c.bf16 %v4415_v35, %v4399_v23  ;;  %v4432_v11 = vpack.c.bf16 %v4416_v25, %v4400_v2  ;;  %v4184_v56 = vpop.f32.mrf.mxu2  ;;  %v4198_v40 = vpop.f32.mrf.mxu3  ;;  %v5735_v2 = vor.u32 %v5825_v39, %v5734_v37  ;;  %v5739_v35 = vor.u32 %v5817_v41, %v5736_v14 }
 0xd18   : > { %v4185_v1 = vadd.f32 %v4184_v56, %v3978_v55  ;;  %v4199_v9 = vadd.f32 %v4198_v40, %v3979_v54  ;;  %v5647_v54 = vor.u32 %v5806_v45, %v5646_v44  ;;  %v5824_v56 = vld [vmem:[%s7179_s5 + $0xec] sm:$0xf0]  ;;  %v5816_v40 = vld [vmem:[%s7179_s5 + $0xb4] sm:$0xf] }
 0xd19   : > { %4644 = vmatmul.bf16.vlgmr.msra.gmra.mxu0 %v4431_v27  ;;  %4658 = vmatmul.bf16.vlgmr.msrb.gmra.mxu1 %v4432_v11 }
 0xd1a   : > { %v4413_v24 = vmax.f32 %v4185_v1, 0.0  ;;  %v4414_v43 = vmax.f32 %v4199_v9, 0.0  ;;  %v4266_v29 = vpop.f32.mrf.mxu0  ;;  %v4280_v4 = vpop.f32.mrf.mxu1  ;;  %4754 = vmatpush.bf16.xpose.msra.mxu0 %v5719_v20  ;;  %4768 = vmatpush.bf16.xpose.msrb.mxu1 %v5723_v13  ;;  %v5726_v13 = vld [vmem:[%s7179_s5 + $0xb0] sm:$0xf] }
 0xd1b   : > { %v4267_v51 = vadd.f32 %v4266_v29, %v3984_v31  ;;  %v4281_v15 = vadd.f32 %v4280_v4, %v3985_v32  ;;  %v8177_v1 = vld [vmem:[%s7232_s26 + $0x8] sm:$0xff]  ;;  %v5731_v29 = vor.u32 %v5816_v40, %v5728_v36  ;;  %v5809_v4 = vld [vmem:[%s7179_s5 + $0x74] sm:$0xf0]  ;;  %s8381_s26 = scalar_lea.vmem [#allocation21], %s7145_s0 }
 0xd1c   : > { %v4429_v57 = vpack.c.bf16 %v4413_v24, %v4397_v22  ;;  %v4430_v8 = vpack.c.bf16 %v4414_v43, %v4398_v26  ;;  %v5670_v24 = vld [vmem:[%s7179_s5 + $0x38] sm:$0xf]  ;;  %v5727_v43 = vor.u32 %v5824_v56, %v5726_v13  ;;  %v3988_v21 = vperm.slane %v8177_v1, 2 }
 0xd1d   : > { %v4403_v0 = vmax.f32 %v4267_v51, 0.0  ;;  %v4404_v61 = vmax.f32 %v4281_v15, 0.0  ;;  %v3989_v46 = vperm.slane %v8177_v1, 3  ;;  %v3986_v47 = vperm.slane %v8177_v1, 0 }
 0xd1e   : > { %4616 = vmatmul.bf16.vlgmr.msrb.gmra.mxu2 %v4429_v57  ;;  %4630 = vmatmul.bf16.vlgmr.msrb.gmra.mxu3 %v4430_v8  ;;  %v5671_v57 = vor.u32 %v5809_v4, %v5670_v24  ;;  %v3987_v49 = vperm.slane %v8177_v1, 1  ;;  %v3992_v13 = vperm.slane %v8177_v1, 6 }
 0xd1f   : > { %v4238_v17 = vpop.f32.mrf.mxu2  ;;  %v4252_v60 = vpop.f32.mrf.mxu3  ;;  %4726 = vmatpush.bf16.xpose.msrb.mxu2 %v5711_v12  ;;  %4740 = vmatpush.bf16.xpose.msrb.mxu3 %v5715_v28  ;;  %v5672_v12 = vld [vmem:[%s7179_s5 + $0x78] sm:$0xf0] }
 0xd20   : > { %v4239_v63 = vadd.f32 %v4238_v17, %v3982_v42  ;;  %v4253_v23 = vadd.f32 %v4252_v60, %v3983_v19  ;;  %v5675_v8 = vor.u32 %v5801_v58, %v5672_v12  ;;  %v5800_v17 = vld [vmem:[%s7179_s5 + $0x34] sm:$0xf] }
 0xd21   : > { %v5664_v60 = vld [vmem:[%s7179_s5 + $0x70] sm:$0xf0] }
 0xd22   : > { %v4268_v53 = vpop.f32.mrf.mxu0  ;;  %v4282_v5 = vpop.f32.mrf.mxu1  ;;  %4755 = vmatpush.bf16.xpose.msra.mxu0 %v5655_v38  ;;  %4769 = vmatpush.bf16.xpose.msrb.mxu1 %v5659_v7  ;;  %v4401_v9 = vmax.f32 %v4239_v63, 0.0  ;;  %v4402_v10 = vmax.f32 %v4253_v23, 0.0  ;;  %v5662_v38 = vld [vmem:[%s7179_s5 + $0x30] sm:$0xf] }
 0xd23   : > { %v4269_v30 = vadd.f32 %v4268_v53, %v3984_v31  ;;  %v4283_v55 = vadd.f32 %v4282_v5, %v3985_v32  ;;  %v5808_v7 = vld [vmem:[%s7179_s5 + $0x6c] sm:$0xf0]  ;;  %v5667_v5 = vor.u32 %v5800_v17, %v5664_v60  ;;  %s8380_s5 = scalar_lea.vmem [#allocation20], %s7145_s0 }
 0xd24   : > { %v5663_v53 = vor.u32 %v5808_v7, %v5662_v38 }
 0xd25   : > { %v4419_v3 = vmax.f32 %v4269_v30, 0.0  ;;  %v4420_v50 = vmax.f32 %v4283_v55, 0.0 }
 0xd27   : > { %v4435_v25 = vpack.c.bf16 %v4419_v3, %v4403_v0  ;;  %v4436_v59 = vpack.c.bf16 %v4420_v50, %v4404_v61  ;;  %v4240_v33 = vpop.f32.mrf.mxu2  ;;  %v4254_v20 = vpop.f32.mrf.mxu3  ;;  %4727 = vmatpush.bf16.xpose.msrb.mxu2 %v5647_v54  ;;  %4741 = vmatpush.bf16.xpose.msrb.mxu3 %v5651_v34 }
 0xd28   : > { %v4241_v27 = vadd.f32 %v4240_v33, %v3982_v42  ;;  %v4255_v11 = vadd.f32 %v4254_v20, %v3983_v19 }
 0xd29   : > { %4700 = vmatmul.bf16.vlgmr.msrb.gmra.mxu0 %v4435_v25  ;;  %4714 = vmatmul.bf16.vlgmr.msra.gmra.mxu1 %v4436_v59 }
 0xd2a   : > { %v4417_v52 = vmax.f32 %v4241_v27, 0.0  ;;  %v4418_v18 = vmax.f32 %v4255_v11, 0.0  ;;  %v4322_v22 = vpop.f32.mrf.mxu0  ;;  %v4336_v26 = vpop.f32.mrf.mxu1  ;;  %4810 = vmatpush.bf16.xpose.msrb.mxu0 %v5735_v2  ;;  %4824 = vmatpush.bf16.xpose.msra.mxu1 %v5739_v35  ;;  %v3993_v27 = vperm.slane %v8177_v1, 7 }
 0xd2b   : > { %v4323_v44 = vadd.f32 %v4322_v22, %v3988_v21  ;;  %v4337_v45 = vadd.f32 %v4336_v26, %v3989_v46 }
 0xd2c   : > { %v4433_v28 = vpack.c.bf16 %v4417_v52, %v4401_v9  ;;  %v4434_v16 = vpack.c.bf16 %v4418_v18, %v4402_v10  ;;  %v3990_v9 = vperm.slane %v8177_v1, 4  ;;  %v3991_v10 = vperm.slane %v8177_v1, 5 }
 0xd2d   : > { %v4407_v37 = vmax.f32 %v4323_v44, 0.0  ;;  %v4408_v30 = vmax.f32 %v4337_v45, 0.0 }
 0xd2e   : > { %4672 = vmatmul.bf16.vlgmr.msra.gmra.mxu2 %v4433_v28  ;;  %4686 = vmatmul.bf16.vlgmr.msra.gmra.mxu3 %v4434_v16 }
 0xd2f   : > { %v4294_v31 = vpop.f32.mrf.mxu2  ;;  %v4308_v32 = vpop.f32.mrf.mxu3  ;;  %4782 = vmatpush.bf16.xpose.msra.mxu2 %v5727_v43  ;;  %4796 = vmatpush.bf16.xpose.msra.mxu3 %v5731_v29 }
 0xd30   : > { %v4295_v34 = vadd.f32 %v4294_v31, %v3986_v47  ;;  %v4309_v39 = vadd.f32 %v4308_v32, %v3987_v49 }
 0xd32   : > { %v4324_v51 = vpop.f32.mrf.mxu0  ;;  %v4338_v15 = vpop.f32.mrf.mxu1  ;;  %4811 = vmatpush.bf16.xpose.msrb.mxu0 %v5671_v57  ;;  %4825 = vmatpush.bf16.xpose.msra.mxu1 %v5675_v8  ;;  %v4405_v63 = vmax.f32 %v4295_v34, 0.0  ;;  %v4406_v23 = vmax.f32 %v4309_v39, 0.0 }
 0xd33   : > { %v4325_v42 = vadd.f32 %v4324_v51, %v3988_v21  ;;  %v4339_v19 = vadd.f32 %v4338_v15, %v3989_v46  ;;  %v6106_v15 = vld [vmem:[%s8379_s29] ss:$0 sm:$0xff] }
 0xd35   : > { %v4423_v55 = vmax.f32 %v4325_v42, 0.0  ;;  %v4424_v54 = vmax.f32 %v4339_v19, 0.0 }
 0xd37   : > { %v4439_v41 = vpack.c.bf16 %v4423_v55, %v4407_v37  ;;  %v4440_v14 = vpack.c.bf16 %v4424_v54, %v4408_v30  ;;  %v4296_v0 = vpop.f32.mrf.mxu2  ;;  %v4310_v61 = vpop.f32.mrf.mxu3  ;;  %4783 = vmatpush.bf16.xpose.msra.mxu2 %v5663_v53  ;;  %4797 = vmatpush.bf16.xpose.msra.mxu3 %v5667_v5 }
 0xd38   : > { %v4297_v3 = vadd.f32 %v4296_v0, %v3986_v47  ;;  %v4311_v50 = vadd.f32 %v4310_v61, %v3987_v49 }
 0xd39   : > { %4756 = vmatmul.bf16.vlgmr.msra.gmra.mxu0 %v4439_v41  ;;  %4770 = vmatmul.bf16.vlgmr.msrb.gmra.mxu1 %v4440_v14 }
 0xd3a   : > { %v4421_v2 = vmax.f32 %v4297_v3, 0.0  ;;  %v4422_v35 = vmax.f32 %v4311_v50, 0.0  ;;  %v4378_v25 = vpop.f32.mrf.mxu0  ;;  %v4392_v59 = vpop.f32.mrf.mxu1 }
 0xd3b   : > { %v4379_v40 = vadd.f32 %v4378_v25, %v3992_v13  ;;  %v4393_v36 = vadd.f32 %v4392_v59, %v3993_v27 }
 0xd3c   : > { %v4437_v33 = vpack.c.bf16 %v4421_v2, %v4405_v63  ;;  %v4438_v20 = vpack.c.bf16 %v4422_v35, %v4406_v23 }
 0xd3d   : > { %v4411_v24 = vmax.f32 %v4379_v40, 0.0  ;;  %v4412_v43 = vmax.f32 %v4393_v36, 0.0 }
 0xd3e   : > { %4728 = vmatmul.bf16.vlgmr.msrb.gmra.mxu2 %v4437_v33  ;;  %4742 = vmatmul.bf16.vlgmr.msrb.gmra.mxu3 %v4438_v20 }
 0xd3f   : > { %v4350_v11 = vpop.f32.mrf.mxu2  ;;  %v4364_v56 = vpop.f32.mrf.mxu3 }
 0xd40   : > { %v4351_v58 = vadd.f32 %v4350_v11, %v3990_v9  ;;  %v4365_v12 = vadd.f32 %v4364_v56, %v3991_v10 }
 0xd42   : > { %v4380_v52 = vpop.f32.mrf.mxu0  ;;  %v4394_v18 = vpop.f32.mrf.mxu1  ;;  %v4409_v1 = vmax.f32 %v4351_v58, 0.0  ;;  %v4410_v31 = vmax.f32 %v4365_v12, 0.0 }
 0xd43   : > { %v4381_v22 = vadd.f32 %v4380_v52, %v3992_v13  ;;  %v4395_v26 = vadd.f32 %v4394_v18, %v3993_v27 }
 0xd45   : > { %v4427_v29 = vmax.f32 %v4381_v22, 0.0  ;;  %v4428_v4 = vmax.f32 %v4395_v26, 0.0 }
 0xd47   : > { %v4443_v28 = vpack.c.bf16 %v4427_v29, %v4411_v24  ;;  %v4444_v16 = vpack.c.bf16 %v4428_v4, %v4412_v43  ;;  %v4352_v21 = vpop.f32.mrf.mxu2  ;;  %v4366_v46 = vpop.f32.mrf.mxu3 }
 0xd48   : > { %v4353_v57 = vadd.f32 %v4352_v21, %v3990_v9  ;;  %v4367_v8 = vadd.f32 %v4366_v46, %v3991_v10 }
 0xd49   : > { %4812 = vmatmul.bf16.vlgmr.msrb.gmra.mxu0 %v4443_v28  ;;  %4826 = vmatmul.bf16.vlgmr.msra.gmra.mxu1 %v4444_v16 }
 0xd4a   : > { %v4425_v32 = vmax.f32 %v4353_v57, 0.0  ;;  %v4426_v38 = vmax.f32 %v4367_v8, 0.0 }
 0xd4c   : > { %v4441_v7 = vpack.c.bf16 %v4425_v32, %v4409_v1  ;;  %v4442_v17 = vpack.c.bf16 %v4426_v38, %v4410_v31 }
 0xd4e   : > { %4784 = vmatmul.bf16.vlgmr.msra.gmra.mxu2 %v4441_v7  ;;  %4798 = vmatmul.bf16.vlgmr.msra.gmra.mxu3 %v4442_v17 }
 0xd96   : > { %v4645_v60 = vpop.f32.mrf.mxu0  ;;  %v4659_v44 = vpop.f32.mrf.mxu1 }
 0xd9e   : > { %v4647_v45 = vpop.f32.mrf.mxu0  ;;  %v4661_v51 = vpop.f32.mrf.mxu1 }
 0xda1   : > { %v4617_v47 = vpop.f32.mrf.mxu2  ;;  %v4631_v49 = vpop.f32.mrf.mxu3 }
 0xda2   : > { %v4618_v42 = vadd.f32 %v6106_v15, %v4617_v47 }
 0xda4   : > { %v4632_v37 = vadd.f32 %v4631_v49, %v4618_v42 }
 0xda6   : > { %v4701_v5 = vpop.f32.mrf.mxu0  ;;  %v4715_v30 = vpop.f32.mrf.mxu1  ;;  %v4646_v55 = vadd.f32 %v4645_v60, %v4632_v37 }
 0xda8   : > { %v4660_v0 = vadd.f32 %v4659_v44, %v4646_v55 }
 0xda9   : > { %v4619_v19 = vpop.f32.mrf.mxu2  ;;  %v4633_v53 = vpop.f32.mrf.mxu3 }
 0xdaa   : > { %v4620_v54 = vadd.f32 %v6106_v15, %v4619_v19 }
 0xdac   : > { %v4634_v41 = vadd.f32 %v4633_v53, %v4620_v54 }
 0xdae   : > { %v4703_v14 = vpop.f32.mrf.mxu0  ;;  %v4717_v61 = vpop.f32.mrf.mxu1  ;;  %v4648_v50 = vadd.f32 %v4647_v45, %v4634_v41 }
 0xdb0   : > { %v4662_v35 = vadd.f32 %v4661_v51, %v4648_v50 }
 0xdb1   : > { %v4673_v34 = vpop.f32.mrf.mxu2  ;;  %v4687_v39 = vpop.f32.mrf.mxu3 }
 0xdb2   : > { %v4674_v3 = vadd.f32 %v4673_v34, %v4660_v0 }
 0xdb4   : > { %v4688_v2 = vadd.f32 %v4687_v39, %v4674_v3 }
 0xdb6   : > { %v4702_v25 = vadd.f32 %v4701_v5, %v4688_v2  ;;  %v4757_v59 = vpop.f32.mrf.mxu0  ;;  %v4771_v20 = vpop.f32.mrf.mxu1 }
 0xdb8   : > { %v4716_v56 = vadd.f32 %v4715_v30, %v4702_v25 }
 0xdb9   : > { %v4675_v63 = vpop.f32.mrf.mxu2  ;;  %v4689_v23 = vpop.f32.mrf.mxu3 }
 0xdba   : > { %v4676_v33 = vadd.f32 %v4675_v63, %v4662_v35 }
 0xdbc   : > { %v4690_v11 = vadd.f32 %v4689_v23, %v4676_v33 }
 0xdbe   : > { %v4704_v36 = vadd.f32 %v4703_v14, %v4690_v11  ;;  %v4759_v9 = vpop.f32.mrf.mxu0  ;;  %v4773_v26 = vpop.f32.mrf.mxu1  ;;  %v6108_v11 = vld [vmem:[%s8381_s26] ss:$0 sm:$0xff] }
 0xdc0   : > { %v4718_v22 = vadd.f32 %v4717_v61, %v4704_v36 }
 0xdc1   : > { %v4729_v13 = vpop.f32.mrf.mxu2  ;;  %v4743_v27 = vpop.f32.mrf.mxu3 }
 0xdc2   : > { %v4730_v40 = vadd.f32 %v4729_v13, %v4716_v56 }
 0xdc4   : > { %v4744_v10 = vadd.f32 %v4743_v27, %v4730_v40 }
 0xdc6   : > { %v4758_v24 = vadd.f32 %v4757_v59, %v4744_v10  ;;  %v4813_v16 = vpop.f32.mrf.mxu0  ;;  %v4827_v57 = vpop.f32.mrf.mxu1 }
 0xdc8   : > { %v4772_v4 = vadd.f32 %v4771_v20, %v4758_v24  ;;  %v6107_v20 = vld [vmem:[%s8380_s5] ss:$0 sm:$0xff] }
 0xdc9   : > { %v4731_v52 = vpop.f32.mrf.mxu2  ;;  %v4745_v18 = vpop.f32.mrf.mxu3 }
 0xdca   : > { %v4732_v43 = vadd.f32 %v4731_v52, %v4718_v22 }
 0xdcc   : > { %v4746_v29 = vadd.f32 %v4745_v18, %v4732_v43 }
 0xdce   : > { %v4760_v21 = vadd.f32 %v4759_v9, %v4746_v29  ;;  %v4815_v45 = vpop.f32.mrf.mxu0  ;;  %v4829_v49 = vpop.f32.mrf.mxu1 }
 0xdd0   : > { %v4774_v31 = vadd.f32 %v4773_v26, %v4760_v21 }
 0xdd1   : > { %v4785_v58 = vpop.f32.mrf.mxu2  ;;  %v4799_v12 = vpop.f32.mrf.mxu3 }
 0xdd2   : > { %v4786_v28 = vadd.f32 %v4785_v58, %v4772_v4 }
 0xdd4   : > { %v4800_v46 = vadd.f32 %v4799_v12, %v4786_v28 }
 0xdd6   : > { %v4814_v8 = vadd.f32 %v4813_v16, %v4800_v46 }
 0xdd8   : > { %v4828_v1 = vadd.f32 %v4827_v57, %v4814_v8 }
 0xdd9   : > { %v4787_v32 = vpop.f32.mrf.mxu2  ;;  %v4801_v17 = vpop.f32.mrf.mxu3 }
 0xdda   : > { %v4788_v38 = vadd.f32 %v4787_v32, %v4774_v31  ;;  %v4832_v7 = vadd.f32 %v4828_v1, %v8042_v48 }
 0xddc   : > { %v4802_v60 = vadd.f32 %v4801_v17, %v4788_v38  ;;  %v4836_v44 = vsel %vm1351_vm1, %v4832_v7, 0.0 }
 0xddd   : > { %4837 = vadd.xlane.f32.xlu0 %v4836_v44 }
 0xdde   : > { %v4816_v47 = vadd.f32 %v4815_v45, %v4802_v60 }
 0xde0   : > { %v4830_v51 = vadd.f32 %v4829_v49, %v4816_v47 }
 0xde2   : > { %v4833_v15 = vadd.f32 %v4830_v51, %v8044_v6 }
 0xde4   : > { %v4839_v42 = vsel %vm1351_vm1, %v4833_v15, 0.0 }
 0xde5   : > { %4840 = vadd.xlane.f32.xlu2 %v4839_v42 }
 0xe50   : > { %v4838_v19 = vpop.xlane.xlu0 %4837 }
 0xe51   : > { %v4842_v53 = vmul.f32 %v4838_v19, %v7626_v62 }
 0xe53   : > { %v4844_v5 = vsub.f32 %v4832_v7, %v4842_v53 }
 0xe55   : > { %v4846_v37 = vmul.f32 %v4844_v5, %v4844_v5 }
 0xe57   : > { %v4848_v48 = vsel %vm1351_vm1, %v4846_v37, 0.0 }
 0xe58   : > { %v4841_v30 = vpop.xlane.xlu2 %4840  ;;  %4849 = vadd.xlane.f32.xlu1 %v4848_v48 }
 0xe59   : > { %v4843_v55 = vmul.f32 %v4841_v30, %v7626_v62 }
 0xe5b   : > { %v4845_v54 = vsub.f32 %v4833_v15, %v4843_v55 }
 0xe5d   : > { %v4847_v34 = vmul.f32 %v4845_v54, %v4845_v54 }
 0xe5f   : > { %v4851_v39 = vsel %vm1351_vm1, %v4847_v34, 0.0 }
 0xe60   : > { %4852 = vadd.xlane.f32.xlu0 %v4851_v39 }
 0xecb   : > { %v4850_v6 = vpop.xlane.xlu1 %4849 }
 0xecc   : > { %v4854_v41 = vmul.f32 %v4850_v6, %v7626_v62 }
 0xece   : > { %v4856_v14 = vadd.f32 1e-05, %v4854_v41 }
 0xed0   : > { %6247 = vrsqrt.f32 %v4856_v14  ;;  %vm4864_vm8 = vweird.f32 %v4856_v14 }
 0xed3   : > { %v4853_v0 = vpop.xlane.xlu0 %4852 }
 0xed4   : > { %v4855_v61 = vmul.f32 %v4853_v0, %v7626_v62 }
 0xed6   : > { %v6248_v3 = vpop.eup %6247  ;;  %v4857_v50 = vadd.f32 1e-05, %v4855_v61 }
 0xed7   : > { %v4859_v63 = vmul.f32 %v6248_v3, %v4856_v14  ;;  %vm4865_vm7 = vweird.f32 %v6248_v3 }
 0xed8   : > { %6249 = vrsqrt.f32 %v4857_v50  ;;  %vm4866_vm9 = vmor %vm4864_vm8, %vm4865_vm7  ;;  %vm4874_vm11 = vweird.f32 %v4857_v50 }
 0xed9   : > { %v4860_v23 = vmul.f32 %v6248_v3, %v4859_v63 }
 0xedb   : > { %v4861_v2 = vmul.f32 0.5, %v4860_v23 }
 0xedd   : > { %v4862_v35 = vsub.f32 1.5, %v4861_v2 }
 0xede   : > { %v6250_v25 = vpop.eup %6249 }
 0xedf   : > { %v4863_v59 = vmul.f32 %v6248_v3, %v4862_v35  ;;  %v4869_v33 = vmul.f32 %v6250_v25, %v4857_v50  ;;  %vm4875_vm10 = vweird.f32 %v6250_v25 }
 0xee0   : > { %vm4876_vm12 = vmor %vm4874_vm11, %vm4875_vm10 }
 0xee1   : > { %v4867_v13 = vsel %vm4866_vm9, %v6248_v3, %v4863_v59  ;;  %v4870_v27 = vmul.f32 %v6250_v25, %v4869_v33 }
 0xee2   : > { %v4878_v56 = vmul.f32 %v4867_v13, %v4844_v5 }
 0xee3   : > { %v4871_v40 = vmul.f32 0.5, %v4870_v27 }
 0xee4   : > { %v4883_v36 = vmul.f32 %v6107_v20, %v4878_v56 }
 0xee5   : > { %v4872_v9 = vsub.f32 1.5, %v4871_v40 }
 0xee6   : > { %v4888_v10 = vadd.f32 %v6108_v11, %v4883_v36 }
 0xee7   : > { %v4873_v52 = vmul.f32 %v6250_v25, %v4872_v9 }
 0xee8   : > { %4890 = vst.msk [vmem:[#allocation2] sm:$0xff] %vm1351_vm1, %v4888_v10 }
 0xee9   : > { %v4877_v18 = vsel %vm4876_vm12, %v6250_v25, %v4873_v52 }
 0xeea   : > { %v4879_v22 = vmul.f32 %v4877_v18, %v4845_v54 }
 0xeec   : > { %v4884_v26 = vmul.f32 %v6107_v20, %v4879_v22  ;;  %4895 = sbr.rel (%p5740_p10) target bundleno = 4102 (0x1006), region = 176 }
 0xeee   : > { %v4889_v24 = vadd.f32 %v6108_v11, %v4884_v26 }
 0xef0   : > { %4891 = vst.msk [vmem:[#allocation2 + $0x8] sm:$0xff] %vm1351_vm1, %v4889_v24 }
 0xef1   : > { %v4898_v43 = vsel %vm1351_vm1, %v4888_v10, 0.0  ;;  %v4901_v29 = vsel %vm1351_vm1, %v4889_v24, 0.0  ;;  %v6253_v53 = vld [vmem:[%s8383_s2] ss:$0 sm:$0xff] }
 0xef2   : > { %4899 = vadd.xlane.f32.xlu0 %v4898_v43  ;;  %v6254_v48 = vld [vmem:[%s8384_s17] ss:$0 sm:$0xff] }
 0xefa   : > { %4902 = vadd.xlane.f32.xlu0 %v4901_v29 }
 0xf65   : > { %v4900_v4 = vpop.xlane.xlu0 %4899 }
 0xf66   : > { %v4904_v58 = vmul.f32 %v4900_v4, %v7626_v62 }
 0xf68   : > { %v4906_v12 = vsub.f32 %v4888_v10, %v4904_v58 }
 0xf6a   : > { %v4908_v28 = vmul.f32 %v4906_v12, %v4906_v12 }
 0xf6c   : > { %v4910_v16 = vsel %vm1351_vm1, %v4908_v28, 0.0 }
 0xf6d   : > { %4911 = vadd.xlane.f32.xlu1 %v4910_v16  ;;  %v4903_v21 = vpop.xlane.xlu0 %4902 }
 0xf6e   : > { %v4905_v46 = vmul.f32 %v4903_v21, %v7626_v62 }
 0xf70   : > { %v4907_v57 = vsub.f32 %v4889_v24, %v4905_v46 }
 0xf72   : > { %v4909_v8 = vmul.f32 %v4907_v57, %v4907_v57 }
 0xf74   : > { %v4913_v1 = vsel %vm1351_vm1, %v4909_v8, 0.0 }
 0xf75   : > { %4914 = vadd.xlane.f32.xlu1 %v4913_v1 }
 0xfe0   : > { %v4912_v31 = vpop.xlane.xlu1 %4911 }
 0xfe1   : > { %v4916_v32 = vmul.f32 %v4912_v31, %v7626_v62 }
 0xfe3   : > { %v4918_v38 = vadd.f32 1e-05, %v4916_v32 }
 0xfe5   : > { %6255 = vrsqrt.f32 %v4918_v38  ;;  %vm4926_vm14 = vweird.f32 %v4918_v38 }
 0xfe8   : > { %v4915_v7 = vpop.xlane.xlu1 %4914 }
 0xfe9   : > { %v4917_v17 = vmul.f32 %v4915_v7, %v7626_v62 }
 0xfeb   : > { %v6256_v60 = vpop.eup %6255  ;;  %v4919_v44 = vadd.f32 1e-05, %v4917_v17 }
 0xfec   : > { %v4921_v45 = vmul.f32 %v6256_v60, %v4918_v38  ;;  %vm4927_vm13 = vweird.f32 %v6256_v60 }
 0xfed   : > { %6257 = vrsqrt.f32 %v4919_v44  ;;  %vm4928_vm15 = vmor %vm4926_vm14, %vm4927_vm13  ;;  %vm4936_vm2 = vweird.f32 %v4919_v44 }
 0xfee   : > { %v4922_v47 = vmul.f32 %v6256_v60, %v4921_v45 }
 0xff0   : > { %v4923_v49 = vmul.f32 0.5, %v4922_v47 }
 0xff2   : > { %v4924_v51 = vsub.f32 1.5, %v4923_v49 }
 0xff3   : > { %v6258_v15 = vpop.eup %6257 }
 0xff4   : > { %v4925_v42 = vmul.f32 %v6256_v60, %v4924_v51  ;;  %v4931_v19 = vmul.f32 %v6258_v15, %v4919_v44  ;;  %vm4937_vm0 = vweird.f32 %v6258_v15 }
 0xff5   : > { %vm4938_vm3 = vmor %vm4936_vm2, %vm4937_vm0 }
 0xff6   : > { %v4929_v5 = vsel %vm4928_vm15, %v6256_v60, %v4925_v42  ;;  %v4932_v37 = vmul.f32 %v6258_v15, %v4931_v19 }
 0xff7   : > { %v4940_v62 = vmul.f32 %v4929_v5, %v4906_v12 }
 0xff8   : > { %v4933_v30 = vmul.f32 0.5, %v4932_v37 }
 0xff9   : > { %v4945_v55 = vmul.f32 %v6253_v53, %v4940_v62 }
 0xffa   : > { %v4934_v54 = vsub.f32 1.5, %v4933_v30 }
 0xffb   : > { %v4950_v34 = vadd.f32 %v6254_v48, %v4945_v55 }
 0xffc   : > { %v4935_v39 = vmul.f32 %v6258_v15, %v4934_v54 }
 0xffd   : > { %4952 = vst.msk [vmem:[#allocation23] sm:$0xff] %vm1351_vm1, %v4950_v34 }
 0xffe   : > { %v4939_v6 = vsel %vm4938_vm3, %v6258_v15, %v4935_v39 }
 0xfff   : > { %v4941_v41 = vmul.f32 %v4939_v6, %v4907_v57 }
0x1001   : > { %v4946_v14 = vmul.f32 %v6253_v53, %v4941_v41 }
0x1003   : > { %v4951_v0 = vadd.f32 %v6254_v48, %v4946_v14 }
0x1005   : > { %4953 = vst.msk [vmem:[#allocation23 + $0x8] sm:$0xff] %vm1351_vm1, %v4951_v0 }
0x1006 PF: > { %s8385_s24 = sld [smem:[#allocation34_spill]]  ;;  %s6730_s10 = smov [#allocation23]  }
0x1007   : > { %s4959_s16 = sshll.u32 %s6730_s10, 4  ;;  %s8386_s28 = sld [smem:[#allocation61_spill]]  ;;  %s4960_s16 = int_to_ptr.vmem [resolvable:$true] %s4959_s16 }
0x1008   : > { %s6731_s11 = smov 128   ;;  %s8387_s8 = smov 8  }
0x100c   : > { %p5892_p5 = scmp.eq.s32.totalorder %s8385_s24, 5 }
0x100d   : > { %s4961_s19 = sshll.u32 %s8386_s28, 4  ;;  %s4962_s19 = int_to_ptr.hbm [resolvable:$true] %s4961_s19 }
0x100e   : > { %5851 = dma.vmem_to_hbm [thread:$0]  (%p5892_p5), %s4960_s16, 256, %s4962_s19, [#allocation5], %s6731_s11, %s6731_s11, %s8387_s8  }
0x100f   : > { %6692 = dma.done.wait (%p5892_p5), [#allocation5], 256  }
0x1010   : > { %6694 = vsyncadd (%p5892_p5), [#allocation5], 4294967040 }
0x1011 PF: > { %s8388_s30 = sld [smem:[#allocation35_spill]] }
0x1012   : > { %s8389_s29 = sld [smem:[#allocation32_spill]] }
0x1013   : > { %s8390_s2 = sld [smem:[#allocation33_spill]] }
0x1014   : > { %s8391_s6 = sld [smem:[#allocation36_spill]] }
0x1017   : > { %p54_p2 = scmp.ge.s32.totalorder %s8388_s30, 8  }
0x1019   :  { %56 = sbr.rel (!%p54_p2) target bundleno = 40 (0x28), region = 322 }
0x101e   :  { %4978 = vsyncpa [#allocation4], 1 }
0x101f   :  { %4980 = vsyncpa [#allocation4 + $0x1], 1 }
0x1020   :  { %4981 = vsyncpa [#allocation7], 1 }
0x1021   :  { %4983 = vsyncpa [#allocation7 + $0x1], 1 }
0x1022   :  { %4984 = vsyncpa [#allocation10], 1 }
0x1023   :  { %4986 = vsyncpa [#allocation10 + $0x1], 1 }
0x1024   :  { %4987 = vsyncpa [#allocation13], 1 }
0x1025   :  { %4989 = vsyncpa [#allocation13 + $0x1], 1 }
0x1026   :  { %4990 = vsyncpa [#allocation16], 1 }
0x1027   :  { %4992 = vsyncpa [#allocation16 + $0x1], 1 }
0x1028   :  { %4993 = vsyncpa [#allocation19], 1 }
0x1029   :  { %4995 = vsyncpa [#allocation19 + $0x1], 1 }
0x102a   :  { %4996 = vsyncpa [#allocation22], 1 }
0x102b   :  { %4998 = vsyncpa [#allocation22 + $0x1], 1 }
0x102c   :  { %4999 = vsyncpa [#allocation5], 1 }
0x102d   :  { %5001 = vsyncpa [#allocation5 + $0x1], 1 }

</bundles_post_ra>
